<compile_context>
chip_gen: v7x
topology: tpu7x:2x2x1
jax: 0.10.0
libtpu: 0.0.40
codegen_flags: <defaults>
</compile_context>

<pallas_src>
import jax
import jax.numpy as jnp
from jax.experimental import pallas as pl
from jax.experimental.pallas import tpu as pltpu

NUM_NEURON = 128
NUM_MID_LAYERS = 14   # fc2 .. fc15 (fc16 is defined in the module but unused in forward)


def _silu(z):
    # silu(z) = z * sigmoid(z); sigmoid via a single EUP tanh push (no exp + recip).
    return z * (0.5 * jnp.tanh(0.5 * z) + 0.5)


def displacement_kernel(x_ref, w1_ref, b1_ref, wmid_ref, bmid_ref,
                        w17t_ref, b17_ref, out_ref):
    # x:(TN,2) f32 | w1:(2,128) f32 | b1:(1,128) f32
    # wmid:(14,128,128) bf16 | bmid:(14,1,128) f32
    # w17t:(1,128) f32 | b17:(1,1) f32 | out:(TN,1) f32
    x = x_ref[...]
    w1 = w1_ref[...]

    # fc1 (K=2): two VPU broadcast-FMAs, stays in f32.
    h = x[:, 0:1] * w1[0:1, :] + x[:, 1:2] * w1[1:2, :] + b1_ref[...]
    h = _silu(h)

    # fc2 .. fc15: fully unrolled, bf16 weights & activations into the MXU,
    # f32 accumulation, f32 SiLU.
    for i in range(NUM_MID_LAYERS):
        z = jnp.dot(h.astype(jnp.bfloat16), wmid_ref[i],
                    preferred_element_type=jnp.float32) + bmid_ref[i]
        h = _silu(z)

    # fc17 (single output column): VPU multiply + XLU lane-reduce (no MXU).
    out = jnp.sum(h * w17t_ref[...], axis=-1, keepdims=True) + b17_ref[...]
    out_ref[...] = out.astype(out_ref.dtype)


def displacement_net(x, params, *, tile_n=256):
    """x: [N, 2] float32 coordinates. Returns [N, 1] float32 displacement."""
    N, F = x.shape
    assert F == 2
    w1, b1, wmid, bmid, w17t, b17 = params

    # Pad the batch to a tile multiple (padded rows are computed and discarded).
    n_pad = (-N) % tile_n
    if n_pad:
        x = jnp.pad(x, ((0, n_pad), (0, 0)))
    n_total = N + n_pad

    grid = (n_total // tile_n,)
    out = pl.pallas_call(
        displacement_kernel,
        out_shape=jax.ShapeDtypeStruct((n_total, 1), jnp.float32),
        grid_spec=pltpu.PrefetchScalarGridSpec(
            num_scalar_prefetch=0,
            grid=grid,
            in_specs=[
                pl.BlockSpec((tile_n, 2), lambda i: (i, 0)),
                pl.BlockSpec((2, NUM_NEURON), lambda i: (0, 0)),
                pl.BlockSpec((1, NUM_NEURON), lambda i: (0, 0)),
                pl.BlockSpec((NUM_MID_LAYERS, NUM_NEURON, NUM_NEURON),
                             lambda i: (0, 0, 0)),
                pl.BlockSpec((NUM_MID_LAYERS, 1, NUM_NEURON),
                             lambda i: (0, 0, 0)),
                pl.BlockSpec((1, NUM_NEURON), lambda i: (0, 0)),
                pl.BlockSpec((1, 1), lambda i: (0, 0)),
            ],
            out_specs=pl.BlockSpec((tile_n, 1), lambda i: (i, 0)),
        ),
        compiler_params=pltpu.CompilerParams(
            dimension_semantics=("parallel",)),
    )(x, w1, b1, wmid, bmid, w17t, b17)

    return out[:N] if n_pad else out


def init_params(key):
    """Deterministic synthetic parameters (PyTorch-Linear-like fan_in scaling)."""
    ks = jax.random.split(key, 6)

    def uniform(k, shape, fan_in):
        bound = 1.0 / jnp.sqrt(float(fan_in))
        return jax.random.uniform(k, shape, jnp.float32, -bound, bound)

    w1 = uniform(ks[0], (2, NUM_NEURON), 2)
    b1 = uniform(ks[1], (1, NUM_NEURON), 2)
    # Mid-layer weights stored in bf16 (f32 accumulation inside the kernel).
    wmid = uniform(ks[2], (NUM_MID_LAYERS, NUM_NEURON, NUM_NEURON),
                   NUM_NEURON).astype(jnp.bfloat16)
    bmid = uniform(ks[3], (NUM_MID_LAYERS, 1, NUM_NEURON), NUM_NEURON)
    # fc17 weight stored pre-transposed (1, 128) for the lane-reduce path.
    w17t = uniform(ks[4], (1, NUM_NEURON), NUM_NEURON)
    b17 = uniform(ks[5], (1, 1), NUM_NEURON)
    return (w1, b1, wmid, bmid, w17t, b17)


def reference_forward(x, params):
    """Pure-JAX reference using the same mixed-precision recipe as the kernel."""
    w1, b1, wmid, bmid, w17t, b17 = params
    h = _silu(x[:, 0:1] * w1[0:1, :] + x[:, 1:2] * w1[1:2, :] + b1)
    for i in range(NUM_MID_LAYERS):
        z = jnp.dot(h.astype(jnp.bfloat16), wmid[i],
                    preferred_element_type=jnp.float32) + bmid[i]
        h = _silu(z)
    return jnp.sum(h * w17t, axis=-1, keepdims=True) + b17


if __name__ == "__main__":
    key = jax.random.PRNGKey(0)
    k_x, k_p = jax.random.split(key)

    # 384 coordinate points -> pads to 512 rows = 2 grid steps at tile_n=256,
    # exercising both the tiling and the pad/unpad path.
    N = 384
    x = jax.random.uniform(k_x, (N, 2), jnp.float32)
    params = init_params(k_p)

    out = jax.block_until_ready(displacement_net(x, params, tile_n=256))
    ref = reference_forward(x, params)

    assert out.shape == (N, 1)
    assert jnp.all(jnp.isfinite(out)), "non-finite output"
    assert jnp.allclose(out, ref, atol=5e-3, rtol=5e-3), "mismatch vs JAX reference"

    print("KERNEL_OK")
</pallas_src>

<mosaic_0001>
module attributes {stable_mosaic.version = 11 : i64} {
  func.func @displacement_kernel(%arg0: i32, %arg1: memref<256x2xf32, #tpu.memory_space<vmem>>, %arg2: memref<2x128xf32, #tpu.memory_space<vmem>>, %arg3: memref<1x128xf32, #tpu.memory_space<vmem>>, %arg4: memref<14x128x128xbf16, #tpu.memory_space<vmem>>, %arg5: memref<14x1x128xf32, #tpu.memory_space<vmem>>, %arg6: memref<1x128xf32, #tpu.memory_space<vmem>>, %arg7: memref<1x1xf32, #tpu.memory_space<vmem>>, %arg8: memref<256x1xf32, #tpu.memory_space<vmem>>) attributes {dimension_semantics = [#tpu.dimension_semantics<parallel>], iteration_bounds = array<i64: 2>, scalar_prefetch = 0 : i64, scratch_operands = 0 : i64, tpu.core_type = #tpu.core_type<tc>, window_params = [{transform_indices = @transform_0, window_bounds = array<i64: 256, 2>}, {pipeline_mode = #tpu.pipeline_mode<synchronous>, transform_indices = @transform_1, window_bounds = array<i64: 2, 128>}, {pipeline_mode = #tpu.pipeline_mode<synchronous>, transform_indices = @transform_2, window_bounds = array<i64: 1, 128>}, {pipeline_mode = #tpu.pipeline_mode<synchronous>, transform_indices = @transform_3, window_bounds = array<i64: 14, 128, 128>}, {pipeline_mode = #tpu.pipeline_mode<synchronous>, transform_indices = @transform_4, window_bounds = array<i64: 14, 1, 128>}, {pipeline_mode = #tpu.pipeline_mode<synchronous>, transform_indices = @transform_5, window_bounds = array<i64: 1, 128>}, {pipeline_mode = #tpu.pipeline_mode<synchronous>, transform_indices = @transform_6, window_bounds = array<i64: 1, 1>}, {transform_indices = @transform_7, window_bounds = array<i64: 256, 1>}]} {
    %c0 = arith.constant 0 : index
    %c0_0 = arith.constant 0 : index
    %0 = vector.load %arg1[%c0, %c0_0] : memref<256x2xf32, #tpu.memory_space<vmem>>, vector<256x2xf32>
    %c0_1 = arith.constant 0 : index
    %c0_2 = arith.constant 0 : index
    %1 = vector.load %arg2[%c0_1, %c0_2] : memref<2x128xf32, #tpu.memory_space<vmem>>, vector<2x128xf32>
    %2 = vector.extract_strided_slice %0 {offsets = [0, 0], sizes = [256, 1], strides = [1, 1]} : vector<256x2xf32> to vector<256x1xf32>
    %3 = vector.extract_strided_slice %1 {offsets = [0, 0], sizes = [1, 128], strides = [1, 1]} : vector<2x128xf32> to vector<1x128xf32>
    %4 = vector.broadcast %2 : vector<256x1xf32> to vector<256x128xf32>
    %5 = vector.broadcast %3 : vector<1x128xf32> to vector<256x128xf32>
    %6 = arith.mulf %4, %5 : vector<256x128xf32>
    %7 = vector.extract_strided_slice %0 {offsets = [0, 1], sizes = [256, 1], strides = [1, 1]} : vector<256x2xf32> to vector<256x1xf32>
    %8 = vector.extract_strided_slice %1 {offsets = [1, 0], sizes = [1, 128], strides = [1, 1]} : vector<2x128xf32> to vector<1x128xf32>
    %9 = vector.broadcast %7 : vector<256x1xf32> to vector<256x128xf32>
    %10 = vector.broadcast %8 : vector<1x128xf32> to vector<256x128xf32>
    %11 = arith.mulf %9, %10 : vector<256x128xf32>
    %12 = arith.addf %6, %11 : vector<256x128xf32>
    %c0_3 = arith.constant 0 : index
    %c0_4 = arith.constant 0 : index
    %13 = vector.load %arg3[%c0_3, %c0_4] : memref<1x128xf32, #tpu.memory_space<vmem>>, vector<1x128xf32>
    %14 = vector.broadcast %13 : vector<1x128xf32> to vector<256x128xf32>
    %15 = arith.addf %12, %14 : vector<256x128xf32>
    %cst = arith.constant 5.000000e-01 : f32
    %16 = vector.broadcast %cst : f32 to vector<256x128xf32>
    %17 = arith.mulf %16, %15 : vector<256x128xf32>
    %18 = math.tanh %17 : vector<256x128xf32>
    %cst_5 = arith.constant 5.000000e-01 : f32
    %19 = vector.broadcast %cst_5 : f32 to vector<256x128xf32>
    %20 = arith.mulf %19, %18 : vector<256x128xf32>
    %cst_6 = arith.constant 5.000000e-01 : f32
    %21 = vector.broadcast %cst_6 : f32 to vector<256x128xf32>
    %22 = arith.addf %20, %21 : vector<256x128xf32>
    %23 = arith.mulf %15, %22 : vector<256x128xf32>
    %24 = arith.truncf %23 : vector<256x128xf32> to vector<256x128xbf16>
    %c0_7 = arith.constant 0 : index
    %c0_8 = arith.constant 0 : index
    %c0_9 = arith.constant 0 : index
    %25 = vector.load %arg4[%c0_7, %c0_8, %c0_9] : memref<14x128x128xbf16, #tpu.memory_space<vmem>>, vector<1x128x128xbf16>
    %26 = vector.shape_cast %25 : vector<1x128x128xbf16> to vector<128x128xbf16>
    %cst_10 = arith.constant dense<0.000000e+00> : vector<256x128xf32>
    %27 = tpu.matmul %24, %26, %cst_10 {dimension_numbers = #tpu.dot_dimension_numbers<[1], [0], [0], [1], [0, 0, 1, 1], [], []>} : vector<256x128xbf16>, vector<128x128xbf16>, vector<256x128xf32> -> vector<256x128xf32>
    %c0_11 = arith.constant 0 : index
    %c0_12 = arith.constant 0 : index
    %c0_13 = arith.constant 0 : index
    %28 = vector.load %arg5[%c0_11, %c0_12, %c0_13] : memref<14x1x128xf32, #tpu.memory_space<vmem>>, vector<1x1x128xf32>
    %29 = vector.shape_cast %28 : vector<1x1x128xf32> to vector<1x128xf32>
    %30 = vector.broadcast %29 : vector<1x128xf32> to vector<256x128xf32>
    %31 = arith.addf %27, %30 : vector<256x128xf32>
    %cst_14 = arith.constant 5.000000e-01 : f32
    %32 = vector.broadcast %cst_14 : f32 to vector<256x128xf32>
    %33 = arith.mulf %32, %31 : vector<256x128xf32>
    %34 = math.tanh %33 : vector<256x128xf32>
    %cst_15 = arith.constant 5.000000e-01 : f32
    %35 = vector.broadcast %cst_15 : f32 to vector<256x128xf32>
    %36 = arith.mulf %35, %34 : vector<256x128xf32>
    %cst_16 = arith.constant 5.000000e-01 : f32
    %37 = vector.broadcast %cst_16 : f32 to vector<256x128xf32>
    %38 = arith.addf %36, %37 : vector<256x128xf32>
    %39 = arith.mulf %31, %38 : vector<256x128xf32>
    %40 = arith.truncf %39 : vector<256x128xf32> to vector<256x128xbf16>
    %c1 = arith.constant 1 : index
    %c0_17 = arith.constant 0 : index
    %c0_18 = arith.constant 0 : index
    %41 = vector.load %arg4[%c1, %c0_17, %c0_18] : memref<14x128x128xbf16, #tpu.memory_space<vmem>>, vector<1x128x128xbf16>
    %42 = vector.shape_cast %41 : vector<1x128x128xbf16> to vector<128x128xbf16>
    %cst_19 = arith.constant dense<0.000000e+00> : vector<256x128xf32>
    %43 = tpu.matmul %40, %42, %cst_19 {dimension_numbers = #tpu.dot_dimension_numbers<[1], [0], [0], [1], [0, 0, 1, 1], [], []>} : vector<256x128xbf16>, vector<128x128xbf16>, vector<256x128xf32> -> vector<256x128xf32>
    %c1_20 = arith.constant 1 : index
    %c0_21 = arith.constant 0 : index
    %c0_22 = arith.constant 0 : index
    %44 = vector.load %arg5[%c1_20, %c0_21, %c0_22] : memref<14x1x128xf32, #tpu.memory_space<vmem>>, vector<1x1x128xf32>
    %45 = vector.shape_cast %44 : vector<1x1x128xf32> to vector<1x128xf32>
    %46 = vector.broadcast %45 : vector<1x128xf32> to vector<256x128xf32>
    %47 = arith.addf %43, %46 : vector<256x128xf32>
    %cst_23 = arith.constant 5.000000e-01 : f32
    %48 = vector.broadcast %cst_23 : f32 to vector<256x128xf32>
    %49 = arith.mulf %48, %47 : vector<256x128xf32>
    %50 = math.tanh %49 : vector<256x128xf32>
    %cst_24 = arith.constant 5.000000e-01 : f32
    %51 = vector.broadcast %cst_24 : f32 to vector<256x128xf32>
    %52 = arith.mulf %51, %50 : vector<256x128xf32>
    %cst_25 = arith.constant 5.000000e-01 : f32
    %53 = vector.broadcast %cst_25 : f32 to vector<256x128xf32>
    %54 = arith.addf %52, %53 : vector<256x128xf32>
    %55 = arith.mulf %47, %54 : vector<256x128xf32>
    %56 = arith.truncf %55 : vector<256x128xf32> to vector<256x128xbf16>
    %c2 = arith.constant 2 : index
    %c0_26 = arith.constant 0 : index
    %c0_27 = arith.constant 0 : index
    %57 = vector.load %arg4[%c2, %c0_26, %c0_27] : memref<14x128x128xbf16, #tpu.memory_space<vmem>>, vector<1x128x128xbf16>
    %58 = vector.shape_cast %57 : vector<1x128x128xbf16> to vector<128x128xbf16>
    %cst_28 = arith.constant dense<0.000000e+00> : vector<256x128xf32>
    %59 = tpu.matmul %56, %58, %cst_28 {dimension_numbers = #tpu.dot_dimension_numbers<[1], [0], [0], [1], [0, 0, 1, 1], [], []>} : vector<256x128xbf16>, vector<128x128xbf16>, vector<256x128xf32> -> vector<256x128xf32>
    %c2_29 = arith.constant 2 : index
    %c0_30 = arith.constant 0 : index
    %c0_31 = arith.constant 0 : index
    %60 = vector.load %arg5[%c2_29, %c0_30, %c0_31] : memref<14x1x128xf32, #tpu.memory_space<vmem>>, vector<1x1x128xf32>
    %61 = vector.shape_cast %60 : vector<1x1x128xf32> to vector<1x128xf32>
    %62 = vector.broadcast %61 : vector<1x128xf32> to vector<256x128xf32>
    %63 = arith.addf %59, %62 : vector<256x128xf32>
    %cst_32 = arith.constant 5.000000e-01 : f32
    %64 = vector.broadcast %cst_32 : f32 to vector<256x128xf32>
    %65 = arith.mulf %64, %63 : vector<256x128xf32>
    %66 = math.tanh %65 : vector<256x128xf32>
    %cst_33 = arith.constant 5.000000e-01 : f32
    %67 = vector.broadcast %cst_33 : f32 to vector<256x128xf32>
    %68 = arith.mulf %67, %66 : vector<256x128xf32>
    %cst_34 = arith.constant 5.000000e-01 : f32
    %69 = vector.broadcast %cst_34 : f32 to vector<256x128xf32>
    %70 = arith.addf %68, %69 : vector<256x128xf32>
    %71 = arith.mulf %63, %70 : vector<256x128xf32>
    %72 = arith.truncf %71 : vector<256x128xf32> to vector<256x128xbf16>
    %c3 = arith.constant 3 : index
    %c0_35 = arith.constant 0 : index
    %c0_36 = arith.constant 0 : index
    %73 = vector.load %arg4[%c3, %c0_35, %c0_36] : memref<14x128x128xbf16, #tpu.memory_space<vmem>>, vector<1x128x128xbf16>
    %74 = vector.shape_cast %73 : vector<1x128x128xbf16> to vector<128x128xbf16>
    %cst_37 = arith.constant dense<0.000000e+00> : vector<256x128xf32>
    %75 = tpu.matmul %72, %74, %cst_37 {dimension_numbers = #tpu.dot_dimension_numbers<[1], [0], [0], [1], [0, 0, 1, 1], [], []>} : vector<256x128xbf16>, vector<128x128xbf16>, vector<256x128xf32> -> vector<256x128xf32>
    %c3_38 = arith.constant 3 : index
    %c0_39 = arith.constant 0 : index
    %c0_40 = arith.constant 0 : index
    %76 = vector.load %arg5[%c3_38, %c0_39, %c0_40] : memref<14x1x128xf32, #tpu.memory_space<vmem>>, vector<1x1x128xf32>
    %77 = vector.shape_cast %76 : vector<1x1x128xf32> to vector<1x128xf32>
    %78 = vector.broadcast %77 : vector<1x128xf32> to vector<256x128xf32>
    %79 = arith.addf %75, %78 : vector<256x128xf32>
    %cst_41 = arith.constant 5.000000e-01 : f32
    %80 = vector.broadcast %cst_41 : f32 to vector<256x128xf32>
    %81 = arith.mulf %80, %79 : vector<256x128xf32>
    %82 = math.tanh %81 : vector<256x128xf32>
    %cst_42 = arith.constant 5.000000e-01 : f32
    %83 = vector.broadcast %cst_42 : f32 to vector<256x128xf32>
    %84 = arith.mulf %83, %82 : vector<256x128xf32>
    %cst_43 = arith.constant 5.000000e-01 : f32
    %85 = vector.broadcast %cst_43 : f32 to vector<256x128xf32>
    %86 = arith.addf %84, %85 : vector<256x128xf32>
    %87 = arith.mulf %79, %86 : vector<256x128xf32>
    %88 = arith.truncf %87 : vector<256x128xf32> to vector<256x128xbf16>
    %c4 = arith.constant 4 : index
    %c0_44 = arith.constant 0 : index
    %c0_45 = arith.constant 0 : index
    %89 = vector.load %arg4[%c4, %c0_44, %c0_45] : memref<14x128x128xbf16, #tpu.memory_space<vmem>>, vector<1x128x128xbf16>
    %90 = vector.shape_cast %89 : vector<1x128x128xbf16> to vector<128x128xbf16>
    %cst_46 = arith.constant dense<0.000000e+00> : vector<256x128xf32>
    %91 = tpu.matmul %88, %90, %cst_46 {dimension_numbers = #tpu.dot_dimension_numbers<[1], [0], [0], [1], [0, 0, 1, 1], [], []>} : vector<256x128xbf16>, vector<128x128xbf16>, vector<256x128xf32> -> vector<256x128xf32>
    %c4_47 = arith.constant 4 : index
    %c0_48 = arith.constant 0 : index
    %c0_49 = arith.constant 0 : index
    %92 = vector.load %arg5[%c4_47, %c0_48, %c0_49] : memref<14x1x128xf32, #tpu.memory_space<vmem>>, vector<1x1x128xf32>
    %93 = vector.shape_cast %92 : vector<1x1x128xf32> to vector<1x128xf32>
    %94 = vector.broadcast %93 : vector<1x128xf32> to vector<256x128xf32>
    %95 = arith.addf %91, %94 : vector<256x128xf32>
    %cst_50 = arith.constant 5.000000e-01 : f32
    %96 = vector.broadcast %cst_50 : f32 to vector<256x128xf32>
    %97 = arith.mulf %96, %95 : vector<256x128xf32>
    %98 = math.tanh %97 : vector<256x128xf32>
    %cst_51 = arith.constant 5.000000e-01 : f32
    %99 = vector.broadcast %cst_51 : f32 to vector<256x128xf32>
    %100 = arith.mulf %99, %98 : vector<256x128xf32>
    %cst_52 = arith.constant 5.000000e-01 : f32
    %101 = vector.broadcast %cst_52 : f32 to vector<256x128xf32>
    %102 = arith.addf %100, %101 : vector<256x128xf32>
    %103 = arith.mulf %95, %102 : vector<256x128xf32>
    %104 = arith.truncf %103 : vector<256x128xf32> to vector<256x128xbf16>
    %c5 = arith.constant 5 : index
    %c0_53 = arith.constant 0 : index
    %c0_54 = arith.constant 0 : index
    %105 = vector.load %arg4[%c5, %c0_53, %c0_54] : memref<14x128x128xbf16, #tpu.memory_space<vmem>>, vector<1x128x128xbf16>
    %106 = vector.shape_cast %105 : vector<1x128x128xbf16> to vector<128x128xbf16>
    %cst_55 = arith.constant dense<0.000000e+00> : vector<256x128xf32>
    %107 = tpu.matmul %104, %106, %cst_55 {dimension_numbers = #tpu.dot_dimension_numbers<[1], [0], [0], [1], [0, 0, 1, 1], [], []>} : vector<256x128xbf16>, vector<128x128xbf16>, vector<256x128xf32> -> vector<256x128xf32>
    %c5_56 = arith.constant 5 : index
    %c0_57 = arith.constant 0 : index
    %c0_58 = arith.constant 0 : index
    %108 = vector.load %arg5[%c5_56, %c0_57, %c0_58] : memref<14x1x128xf32, #tpu.memory_space<vmem>>, vector<1x1x128xf32>
    %109 = vector.shape_cast %108 : vector<1x1x128xf32> to vector<1x128xf32>
    %110 = vector.broadcast %109 : vector<1x128xf32> to vector<256x128xf32>
    %111 = arith.addf %107, %110 : vector<256x128xf32>
    %cst_59 = arith.constant 5.000000e-01 : f32
    %112 = vector.broadcast %cst_59 : f32 to vector<256x128xf32>
    %113 = arith.mulf %112, %111 : vector<256x128xf32>
    %114 = math.tanh %113 : vector<256x128xf32>
    %cst_60 = arith.constant 5.000000e-01 : f32
    %115 = vector.broadcast %cst_60 : f32 to vector<256x128xf32>
    %116 = arith.mulf %115, %114 : vector<256x128xf32>
    %cst_61 = arith.constant 5.000000e-01 : f32
    %117 = vector.broadcast %cst_61 : f32 to vector<256x128xf32>
    %118 = arith.addf %116, %117 : vector<256x128xf32>
    %119 = arith.mulf %111, %118 : vector<256x128xf32>
    %120 = arith.truncf %119 : vector<256x128xf32> to vector<256x128xbf16>
    %c6 = arith.constant 6 : index
    %c0_62 = arith.constant 0 : index
    %c0_63 = arith.constant 0 : index
    %121 = vector.load %arg4[%c6, %c0_62, %c0_63] : memref<14x128x128xbf16, #tpu.memory_space<vmem>>, vector<1x128x128xbf16>
    %122 = vector.shape_cast %121 : vector<1x128x128xbf16> to vector<128x128xbf16>
    %cst_64 = arith.constant dense<0.000000e+00> : vector<256x128xf32>
    %123 = tpu.matmul %120, %122, %cst_64 {dimension_numbers = #tpu.dot_dimension_numbers<[1], [0], [0], [1], [0, 0, 1, 1], [], []>} : vector<256x128xbf16>, vector<128x128xbf16>, vector<256x128xf32> -> vector<256x128xf32>
    %c6_65 = arith.constant 6 : index
    %c0_66 = arith.constant 0 : index
    %c0_67 = arith.constant 0 : index
    %124 = vector.load %arg5[%c6_65, %c0_66, %c0_67] : memref<14x1x128xf32, #tpu.memory_space<vmem>>, vector<1x1x128xf32>
    %125 = vector.shape_cast %124 : vector<1x1x128xf32> to vector<1x128xf32>
    %126 = vector.broadcast %125 : vector<1x128xf32> to vector<256x128xf32>
    %127 = arith.addf %123, %126 : vector<256x128xf32>
    %cst_68 = arith.constant 5.000000e-01 : f32
    %128 = vector.broadcast %cst_68 : f32 to vector<256x128xf32>
    %129 = arith.mulf %128, %127 : vector<256x128xf32>
    %130 = math.tanh %129 : vector<256x128xf32>
    %cst_69 = arith.constant 5.000000e-01 : f32
    %131 = vector.broadcast %cst_69 : f32 to vector<256x128xf32>
    %132 = arith.mulf %131, %130 : vector<256x128xf32>
    %cst_70 = arith.constant 5.000000e-01 : f32
    %133 = vector.broadcast %cst_70 : f32 to vector<256x128xf32>
    %134 = arith.addf %132, %133 : vector<256x128xf32>
    %135 = arith.mulf %127, %134 : vector<256x128xf32>
    %136 = arith.truncf %135 : vector<256x128xf32> to vector<256x128xbf16>
    %c7 = arith.constant 7 : index
    %c0_71 = arith.constant 0 : index
    %c0_72 = arith.constant 0 : index
    %137 = vector.load %arg4[%c7, %c0_71, %c0_72] : memref<14x128x128xbf16, #tpu.memory_space<vmem>>, vector<1x128x128xbf16>
    %138 = vector.shape_cast %137 : vector<1x128x128xbf16> to vector<128x128xbf16>
    %cst_73 = arith.constant dense<0.000000e+00> : vector<256x128xf32>
    %139 = tpu.matmul %136, %138, %cst_73 {dimension_numbers = #tpu.dot_dimension_numbers<[1], [0], [0], [1], [0, 0, 1, 1], [], []>} : vector<256x128xbf16>, vector<128x128xbf16>, vector<256x128xf32> -> vector<256x128xf32>
    %c7_74 = arith.constant 7 : index
    %c0_75 = arith.constant 0 : index
    %c0_76 = arith.constant 0 : index
    %140 = vector.load %arg5[%c7_74, %c0_75, %c0_76] : memref<14x1x128xf32, #tpu.memory_space<vmem>>, vector<1x1x128xf32>
    %141 = vector.shape_cast %140 : vector<1x1x128xf32> to vector<1x128xf32>
    %142 = vector.broadcast %141 : vector<1x128xf32> to vector<256x128xf32>
    %143 = arith.addf %139, %142 : vector<256x128xf32>
    %cst_77 = arith.constant 5.000000e-01 : f32
    %144 = vector.broadcast %cst_77 : f32 to vector<256x128xf32>
    %145 = arith.mulf %144, %143 : vector<256x128xf32>
    %146 = math.tanh %145 : vector<256x128xf32>
    %cst_78 = arith.constant 5.000000e-01 : f32
    %147 = vector.broadcast %cst_78 : f32 to vector<256x128xf32>
    %148 = arith.mulf %147, %146 : vector<256x128xf32>
    %cst_79 = arith.constant 5.000000e-01 : f32
    %149 = vector.broadcast %cst_79 : f32 to vector<256x128xf32>
    %150 = arith.addf %148, %149 : vector<256x128xf32>
    %151 = arith.mulf %143, %150 : vector<256x128xf32>
    %152 = arith.truncf %151 : vector<256x128xf32> to vector<256x128xbf16>
    %c8 = arith.constant 8 : index
    %c0_80 = arith.constant 0 : index
    %c0_81 = arith.constant 0 : index
    %153 = vector.load %arg4[%c8, %c0_80, %c0_81] : memref<14x128x128xbf16, #tpu.memory_space<vmem>>, vector<1x128x128xbf16>
    %154 = vector.shape_cast %153 : vector<1x128x128xbf16> to vector<128x128xbf16>
    %cst_82 = arith.constant dense<0.000000e+00> : vector<256x128xf32>
    %155 = tpu.matmul %152, %154, %cst_82 {dimension_numbers = #tpu.dot_dimension_numbers<[1], [0], [0], [1], [0, 0, 1, 1], [], []>} : vector<256x128xbf16>, vector<128x128xbf16>, vector<256x128xf32> -> vector<256x128xf32>
    %c8_83 = arith.constant 8 : index
    %c0_84 = arith.constant 0 : index
    %c0_85 = arith.constant 0 : index
    %156 = vector.load %arg5[%c8_83, %c0_84, %c0_85] : memref<14x1x128xf32, #tpu.memory_space<vmem>>, vector<1x1x128xf32>
    %157 = vector.shape_cast %156 : vector<1x1x128xf32> to vector<1x128xf32>
    %158 = vector.broadcast %157 : vector<1x128xf32> to vector<256x128xf32>
    %159 = arith.addf %155, %158 : vector<256x128xf32>
    %cst_86 = arith.constant 5.000000e-01 : f32
    %160 = vector.broadcast %cst_86 : f32 to vector<256x128xf32>
    %161 = arith.mulf %160, %159 : vector<256x128xf32>
    %162 = math.tanh %161 : vector<256x128xf32>
    %cst_87 = arith.constant 5.000000e-01 : f32
    %163 = vector.broadcast %cst_87 : f32 to vector<256x128xf32>
    %164 = arith.mulf %163, %162 : vector<256x128xf32>
    %cst_88 = arith.constant 5.000000e-01 : f32
    %165 = vector.broadcast %cst_88 : f32 to vector<256x128xf32>
    %166 = arith.addf %164, %165 : vector<256x128xf32>
    %167 = arith.mulf %159, %166 : vector<256x128xf32>
    %168 = arith.truncf %167 : vector<256x128xf32> to vector<256x128xbf16>
    %c9 = arith.constant 9 : index
    %c0_89 = arith.constant 0 : index
    %c0_90 = arith.constant 0 : index
    %169 = vector.load %arg4[%c9, %c0_89, %c0_90] : memref<14x128x128xbf16, #tpu.memory_space<vmem>>, vector<1x128x128xbf16>
    %170 = vector.shape_cast %169 : vector<1x128x128xbf16> to vector<128x128xbf16>
    %cst_91 = arith.constant dense<0.000000e+00> : vector<256x128xf32>
    %171 = tpu.matmul %168, %170, %cst_91 {dimension_numbers = #tpu.dot_dimension_numbers<[1], [0], [0], [1], [0, 0, 1, 1], [], []>} : vector<256x128xbf16>, vector<128x128xbf16>, vector<256x128xf32> -> vector<256x128xf32>
    %c9_92 = arith.constant 9 : index
    %c0_93 = arith.constant 0 : index
    %c0_94 = arith.constant 0 : index
    %172 = vector.load %arg5[%c9_92, %c0_93, %c0_94] : memref<14x1x128xf32, #tpu.memory_space<vmem>>, vector<1x1x128xf32>
    %173 = vector.shape_cast %172 : vector<1x1x128xf32> to vector<1x128xf32>
    %174 = vector.broadcast %173 : vector<1x128xf32> to vector<256x128xf32>
    %175 = arith.addf %171, %174 : vector<256x128xf32>
    %cst_95 = arith.constant 5.000000e-01 : f32
    %176 = vector.broadcast %cst_95 : f32 to vector<256x128xf32>
    %177 = arith.mulf %176, %175 : vector<256x128xf32>
    %178 = math.tanh %177 : vector<256x128xf32>
    %cst_96 = arith.constant 5.000000e-01 : f32
    %179 = vector.broadcast %cst_96 : f32 to vector<256x128xf32>
    %180 = arith.mulf %179, %178 : vector<256x128xf32>
    %cst_97 = arith.constant 5.000000e-01 : f32
    %181 = vector.broadcast %cst_97 : f32 to vector<256x128xf32>
    %182 = arith.addf %180, %181 : vector<256x128xf32>
    %183 = arith.mulf %175, %182 : vector<256x128xf32>
    %184 = arith.truncf %183 : vector<256x128xf32> to vector<256x128xbf16>
    %c10 = arith.constant 10 : index
    %c0_98 = arith.constant 0 : index
    %c0_99 = arith.constant 0 : index
    %185 = vector.load %arg4[%c10, %c0_98, %c0_99] : memref<14x128x128xbf16, #tpu.memory_space<vmem>>, vector<1x128x128xbf16>
    %186 = vector.shape_cast %185 : vector<1x128x128xbf16> to vector<128x128xbf16>
    %cst_100 = arith.constant dense<0.000000e+00> : vector<256x128xf32>
    %187 = tpu.matmul %184, %186, %cst_100 {dimension_numbers = #tpu.dot_dimension_numbers<[1], [0], [0], [1], [0, 0, 1, 1], [], []>} : vector<256x128xbf16>, vector<128x128xbf16>, vector<256x128xf32> -> vector<256x128xf32>
    %c10_101 = arith.constant 10 : index
    %c0_102 = arith.constant 0 : index
    %c0_103 = arith.constant 0 : index
    %188 = vector.load %arg5[%c10_101, %c0_102, %c0_103] : memref<14x1x128xf32, #tpu.memory_space<vmem>>, vector<1x1x128xf32>
    %189 = vector.shape_cast %188 : vector<1x1x128xf32> to vector<1x128xf32>
    %190 = vector.broadcast %189 : vector<1x128xf32> to vector<256x128xf32>
    %191 = arith.addf %187, %190 : vector<256x128xf32>
    %cst_104 = arith.constant 5.000000e-01 : f32
    %192 = vector.broadcast %cst_104 : f32 to vector<256x128xf32>
    %193 = arith.mulf %192, %191 : vector<256x128xf32>
    %194 = math.tanh %193 : vector<256x128xf32>
    %cst_105 = arith.constant 5.000000e-01 : f32
    %195 = vector.broadcast %cst_105 : f32 to vector<256x128xf32>
    %196 = arith.mulf %195, %194 : vector<256x128xf32>
    %cst_106 = arith.constant 5.000000e-01 : f32
    %197 = vector.broadcast %cst_106 : f32 to vector<256x128xf32>
    %198 = arith.addf %196, %197 : vector<256x128xf32>
    %199 = arith.mulf %191, %198 : vector<256x128xf32>
    %200 = arith.truncf %199 : vector<256x128xf32> to vector<256x128xbf16>
    %c11 = arith.constant 11 : index
    %c0_107 = arith.constant 0 : index
    %c0_108 = arith.constant 0 : index
    %201 = vector.load %arg4[%c11, %c0_107, %c0_108] : memref<14x128x128xbf16, #tpu.memory_space<vmem>>, vector<1x128x128xbf16>
    %202 = vector.shape_cast %201 : vector<1x128x128xbf16> to vector<128x128xbf16>
    %cst_109 = arith.constant dense<0.000000e+00> : vector<256x128xf32>
    %203 = tpu.matmul %200, %202, %cst_109 {dimension_numbers = #tpu.dot_dimension_numbers<[1], [0], [0], [1], [0, 0, 1, 1], [], []>} : vector<256x128xbf16>, vector<128x128xbf16>, vector<256x128xf32> -> vector<256x128xf32>
    %c11_110 = arith.constant 11 : index
    %c0_111 = arith.constant 0 : index
    %c0_112 = arith.constant 0 : index
    %204 = vector.load %arg5[%c11_110, %c0_111, %c0_112] : memref<14x1x128xf32, #tpu.memory_space<vmem>>, vector<1x1x128xf32>
    %205 = vector.shape_cast %204 : vector<1x1x128xf32> to vector<1x128xf32>
    %206 = vector.broadcast %205 : vector<1x128xf32> to vector<256x128xf32>
    %207 = arith.addf %203, %206 : vector<256x128xf32>
    %cst_113 = arith.constant 5.000000e-01 : f32
    %208 = vector.broadcast %cst_113 : f32 to vector<256x128xf32>
    %209 = arith.mulf %208, %207 : vector<256x128xf32>
    %210 = math.tanh %209 : vector<256x128xf32>
    %cst_114 = arith.constant 5.000000e-01 : f32
    %211 = vector.broadcast %cst_114 : f32 to vector<256x128xf32>
    %212 = arith.mulf %211, %210 : vector<256x128xf32>
    %cst_115 = arith.constant 5.000000e-01 : f32
    %213 = vector.broadcast %cst_115 : f32 to vector<256x128xf32>
    %214 = arith.addf %212, %213 : vector<256x128xf32>
    %215 = arith.mulf %207, %214 : vector<256x128xf32>
    %216 = arith.truncf %215 : vector<256x128xf32> to vector<256x128xbf16>
    %c12 = arith.constant 12 : index
    %c0_116 = arith.constant 0 : index
    %c0_117 = arith.constant 0 : index
    %217 = vector.load %arg4[%c12, %c0_116, %c0_117] : memref<14x128x128xbf16, #tpu.memory_space<vmem>>, vector<1x128x128xbf16>
    %218 = vector.shape_cast %217 : vector<1x128x128xbf16> to vector<128x128xbf16>
    %cst_118 = arith.constant dense<0.000000e+00> : vector<256x128xf32>
    %219 = tpu.matmul %216, %218, %cst_118 {dimension_numbers = #tpu.dot_dimension_numbers<[1], [0], [0], [1], [0, 0, 1, 1], [], []>} : vector<256x128xbf16>, vector<128x128xbf16>, vector<256x128xf32> -> vector<256x128xf32>
    %c12_119 = arith.constant 12 : index
    %c0_120 = arith.constant 0 : index
    %c0_121 = arith.constant 0 : index
    %220 = vector.load %arg5[%c12_119, %c0_120, %c0_121] : memref<14x1x128xf32, #tpu.memory_space<vmem>>, vector<1x1x128xf32>
    %221 = vector.shape_cast %220 : vector<1x1x128xf32> to vector<1x128xf32>
    %222 = vector.broadcast %221 : vector<1x128xf32> to vector<256x128xf32>
    %223 = arith.addf %219, %222 : vector<256x128xf32>
    %cst_122 = arith.constant 5.000000e-01 : f32
    %224 = vector.broadcast %cst_122 : f32 to vector<256x128xf32>
    %225 = arith.mulf %224, %223 : vector<256x128xf32>
    %226 = math.tanh %225 : vector<256x128xf32>
    %cst_123 = arith.constant 5.000000e-01 : f32
    %227 = vector.broadcast %cst_123 : f32 to vector<256x128xf32>
    %228 = arith.mulf %227, %226 : vector<256x128xf32>
    %cst_124 = arith.constant 5.000000e-01 : f32
    %229 = vector.broadcast %cst_124 : f32 to vector<256x128xf32>
    %230 = arith.addf %228, %229 : vector<256x128xf32>
    %231 = arith.mulf %223, %230 : vector<256x128xf32>
    %232 = arith.truncf %231 : vector<256x128xf32> to vector<256x128xbf16>
    %c13 = arith.constant 13 : index
    %c0_125 = arith.constant 0 : index
    %c0_126 = arith.constant 0 : index
    %233 = vector.load %arg4[%c13, %c0_125, %c0_126] : memref<14x128x128xbf16, #tpu.memory_space<vmem>>, vector<1x128x128xbf16>
    %234 = vector.shape_cast %233 : vector<1x128x128xbf16> to vector<128x128xbf16>
    %cst_127 = arith.constant dense<0.000000e+00> : vector<256x128xf32>
    %235 = tpu.matmul %232, %234, %cst_127 {dimension_numbers = #tpu.dot_dimension_numbers<[1], [0], [0], [1], [0, 0, 1, 1], [], []>} : vector<256x128xbf16>, vector<128x128xbf16>, vector<256x128xf32> -> vector<256x128xf32>
    %c13_128 = arith.constant 13 : index
    %c0_129 = arith.constant 0 : index
    %c0_130 = arith.constant 0 : index
    %236 = vector.load %arg5[%c13_128, %c0_129, %c0_130] : memref<14x1x128xf32, #tpu.memory_space<vmem>>, vector<1x1x128xf32>
    %237 = vector.shape_cast %236 : vector<1x1x128xf32> to vector<1x128xf32>
    %238 = vector.broadcast %237 : vector<1x128xf32> to vector<256x128xf32>
    %239 = arith.addf %235, %238 : vector<256x128xf32>
    %cst_131 = arith.constant 5.000000e-01 : f32
    %240 = vector.broadcast %cst_131 : f32 to vector<256x128xf32>
    %241 = arith.mulf %240, %239 : vector<256x128xf32>
    %242 = math.tanh %241 : vector<256x128xf32>
    %cst_132 = arith.constant 5.000000e-01 : f32
    %243 = vector.broadcast %cst_132 : f32 to vector<256x128xf32>
    %244 = arith.mulf %243, %242 : vector<256x128xf32>
    %cst_133 = arith.constant 5.000000e-01 : f32
    %245 = vector.broadcast %cst_133 : f32 to vector<256x128xf32>
    %246 = arith.addf %244, %245 : vector<256x128xf32>
    %247 = arith.mulf %239, %246 : vector<256x128xf32>
    %c0_134 = arith.constant 0 : index
    %c0_135 = arith.constant 0 : index
    %248 = vector.load %arg6[%c0_134, %c0_135] : memref<1x128xf32, #tpu.memory_space<vmem>>, vector<1x128xf32>
    %249 = vector.broadcast %248 : vector<1x128xf32> to vector<256x128xf32>
    %250 = arith.mulf %247, %249 : vector<256x128xf32>
    %cst_136 = arith.constant dense<0.000000e+00> : vector<256xf32>
    %251 = vector.multi_reduction <add>, %250, %cst_136 [1] : vector<256x128xf32> to vector<256xf32>
    %252 = vector.shape_cast %251 : vector<256xf32> to vector<256x1xf32>
    %c0_137 = arith.constant 0 : index
    %c0_138 = arith.constant 0 : index
    %253 = vector.load %arg7[%c0_137, %c0_138] : memref<1x1xf32, #tpu.memory_space<vmem>>, vector<1x1xf32>
    %254 = vector.broadcast %253 : vector<1x1xf32> to vector<256x1xf32>
    %255 = arith.addf %252, %254 : vector<256x1xf32>
    %c0_139 = arith.constant 0 : index
    %c0_140 = arith.constant 0 : index
    %256 = vector.load %arg8[%c0_139, %c0_140] : memref<256x1xf32, #tpu.memory_space<vmem>>, vector<256x1xf32>
    tpu.vector_store %arg8[%c0_139, %c0_140], %255 {strides = array<i32>} : memref<256x1xf32, #tpu.memory_space<vmem>>, vector<256x1xf32>,
    return
  }
  func.func @transform_0(%arg0: i32) -> (i32, i32) {
    %c0_i32 = arith.constant 0 : i32
    %c0_i32_0 = arith.constant 0 : i32
    return %arg0, %c0_i32 : i32, i32
  }
  func.func @transform_1(%arg0: i32) -> (i32, i32) {
    %c0_i32 = arith.constant 0 : i32
    %c0_i32_0 = arith.constant 0 : i32
    %c0_i32_1 = arith.constant 0 : i32
    return %c0_i32, %c0_i32_0 : i32, i32
  }
  func.func @transform_2(%arg0: i32) -> (i32, i32) {
    %c0_i32 = arith.constant 0 : i32
    %c0_i32_0 = arith.constant 0 : i32
    %c0_i32_1 = arith.constant 0 : i32
    return %c0_i32, %c0_i32_0 : i32, i32
  }
  func.func @transform_3(%arg0: i32) -> (i32, i32, i32) {
    %c0_i32 = arith.constant 0 : i32
    %c0_i32_0 = arith.constant 0 : i32
    %c0_i32_1 = arith.constant 0 : i32
    %c0_i32_2 = arith.constant 0 : i32
    return %c0_i32, %c0_i32_0, %c0_i32_1 : i32, i32, i32
  }
  func.func @transform_4(%arg0: i32) -> (i32, i32, i32) {
    %c0_i32 = arith.constant 0 : i32
    %c0_i32_0 = arith.constant 0 : i32
    %c0_i32_1 = arith.constant 0 : i32
    %c0_i32_2 = arith.constant 0 : i32
    return %c0_i32, %c0_i32_0, %c0_i32_1 : i32, i32, i32
  }
  func.func @transform_5(%arg0: i32) -> (i32, i32) {
    %c0_i32 = arith.constant 0 : i32
    %c0_i32_0 = arith.constant 0 : i32
    %c0_i32_1 = arith.constant 0 : i32
    return %c0_i32, %c0_i32_0 : i32, i32
  }
  func.func @transform_6(%arg0: i32) -> (i32, i32) {
    %c0_i32 = arith.constant 0 : i32
    %c0_i32_0 = arith.constant 0 : i32
    %c0_i32_1 = arith.constant 0 : i32
    return %c0_i32, %c0_i32_0 : i32, i32
  }
  func.func @transform_7(%arg0: i32) -> (i32, i32) {
    %c0_i32 = arith.constant 0 : i32
    %c0_i32_0 = arith.constant 0 : i32
    return %arg0, %c0_i32 : i32, i32
  }
}

</mosaic_0001>

<bundles_post_ra>
// kernel: tpu_custom_call.1
= control target key start
LH: loop header
LB: loop body
LE: loop exit
PB: predicated region body
PF: predicated region fallthrough
CT: control target
= control target key end

     0   :  { %s10276_s0 = inlined_call_operand.vmem [shape: f32[512,2], index: 0, kind: input, shape index: {}]   ;;  %s10277_s1 = inlined_call_operand.vmem [shape: f32[2,128], index: 1, kind: input, shape index: {}]   ;;  %s10278_s2 = inlined_call_operand.vmem [shape: f32[1,128], index: 2, kind: input, shape index: {}]   ;;  %s10279_s3 = inlined_call_operand.hbm [shape: bf16[14,128,128], index: 3, kind: input, shape index: {}]   ;;  %s10280_s4 = inlined_call_operand.vmem [shape: f32[14,1,128], index: 4, kind: input, shape index: {}]   ;;  %s10281_s5 = inlined_call_operand.vmem [shape: f32[1,128], index: 5, kind: input, shape index: {}]   ;;  %s10282_s6 = inlined_call_operand.<no memory space> [shape: f32[1,1], index: 6, kind: input, shape index: {}]   ;;  %s10283_s7 = inlined_call_operand.vmem [shape: f32[512,1], index: 7, kind: output, shape index: {}]  }
   0x1   :  { %v12_v0 = vstv %s10282_s6 }
   0x2   :  { %13 = vst [vmem:[#allocation2] sm:$0x1] %v12_v0 }
   0x3   :  { %14 = vsyncpa [#allocation4], 0  ;;  %s9285_s26 = smov 0  }
   0x4 LB: > { %s6905_s27 = sadd.s32 4294967295, %s9235_s26   ;;  %p6907_p0 = scmp.ge.s32.totalorder %s9235_s26, 1  ;;  %s9235_s26 = sphi %s9285_s26, %s20_s26  }
   0x5   : > { %p203_p1 = scmp.lt.s32.totalorder %s9235_s26, 3  ;;  %s9237_s28 = smov [#allocation3]  }
   0x6   : > { %s221_s29 = sshll.u32 %s9237_s28, 4  ;;  %p9299_p3 = scmp.eq.s32.totalorder %s6905_s27, 0  ;;  %s222_s29 = int_to_ptr.vmem [resolvable:$true] %s221_s29 }
   0x7   : > { %p9293_p2 = pnand %p6907_p0, %p203_p1  ;;  %s9197_s11 = scalar_lea.hbm %s10279_s3, 14336 }
   0x8   : > { %s10288_s30 = scalar_select %p9299_p3, 1, 0 }
   0x9   : > { %s10287_s6 = scalar_select %p9293_p2, 1, 0 }
   0xa   : > { %p8072_p4 = pneg %p9293_p2  ;;  %p9198_p6 = scmp.ne.s32.totalorder %s10279_s3, %s9197_s11 }
   0xb   : > { %p9204_p10 = scmp.lt.u32.totalorder %s9197_s11, %s10279_s3 }
   0xc   : > { %p9307_p5 = pnand %p9299_p3, %p8072_p4 }
   0xe   : > { %p9199_p7 = pneg %p9307_p5 }
  0x10   : > { %p9200_p8 = pnand %p9199_p7, %p9198_p6 }
  0x12   : > { %p9201_p9 = pneg %p9200_p8 }
  0x14   : > { %p9206_p11 = pnand %p9204_p10, %p9201_p9 }
  0x16   : > { %9209 = shalt.err (!%p9206_p11)
}
  0x17   : > { %s9210_s16 = scalar_lea.vmem %s222_s29, 14336  ;;  %p9218_p1 = scmp.lt.s32.totalorder %s222_s29, %s222_s29 }
  0x18   : > { %p9211_p12 = scmp.ne.s32.totalorder %s222_s29, %s9210_s16  ;;  %p9219_p4 = scmp.lt.s32.totalorder %s9210_s16, %s9210_s16 }
  0x1a   : > { %p9213_p13 = pnand %p9211_p12, %p9199_p7  ;;  %p9220_p3 = por %p9219_p4, %p9218_p1 }
  0x1c   : > { %p9214_p0 = pneg %p9213_p13 }
  0x1e   : > { %p9221_p2 = pnand %p9220_p3, %p9214_p0 }
  0x20   : > { %9224 = shalt.err (!%p9221_p2)
}
  0x21   : > { %s9238_s17 = smov 64   ;;  %s9239_s18 = smov 4  }
  0x22   : > { %8075 = dma.hbm_to_vmem [thread:$0]  (!%p9307_p5), %s10279_s3, 14336, %s222_s29, [#allocation4], %s9238_s17, %s9238_s17, %s9239_s18  }
  0x23   : > { %p10290_p6 = scmp.ne.s32.totalorder %s10287_s6, 0 }
  0x24   : > { %p10291_p8 = scmp.ne.s32.totalorder (!%p10290_p6), %s10288_s30, 0 }
  0x25   : > { %255 = sbr.rel (%p10290_p6) target bundleno = 3883 (0xf2b), region = 48 }
  0x2c   : > { %9230 = dma.done.wait (%p10291_p8), [#allocation4], 14336  }
  0x2d   : > { %9232 = vsyncadd (%p10291_p8), [#allocation4], 4294952960  ;;  %s6912_s21 = sshll.u32 %s6905_s27, 5  ;;  %v9240_v1 = vmov 1   ;;  %v9241_v8 = vmov 0   ;;  %v8125_v16 = vld [vmem:[#allocation3] sm:$0xff]   ;;  %v493_v44 = vlaneseq }
  0x2e   : > { %8093 = vset.pattern.permute.xlu0 %v9240_v1  ;;  %8091 = vset.pattern.permute.xlu1 %v9240_v1  ;;  %p288_p2 = scmp.lt.s32.totalorder %s6912_s21, 63  ;;  %v8126_v17 = vld [vmem:[#allocation3 + $0x8] sm:$0xff]   ;;  %v8127_v19 = vld [vmem:[#allocation3 + $0x10] sm:$0xff]   ;;  %v8128_v20 = vld [vmem:[#allocation3 + $0x18] sm:$0xff]   ;;  %vm6804_vm0 = vcmask 7168  }
  0x2f   : > { %7396 = vmatprep.subr.bf16.mxu0 %v8125_v16  ;;  %v8129_v22 = vld [vmem:[#allocation3 + $0x20] sm:$0xff]   ;;  %v8130_v23 = vld [vmem:[#allocation3 + $0x28] sm:$0xff]   ;;  %v8131_v26 = vld [vmem:[#allocation3 + $0x30] sm:$0xff]   ;;  %v494_v48 = vshrl.u32 %v493_v44, 7 }
  0x30   : > { %s10293_s21 = smov (!%p288_p2, %s6912_s21), 63  ;;  %7397 = vmatpush3.bf16.msra.mxu0 %v8125_v16  ;;  %v8132_v27 = vld [vmem:[#allocation3 + $0x38] sm:$0xff]  }
  0x31   : > { %s6913_s22 = sshll.u32 %s10293_s21, 3  ;;  %7398 = vmatprep.subr.bf16.mxu0 %v8126_v17  ;;  %v659_v51 = vsub.s32 1, %v494_v48  ;;  %v495_v52 = vsub.s32 0, %v494_v48  ;;  %v332_v53 = vld [vmem:[%s10277_s1] sm:$0x3] }
  0x32   : > { %s9345_s25 = scalar_lea.vmem %s10276_s0, %s6913_s22  ;;  %s10171_s18 = scalar_lea.vmem %s10283_s7, %s6913_s22 }
  0x33   : > { %v302_v2 = vld [vmem:[%s9345_s25 + $0x10] sm:$0xff]  ;;  %v300_v3 = vld [vmem:[%s9345_s25] sm:$0xff]  ;;  %v301_v5 = vld [vmem:[%s9345_s25 + $0x8] sm:$0xff]  ;;  %v9434_v56 = vrot.slane %v332_v53, %v659_v51  ;;  %v9436_v57 = vrot.slane %v332_v53, %v495_v52 }
  0x34   : > { %538 = vperm.xlu0 %8093, %v302_v2   ;;  %530 = vperm.xlu1 %8091, %v300_v3   ;;  %v306_v4 = vld [vmem:[%s9345_s25 + $0x30] sm:$0xff]  ;;  %v303_v7 = vld [vmem:[%s9345_s25 + $0x18] sm:$0xff]  ;;  %v304_v11 = vld [vmem:[%s9345_s25 + $0x20] sm:$0xff] }
  0x35   : > { %v310_v6 = vld [vmem:[%s9345_s25 + $0x50] sm:$0xff]  ;;  %v305_v14 = vld [vmem:[%s9345_s25 + $0x28] sm:$0xff]  ;;  %v307_v15 = vld [vmem:[%s9345_s25 + $0x38] sm:$0xff]  ;;  %7399 = vmatpush3.bf16.msra.mxu0 %v8126_v17 }
  0x36   : > { %v9355_v9 = vld [vmem:[%s9345_s25 + $0x70] sm:$0xff]  ;;  %v308_v18 = vld [vmem:[%s9345_s25 + $0x40] sm:$0xff]  ;;  %7400 = vmatprep.subr.bf16.mxu0 %v8127_v19  ;;  %v309_v21 = vld [vmem:[%s9345_s25 + $0x48] sm:$0xff] }
  0x37   : > { %v9359_v10 = vld [vmem:[%s9345_s25 + $0x90] sm:$0xff]  ;;  %v313_v24 = vld [vmem:[%s9345_s25 + $0x68] sm:$0xff]  ;;  %v311_v25 = vld [vmem:[%s9345_s25 + $0x58] sm:$0xff] }
  0x38   : > { %554 = vperm.xlu0 %8093, %v306_v4   ;;  %534 = vperm.xlu1 %8091, %v301_v5   ;;  %v9364_v12 = vld [vmem:[%s9345_s25 + $0xb0] sm:$0xff]  ;;  %v317_v28 = vld [vmem:[%s9345_s25 + $0x88] sm:$0xff]  ;;  %v312_v29 = vld [vmem:[%s9345_s25 + $0x60] sm:$0xff] }
  0x39   : > { %v9369_v13 = vld [vmem:[%s9345_s25 + $0xd0] sm:$0xff]  ;;  %7401 = vmatpush3.bf16.msra.mxu0 %v8127_v19  ;;  %v321_v30 = vld [vmem:[%s9345_s25 + $0xa8] sm:$0xff]  ;;  %v315_v32 = vld [vmem:[%s9345_s25 + $0x78] sm:$0xff] }
  0x3a   : > { %7402 = vmatprep.subr.bf16.mxu0 %v8128_v20  ;;  %v325_v31 = vld [vmem:[%s9345_s25 + $0xc8] sm:$0xff]  ;;  %v316_v34 = vld [vmem:[%s9345_s25 + $0x80] sm:$0xff]  ;;  %v330_v35 = vld [vmem:[%s9345_s25 + $0xf0] sm:$0xff] }
  0x3b   : > { %v9399_v33 = vld [vmem:[%s9345_s25 + $0xe8] sm:$0xff]  ;;  %v319_v36 = vld [vmem:[%s9345_s25 + $0x98] sm:$0xff]  ;;  %v320_v37 = vld [vmem:[%s9345_s25 + $0xa0] sm:$0xff] }
  0x3c   : > { %570 = vperm.xlu0 %8093, %v310_v6   ;;  %8092 = vset.pattern.permute.xlu1 %v9241_v8  ;;  %v323_v38 = vld [vmem:[%s9345_s25 + $0xb8] sm:$0xff]  ;;  %v324_v46 = vld [vmem:[%s9345_s25 + $0xc0] sm:$0xff] }
  0x3d   : > { %350 = vperm.xlu1 %8092, %v303_v7   ;;  %7403 = vmatpush3.bf16.msra.mxu0 %v8128_v20  ;;  %v327_v59 = vld [vmem:[%s9345_s25 + $0xd8] sm:$0xff] }
  0x3e   : > { %7404 = vmatprep.subr.bf16.mxu0 %v8129_v22  ;;  %v331_v51 = vld [vmem:[%s9345_s25 + $0xf8] sm:$0xff] }
  0x40   : > { %586 = vperm.xlu0 %8093, %v9355_v9  }
  0x41   : > { %8094 = vset.pattern.permute.xlu1 %v9240_v1  ;;  %7405 = vmatpush3.bf16.msra.mxu0 %v8129_v22 }
  0x42   : > { %542 = vperm.xlu1 %8094, %v303_v7   ;;  %7406 = vmatprep.subr.bf16.mxu0 %v8130_v23 }
  0x44   : > { %602 = vperm.xlu0 %8093, %v9359_v10  }
  0x45   : > { %7407 = vmatpush3.bf16.msra.mxu0 %v8130_v23 }
  0x46   : > { %8095 = vset.pattern.permute.xlu1 %v9241_v8  ;;  %7408 = vmatprep.subr.bf16.mxu0 %v8131_v26 }
  0x47   : > { %355 = vperm.xlu1 %8095, %v304_v11  }
  0x48   : > { %618 = vperm.xlu0 %8093, %v9364_v12  }
  0x49   : > { %7409 = vmatpush3.bf16.msra.mxu0 %v8131_v26 }
  0x4a   : > { %7410 = vmatprep.subr.bf16.mxu0 %v8132_v27 }
  0x4b   : > { %8096 = vset.pattern.permute.xlu1 %v9240_v1 }
  0x4c   : > { %634 = vperm.xlu0 %8093, %v9369_v13   ;;  %546 = vperm.xlu1 %8096, %v304_v11  }
  0x4d   : > { %7411 = vmatpush3.bf16.msra.mxu0 %v8132_v27 }
  0x50   : > { %8118 = vset.pattern.permute.xlu0 %v9241_v8  ;;  %550 = vperm.xlu1 %8096, %v305_v14  }
  0x51   : > { %335 = vperm.xlu0 %8118, %v300_v3  }
  0x54   : > { %8097 = vset.pattern.permute.xlu1 %v9241_v8 }
  0x55   : > { %340 = vperm.xlu0 %8118, %v301_v5   ;;  %370 = vperm.xlu1 %8097, %v307_v15  }
  0x59   : > { %345 = vperm.xlu0 %8118, %v302_v2   ;;  %8098 = vset.pattern.permute.xlu1 %v9240_v1  ;;  %v9448_v2 = vld [vmem:[%s10278_s2] ss:$0 sm:$0xff] }
  0x5a   : > { %558 = vperm.xlu1 %8098, %v307_v15  }
  0x5d   : > { %360 = vperm.xlu0 %8118, %v305_v14   ;;  %v328_v14 = vld [vmem:[%s9345_s25 + $0xe0] sm:$0xff] }
  0x5e   : > { %8099 = vset.pattern.permute.xlu1 %v9241_v8 }
  0x5f   : > { %375 = vperm.xlu1 %8099, %v308_v18  }
  0x61   : > { %365 = vperm.xlu0 %8118, %v306_v4  }
  0x63   : > { %8100 = vset.pattern.permute.xlu1 %v9240_v1 }
  0x64   : > { %562 = vperm.xlu1 %8100, %v308_v18  }
  0x65   : > { %380 = vperm.xlu0 %8118, %v309_v21  }
  0x68   : > { %566 = vperm.xlu1 %8100, %v309_v21  }
  0x69   : > { %385 = vperm.xlu0 %8118, %v310_v6  }
  0x6c   : > { %8101 = vset.pattern.permute.xlu1 %v9241_v8 }
  0x6d   : > { %400 = vperm.xlu0 %8118, %v313_v24   ;;  %390 = vperm.xlu1 %8101, %v311_v25  }
  0x71   : > { %405 = vperm.xlu0 %8118, %v9355_v9   ;;  %8102 = vset.pattern.permute.xlu1 %v9240_v1 }
  0x72   : > { %574 = vperm.xlu1 %8102, %v311_v25  }
  0x75   : > { %420 = vperm.xlu0 %8118, %v317_v28  }
  0x76   : > { %8103 = vset.pattern.permute.xlu1 %v9241_v8 }
  0x77   : > { %395 = vperm.xlu1 %8103, %v312_v29  }
  0x79   : > { %425 = vperm.xlu0 %8118, %v9359_v10  }
  0x7b   : > { %8104 = vset.pattern.permute.xlu1 %v9240_v1 }
  0x7c   : > { %578 = vperm.xlu1 %8104, %v312_v29  }
  0x7d   : > { %440 = vperm.xlu0 %8118, %v321_v30  }
  0x80   : > { %582 = vperm.xlu1 %8104, %v313_v24  }
  0x81   : > { %445 = vperm.xlu0 %8118, %v9364_v12  }
  0x84   : > { %8105 = vset.pattern.permute.xlu1 %v9241_v8 }
  0x85   : > { %460 = vperm.xlu0 %8118, %v325_v31   ;;  %410 = vperm.xlu1 %8105, %v315_v32  }
  0x89   : > { %465 = vperm.xlu0 %8118, %v9369_v13   ;;  %8106 = vset.pattern.permute.xlu1 %v9240_v1 }
  0x8a   : > { %590 = vperm.xlu1 %8106, %v315_v32  }
  0x8d   : > { %480 = vperm.xlu0 %8118, %v9399_v33  }
  0x8e   : > { %8107 = vset.pattern.permute.xlu1 %v9241_v8 }
  0x8f   : > { %415 = vperm.xlu1 %8107, %v316_v34  }
  0x91   : > { %485 = vperm.xlu0 %8118, %v330_v35  }
  0x93   : > { %8108 = vset.pattern.permute.xlu1 %v9240_v1 }
  0x94   : > { %594 = vperm.xlu1 %8108, %v316_v34  }
  0x95   : > { %8123 = vset.pattern.permute.xlu0 %v9240_v1 }
  0x96   : > { %650 = vperm.xlu0 %8123, %v330_v35  }
  0x98   : > { %598 = vperm.xlu1 %8108, %v317_v28  }
  0x9c   : > { %8109 = vset.pattern.permute.xlu1 %v9241_v8 }
  0x9d   : > { %430 = vperm.xlu1 %8109, %v319_v36  }
  0xa1   : > { %8110 = vset.pattern.permute.xlu1 %v9240_v1 }
  0xa2   : > { %606 = vperm.xlu1 %8110, %v319_v36  }
  0xa6   : > { %8111 = vset.pattern.permute.xlu1 %v9241_v8 }
  0xa7   : > { %435 = vperm.xlu1 %8111, %v320_v37  }
  0xab   : > { %8112 = vset.pattern.permute.xlu1 %v9240_v1 }
  0xac   : > { %610 = vperm.xlu1 %8112, %v320_v37  }
  0xb0   : > { %614 = vperm.xlu1 %8112, %v321_v30  }
  0xb3   : > { %v531_v39 = vpop.permute.xlu1 %530  ;;  %v539_v40 = vpop.permute.xlu0 %538 }
  0xb4   : > { %8113 = vset.pattern.permute.xlu1 %v9241_v8  ;;  %v661_v6 = vmul.f32 %v9434_v56, %v531_v39  ;;  %v663_v20 = vmul.f32 %v9434_v56, %v539_v40 }
  0xb5   : > { %450 = vperm.xlu1 %8113, %v323_v38  }
  0xb7   : > { %v535_v41 = vpop.permute.xlu1 %534  ;;  %v9417_v42 = vpop.permute.xlu0 %554 }
  0xb8   : > { %v662_v15 = vmul.f32 %v9434_v56, %v535_v41  ;;  %v667_v40 = vmul.f32 %v9434_v56, %v9417_v42 }
  0xb9   : > { %8114 = vset.pattern.permute.xlu1 %v9240_v1 }
  0xba   : > { %622 = vperm.xlu1 %8114, %v323_v38  }
  0xbb   : > { %v9420_v43 = vpop.permute.xlu0 %570 }
  0xbc   : > { %v351_v45 = vpop.permute.xlu1 %350 }
  0xbd   : > { %v500_v62 = vmul.f32 %v9436_v57, %v351_v45 }
  0xbe   : > { %8115 = vset.pattern.permute.xlu1 %v9241_v8 }
  0xbf   : > { %455 = vperm.xlu1 %8115, %v324_v46   ;;  %v9424_v47 = vpop.permute.xlu0 %586 }
  0xc1   : > { %v543_v49 = vpop.permute.xlu1 %542 }
  0xc2   : > { %v664_v58 = vmul.f32 %v9434_v56, %v543_v49 }
  0xc3   : > { %8116 = vset.pattern.permute.xlu1 %v9240_v1  ;;  %v9427_v50 = vpop.permute.xlu0 %602 }
  0xc4   : > { %626 = vperm.xlu1 %8116, %v324_v46   ;;  %v696_v63 = vadd.f32 %v664_v58, %v500_v62 }
  0xc6   : > { %v356_v54 = vpop.permute.xlu1 %355  ;;  %v9455_v9 = vadd.f32 %v9448_v2, %v696_v63 }
  0xc7   : > { %v9432_v55 = vpop.permute.xlu0 %618  ;;  %v501_v4 = vmul.f32 %v9436_v57, %v356_v54 }
  0xc8   : > { %630 = vperm.xlu1 %8116, %v325_v31   ;;  %v767_v18 = vmul.f32 0.5, %v9455_v9 }
  0xcb   : > { %v547_v60 = vpop.permute.xlu1 %546  ;;  %v9440_v61 = vpop.permute.xlu0 %634 }
  0xcc   : > { %8117 = vset.pattern.permute.xlu1 %v9241_v8  ;;  %v665_v0 = vmul.f32 %v9434_v56, %v547_v60 }
  0xcd   : > { %470 = vperm.xlu1 %8117, %v327_v59  }
  0xce   : > { %v697_v10 = vadd.f32 %v665_v0, %v501_v4 }
  0xcf   : > { %v551_v3 = vpop.permute.xlu1 %550 }
  0xd0   : > { %v336_v5 = vpop.permute.xlu0 %335  ;;  %v9465_v19 = vadd.f32 %v9448_v2, %v697_v10  ;;  %v666_v35 = vmul.f32 %v9434_v56, %v551_v3 }
  0xd1   : > { %v497_v7 = vmul.f32 %v9436_v57, %v336_v5  ;;  %8119 = vset.pattern.permute.xlu1 %v9240_v1  ;;  %v671_v5 = vmul.f32 %v9434_v56, %v9420_v43 }
  0xd2   : > { %638 = vperm.xlu1 %8119, %v327_v59   ;;  %v768_v27 = vmul.f32 0.5, %v9465_v19 }
  0xd3   : > { %v693_v11 = vadd.f32 %v661_v6, %v497_v7 }
  0xd4   : > { %v341_v12 = vpop.permute.xlu0 %340  ;;  %v371_v13 = vpop.permute.xlu1 %370 }
  0xd5   : > { %v498_v16 = vmul.f32 %v9436_v57, %v341_v12  ;;  %v9461_v17 = vadd.f32 %v9448_v2, %v693_v11  ;;  %v504_v28 = vmul.f32 %v9436_v57, %v371_v13 }
  0xd6   : > { %8120 = vset.pattern.permute.xlu1 %v9241_v8 }
  0xd7   : > { %v694_v21 = vadd.f32 %v662_v15, %v498_v16  ;;  %475 = vperm.xlu1 %8120, %v328_v14   ;;  %v764_v22 = vmul.f32 0.5, %v9461_v17 }
  0xd8   : > { %v346_v23 = vpop.permute.xlu0 %345 }
  0xd9   : > { %v499_v24 = vmul.f32 %v9436_v57, %v346_v23  ;;  %v559_v25 = vpop.permute.xlu1 %558  ;;  %v9472_v26 = vadd.f32 %v9448_v2, %v694_v21  ;;  %8237 = vtanh.f32 %v764_v22 }
  0xda   : > { %8239 = vtanh.f32 %v767_v18  ;;  %v668_v29 = vmul.f32 %v9434_v56, %v559_v25 }
  0xdb   : > { %v695_v30 = vadd.f32 %v663_v20, %v499_v24  ;;  %8121 = vset.pattern.permute.xlu1 %v9240_v1  ;;  %v765_v31 = vmul.f32 0.5, %v9472_v26 }
  0xdc   : > { %v700_v32 = vadd.f32 %v668_v29, %v504_v28  ;;  %v361_v34 = vpop.permute.xlu0 %360  ;;  %642 = vperm.xlu1 %8121, %v328_v14  }
  0xdd   : > { %v9481_v36 = vadd.f32 %v9448_v2, %v695_v30  ;;  %v502_v37 = vmul.f32 %v9436_v57, %v361_v34  ;;  %8241 = vtanh.f32 %v765_v31 }
  0xde   : > { %8243 = vtanh.f32 %v768_v27  ;;  %v9485_v38 = vadd.f32 %v9448_v2, %v700_v32  ;;  %v376_v39 = vpop.permute.xlu1 %375 }
  0xdf   : > { %v766_v41 = vmul.f32 0.5, %v9481_v36  ;;  %v698_v44 = vadd.f32 %v666_v35, %v502_v37  ;;  %v505_v59 = vmul.f32 %v9436_v57, %v376_v39 }
  0xe0   : > { %v771_v45 = vmul.f32 0.5, %v9485_v38  ;;  %v366_v46 = vpop.permute.xlu0 %365  ;;  %646 = vperm.xlu1 %8121, %v9399_v33  }
  0xe1   : > { %8245 = vtanh.f32 %v766_v41  ;;  %v9493_v48 = vadd.f32 %v9448_v2, %v698_v44  ;;  %v503_v49 = vmul.f32 %v9436_v57, %v366_v46 }
  0xe2   : > { %8247 = vtanh.f32 %v771_v45 }
  0xe3   : > { %v8238_v52 = vpop.eup %8237  ;;  %v769_v53 = vmul.f32 0.5, %v9493_v48  ;;  %v699_v42 = vadd.f32 %v667_v40, %v503_v49  ;;  %v563_v54 = vpop.permute.xlu1 %562 }
  0xe4   : > { %v8240_v58 = vpop.eup %8239  ;;  %v669_v60 = vmul.f32 %v9434_v56, %v563_v54  ;;  %v381_v62 = vpop.permute.xlu0 %380  ;;  %8122 = vset.pattern.permute.xlu1 %v9241_v8  ;;  %v828_v33 = vmul.f32 0.5, %v8238_v52 }
  0xe5   : > { %8249 = vtanh.f32 %v769_v53  ;;  %v9502_v63 = vadd.f32 %v9448_v2, %v699_v42  ;;  %490 = vperm.xlu1 %8122, %v331_v51   ;;  %v506_v3 = vmul.f32 %v9436_v57, %v381_v62  ;;  %v831_v11 = vmul.f32 0.5, %v8240_v58 }
  0xe6   : > { %v701_v0 = vadd.f32 %v669_v60, %v505_v59  ;;  %v860_v10 = vadd.f32 0.5, %v828_v33 }
  0xe7   : > { %v8242_v4 = vpop.eup %8241  ;;  %v770_v6 = vmul.f32 0.5, %v9502_v63  ;;  %v567_v7 = vpop.permute.xlu1 %566  ;;  %v863_v24 = vadd.f32 0.5, %v831_v11 }
  0xe8   : > { %v8244_v12 = vpop.eup %8243  ;;  %v9509_v8 = vadd.f32 %v9448_v2, %v701_v0  ;;  %v670_v13 = vmul.f32 %v9434_v56, %v567_v7  ;;  %v386_v14 = vpop.permute.xlu0 %385  ;;  %v829_v15 = vmul.f32 0.5, %v8242_v4  ;;  %v892_v23 = vmul.f32 %v860_v10, %v9461_v17 }
  0xe9   : > { %8251 = vtanh.f32 %v770_v6  ;;  %v507_v16 = vmul.f32 %v9436_v57, %v386_v14  ;;  %8124 = vset.pattern.permute.xlu1 %v9240_v1  ;;  %v832_v25 = vmul.f32 0.5, %v8244_v12  ;;  %v895_v17 = vmul.f32 %v863_v24, %v9455_v9 }
  0xea   : > { %v772_v43 = vmul.f32 0.5, %v9509_v8  ;;  %v702_v18 = vadd.f32 %v670_v13, %v506_v3  ;;  %654 = vperm.xlu1 %8124, %v331_v51   ;;  %v861_v20 = vadd.f32 0.5, %v829_v15  ;;  %v675_v15 = vmul.f32 %v9434_v56, %v9424_v47 }
  0xeb   : > { %v8246_v21 = vpop.eup %8245  ;;  %v703_v22 = vadd.f32 %v671_v5, %v507_v16  ;;  %v864_v40 = vadd.f32 0.5, %v832_v25 }
  0xec   : > { %8253 = vtanh.f32 %v772_v43  ;;  %v741_v27 = vadd.f32 %v9448_v2, %v702_v18  ;;  %v391_v28 = vpop.permute.xlu1 %390  ;;  %v893_v29 = vmul.f32 %v861_v20, %v9472_v26  ;;  %v830_v30 = vmul.f32 0.5, %v8246_v21  ;;  %v8248_v31 = vpop.eup %8247 }
  0xed   : > { %v9519_v1 = vadd.f32 %v9448_v2, %v703_v22  ;;  %v835_v26 = vmul.f32 0.5, %v8248_v31  ;;  %v508_v45 = vmul.f32 %v9436_v57, %v391_v28  ;;  %v896_v42 = vmul.f32 %v864_v40, %v9465_v19 }
  0xee   : > { %v773_v32 = vmul.f32 0.5, %v741_v27  ;;  %v924_v34 = vpack.c.bf16 %v893_v29, %v892_v23  ;;  %v862_v35 = vadd.f32 0.5, %v830_v30 }
  0xef   : > { %v8250_v37 = vpop.eup %8249  ;;  %v774_v39 = vmul.f32 0.5, %v9519_v1  ;;  %v867_v59 = vadd.f32 0.5, %v835_v26 }
  0xf0   : > { %8255 = vtanh.f32 %v773_v32  ;;  %7412 = vmatprep.mubr.bf16.mxu0 %v924_v34  ;;  %v894_v41 = vmul.f32 %v862_v35, %v9481_v36  ;;  %v833_v44 = vmul.f32 0.5, %v8250_v37  ;;  %v401_v36 = vpop.permute.xlu0 %400 }
  0xf1   : > { %v575_v46 = vpop.permute.xlu1 %574  ;;  %8257 = vtanh.f32 %v774_v39  ;;  %v899_v19 = vmul.f32 %v867_v59, %v9485_v38  ;;  %v510_v38 = vmul.f32 %v9436_v57, %v401_v36  ;;  %v8133_v39 = vld [vmem:[#allocation3 + $0x40] sm:$0xff]  }
  0xf2   : > { %v672_v49 = vmul.f32 %v9434_v56, %v575_v46  ;;  %v925_v51 = vpack.c.bf16 %v895_v17, %v894_v41  ;;  %v865_v52 = vadd.f32 0.5, %v833_v44  ;;  %7444 = vmatprep.subr.bf16.mxu1 %v8133_v39 }
  0xf3   : > { %v8252_v53 = vpop.eup %8251  ;;  %7445 = vmatpush3.bf16.msra.mxu1 %v8133_v39 }
  0xf4   : > { %v704_v54 = vadd.f32 %v672_v49, %v508_v45  ;;  %7413 = vmatmul.mubr.bf16.vlgmr.msra.gmra.mrb[0].mxu0 %v925_v51  ;;  %v897_v9 = vmul.f32 %v865_v52, %v9493_v48  ;;  %v834_v58 = vmul.f32 0.5, %v8252_v53  ;;  %v406_v48 = vpop.permute.xlu0 %405 }
  0xf5   : > { %v511_v16 = vmul.f32 %v9436_v57, %v406_v48 }
  0xf6   : > { %v8254_v60 = vpop.eup %8253  ;;  %v743_v62 = vadd.f32 %v9448_v2, %v704_v54  ;;  %v396_v33 = vpop.permute.xlu1 %395  ;;  %v926_v0 = vpack.c.bf16 %v897_v9, %v896_v42  ;;  %v866_v3 = vadd.f32 0.5, %v834_v58 }
  0xf7   : > { %v836_v4 = vmul.f32 0.5, %v8254_v60  ;;  %v509_v43 = vmul.f32 %v9436_v57, %v396_v33  ;;  %v707_v25 = vadd.f32 %v675_v15, %v511_v16 }
  0xf8   : > { %v775_v5 = vmul.f32 0.5, %v743_v62  ;;  %7416 = vmatprep.mubr.bf16.mxu0 %v926_v0  ;;  %v898_v6 = vmul.f32 %v866_v3, %v9502_v63  ;;  %v421_v51 = vpop.permute.xlu0 %420  ;;  %v679_v0 = vmul.f32 %v9434_v56, %v9427_v50 }
  0xf9   : > { %v868_v13 = vadd.f32 0.5, %v836_v4  ;;  %v9541_v35 = vadd.f32 %v9448_v2, %v707_v25 }
  0xfa   : > { %v8256_v7 = vpop.eup %8255  ;;  %8259 = vtanh.f32 %v775_v5  ;;  %v927_v10 = vpack.c.bf16 %v899_v19, %v898_v6 }
  0xfb   : > { %v579_v11 = vpop.permute.xlu1 %578  ;;  %v837_v12 = vmul.f32 0.5, %v8256_v7  ;;  %v8258_v14 = vpop.eup %8257  ;;  %v900_v22 = vmul.f32 %v868_v13, %v9509_v8  ;;  %v778_v44 = vmul.f32 0.5, %v9541_v35  ;;  %v514_v7 = vmul.f32 %v9436_v57, %v421_v51 }
  0xfc   : > { %v673_v18 = vmul.f32 %v9434_v56, %v579_v11  ;;  %7417 = vmatmul.mubr.bf16.gmra.mrb[4].mxu0 %v927_v10  ;;  %v838_v24 = vmul.f32 0.5, %v8258_v14  ;;  %v426_v59 = vpop.permute.xlu0 %425 }
  0xfd   : > { %v869_v63 = vadd.f32 0.5, %v837_v12  ;;  %v515_v3 = vmul.f32 %v9436_v57, %v426_v59 }
  0xfe   : > { %v705_v20 = vadd.f32 %v673_v18, %v509_v43  ;;  %v870_v32 = vadd.f32 0.5, %v838_v24 }
  0xff   : > { %v583_v21 = vpop.permute.xlu1 %582  ;;  %v901_v23 = vmul.f32 %v869_v63, %v741_v27  ;;  %v711_v13 = vadd.f32 %v679_v0, %v515_v3 }
 0x100   : > { %v744_v28 = vadd.f32 %v9448_v2, %v705_v20  ;;  %v674_v47 = vmul.f32 %v9434_v56, %v583_v21  ;;  %v902_v41 = vmul.f32 %v870_v32, %v9519_v1 }
 0x101   : > { %v928_v29 = vpack.c.bf16 %v901_v23, %v900_v22 }
 0x102   : > { %v776_v30 = vmul.f32 0.5, %v744_v28  ;;  %v706_v31 = vadd.f32 %v674_v47, %v510_v38  ;;  %v750_v38 = vadd.f32 %v9448_v2, %v711_v13 }
 0x103   : > { %7420 = vmatprep.mubr.bf16.mxu0 %v928_v29 }
 0x104   : > { %v8260_v34 = vpop.eup %8259  ;;  %8261 = vtanh.f32 %v776_v30  ;;  %v745_v37 = vadd.f32 %v9448_v2, %v706_v31  ;;  %v411_v8 = vpop.permute.xlu1 %410 }
 0x105   : > { %v839_v27 = vmul.f32 0.5, %v8260_v34  ;;  %v512_v46 = vmul.f32 %v9436_v57, %v411_v8  ;;  %v441_v34 = vpop.permute.xlu0 %440 }
 0x106   : > { %v777_v17 = vmul.f32 0.5, %v745_v37 }
 0x107   : > { %v871_v40 = vadd.f32 0.5, %v839_v27 }
 0x108   : > { %8263 = vtanh.f32 %v777_v17 }
 0x109   : > { %v591_v26 = vpop.permute.xlu1 %590  ;;  %v903_v45 = vmul.f32 %v871_v40, %v743_v62  ;;  %8265 = vtanh.f32 %v778_v44  ;;  %v446_v44 = vpop.permute.xlu0 %445 }
 0x10a   : > { %v676_v49 = vmul.f32 %v9434_v56, %v591_v26  ;;  %v519_v51 = vmul.f32 %v9436_v57, %v446_v44 }
 0x10b   : > { %v929_v52 = vpack.c.bf16 %v903_v45, %v902_v41 }
 0x10c   : > { %v708_v53 = vadd.f32 %v676_v49, %v512_v46  ;;  %v683_v49 = vmul.f32 %v9434_v56, %v9432_v55 }
 0x10d   : > { %7421 = vmatmul.mubr.bf16.gmra.mrb[8].mxu0 %v929_v52 }
 0x10e   : > { %v8262_v42 = vpop.eup %8261  ;;  %v747_v54 = vadd.f32 %v9448_v2, %v708_v53  ;;  %v416_v1 = vpop.permute.xlu1 %415 }
 0x10f   : > { %v840_v9 = vmul.f32 0.5, %v8262_v42  ;;  %v513_v4 = vmul.f32 %v9436_v57, %v416_v1 }
 0x110   : > { %v779_v58 = vmul.f32 0.5, %v747_v54 }
 0x111   : > { %v872_v33 = vadd.f32 0.5, %v840_v9 }
 0x112   : > { %v8264_v36 = vpop.eup %8263  ;;  %8267 = vtanh.f32 %v779_v58 }
 0x113   : > { %v595_v60 = vpop.permute.xlu1 %594  ;;  %v841_v62 = vmul.f32 0.5, %v8264_v36  ;;  %v8266_v19 = vpop.eup %8265  ;;  %v904_v11 = vmul.f32 %v872_v33, %v744_v28  ;;  %v782_v28 = vmul.f32 0.5, %v750_v38  ;;  %v518_v36 = vmul.f32 %v9436_v57, %v441_v34 }
 0x114   : > { %v677_v5 = vmul.f32 %v9434_v56, %v595_v60  ;;  %v842_v16 = vmul.f32 0.5, %v8266_v19  ;;  %v715_v60 = vadd.f32 %v683_v49, %v519_v51  ;;  %v8135_v51 = vld [vmem:[#allocation3 + $0x50] sm:$0xff]  }
 0x115   : > { %v873_v6 = vadd.f32 0.5, %v841_v62 }
 0x116   : > { %v709_v10 = vadd.f32 %v677_v5, %v513_v4  ;;  %v874_v23 = vadd.f32 0.5, %v842_v16 }
 0x117   : > { %v599_v48 = vpop.permute.xlu1 %598  ;;  %v905_v12 = vmul.f32 %v873_v6, %v745_v37  ;;  %v9572_v6 = vadd.f32 %v9448_v2, %v715_v60  ;;  %v8136_v60 = vld [vmem:[#allocation3 + $0x58] sm:$0xff]  }
 0x118   : > { %v748_v14 = vadd.f32 %v9448_v2, %v709_v10  ;;  %v678_v15 = vmul.f32 %v9434_v56, %v599_v48  ;;  %v906_v29 = vmul.f32 %v874_v23, %v9541_v35 }
 0x119   : > { %v930_v50 = vpack.c.bf16 %v905_v12, %v904_v11  ;;  %v786_v13 = vmul.f32 0.5, %v9572_v6 }
 0x11a   : > { %v780_v43 = vmul.f32 0.5, %v748_v14  ;;  %v710_v18 = vadd.f32 %v678_v15, %v514_v7 }
 0x11b   : > { %7424 = vmatprep.mubr.bf16.mxu0 %v930_v50 }
 0x11c   : > { %v8268_v63 = vpop.eup %8267  ;;  %8269 = vtanh.f32 %v780_v43  ;;  %v749_v20 = vadd.f32 %v9448_v2, %v710_v18  ;;  %v431_v21 = vpop.permute.xlu1 %430 }
 0x11d   : > { %v843_v22 = vmul.f32 0.5, %v8268_v63  ;;  %v516_v31 = vmul.f32 %v9436_v57, %v431_v21  ;;  %v461_v18 = vpop.permute.xlu0 %460 }
 0x11e   : > { %v781_v24 = vmul.f32 0.5, %v749_v20 }
 0x11f   : > { %v875_v25 = vadd.f32 0.5, %v843_v22 }
 0x120   : > { %8271 = vtanh.f32 %v781_v24 }
 0x121   : > { %v607_v47 = vpop.permute.xlu1 %606  ;;  %v907_v30 = vmul.f32 %v875_v25, %v747_v54  ;;  %8273 = vtanh.f32 %v782_v28  ;;  %v466_v28 = vpop.permute.xlu0 %465 }
 0x122   : > { %v680_v32 = vmul.f32 %v9434_v56, %v607_v47 }
 0x123   : > { %v931_v37 = vpack.c.bf16 %v907_v30, %v906_v29 }
 0x124   : > { %v712_v8 = vadd.f32 %v680_v32, %v516_v31  ;;  %v687_v31 = vmul.f32 %v9434_v56, %v9440_v61  ;;  %v523_v32 = vmul.f32 %v9436_v57, %v466_v28 }
 0x125   : > { %7425 = vmatmul.mubr.bf16.gmra.mrb[12].mxu0 %v931_v37 }
 0x126   : > { %v8270_v27 = vpop.eup %8269  ;;  %v751_v39 = vadd.f32 %v9448_v2, %v712_v8  ;;  %v436_v17 = vpop.permute.xlu1 %435 }
 0x127   : > { %v844_v40 = vmul.f32 0.5, %v8270_v27  ;;  %v517_v52 = vmul.f32 %v9436_v57, %v436_v17  ;;  %v8134_v27 = vld [vmem:[#allocation3 + $0x48] sm:$0xff]  }
 0x128   : > { %v783_v41 = vmul.f32 0.5, %v751_v39  ;;  %7446 = vmatprep.subr.bf16.mxu1 %v8134_v27 }
 0x129   : > { %v876_v46 = vadd.f32 0.5, %v844_v40  ;;  %7447 = vmatpush3.bf16.msra.mxu1 %v8134_v27 }
 0x12a   : > { %v8272_v26 = vpop.eup %8271  ;;  %8275 = vtanh.f32 %v783_v41  ;;  %7448 = vmatprep.subr.bf16.mxu1 %v8135_v51 }
 0x12b   : > { %v611_v35 = vpop.permute.xlu1 %610  ;;  %v845_v45 = vmul.f32 0.5, %v8272_v26  ;;  %v8274_v54 = vpop.eup %8273  ;;  %v908_v58 = vmul.f32 %v876_v46, %v748_v14  ;;  %v522_v26 = vmul.f32 %v9436_v57, %v461_v18 }
 0x12c   : > { %v681_v53 = vmul.f32 %v9434_v56, %v611_v35  ;;  %v846_v0 = vmul.f32 0.5, %v8274_v54  ;;  %v719_v35 = vadd.f32 %v687_v31, %v523_v32 }
 0x12d   : > { %v877_v42 = vadd.f32 0.5, %v845_v45  ;;  %7449 = vmatpush3.bf16.msra.mxu1 %v8135_v51 }
 0x12e   : > { %v713_v1 = vadd.f32 %v681_v53, %v517_v52  ;;  %v878_v48 = vadd.f32 0.5, %v846_v0  ;;  %v9591_v54 = vadd.f32 %v9448_v2, %v719_v35  ;;  %7450 = vmatprep.subr.bf16.mxu1 %v8136_v60 }
 0x12f   : > { %v615_v9 = vpop.permute.xlu1 %614  ;;  %v909_v59 = vmul.f32 %v877_v42, %v749_v20 }
 0x130   : > { %v752_v62 = vadd.f32 %v9448_v2, %v713_v1  ;;  %v682_v33 = vmul.f32 %v9434_v56, %v615_v9  ;;  %v910_v15 = vmul.f32 %v878_v48, %v750_v38 }
 0x131   : > { %v932_v55 = vpack.c.bf16 %v909_v59, %v908_v58  ;;  %v481_v58 = vpop.permute.xlu0 %480  ;;  %7451 = vmatpush3.bf16.msra.mxu1 %v8136_v60 }
 0x132   : > { %v784_v3 = vmul.f32 0.5, %v752_v62  ;;  %v714_v4 = vadd.f32 %v682_v33, %v518_v36 }
 0x133   : > { %7428 = vmatprep.mubr.bf16.mxu0 %v932_v55  ;;  %v790_v55 = vmul.f32 0.5, %v9591_v54 }
 0x134   : > { %v8276_v5 = vpop.eup %8275  ;;  %8277 = vtanh.f32 %v784_v3  ;;  %v753_v19 = vadd.f32 %v9448_v2, %v714_v4  ;;  %v451_v7 = vpop.permute.xlu1 %450 }
 0x135   : > { %v847_v10 = vmul.f32 0.5, %v8276_v5  ;;  %v520_v16 = vmul.f32 %v9436_v57, %v451_v7  ;;  %v8137_v5 = vld [vmem:[#allocation3 + $0x60] sm:$0xff]  }
 0x136   : > { %v785_v11 = vmul.f32 0.5, %v753_v19  ;;  %7452 = vmatprep.subr.bf16.mxu1 %v8137_v5 }
 0x137   : > { %v879_v12 = vadd.f32 0.5, %v847_v10  ;;  %v486_v10 = vpop.permute.xlu0 %485  ;;  %7453 = vmatpush3.bf16.msra.mxu1 %v8137_v5 }
 0x138   : > { %8279 = vtanh.f32 %v785_v11 }
 0x139   : > { %v623_v14 = vpop.permute.xlu1 %622  ;;  %v911_v50 = vmul.f32 %v879_v12, %v751_v39  ;;  %8281 = vtanh.f32 %v786_v13  ;;  %v8138_v12 = vld [vmem:[#allocation3 + $0x68] sm:$0xff]  }
 0x13a   : > { %v684_v43 = vmul.f32 %v9434_v56, %v623_v14  ;;  %7454 = vmatprep.subr.bf16.mxu1 %v8138_v12 }
 0x13b   : > { %v933_v63 = vpack.c.bf16 %v911_v50, %v910_v15  ;;  %7455 = vmatpush3.bf16.msra.mxu1 %v8138_v12 }
 0x13c   : > { %v716_v20 = vadd.f32 %v684_v43, %v520_v16  ;;  %v651_v16 = vpop.permute.xlu0 %650  ;;  %v8139_v43 = vld [vmem:[#allocation3 + $0x70] sm:$0xff]  }
 0x13d   : > { %7429 = vmatmul.mubr.bf16.gmra.mrb[16].mxu0 %v933_v63  ;;  %7456 = vmatprep.subr.bf16.mxu1 %v8139_v43 }
 0x13e   : > { %v8278_v21 = vpop.eup %8277  ;;  %v755_v22 = vadd.f32 %v9448_v2, %v716_v20  ;;  %v456_v23 = vpop.permute.xlu1 %455 }
 0x13f   : > { %v848_v24 = vmul.f32 0.5, %v8278_v21  ;;  %v521_v34 = vmul.f32 %v9436_v57, %v456_v23  ;;  %v691_v23 = vmul.f32 %v9434_v56, %v651_v16  ;;  %7457 = vmatpush3.bf16.msra.mxu1 %v8139_v43 }
 0x140   : > { %v787_v25 = vmul.f32 0.5, %v755_v22 }
 0x141   : > { %v880_v30 = vadd.f32 0.5, %v848_v24 }
 0x142   : > { %v8280_v47 = vpop.eup %8279  ;;  %8283 = vtanh.f32 %v787_v25 }
 0x143   : > { %v627_v38 = vpop.permute.xlu1 %626  ;;  %v849_v29 = vmul.f32 0.5, %v8280_v47  ;;  %v8282_v39 = vpop.eup %8281  ;;  %v912_v41 = vmul.f32 %v880_v30, %v752_v62  ;;  %v8140_v47 = vld [vmem:[#allocation3 + $0x78] sm:$0xff]  }
 0x144   : > { %v685_v37 = vmul.f32 %v9434_v56, %v627_v38  ;;  %v850_v49 = vmul.f32 0.5, %v8282_v39  ;;  %7458 = vmatprep.subr.bf16.mxu1 %v8140_v47 }
 0x145   : > { %v881_v8 = vadd.f32 0.5, %v849_v29  ;;  %7459 = vmatpush3.bf16.msra.mxu1 %v8140_v47 }
 0x146   : > { %v717_v17 = vadd.f32 %v685_v37, %v521_v34  ;;  %v882_v36 = vadd.f32 0.5, %v850_v49  ;;  %v526_v34 = vmul.f32 %v9436_v57, %v481_v58 }
 0x147   : > { %v631_v40 = vpop.permute.xlu1 %630  ;;  %v913_v44 = vmul.f32 %v881_v8, %v753_v19 }
 0x148   : > { %v9586_v45 = vadd.f32 %v9448_v2, %v717_v17  ;;  %v686_v61 = vmul.f32 %v9434_v56, %v631_v40  ;;  %v914_v3 = vmul.f32 %v882_v36, %v9572_v6 }
 0x149   : > { %v934_v46 = vpack.c.bf16 %v913_v44, %v912_v41 }
 0x14a   : > { %v788_v52 = vmul.f32 0.5, %v9586_v45  ;;  %v718_v53 = vadd.f32 %v686_v61, %v522_v26 }
 0x14b   : > { %7432 = vmatprep.mubr.bf16.mxu0 %v934_v46 }
 0x14c   : > { %v8284_v42 = vpop.eup %8283  ;;  %8285 = vtanh.f32 %v788_v52  ;;  %v757_v1 = vadd.f32 %v9448_v2, %v718_v53  ;;  %v471_v9 = vpop.permute.xlu1 %470 }
 0x14d   : > { %v851_v59 = vmul.f32 0.5, %v8284_v42  ;;  %v524_v19 = vmul.f32 %v9436_v57, %v471_v9 }
 0x14e   : > { %v789_v62 = vmul.f32 0.5, %v757_v1 }
 0x14f   : > { %v883_v33 = vadd.f32 0.5, %v851_v59 }
 0x150   : > { %8287 = vtanh.f32 %v789_v62 }
 0x151   : > { %v639_v0 = vpop.permute.xlu1 %638  ;;  %v915_v4 = vmul.f32 %v883_v33, %v755_v22  ;;  %8289 = vtanh.f32 %v790_v55  ;;  %v527_v22 = vmul.f32 %v9436_v57, %v486_v10 }
 0x152   : > { %v688_v7 = vmul.f32 %v9434_v56, %v639_v0 }
 0x153   : > { %v935_v48 = vpack.c.bf16 %v915_v4, %v914_v3  ;;  %v723_v37 = vadd.f32 %v691_v23, %v527_v22 }
 0x154   : > { %v720_v11 = vadd.f32 %v688_v7, %v524_v19 }
 0x155   : > { %7433 = vmatmul.mubr.bf16.gmra.mrb[20].mxu0 %v935_v48  ;;  %v762_v26 = vadd.f32 %v9448_v2, %v723_v37 }
 0x156   : > { %v8286_v13 = vpop.eup %8285  ;;  %v759_v14 = vadd.f32 %v9448_v2, %v720_v11  ;;  %v476_v15 = vpop.permute.xlu1 %475 }
 0x157   : > { %v852_v50 = vmul.f32 0.5, %v8286_v13  ;;  %v525_v24 = vmul.f32 %v9436_v57, %v476_v15  ;;  %v794_v52 = vmul.f32 0.5, %v762_v26  ;;  %v9616_v15 = vld [vmem:[%s10280_s4] ss:$0 sm:$0xff] }
 0x158   : > { %v791_v6 = vmul.f32 0.5, %v759_v14 }
 0x159   : > { %v884_v21 = vadd.f32 0.5, %v852_v50 }
 0x15a   : > { %v8288_v18 = vpop.eup %8287  ;;  %8291 = vtanh.f32 %v791_v6 }
 0x15b   : > { %v643_v63 = vpop.permute.xlu1 %642  ;;  %v853_v20 = vmul.f32 0.5, %v8288_v18  ;;  %v8290_v38 = vpop.eup %8289  ;;  %v916_v31 = vmul.f32 %v884_v21, %v9586_v45 }
 0x15c   : > { %v689_v25 = vmul.f32 %v9434_v56, %v643_v63  ;;  %v854_v17 = vmul.f32 0.5, %v8290_v38 }
 0x15d   : > { %v885_v28 = vadd.f32 0.5, %v853_v20 }
 0x15e   : > { %v721_v29 = vadd.f32 %v689_v25, %v525_v24  ;;  %v886_v46 = vadd.f32 0.5, %v854_v17 }
 0x15f   : > { %v647_v30 = vpop.permute.xlu1 %646  ;;  %v917_v32 = vmul.f32 %v885_v28, %v757_v1 }
 0x160   : > { %v760_v8 = vadd.f32 %v9448_v2, %v721_v29  ;;  %v690_v27 = vmul.f32 %v9434_v56, %v647_v30  ;;  %v918_v42 = vmul.f32 %v886_v46, %v9591_v54 }
 0x161   : > { %v936_v39 = vpack.c.bf16 %v917_v32, %v916_v31 }
 0x162   : > { %v792_v40 = vmul.f32 0.5, %v760_v8  ;;  %v722_v41 = vadd.f32 %v690_v27, %v526_v34 }
 0x163   : > { %7436 = vmatprep.mubr.bf16.mxu0 %v936_v39 }
 0x164   : > { %v8292_v44 = vpop.eup %8291  ;;  %8293 = vtanh.f32 %v792_v40  ;;  %v761_v35 = vadd.f32 %v9448_v2, %v722_v41  ;;  %v491_v45 = vpop.permute.xlu1 %490 }
 0x165   : > { %v855_v61 = vmul.f32 0.5, %v8292_v44  ;;  %v528_v9 = vmul.f32 %v9436_v57, %v491_v45 }
 0x166   : > { %v793_v49 = vmul.f32 0.5, %v761_v35 }
 0x167   : > { %v887_v51 = vadd.f32 0.5, %v855_v61 }
 0x168   : > { %8295 = vtanh.f32 %v793_v49 }
 0x169   : > { %v655_v53 = vpop.permute.xlu1 %654  ;;  %v919_v1 = vmul.f32 %v887_v51, %v759_v14  ;;  %8297 = vtanh.f32 %v794_v52 }
 0x16a   : > { %v692_v58 = vmul.f32 %v9434_v56, %v655_v53 }
 0x16b   : > { %v937_v59 = vpack.c.bf16 %v919_v1, %v918_v42 }
 0x16c   : > { %v724_v36 = vadd.f32 %v692_v58, %v528_v9 }
 0x16d   : > { %7437 = vmatmul.mubr.bf16.gmra.mrb[24].mxu0 %v937_v59 }
 0x16e   : > { %v8294_v60 = vpop.eup %8293  ;;  %v763_v62 = vadd.f32 %v9448_v2, %v724_v36 }
 0x16f   : > { %v856_v33 = vmul.f32 0.5, %v8294_v60 }
 0x170   : > { %v795_v55 = vmul.f32 0.5, %v763_v62 }
 0x171   : > { %v888_v4 = vadd.f32 0.5, %v856_v33 }
 0x172   : > { %v8296_v0 = vpop.eup %8295  ;;  %8299 = vtanh.f32 %v795_v55 }
 0x173   : > { %v857_v3 = vmul.f32 0.5, %v8296_v0  ;;  %v8298_v54 = vpop.eup %8297  ;;  %v920_v19 = vmul.f32 %v888_v4, %v760_v8 }
 0x174   : > { %v858_v10 = vmul.f32 0.5, %v8298_v54 }
 0x175   : > { %v889_v5 = vadd.f32 0.5, %v857_v3 }
 0x176   : > { %v890_v11 = vadd.f32 0.5, %v858_v10 }
 0x177   : > { %v921_v7 = vmul.f32 %v889_v5, %v761_v35 }
 0x178   : > { %v922_v13 = vmul.f32 %v890_v11, %v762_v26 }
 0x179   : > { %v938_v57 = vpack.c.bf16 %v921_v7, %v920_v19 }
 0x17b   : > { %7440 = vmatprep.mubr.bf16.mxu0 %v938_v57 }
 0x17c   : > { %v8300_v56 = vpop.eup %8299 }
 0x17d   : > { %v859_v48 = vmul.f32 0.5, %v8300_v56 }
 0x17f   : > { %v891_v12 = vadd.f32 0.5, %v859_v48 }
 0x181   : > { %v923_v14 = vmul.f32 %v891_v12, %v763_v62 }
 0x183   : > { %v939_v2 = vpack.c.bf16 %v923_v14, %v922_v13 }
 0x185   : > { %7441 = vmatmul.mubr.bf16.gmra.mrb[28].mxu0 %v939_v2 }
 0x1c7   : > { %v7414_v50 = vpop.f32.mrb[0].mxu0 }
 0x1c8   : > { %v1054_v6 = vadd.f32 %v7414_v50, %v9616_v15  ;;  %v1045_v16 = vpop.f32.mrb[1].mxu0 }
 0x1c9   : > { %v1046_v43 = vadd.f32 %v9616_v15, %v1045_v16  ;;  %v7415_v18 = vpop.f32.mrb[2].mxu0 }
 0x1ca   : > { %v1174_v63 = vmul.f32 0.5, %v1054_v6  ;;  %v1057_v20 = vadd.f32 %v7415_v18, %v9616_v15  ;;  %v1048_v21 = vpop.f32.mrb[3].mxu0 }
 0x1cb   : > { %v1172_v22 = vmul.f32 0.5, %v1046_v43  ;;  %v1049_v23 = vadd.f32 %v9616_v15, %v1048_v21 }
 0x1cc   : > { %8301 = vtanh.f32 %v1174_v63  ;;  %v1175_v24 = vmul.f32 0.5, %v1057_v20 }
 0x1cd   : > { %8303 = vtanh.f32 %v1172_v22  ;;  %v1173_v25 = vmul.f32 0.5, %v1049_v23 }
 0x1ce   : > { %8305 = vtanh.f32 %v1175_v24 }
 0x1cf   : > { %8307 = vtanh.f32 %v1173_v25  ;;  %v7418_v28 = vpop.f32.mrb[4].mxu0 }
 0x1d0   : > { %v1070_v47 = vadd.f32 %v7418_v28, %v9616_v15  ;;  %v1061_v38 = vpop.f32.mrb[5].mxu0 }
 0x1d1   : > { %v1062_v29 = vadd.f32 %v9616_v15, %v1061_v38  ;;  %v7419_v30 = vpop.f32.mrb[6].mxu0 }
 0x1d2   : > { %v1178_v31 = vmul.f32 0.5, %v1070_v47  ;;  %v1073_v32 = vadd.f32 %v7419_v30, %v9616_v15  ;;  %v1064_v34 = vpop.f32.mrb[7].mxu0 }
 0x1d3   : > { %v1176_v37 = vmul.f32 0.5, %v1062_v29  ;;  %v1065_v8 = vadd.f32 %v9616_v15, %v1064_v34 }
 0x1d4   : > { %8309 = vtanh.f32 %v1178_v31  ;;  %v1179_v27 = vmul.f32 0.5, %v1073_v32 }
 0x1d5   : > { %8311 = vtanh.f32 %v1176_v37  ;;  %v1177_v39 = vmul.f32 0.5, %v1065_v8  ;;  %v8141_v37 = vld [vmem:[#allocation3 + $0x80] sm:$0xff]  }
 0x1d6   : > { %v8302_v17 = vpop.eup %8301  ;;  %8313 = vtanh.f32 %v1179_v27  ;;  %7492 = vmatprep.subr.bf16.mxu0 %v8141_v37 }
 0x1d7   : > { %v8304_v40 = vpop.eup %8303  ;;  %v1238_v41 = vmul.f32 0.5, %v8302_v17  ;;  %8315 = vtanh.f32 %v1177_v39  ;;  %7493 = vmatpush3.bf16.msra.mxu0 %v8141_v37 }
 0x1d8   : > { %v8306_v44 = vpop.eup %8305  ;;  %v1236_v26 = vmul.f32 0.5, %v8304_v40 }
 0x1d9   : > { %v8308_v35 = vpop.eup %8307  ;;  %v1270_v45 = vadd.f32 0.5, %v1238_v41  ;;  %v1239_v61 = vmul.f32 0.5, %v8306_v44 }
 0x1da   : > { %v1237_v46 = vmul.f32 0.5, %v8308_v35  ;;  %v1268_v49 = vadd.f32 0.5, %v1236_v26 }
 0x1db   : > { %v1271_v51 = vadd.f32 0.5, %v1239_v61  ;;  %v1302_v53 = vmul.f32 %v1270_v45, %v1054_v6 }
 0x1dc   : > { %v1269_v52 = vadd.f32 0.5, %v1237_v46  ;;  %v1300_v9 = vmul.f32 %v1268_v49, %v1046_v43 }
 0x1dd   : > { %v1303_v42 = vmul.f32 %v1271_v51, %v1057_v20 }
 0x1de   : > { %v8310_v1 = vpop.eup %8309  ;;  %v1301_v58 = vmul.f32 %v1269_v52, %v1049_v23 }
 0x1df   : > { %v8312_v59 = vpop.eup %8311  ;;  %v1242_v36 = vmul.f32 0.5, %v8310_v1  ;;  %v1333_v60 = vpack.c.bf16 %v1303_v42, %v1302_v53 }
 0x1e0   : > { %v8314_v62 = vpop.eup %8313  ;;  %v1240_v33 = vmul.f32 0.5, %v8312_v59  ;;  %v7422_v55 = vpop.f32.mrb[8].mxu0  ;;  %v1332_v0 = vpack.c.bf16 %v1301_v58, %v1300_v9 }
 0x1e1   : > { %v8316_v3 = vpop.eup %8315  ;;  %v1274_v4 = vadd.f32 0.5, %v1242_v36  ;;  %v1243_v5 = vmul.f32 0.5, %v8314_v62  ;;  %v1086_v54 = vadd.f32 %v7422_v55, %v9616_v15  ;;  %v1077_v19 = vpop.f32.mrb[9].mxu0 }
 0x1e2   : > { %v1272_v7 = vadd.f32 0.5, %v1240_v33  ;;  %v1241_v57 = vmul.f32 0.5, %v8316_v3  ;;  %v1078_v10 = vadd.f32 %v9616_v15, %v1077_v19  ;;  %v7423_v56 = vpop.f32.mrb[10].mxu0  ;;  %7460 = vmatprep.mubr.bf16.mxu1 %v1332_v0 }
 0x1e3   : > { %v1275_v48 = vadd.f32 0.5, %v1243_v5  ;;  %v1182_v11 = vmul.f32 0.5, %v1086_v54  ;;  %v1089_v12 = vadd.f32 %v7423_v56, %v9616_v15  ;;  %v1080_v13 = vpop.f32.mrb[11].mxu0  ;;  %7461 = vmatmul.mubr.bf16.vlgmr.msra.gmra.mrb[0].mxu1 %v1333_v60  ;;  %v1306_v6 = vmul.f32 %v1274_v4, %v1070_v47 }
 0x1e4   : > { %v1273_v14 = vadd.f32 0.5, %v1241_v57  ;;  %v1180_v2 = vmul.f32 0.5, %v1078_v10  ;;  %v1081_v50 = vadd.f32 %v9616_v15, %v1080_v13  ;;  %v1304_v18 = vmul.f32 %v1272_v7, %v1062_v29 }
 0x1e5   : > { %v1307_v16 = vmul.f32 %v1275_v48, %v1073_v32  ;;  %8317 = vtanh.f32 %v1182_v11  ;;  %v1183_v43 = vmul.f32 0.5, %v1089_v12 }
 0x1e6   : > { %v1305_v63 = vmul.f32 %v1273_v14, %v1065_v8  ;;  %8319 = vtanh.f32 %v1180_v2  ;;  %v1181_v20 = vmul.f32 0.5, %v1081_v50 }
 0x1e7   : > { %8321 = vtanh.f32 %v1183_v43  ;;  %v1335_v21 = vpack.c.bf16 %v1307_v16, %v1306_v6 }
 0x1e8   : > { %8323 = vtanh.f32 %v1181_v20  ;;  %v1334_v22 = vpack.c.bf16 %v1305_v63, %v1304_v18 }
 0x1ea   : > { %7464 = vmatprep.mubr.bf16.mxu1 %v1334_v22 }
 0x1eb   : > { %7465 = vmatmul.mubr.bf16.gmra.mrb[4].mxu1 %v1335_v21 }
 0x1ef   : > { %v8318_v23 = vpop.eup %8317 }
 0x1f0   : > { %v8320_v24 = vpop.eup %8319  ;;  %v1246_v25 = vmul.f32 0.5, %v8318_v23 }
 0x1f1   : > { %v8322_v28 = vpop.eup %8321  ;;  %v1244_v38 = vmul.f32 0.5, %v8320_v24 }
 0x1f2   : > { %v8324_v30 = vpop.eup %8323  ;;  %v1278_v47 = vadd.f32 0.5, %v1246_v25  ;;  %v1247_v31 = vmul.f32 0.5, %v8322_v28 }
 0x1f3   : > { %v1276_v32 = vadd.f32 0.5, %v1244_v38  ;;  %v1245_v34 = vmul.f32 0.5, %v8324_v30 }
 0x1f4   : > { %v1279_v29 = vadd.f32 0.5, %v1247_v31  ;;  %v1310_v27 = vmul.f32 %v1278_v47, %v1086_v54 }
 0x1f5   : > { %v1277_v8 = vadd.f32 0.5, %v1245_v34  ;;  %v1308_v17 = vmul.f32 %v1276_v32, %v1078_v10 }
 0x1f6   : > { %v1311_v39 = vmul.f32 %v1279_v29, %v1089_v12 }
 0x1f7   : > { %v1309_v40 = vmul.f32 %v1277_v8, %v1081_v50 }
 0x1f8   : > { %v7426_v41 = vpop.f32.mrb[12].mxu0  ;;  %v1337_v44 = vpack.c.bf16 %v1311_v39, %v1310_v27 }
 0x1f9   : > { %v1102_v26 = vadd.f32 %v7426_v41, %v9616_v15  ;;  %v1093_v35 = vpop.f32.mrb[13].mxu0  ;;  %v1336_v45 = vpack.c.bf16 %v1309_v40, %v1308_v17 }
 0x1fa   : > { %v1094_v61 = vadd.f32 %v9616_v15, %v1093_v35  ;;  %v7427_v46 = vpop.f32.mrb[14].mxu0 }
 0x1fb   : > { %v1186_v49 = vmul.f32 0.5, %v1102_v26  ;;  %v1105_v51 = vadd.f32 %v7427_v46, %v9616_v15  ;;  %v1096_v52 = vpop.f32.mrb[15].mxu0  ;;  %7468 = vmatprep.mubr.bf16.mxu1 %v1336_v45 }
 0x1fc   : > { %v1184_v53 = vmul.f32 0.5, %v1094_v61  ;;  %v1097_v42 = vadd.f32 %v9616_v15, %v1096_v52  ;;  %7469 = vmatmul.mubr.bf16.gmra.mrb[8].mxu1 %v1337_v44 }
 0x1fd   : > { %8325 = vtanh.f32 %v1186_v49  ;;  %v1187_v1 = vmul.f32 0.5, %v1105_v51 }
 0x1fe   : > { %8327 = vtanh.f32 %v1184_v53  ;;  %v1185_v9 = vmul.f32 0.5, %v1097_v42 }
 0x1ff   : > { %8329 = vtanh.f32 %v1187_v1 }
 0x200   : > { %8331 = vtanh.f32 %v1185_v9 }
 0x207   : > { %v8326_v58 = vpop.eup %8325 }
 0x208   : > { %v8328_v59 = vpop.eup %8327  ;;  %v1250_v36 = vmul.f32 0.5, %v8326_v58 }
 0x209   : > { %v8330_v60 = vpop.eup %8329  ;;  %v1248_v62 = vmul.f32 0.5, %v8328_v59  ;;  %v8143_v59 = vld [vmem:[#allocation3 + $0x90] sm:$0xff]  }
 0x20a   : > { %v8332_v33 = vpop.eup %8331  ;;  %v1282_v55 = vadd.f32 0.5, %v1250_v36  ;;  %v1251_v0 = vmul.f32 0.5, %v8330_v60 }
 0x20b   : > { %v1280_v3 = vadd.f32 0.5, %v1248_v62  ;;  %v1249_v4 = vmul.f32 0.5, %v8332_v33 }
 0x20c   : > { %v1283_v5 = vadd.f32 0.5, %v1251_v0  ;;  %v1314_v19 = vmul.f32 %v1282_v55, %v1102_v26 }
 0x20d   : > { %v1281_v54 = vadd.f32 0.5, %v1249_v4  ;;  %v1312_v57 = vmul.f32 %v1280_v3, %v1094_v61 }
 0x20e   : > { %v1315_v7 = vmul.f32 %v1283_v5, %v1105_v51  ;;  %v8144_v5 = vld [vmem:[#allocation3 + $0x98] sm:$0xff]  }
 0x20f   : > { %v1313_v10 = vmul.f32 %v1281_v54, %v1097_v42  ;;  %v8142_v42 = vld [vmem:[#allocation3 + $0x88] sm:$0xff]  }
 0x210   : > { %v7430_v56 = vpop.f32.mrb[16].mxu0  ;;  %v1339_v48 = vpack.c.bf16 %v1315_v7, %v1314_v19  ;;  %7494 = vmatprep.subr.bf16.mxu0 %v8142_v42 }
 0x211   : > { %v1118_v11 = vadd.f32 %v7430_v56, %v9616_v15  ;;  %v1109_v12 = vpop.f32.mrb[17].mxu0  ;;  %v1338_v13 = vpack.c.bf16 %v1313_v10, %v1312_v57  ;;  %7495 = vmatpush3.bf16.msra.mxu0 %v8142_v42 }
 0x212   : > { %v1110_v14 = vadd.f32 %v9616_v15, %v1109_v12  ;;  %v7431_v2 = vpop.f32.mrb[18].mxu0  ;;  %7496 = vmatprep.subr.bf16.mxu0 %v8143_v59 }
 0x213   : > { %v1190_v50 = vmul.f32 0.5, %v1118_v11  ;;  %v1121_v6 = vadd.f32 %v7431_v2, %v9616_v15  ;;  %v1112_v16 = vpop.f32.mrb[19].mxu0  ;;  %7472 = vmatprep.mubr.bf16.mxu1 %v1338_v13 }
 0x214   : > { %v1188_v43 = vmul.f32 0.5, %v1110_v14  ;;  %v1113_v18 = vadd.f32 %v9616_v15, %v1112_v16  ;;  %7473 = vmatmul.mubr.bf16.gmra.mrb[12].mxu1 %v1339_v48 }
 0x215   : > { %8333 = vtanh.f32 %v1190_v50  ;;  %v1191_v63 = vmul.f32 0.5, %v1121_v6  ;;  %7497 = vmatpush3.bf16.msra.mxu0 %v8143_v59 }
 0x216   : > { %8335 = vtanh.f32 %v1188_v43  ;;  %v1189_v20 = vmul.f32 0.5, %v1113_v18  ;;  %7498 = vmatprep.subr.bf16.mxu0 %v8144_v5 }
 0x217   : > { %8337 = vtanh.f32 %v1191_v63 }
 0x218   : > { %8339 = vtanh.f32 %v1189_v20  ;;  %v8146_v20 = vld [vmem:[#allocation3 + $0xa8] sm:$0xff]  }
 0x219   : > { %7499 = vmatpush3.bf16.msra.mxu0 %v8144_v5 }
 0x21f   : > { %v8334_v21 = vpop.eup %8333 }
 0x220   : > { %v8336_v22 = vpop.eup %8335  ;;  %v1254_v23 = vmul.f32 0.5, %v8334_v21 }
 0x221   : > { %v8338_v24 = vpop.eup %8337  ;;  %v1252_v25 = vmul.f32 0.5, %v8336_v22 }
 0x222   : > { %v8340_v28 = vpop.eup %8339  ;;  %v1286_v38 = vadd.f32 0.5, %v1254_v23  ;;  %v1255_v30 = vmul.f32 0.5, %v8338_v24  ;;  %v8147_v23 = vld [vmem:[#allocation3 + $0xb0] sm:$0xff]   ;;  %v8148_v24 = vld [vmem:[#allocation3 + $0xb8] sm:$0xff]  }
 0x223   : > { %v1284_v47 = vadd.f32 0.5, %v1252_v25  ;;  %v1253_v31 = vmul.f32 0.5, %v8340_v28 }
 0x224   : > { %v1287_v32 = vadd.f32 0.5, %v1255_v30  ;;  %v1318_v29 = vmul.f32 %v1286_v38, %v1118_v11  ;;  %v8145_v11 = vld [vmem:[#allocation3 + $0xa0] sm:$0xff]  }
 0x225   : > { %v1285_v34 = vadd.f32 0.5, %v1253_v31  ;;  %v1316_v8 = vmul.f32 %v1284_v47, %v1110_v14  ;;  %7500 = vmatprep.subr.bf16.mxu0 %v8145_v11 }
 0x226   : > { %v1319_v37 = vmul.f32 %v1287_v32, %v1121_v6  ;;  %7501 = vmatpush3.bf16.msra.mxu0 %v8145_v11  ;;  %v9653_v11 = vld [vmem:[%s10280_s4 + $0x1] ss:$0 sm:$0xff] }
 0x227   : > { %v1317_v27 = vmul.f32 %v1285_v34, %v1113_v18  ;;  %7502 = vmatprep.subr.bf16.mxu0 %v8146_v20 }
 0x228   : > { %v7434_v39 = vpop.f32.mrb[20].mxu0  ;;  %v1341_v17 = vpack.c.bf16 %v1319_v37, %v1318_v29 }
 0x229   : > { %v1134_v40 = vadd.f32 %v7434_v39, %v9616_v15  ;;  %v1125_v41 = vpop.f32.mrb[21].mxu0  ;;  %v1340_v44 = vpack.c.bf16 %v1317_v27, %v1316_v8 }
 0x22a   : > { %v1126_v26 = vadd.f32 %v9616_v15, %v1125_v41  ;;  %v7435_v35 = vpop.f32.mrb[22].mxu0  ;;  %7503 = vmatpush3.bf16.msra.mxu0 %v8146_v20 }
 0x22b   : > { %v1194_v45 = vmul.f32 0.5, %v1134_v40  ;;  %v1137_v61 = vadd.f32 %v7435_v35, %v9616_v15  ;;  %v1128_v46 = vpop.f32.mrb[23].mxu0  ;;  %7476 = vmatprep.mubr.bf16.mxu1 %v1340_v44  ;;  %7504 = vmatprep.subr.bf16.mxu0 %v8147_v23 }
 0x22c   : > { %v1192_v49 = vmul.f32 0.5, %v1126_v26  ;;  %v1129_v51 = vadd.f32 %v9616_v15, %v1128_v46  ;;  %7477 = vmatmul.mubr.bf16.gmra.mrb[16].mxu1 %v1341_v17 }
 0x22d   : > { %8341 = vtanh.f32 %v1194_v45  ;;  %v1195_v52 = vmul.f32 0.5, %v1137_v61 }
 0x22e   : > { %8343 = vtanh.f32 %v1192_v49  ;;  %v1193_v53 = vmul.f32 0.5, %v1129_v51  ;;  %7505 = vmatpush3.bf16.msra.mxu0 %v8147_v23 }
 0x22f   : > { %8345 = vtanh.f32 %v1195_v52  ;;  %7506 = vmatprep.subr.bf16.mxu0 %v8148_v24 }
 0x230   : > { %8347 = vtanh.f32 %v1193_v53 }
 0x232   : > { %7507 = vmatpush3.bf16.msra.mxu0 %v8148_v24 }
 0x237   : > { %v8342_v1 = vpop.eup %8341 }
 0x238   : > { %v8344_v9 = vpop.eup %8343  ;;  %v1258_v58 = vmul.f32 0.5, %v8342_v1 }
 0x239   : > { %v8346_v36 = vpop.eup %8345  ;;  %v1256_v60 = vmul.f32 0.5, %v8344_v9 }
 0x23a   : > { %v8348_v62 = vpop.eup %8347  ;;  %v1290_v33 = vadd.f32 0.5, %v1258_v58  ;;  %v1259_v55 = vmul.f32 0.5, %v8346_v36 }
 0x23b   : > { %v1288_v0 = vadd.f32 0.5, %v1256_v60  ;;  %v1257_v3 = vmul.f32 0.5, %v8348_v62 }
 0x23c   : > { %v1291_v4 = vadd.f32 0.5, %v1259_v55  ;;  %v1322_v19 = vmul.f32 %v1290_v33, %v1134_v40 }
 0x23d   : > { %v1289_v54 = vadd.f32 0.5, %v1257_v3  ;;  %v1320_v57 = vmul.f32 %v1288_v0, %v1126_v26 }
 0x23e   : > { %v1323_v7 = vmul.f32 %v1291_v4, %v1137_v61 }
 0x23f   : > { %v1321_v10 = vmul.f32 %v1289_v54, %v1129_v51 }
 0x240   : > { %v7438_v56 = vpop.f32.mrb[24].mxu0  ;;  %v1343_v48 = vpack.c.bf16 %v1323_v7, %v1322_v19 }
 0x241   : > { %v1150_v12 = vadd.f32 %v7438_v56, %v9616_v15  ;;  %v1141_v13 = vpop.f32.mrb[25].mxu0  ;;  %v1342_v14 = vpack.c.bf16 %v1321_v10, %v1320_v57 }
 0x242   : > { %v1142_v2 = vadd.f32 %v9616_v15, %v1141_v13  ;;  %v7439_v50 = vpop.f32.mrb[26].mxu0 }
 0x243   : > { %v1198_v6 = vmul.f32 0.5, %v1150_v12  ;;  %v1153_v16 = vadd.f32 %v7439_v50, %v9616_v15  ;;  %v1144_v43 = vpop.f32.mrb[27].mxu0  ;;  %7480 = vmatprep.mubr.bf16.mxu1 %v1342_v14 }
 0x244   : > { %v1196_v18 = vmul.f32 0.5, %v1142_v2  ;;  %v1145_v63 = vadd.f32 %v9616_v15, %v1144_v43  ;;  %7481 = vmatmul.mubr.bf16.gmra.mrb[20].mxu1 %v1343_v48 }
 0x245   : > { %8349 = vtanh.f32 %v1198_v6  ;;  %v1199_v21 = vmul.f32 0.5, %v1153_v16 }
 0x246   : > { %8351 = vtanh.f32 %v1196_v18  ;;  %v1197_v22 = vmul.f32 0.5, %v1145_v63 }
 0x247   : > { %8353 = vtanh.f32 %v1199_v21 }
 0x248   : > { %8355 = vtanh.f32 %v1197_v22 }
 0x24f   : > { %v8350_v25 = vpop.eup %8349 }
 0x250   : > { %v8352_v28 = vpop.eup %8351  ;;  %v1262_v38 = vmul.f32 0.5, %v8350_v25 }
 0x251   : > { %v8354_v30 = vpop.eup %8353  ;;  %v1260_v47 = vmul.f32 0.5, %v8352_v28 }
 0x252   : > { %v8356_v31 = vpop.eup %8355  ;;  %v1294_v32 = vadd.f32 0.5, %v1262_v38  ;;  %v1263_v34 = vmul.f32 0.5, %v8354_v30 }
 0x253   : > { %v1292_v29 = vadd.f32 0.5, %v1260_v47  ;;  %v1261_v37 = vmul.f32 0.5, %v8356_v31 }
 0x254   : > { %v1295_v8 = vadd.f32 0.5, %v1263_v34  ;;  %v1326_v39 = vmul.f32 %v1294_v32, %v1150_v12 }
 0x255   : > { %v1293_v27 = vadd.f32 0.5, %v1261_v37  ;;  %v1324_v40 = vmul.f32 %v1292_v29, %v1142_v2 }
 0x256   : > { %v1327_v17 = vmul.f32 %v1295_v8, %v1153_v16 }
 0x257   : > { %v1325_v41 = vmul.f32 %v1293_v27, %v1145_v63 }
 0x258   : > { %v7442_v44 = vpop.f32.mrb[28].mxu0  ;;  %v1345_v26 = vpack.c.bf16 %v1327_v17, %v1326_v39 }
 0x259   : > { %v1166_v35 = vadd.f32 %v7442_v44, %v9616_v15  ;;  %v1157_v45 = vpop.f32.mrb[29].mxu0  ;;  %v1344_v61 = vpack.c.bf16 %v1325_v41, %v1324_v40 }
 0x25a   : > { %v1158_v46 = vadd.f32 %v9616_v15, %v1157_v45  ;;  %v7443_v49 = vpop.f32.mrb[30].mxu0 }
 0x25b   : > { %v1202_v51 = vmul.f32 0.5, %v1166_v35  ;;  %v1169_v52 = vadd.f32 %v7443_v49, %v9616_v15  ;;  %v1160_v53 = vpop.f32.mrb[31].mxu0  ;;  %7484 = vmatprep.mubr.bf16.mxu1 %v1344_v61 }
 0x25c   : > { %v1200_v42 = vmul.f32 0.5, %v1158_v46  ;;  %v1161_v1 = vadd.f32 %v9616_v15, %v1160_v53  ;;  %7485 = vmatmul.mubr.bf16.gmra.mrb[24].mxu1 %v1345_v26 }
 0x25d   : > { %8357 = vtanh.f32 %v1202_v51  ;;  %v1203_v9 = vmul.f32 0.5, %v1169_v52 }
 0x25e   : > { %8359 = vtanh.f32 %v1200_v42  ;;  %v1201_v58 = vmul.f32 0.5, %v1161_v1 }
 0x25f   : > { %8361 = vtanh.f32 %v1203_v9 }
 0x260   : > { %8363 = vtanh.f32 %v1201_v58 }
 0x267   : > { %v8358_v59 = vpop.eup %8357 }
 0x268   : > { %v8360_v36 = vpop.eup %8359  ;;  %v1266_v60 = vmul.f32 0.5, %v8358_v59 }
 0x269   : > { %v8362_v62 = vpop.eup %8361  ;;  %v1264_v33 = vmul.f32 0.5, %v8360_v36 }
 0x26a   : > { %v8364_v55 = vpop.eup %8363  ;;  %v1298_v0 = vadd.f32 0.5, %v1266_v60  ;;  %v1267_v3 = vmul.f32 0.5, %v8362_v62 }
 0x26b   : > { %v1296_v4 = vadd.f32 0.5, %v1264_v33  ;;  %v1265_v5 = vmul.f32 0.5, %v8364_v55 }
 0x26c   : > { %v1299_v54 = vadd.f32 0.5, %v1267_v3  ;;  %v1330_v15 = vmul.f32 %v1298_v0, %v1166_v35 }
 0x26d   : > { %v1297_v19 = vadd.f32 0.5, %v1265_v5  ;;  %v1328_v57 = vmul.f32 %v1296_v4, %v1158_v46 }
 0x26e   : > { %v1331_v7 = vmul.f32 %v1299_v54, %v1169_v52 }
 0x26f   : > { %v1329_v10 = vmul.f32 %v1297_v19, %v1161_v1 }
 0x270   : > { %v1347_v56 = vpack.c.bf16 %v1331_v7, %v1330_v15 }
 0x271   : > { %v1346_v48 = vpack.c.bf16 %v1329_v10, %v1328_v57 }
 0x273   : > { %7488 = vmatprep.mubr.bf16.mxu1 %v1346_v48 }
 0x274   : > { %7489 = vmatmul.mubr.bf16.gmra.mrb[28].mxu1 %v1347_v56 }
 0x2b6   : > { %v7462_v12 = vpop.f32.mrb[0].mxu1 }
 0x2b7   : > { %v1464_v13 = vadd.f32 %v7462_v12, %v9653_v11  ;;  %v1455_v14 = vpop.f32.mrb[1].mxu1 }
 0x2b8   : > { %v1456_v2 = vadd.f32 %v9653_v11, %v1455_v14  ;;  %v7463_v50 = vpop.f32.mrb[2].mxu1 }
 0x2b9   : > { %v1584_v6 = vmul.f32 0.5, %v1464_v13  ;;  %v1467_v16 = vadd.f32 %v7463_v50, %v9653_v11  ;;  %v1458_v43 = vpop.f32.mrb[3].mxu1 }
 0x2ba   : > { %v1582_v18 = vmul.f32 0.5, %v1456_v2  ;;  %v1459_v63 = vadd.f32 %v9653_v11, %v1458_v43 }
 0x2bb   : > { %8365 = vtanh.f32 %v1584_v6  ;;  %v1585_v20 = vmul.f32 0.5, %v1467_v16 }
 0x2bc   : > { %8367 = vtanh.f32 %v1582_v18  ;;  %v1583_v21 = vmul.f32 0.5, %v1459_v63 }
 0x2bd   : > { %8369 = vtanh.f32 %v1585_v20 }
 0x2be   : > { %8371 = vtanh.f32 %v1583_v21  ;;  %v7466_v22 = vpop.f32.mrb[4].mxu1 }
 0x2bf   : > { %v1480_v23 = vadd.f32 %v7466_v22, %v9653_v11  ;;  %v1471_v24 = vpop.f32.mrb[5].mxu1 }
 0x2c0   : > { %v1472_v25 = vadd.f32 %v9653_v11, %v1471_v24  ;;  %v7467_v28 = vpop.f32.mrb[6].mxu1 }
 0x2c1   : > { %v1588_v38 = vmul.f32 0.5, %v1480_v23  ;;  %v1483_v30 = vadd.f32 %v7467_v28, %v9653_v11  ;;  %v1474_v47 = vpop.f32.mrb[7].mxu1 }
 0x2c2   : > { %v1586_v31 = vmul.f32 0.5, %v1472_v25  ;;  %v1475_v32 = vadd.f32 %v9653_v11, %v1474_v47 }
 0x2c3   : > { %8373 = vtanh.f32 %v1588_v38  ;;  %v1589_v34 = vmul.f32 0.5, %v1483_v30 }
 0x2c4   : > { %8375 = vtanh.f32 %v1586_v31  ;;  %v1587_v29 = vmul.f32 0.5, %v1475_v32  ;;  %v8149_v31 = vld [vmem:[#allocation3 + $0xc0] sm:$0xff]  }
 0x2c5   : > { %v8366_v37 = vpop.eup %8365  ;;  %8377 = vtanh.f32 %v1589_v34  ;;  %7540 = vmatprep.subr.bf16.mxu1 %v8149_v31 }
 0x2c6   : > { %v8368_v8 = vpop.eup %8367  ;;  %v1648_v27 = vmul.f32 0.5, %v8366_v37  ;;  %8379 = vtanh.f32 %v1587_v29  ;;  %7541 = vmatpush3.bf16.msra.mxu1 %v8149_v31 }
 0x2c7   : > { %v8370_v39 = vpop.eup %8369  ;;  %v1646_v17 = vmul.f32 0.5, %v8368_v8 }
 0x2c8   : > { %v8372_v40 = vpop.eup %8371  ;;  %v1680_v41 = vadd.f32 0.5, %v1648_v27  ;;  %v1649_v44 = vmul.f32 0.5, %v8370_v39 }
 0x2c9   : > { %v1678_v26 = vadd.f32 0.5, %v1646_v17  ;;  %v1647_v35 = vmul.f32 0.5, %v8372_v40 }
 0x2ca   : > { %v1681_v45 = vadd.f32 0.5, %v1649_v44  ;;  %v1712_v46 = vmul.f32 %v1680_v41, %v1464_v13 }
 0x2cb   : > { %v1679_v61 = vadd.f32 0.5, %v1647_v35  ;;  %v1710_v52 = vmul.f32 %v1678_v26, %v1456_v2 }
 0x2cc   : > { %v1713_v49 = vmul.f32 %v1681_v45, %v1467_v16 }
 0x2cd   : > { %v8374_v51 = vpop.eup %8373  ;;  %v1711_v53 = vmul.f32 %v1679_v61, %v1459_v63 }
 0x2ce   : > { %v8376_v42 = vpop.eup %8375  ;;  %v1743_v1 = vpack.c.bf16 %v1713_v49, %v1712_v46  ;;  %v1652_v9 = vmul.f32 0.5, %v8374_v51 }
 0x2cf   : > { %v8378_v58 = vpop.eup %8377  ;;  %v1650_v59 = vmul.f32 0.5, %v8376_v42  ;;  %v7470_v36 = vpop.f32.mrb[8].mxu1  ;;  %v1742_v60 = vpack.c.bf16 %v1711_v53, %v1710_v52 }
 0x2d0   : > { %v8380_v62 = vpop.eup %8379  ;;  %v1684_v33 = vadd.f32 0.5, %v1652_v9  ;;  %v1653_v55 = vmul.f32 0.5, %v8378_v58  ;;  %v1496_v0 = vadd.f32 %v7470_v36, %v9653_v11  ;;  %v1487_v3 = vpop.f32.mrb[9].mxu1 }
 0x2d1   : > { %v1682_v4 = vadd.f32 0.5, %v1650_v59  ;;  %v1651_v5 = vmul.f32 0.5, %v8380_v62  ;;  %v1488_v54 = vadd.f32 %v9653_v11, %v1487_v3  ;;  %v7471_v19 = vpop.f32.mrb[10].mxu1  ;;  %7508 = vmatprep.mubr.bf16.mxu0 %v1742_v60 }
 0x2d2   : > { %v1685_v15 = vadd.f32 0.5, %v1653_v55  ;;  %v1592_v7 = vmul.f32 0.5, %v1496_v0  ;;  %v1499_v57 = vadd.f32 %v7471_v19, %v9653_v11  ;;  %v1490_v10 = vpop.f32.mrb[11].mxu1  ;;  %7509 = vmatmul.mubr.bf16.vlgmr.msra.gmra.mrb[32].mxu0 %v1743_v1  ;;  %v1716_v13 = vmul.f32 %v1684_v33, %v1480_v23 }
 0x2d3   : > { %v1683_v56 = vadd.f32 0.5, %v1651_v5  ;;  %v1590_v48 = vmul.f32 0.5, %v1488_v54  ;;  %v1491_v12 = vadd.f32 %v9653_v11, %v1490_v10  ;;  %v1714_v50 = vmul.f32 %v1682_v4, %v1472_v25 }
 0x2d4   : > { %v1717_v14 = vmul.f32 %v1685_v15, %v1483_v30  ;;  %8381 = vtanh.f32 %v1592_v7  ;;  %v1593_v2 = vmul.f32 0.5, %v1499_v57 }
 0x2d5   : > { %v1715_v6 = vmul.f32 %v1683_v56, %v1475_v32  ;;  %8383 = vtanh.f32 %v1590_v48  ;;  %v1591_v16 = vmul.f32 0.5, %v1491_v12 }
 0x2d6   : > { %8385 = vtanh.f32 %v1593_v2  ;;  %v1745_v43 = vpack.c.bf16 %v1717_v14, %v1716_v13 }
 0x2d7   : > { %8387 = vtanh.f32 %v1591_v16  ;;  %v1744_v18 = vpack.c.bf16 %v1715_v6, %v1714_v50 }
 0x2d9   : > { %7512 = vmatprep.mubr.bf16.mxu0 %v1744_v18 }
 0x2da   : > { %7513 = vmatmul.mubr.bf16.gmra.mrb[36].mxu0 %v1745_v43 }
 0x2de   : > { %v8382_v63 = vpop.eup %8381 }
 0x2df   : > { %v8384_v20 = vpop.eup %8383  ;;  %v1656_v21 = vmul.f32 0.5, %v8382_v63 }
 0x2e0   : > { %v8386_v22 = vpop.eup %8385  ;;  %v1654_v24 = vmul.f32 0.5, %v8384_v20 }
 0x2e1   : > { %v8388_v28 = vpop.eup %8387  ;;  %v1688_v23 = vadd.f32 0.5, %v1656_v21  ;;  %v1657_v38 = vmul.f32 0.5, %v8386_v22 }
 0x2e2   : > { %v1686_v30 = vadd.f32 0.5, %v1654_v24  ;;  %v1655_v47 = vmul.f32 0.5, %v8388_v28 }
 0x2e3   : > { %v1689_v25 = vadd.f32 0.5, %v1657_v38  ;;  %v1720_v34 = vmul.f32 %v1688_v23, %v1496_v0 }
 0x2e4   : > { %v1687_v32 = vadd.f32 0.5, %v1655_v47  ;;  %v1718_v37 = vmul.f32 %v1686_v30, %v1488_v54 }
 0x2e5   : > { %v1721_v29 = vmul.f32 %v1689_v25, %v1499_v57 }
 0x2e6   : > { %v1719_v8 = vmul.f32 %v1687_v32, %v1491_v12 }
 0x2e7   : > { %v7474_v27 = vpop.f32.mrb[12].mxu1  ;;  %v1747_v39 = vpack.c.bf16 %v1721_v29, %v1720_v34 }
 0x2e8   : > { %v1512_v17 = vadd.f32 %v7474_v27, %v9653_v11  ;;  %v1503_v40 = vpop.f32.mrb[13].mxu1  ;;  %v1746_v41 = vpack.c.bf16 %v1719_v8, %v1718_v37 }
 0x2e9   : > { %v1504_v44 = vadd.f32 %v9653_v11, %v1503_v40  ;;  %v7475_v26 = vpop.f32.mrb[14].mxu1 }
 0x2ea   : > { %v1596_v35 = vmul.f32 0.5, %v1512_v17  ;;  %v1515_v45 = vadd.f32 %v7475_v26, %v9653_v11  ;;  %v1506_v61 = vpop.f32.mrb[15].mxu1  ;;  %7516 = vmatprep.mubr.bf16.mxu0 %v1746_v41 }
 0x2eb   : > { %v1594_v46 = vmul.f32 0.5, %v1504_v44  ;;  %v1507_v49 = vadd.f32 %v9653_v11, %v1506_v61  ;;  %7517 = vmatmul.mubr.bf16.gmra.mrb[40].mxu0 %v1747_v39 }
 0x2ec   : > { %8389 = vtanh.f32 %v1596_v35  ;;  %v1597_v51 = vmul.f32 0.5, %v1515_v45 }
 0x2ed   : > { %8391 = vtanh.f32 %v1594_v46  ;;  %v1595_v52 = vmul.f32 0.5, %v1507_v49 }
 0x2ee   : > { %8393 = vtanh.f32 %v1597_v51 }
 0x2ef   : > { %8395 = vtanh.f32 %v1595_v52 }
 0x2f6   : > { %v8390_v53 = vpop.eup %8389 }
 0x2f7   : > { %v8392_v42 = vpop.eup %8391  ;;  %v1660_v1 = vmul.f32 0.5, %v8390_v53 }
 0x2f8   : > { %v8394_v9 = vpop.eup %8393  ;;  %v1658_v58 = vmul.f32 0.5, %v8392_v42  ;;  %v8151_v42 = vld [vmem:[#allocation3 + $0xd0] sm:$0xff]  }
 0x2f9   : > { %v8396_v59 = vpop.eup %8395  ;;  %v1692_v36 = vadd.f32 0.5, %v1660_v1  ;;  %v1661_v60 = vmul.f32 0.5, %v8394_v9 }
 0x2fa   : > { %v1690_v62 = vadd.f32 0.5, %v1658_v58  ;;  %v1659_v33 = vmul.f32 0.5, %v8396_v59 }
 0x2fb   : > { %v1693_v55 = vadd.f32 0.5, %v1661_v60  ;;  %v1724_v3 = vmul.f32 %v1692_v36, %v1512_v17 }
 0x2fc   : > { %v1691_v0 = vadd.f32 0.5, %v1659_v33  ;;  %v1722_v5 = vmul.f32 %v1690_v62, %v1504_v44 }
 0x2fd   : > { %v1725_v4 = vmul.f32 %v1693_v55, %v1515_v45  ;;  %v8152_v55 = vld [vmem:[#allocation3 + $0xd8] sm:$0xff]  }
 0x2fe   : > { %v1723_v54 = vmul.f32 %v1691_v0, %v1507_v49  ;;  %v8150_v49 = vld [vmem:[#allocation3 + $0xc8] sm:$0xff]  }
 0x2ff   : > { %v7478_v19 = vpop.f32.mrb[16].mxu1  ;;  %v1749_v15 = vpack.c.bf16 %v1725_v4, %v1724_v3  ;;  %7542 = vmatprep.subr.bf16.mxu1 %v8150_v49 }
 0x300   : > { %v1528_v7 = vadd.f32 %v7478_v19, %v9653_v11  ;;  %v1519_v57 = vpop.f32.mrb[17].mxu1  ;;  %v1748_v10 = vpack.c.bf16 %v1723_v54, %v1722_v5  ;;  %7543 = vmatpush3.bf16.msra.mxu1 %v8150_v49 }
 0x301   : > { %v1520_v56 = vadd.f32 %v9653_v11, %v1519_v57  ;;  %v7479_v48 = vpop.f32.mrb[18].mxu1  ;;  %7544 = vmatprep.subr.bf16.mxu1 %v8151_v42 }
 0x302   : > { %v1600_v12 = vmul.f32 0.5, %v1528_v7  ;;  %v1531_v13 = vadd.f32 %v7479_v48, %v9653_v11  ;;  %v1522_v14 = vpop.f32.mrb[19].mxu1  ;;  %7520 = vmatprep.mubr.bf16.mxu0 %v1748_v10 }
 0x303   : > { %v1598_v2 = vmul.f32 0.5, %v1520_v56  ;;  %v1523_v50 = vadd.f32 %v9653_v11, %v1522_v14  ;;  %7521 = vmatmul.mubr.bf16.gmra.mrb[44].mxu0 %v1749_v15 }
 0x304   : > { %8397 = vtanh.f32 %v1600_v12  ;;  %v1601_v6 = vmul.f32 0.5, %v1531_v13  ;;  %7545 = vmatpush3.bf16.msra.mxu1 %v8151_v42 }
 0x305   : > { %8399 = vtanh.f32 %v1598_v2  ;;  %v1599_v16 = vmul.f32 0.5, %v1523_v50  ;;  %7546 = vmatprep.subr.bf16.mxu1 %v8152_v55 }
 0x306   : > { %8401 = vtanh.f32 %v1601_v6 }
 0x307   : > { %8403 = vtanh.f32 %v1599_v16  ;;  %v8154_v16 = vld [vmem:[#allocation3 + $0xe8] sm:$0xff]  }
 0x308   : > { %7547 = vmatpush3.bf16.msra.mxu1 %v8152_v55 }
 0x30e   : > { %v8398_v43 = vpop.eup %8397 }
 0x30f   : > { %v8400_v18 = vpop.eup %8399  ;;  %v1664_v63 = vmul.f32 0.5, %v8398_v43 }
 0x310   : > { %v8402_v20 = vpop.eup %8401  ;;  %v1662_v21 = vmul.f32 0.5, %v8400_v18 }
 0x311   : > { %v8404_v22 = vpop.eup %8403  ;;  %v1696_v24 = vadd.f32 0.5, %v1664_v63  ;;  %v1665_v28 = vmul.f32 0.5, %v8402_v20  ;;  %v8155_v63 = vld [vmem:[#allocation3 + $0xf0] sm:$0xff]   ;;  %v8156_v20 = vld [vmem:[#allocation3 + $0xf8] sm:$0xff]  }
 0x312   : > { %v1694_v23 = vadd.f32 0.5, %v1662_v21  ;;  %v1663_v38 = vmul.f32 0.5, %v8404_v22 }
 0x313   : > { %v1697_v30 = vadd.f32 0.5, %v1665_v28  ;;  %v1728_v25 = vmul.f32 %v1696_v24, %v1528_v7  ;;  %v8153_v7 = vld [vmem:[#allocation3 + $0xe0] sm:$0xff]  }
 0x314   : > { %v1695_v47 = vadd.f32 0.5, %v1663_v38  ;;  %v1726_v32 = vmul.f32 %v1694_v23, %v1520_v56  ;;  %7548 = vmatprep.subr.bf16.mxu1 %v8153_v7 }
 0x315   : > { %v1729_v31 = vmul.f32 %v1697_v30, %v1531_v13  ;;  %7549 = vmatpush3.bf16.msra.mxu1 %v8153_v7  ;;  %v9690_v7 = vld [vmem:[%s10280_s4 + $0x2] ss:$0 sm:$0xff] }
 0x316   : > { %v1727_v34 = vmul.f32 %v1695_v47, %v1523_v50  ;;  %7550 = vmatprep.subr.bf16.mxu1 %v8154_v16 }
 0x317   : > { %v7482_v29 = vpop.f32.mrb[20].mxu1  ;;  %v1751_v37 = vpack.c.bf16 %v1729_v31, %v1728_v25 }
 0x318   : > { %v1544_v8 = vadd.f32 %v7482_v29, %v9653_v11  ;;  %v1535_v27 = vpop.f32.mrb[21].mxu1  ;;  %v1750_v39 = vpack.c.bf16 %v1727_v34, %v1726_v32 }
 0x319   : > { %v1536_v17 = vadd.f32 %v9653_v11, %v1535_v27  ;;  %v7483_v40 = vpop.f32.mrb[22].mxu1  ;;  %7551 = vmatpush3.bf16.msra.mxu1 %v8154_v16 }
 0x31a   : > { %v1604_v41 = vmul.f32 0.5, %v1544_v8  ;;  %v1547_v44 = vadd.f32 %v7483_v40, %v9653_v11  ;;  %v1538_v26 = vpop.f32.mrb[23].mxu1  ;;  %7524 = vmatprep.mubr.bf16.mxu0 %v1750_v39  ;;  %7552 = vmatprep.subr.bf16.mxu1 %v8155_v63 }
 0x31b   : > { %v1602_v35 = vmul.f32 0.5, %v1536_v17  ;;  %v1539_v45 = vadd.f32 %v9653_v11, %v1538_v26  ;;  %7525 = vmatmul.mubr.bf16.gmra.mrb[48].mxu0 %v1751_v37 }
 0x31c   : > { %8405 = vtanh.f32 %v1604_v41  ;;  %v1605_v61 = vmul.f32 0.5, %v1547_v44 }
 0x31d   : > { %8407 = vtanh.f32 %v1602_v35  ;;  %v1603_v46 = vmul.f32 0.5, %v1539_v45  ;;  %7553 = vmatpush3.bf16.msra.mxu1 %v8155_v63 }
 0x31e   : > { %8409 = vtanh.f32 %v1605_v61  ;;  %7554 = vmatprep.subr.bf16.mxu1 %v8156_v20 }
 0x31f   : > { %8411 = vtanh.f32 %v1603_v46 }
 0x321   : > { %7555 = vmatpush3.bf16.msra.mxu1 %v8156_v20 }
 0x326   : > { %v8406_v51 = vpop.eup %8405 }
 0x327   : > { %v8408_v52 = vpop.eup %8407  ;;  %v1668_v53 = vmul.f32 0.5, %v8406_v51 }
 0x328   : > { %v8410_v1 = vpop.eup %8409  ;;  %v1666_v9 = vmul.f32 0.5, %v8408_v52 }
 0x329   : > { %v8412_v58 = vpop.eup %8411  ;;  %v1700_v59 = vadd.f32 0.5, %v1668_v53  ;;  %v1669_v36 = vmul.f32 0.5, %v8410_v1 }
 0x32a   : > { %v1698_v60 = vadd.f32 0.5, %v1666_v9  ;;  %v1667_v62 = vmul.f32 0.5, %v8412_v58 }
 0x32b   : > { %v1701_v33 = vadd.f32 0.5, %v1669_v36  ;;  %v1732_v3 = vmul.f32 %v1700_v59, %v1544_v8 }
 0x32c   : > { %v1699_v0 = vadd.f32 0.5, %v1667_v62  ;;  %v1730_v5 = vmul.f32 %v1698_v60, %v1536_v17 }
 0x32d   : > { %v1733_v4 = vmul.f32 %v1701_v33, %v1547_v44 }
 0x32e   : > { %v1731_v54 = vmul.f32 %v1699_v0, %v1539_v45 }
 0x32f   : > { %v7486_v19 = vpop.f32.mrb[24].mxu1  ;;  %v1753_v15 = vpack.c.bf16 %v1733_v4, %v1732_v3 }
 0x330   : > { %v1560_v57 = vadd.f32 %v7486_v19, %v9653_v11  ;;  %v1551_v10 = vpop.f32.mrb[25].mxu1  ;;  %v1752_v56 = vpack.c.bf16 %v1731_v54, %v1730_v5 }
 0x331   : > { %v1552_v48 = vadd.f32 %v9653_v11, %v1551_v10  ;;  %v7487_v12 = vpop.f32.mrb[26].mxu1 }
 0x332   : > { %v1608_v13 = vmul.f32 0.5, %v1560_v57  ;;  %v1563_v14 = vadd.f32 %v7487_v12, %v9653_v11  ;;  %v1554_v2 = vpop.f32.mrb[27].mxu1  ;;  %7528 = vmatprep.mubr.bf16.mxu0 %v1752_v56 }
 0x333   : > { %v1606_v50 = vmul.f32 0.5, %v1552_v48  ;;  %v1555_v6 = vadd.f32 %v9653_v11, %v1554_v2  ;;  %7529 = vmatmul.mubr.bf16.gmra.mrb[52].mxu0 %v1753_v15 }
 0x334   : > { %8413 = vtanh.f32 %v1608_v13  ;;  %v1609_v43 = vmul.f32 0.5, %v1563_v14 }
 0x335   : > { %8415 = vtanh.f32 %v1606_v50  ;;  %v1607_v18 = vmul.f32 0.5, %v1555_v6 }
 0x336   : > { %8417 = vtanh.f32 %v1609_v43 }
 0x337   : > { %8419 = vtanh.f32 %v1607_v18 }
 0x33e   : > { %v8414_v21 = vpop.eup %8413 }
 0x33f   : > { %v8416_v22 = vpop.eup %8415  ;;  %v1672_v24 = vmul.f32 0.5, %v8414_v21 }
 0x340   : > { %v8418_v28 = vpop.eup %8417  ;;  %v1670_v23 = vmul.f32 0.5, %v8416_v22 }
 0x341   : > { %v8420_v38 = vpop.eup %8419  ;;  %v1704_v30 = vadd.f32 0.5, %v1672_v24  ;;  %v1673_v47 = vmul.f32 0.5, %v8418_v28 }
 0x342   : > { %v1702_v25 = vadd.f32 0.5, %v1670_v23  ;;  %v1671_v31 = vmul.f32 0.5, %v8420_v38 }
 0x343   : > { %v1705_v32 = vadd.f32 0.5, %v1673_v47  ;;  %v1736_v29 = vmul.f32 %v1704_v30, %v1560_v57 }
 0x344   : > { %v1703_v34 = vadd.f32 0.5, %v1671_v31  ;;  %v1734_v8 = vmul.f32 %v1702_v25, %v1552_v48 }
 0x345   : > { %v1737_v37 = vmul.f32 %v1705_v32, %v1563_v14 }
 0x346   : > { %v1735_v27 = vmul.f32 %v1703_v34, %v1555_v6 }
 0x347   : > { %v7490_v39 = vpop.f32.mrb[28].mxu1  ;;  %v1755_v17 = vpack.c.bf16 %v1737_v37, %v1736_v29 }
 0x348   : > { %v1576_v40 = vadd.f32 %v7490_v39, %v9653_v11  ;;  %v1567_v41 = vpop.f32.mrb[29].mxu1  ;;  %v1754_v44 = vpack.c.bf16 %v1735_v27, %v1734_v8 }
 0x349   : > { %v1568_v26 = vadd.f32 %v9653_v11, %v1567_v41  ;;  %v7491_v35 = vpop.f32.mrb[30].mxu1 }
 0x34a   : > { %v1612_v45 = vmul.f32 0.5, %v1576_v40  ;;  %v1579_v61 = vadd.f32 %v7491_v35, %v9653_v11  ;;  %v1570_v46 = vpop.f32.mrb[31].mxu1  ;;  %7532 = vmatprep.mubr.bf16.mxu0 %v1754_v44 }
 0x34b   : > { %v1610_v49 = vmul.f32 0.5, %v1568_v26  ;;  %v1571_v51 = vadd.f32 %v9653_v11, %v1570_v46  ;;  %7533 = vmatmul.mubr.bf16.gmra.mrb[56].mxu0 %v1755_v17 }
 0x34c   : > { %8421 = vtanh.f32 %v1612_v45  ;;  %v1613_v52 = vmul.f32 0.5, %v1579_v61 }
 0x34d   : > { %8423 = vtanh.f32 %v1610_v49  ;;  %v1611_v53 = vmul.f32 0.5, %v1571_v51 }
 0x34e   : > { %8425 = vtanh.f32 %v1613_v52 }
 0x34f   : > { %8427 = vtanh.f32 %v1611_v53 }
 0x356   : > { %v8422_v42 = vpop.eup %8421 }
 0x357   : > { %v8424_v1 = vpop.eup %8423  ;;  %v1676_v9 = vmul.f32 0.5, %v8422_v42 }
 0x358   : > { %v8426_v58 = vpop.eup %8425  ;;  %v1674_v59 = vmul.f32 0.5, %v8424_v1 }
 0x359   : > { %v8428_v36 = vpop.eup %8427  ;;  %v1708_v60 = vadd.f32 0.5, %v1676_v9  ;;  %v1677_v62 = vmul.f32 0.5, %v8426_v58 }
 0x35a   : > { %v1706_v33 = vadd.f32 0.5, %v1674_v59  ;;  %v1675_v55 = vmul.f32 0.5, %v8428_v36 }
 0x35b   : > { %v1709_v0 = vadd.f32 0.5, %v1677_v62  ;;  %v1740_v11 = vmul.f32 %v1708_v60, %v1576_v40 }
 0x35c   : > { %v1707_v3 = vadd.f32 0.5, %v1675_v55  ;;  %v1738_v5 = vmul.f32 %v1706_v33, %v1568_v26 }
 0x35d   : > { %v1741_v4 = vmul.f32 %v1709_v0, %v1579_v61 }
 0x35e   : > { %v1739_v54 = vmul.f32 %v1707_v3, %v1571_v51 }
 0x35f   : > { %v1757_v19 = vpack.c.bf16 %v1741_v4, %v1740_v11 }
 0x360   : > { %v1756_v15 = vpack.c.bf16 %v1739_v54, %v1738_v5 }
 0x362   : > { %7536 = vmatprep.mubr.bf16.mxu0 %v1756_v15 }
 0x363   : > { %7537 = vmatmul.mubr.bf16.gmra.mrb[60].mxu0 %v1757_v19 }
 0x3a5   : > { %v7510_v57 = vpop.f32.mrb[32].mxu0 }
 0x3a6   : > { %v1874_v10 = vadd.f32 %v7510_v57, %v9690_v7  ;;  %v1865_v56 = vpop.f32.mrb[33].mxu0 }
 0x3a7   : > { %v1866_v48 = vadd.f32 %v9690_v7, %v1865_v56  ;;  %v7511_v12 = vpop.f32.mrb[34].mxu0 }
 0x3a8   : > { %v1994_v13 = vmul.f32 0.5, %v1874_v10  ;;  %v1877_v14 = vadd.f32 %v7511_v12, %v9690_v7  ;;  %v1868_v2 = vpop.f32.mrb[35].mxu0 }
 0x3a9   : > { %v1992_v50 = vmul.f32 0.5, %v1866_v48  ;;  %v1869_v6 = vadd.f32 %v9690_v7, %v1868_v2 }
 0x3aa   : > { %8429 = vtanh.f32 %v1994_v13  ;;  %v1995_v16 = vmul.f32 0.5, %v1877_v14 }
 0x3ab   : > { %8431 = vtanh.f32 %v1992_v50  ;;  %v1993_v43 = vmul.f32 0.5, %v1869_v6 }
 0x3ac   : > { %8433 = vtanh.f32 %v1995_v16 }
 0x3ad   : > { %8435 = vtanh.f32 %v1993_v43  ;;  %v7514_v18 = vpop.f32.mrb[36].mxu0 }
 0x3ae   : > { %v1890_v63 = vadd.f32 %v7514_v18, %v9690_v7  ;;  %v1881_v20 = vpop.f32.mrb[37].mxu0 }
 0x3af   : > { %v1882_v21 = vadd.f32 %v9690_v7, %v1881_v20  ;;  %v7515_v22 = vpop.f32.mrb[38].mxu0 }
 0x3b0   : > { %v1998_v24 = vmul.f32 0.5, %v1890_v63  ;;  %v1893_v28 = vadd.f32 %v7515_v22, %v9690_v7  ;;  %v1884_v23 = vpop.f32.mrb[39].mxu0 }
 0x3b1   : > { %v1996_v38 = vmul.f32 0.5, %v1882_v21  ;;  %v1885_v30 = vadd.f32 %v9690_v7, %v1884_v23 }
 0x3b2   : > { %8437 = vtanh.f32 %v1998_v24  ;;  %v1999_v47 = vmul.f32 0.5, %v1893_v28 }
 0x3b3   : > { %8439 = vtanh.f32 %v1996_v38  ;;  %v1997_v25 = vmul.f32 0.5, %v1885_v30  ;;  %v8157_v38 = vld [vmem:[#allocation3 + $0x100] sm:$0xff]  }
 0x3b4   : > { %v8430_v31 = vpop.eup %8429  ;;  %8441 = vtanh.f32 %v1999_v47  ;;  %7588 = vmatprep.subr.bf16.mxu0 %v8157_v38 }
 0x3b5   : > { %v8432_v32 = vpop.eup %8431  ;;  %v2058_v34 = vmul.f32 0.5, %v8430_v31  ;;  %8443 = vtanh.f32 %v1997_v25  ;;  %7589 = vmatpush3.bf16.msra.mxu0 %v8157_v38 }
 0x3b6   : > { %v8434_v29 = vpop.eup %8433  ;;  %v2056_v37 = vmul.f32 0.5, %v8432_v32 }
 0x3b7   : > { %v8436_v8 = vpop.eup %8435  ;;  %v2090_v27 = vadd.f32 0.5, %v2058_v34  ;;  %v2059_v39 = vmul.f32 0.5, %v8434_v29 }
 0x3b8   : > { %v2088_v17 = vadd.f32 0.5, %v2056_v37  ;;  %v2057_v40 = vmul.f32 0.5, %v8436_v8 }
 0x3b9   : > { %v2091_v41 = vadd.f32 0.5, %v2059_v39  ;;  %v2122_v26 = vmul.f32 %v2090_v27, %v1874_v10 }
 0x3ba   : > { %v2089_v44 = vadd.f32 0.5, %v2057_v40  ;;  %v2120_v61 = vmul.f32 %v2088_v17, %v1866_v48 }
 0x3bb   : > { %v2123_v35 = vmul.f32 %v2091_v41, %v1877_v14 }
 0x3bc   : > { %v8438_v45 = vpop.eup %8437  ;;  %v2121_v46 = vmul.f32 %v2089_v44, %v1869_v6 }
 0x3bd   : > { %v8440_v49 = vpop.eup %8439  ;;  %v2153_v51 = vpack.c.bf16 %v2123_v35, %v2122_v26  ;;  %v2062_v52 = vmul.f32 0.5, %v8438_v45 }
 0x3be   : > { %v8442_v53 = vpop.eup %8441  ;;  %v2060_v42 = vmul.f32 0.5, %v8440_v49  ;;  %v7518_v1 = vpop.f32.mrb[40].mxu0  ;;  %v2152_v9 = vpack.c.bf16 %v2121_v46, %v2120_v61 }
 0x3bf   : > { %v8444_v58 = vpop.eup %8443  ;;  %v2094_v59 = vadd.f32 0.5, %v2062_v52  ;;  %v2063_v36 = vmul.f32 0.5, %v8442_v53  ;;  %v1906_v60 = vadd.f32 %v7518_v1, %v9690_v7  ;;  %v1897_v62 = vpop.f32.mrb[41].mxu0 }
 0x3c0   : > { %v2092_v33 = vadd.f32 0.5, %v2060_v42  ;;  %v2061_v55 = vmul.f32 0.5, %v8444_v58  ;;  %v1898_v0 = vadd.f32 %v9690_v7, %v1897_v62  ;;  %v7519_v3 = vpop.f32.mrb[42].mxu0  ;;  %7556 = vmatprep.mubr.bf16.mxu1 %v2152_v9 }
 0x3c1   : > { %v2095_v11 = vadd.f32 0.5, %v2063_v36  ;;  %v2002_v4 = vmul.f32 0.5, %v1906_v60  ;;  %v1909_v5 = vadd.f32 %v7519_v3, %v9690_v7  ;;  %v1900_v54 = vpop.f32.mrb[43].mxu0  ;;  %7557 = vmatmul.mubr.bf16.vlgmr.msra.gmra.mrb[32].mxu1 %v2153_v51  ;;  %v2126_v10 = vmul.f32 %v2094_v59, %v1890_v63 }
 0x3c2   : > { %v2093_v19 = vadd.f32 0.5, %v2061_v55  ;;  %v2000_v15 = vmul.f32 0.5, %v1898_v0  ;;  %v1901_v57 = vadd.f32 %v9690_v7, %v1900_v54  ;;  %v2124_v12 = vmul.f32 %v2092_v33, %v1882_v21 }
 0x3c3   : > { %v2127_v56 = vmul.f32 %v2095_v11, %v1893_v28  ;;  %8445 = vtanh.f32 %v2002_v4  ;;  %v2003_v48 = vmul.f32 0.5, %v1909_v5 }
 0x3c4   : > { %v2125_v13 = vmul.f32 %v2093_v19, %v1885_v30  ;;  %8447 = vtanh.f32 %v2000_v15  ;;  %v2001_v14 = vmul.f32 0.5, %v1901_v57 }
 0x3c5   : > { %8449 = vtanh.f32 %v2003_v48  ;;  %v2155_v2 = vpack.c.bf16 %v2127_v56, %v2126_v10 }
 0x3c6   : > { %8451 = vtanh.f32 %v2001_v14  ;;  %v2154_v50 = vpack.c.bf16 %v2125_v13, %v2124_v12 }
 0x3c8   : > { %7560 = vmatprep.mubr.bf16.mxu1 %v2154_v50 }
 0x3c9   : > { %7561 = vmatmul.mubr.bf16.gmra.mrb[36].mxu1 %v2155_v2 }
 0x3cd   : > { %v8446_v6 = vpop.eup %8445 }
 0x3ce   : > { %v8448_v16 = vpop.eup %8447  ;;  %v2066_v43 = vmul.f32 0.5, %v8446_v6 }
 0x3cf   : > { %v8450_v18 = vpop.eup %8449  ;;  %v2064_v20 = vmul.f32 0.5, %v8448_v16 }
 0x3d0   : > { %v8452_v22 = vpop.eup %8451  ;;  %v2098_v63 = vadd.f32 0.5, %v2066_v43  ;;  %v2067_v24 = vmul.f32 0.5, %v8450_v18 }
 0x3d1   : > { %v2096_v28 = vadd.f32 0.5, %v2064_v20  ;;  %v2065_v23 = vmul.f32 0.5, %v8452_v22 }
 0x3d2   : > { %v2099_v21 = vadd.f32 0.5, %v2067_v24  ;;  %v2130_v47 = vmul.f32 %v2098_v63, %v1906_v60 }
 0x3d3   : > { %v2097_v30 = vadd.f32 0.5, %v2065_v23  ;;  %v2128_v31 = vmul.f32 %v2096_v28, %v1898_v0 }
 0x3d4   : > { %v2131_v25 = vmul.f32 %v2099_v21, %v1909_v5 }
 0x3d5   : > { %v2129_v32 = vmul.f32 %v2097_v30, %v1901_v57 }
 0x3d6   : > { %v7522_v34 = vpop.f32.mrb[44].mxu0  ;;  %v2157_v29 = vpack.c.bf16 %v2131_v25, %v2130_v47 }
 0x3d7   : > { %v1922_v37 = vadd.f32 %v7522_v34, %v9690_v7  ;;  %v1913_v8 = vpop.f32.mrb[45].mxu0  ;;  %v2156_v27 = vpack.c.bf16 %v2129_v32, %v2128_v31 }
 0x3d8   : > { %v1914_v39 = vadd.f32 %v9690_v7, %v1913_v8  ;;  %v7523_v17 = vpop.f32.mrb[46].mxu0 }
 0x3d9   : > { %v2006_v40 = vmul.f32 0.5, %v1922_v37  ;;  %v1925_v41 = vadd.f32 %v7523_v17, %v9690_v7  ;;  %v1916_v44 = vpop.f32.mrb[47].mxu0  ;;  %7564 = vmatprep.mubr.bf16.mxu1 %v2156_v27 }
 0x3da   : > { %v2004_v26 = vmul.f32 0.5, %v1914_v39  ;;  %v1917_v35 = vadd.f32 %v9690_v7, %v1916_v44  ;;  %7565 = vmatmul.mubr.bf16.gmra.mrb[40].mxu1 %v2157_v29 }
 0x3db   : > { %8453 = vtanh.f32 %v2006_v40  ;;  %v2007_v45 = vmul.f32 0.5, %v1925_v41 }
 0x3dc   : > { %8455 = vtanh.f32 %v2004_v26  ;;  %v2005_v61 = vmul.f32 0.5, %v1917_v35 }
 0x3dd   : > { %8457 = vtanh.f32 %v2007_v45 }
 0x3de   : > { %8459 = vtanh.f32 %v2005_v61 }
 0x3e5   : > { %v8454_v46 = vpop.eup %8453 }
 0x3e6   : > { %v8456_v49 = vpop.eup %8455  ;;  %v2070_v51 = vmul.f32 0.5, %v8454_v46 }
 0x3e7   : > { %v8458_v52 = vpop.eup %8457  ;;  %v2068_v53 = vmul.f32 0.5, %v8456_v49  ;;  %v8159_v49 = vld [vmem:[#allocation3 + $0x110] sm:$0xff]  }
 0x3e8   : > { %v8460_v42 = vpop.eup %8459  ;;  %v2102_v1 = vadd.f32 0.5, %v2070_v51  ;;  %v2071_v9 = vmul.f32 0.5, %v8458_v52 }
 0x3e9   : > { %v2100_v58 = vadd.f32 0.5, %v2068_v53  ;;  %v2069_v59 = vmul.f32 0.5, %v8460_v42 }
 0x3ea   : > { %v2103_v36 = vadd.f32 0.5, %v2071_v9  ;;  %v2134_v62 = vmul.f32 %v2102_v1, %v1922_v37 }
 0x3eb   : > { %v2101_v60 = vadd.f32 0.5, %v2069_v59  ;;  %v2132_v55 = vmul.f32 %v2100_v58, %v1914_v39 }
 0x3ec   : > { %v2135_v33 = vmul.f32 %v2103_v36, %v1925_v41  ;;  %v8160_v36 = vld [vmem:[#allocation3 + $0x118] sm:$0xff]  }
 0x3ed   : > { %v2133_v0 = vmul.f32 %v2101_v60, %v1917_v35  ;;  %v8158_v35 = vld [vmem:[#allocation3 + $0x108] sm:$0xff]  }
 0x3ee   : > { %v7526_v3 = vpop.f32.mrb[48].mxu0  ;;  %v2159_v11 = vpack.c.bf16 %v2135_v33, %v2134_v62  ;;  %7590 = vmatprep.subr.bf16.mxu0 %v8158_v35 }
 0x3ef   : > { %v1938_v4 = vadd.f32 %v7526_v3, %v9690_v7  ;;  %v1929_v5 = vpop.f32.mrb[49].mxu0  ;;  %v2158_v54 = vpack.c.bf16 %v2133_v0, %v2132_v55  ;;  %7591 = vmatpush3.bf16.msra.mxu0 %v8158_v35 }
 0x3f0   : > { %v1930_v19 = vadd.f32 %v9690_v7, %v1929_v5  ;;  %v7527_v15 = vpop.f32.mrb[50].mxu0  ;;  %7592 = vmatprep.subr.bf16.mxu0 %v8159_v49 }
 0x3f1   : > { %v2010_v57 = vmul.f32 0.5, %v1938_v4  ;;  %v1941_v10 = vadd.f32 %v7527_v15, %v9690_v7  ;;  %v1932_v56 = vpop.f32.mrb[51].mxu0  ;;  %7568 = vmatprep.mubr.bf16.mxu1 %v2158_v54 }
 0x3f2   : > { %v2008_v48 = vmul.f32 0.5, %v1930_v19  ;;  %v1933_v12 = vadd.f32 %v9690_v7, %v1932_v56  ;;  %7569 = vmatmul.mubr.bf16.gmra.mrb[44].mxu1 %v2159_v11 }
 0x3f3   : > { %8461 = vtanh.f32 %v2010_v57  ;;  %v2011_v13 = vmul.f32 0.5, %v1941_v10  ;;  %7593 = vmatpush3.bf16.msra.mxu0 %v8159_v49 }
 0x3f4   : > { %8463 = vtanh.f32 %v2008_v48  ;;  %v2009_v14 = vmul.f32 0.5, %v1933_v12  ;;  %7594 = vmatprep.subr.bf16.mxu0 %v8160_v36 }
 0x3f5   : > { %8465 = vtanh.f32 %v2011_v13 }
 0x3f6   : > { %8467 = vtanh.f32 %v2009_v14  ;;  %v8162_v14 = vld [vmem:[#allocation3 + $0x128] sm:$0xff]  }
 0x3f7   : > { %7595 = vmatpush3.bf16.msra.mxu0 %v8160_v36 }
 0x3fd   : > { %v8462_v2 = vpop.eup %8461 }
 0x3fe   : > { %v8464_v50 = vpop.eup %8463  ;;  %v2074_v6 = vmul.f32 0.5, %v8462_v2 }
 0x3ff   : > { %v8466_v16 = vpop.eup %8465  ;;  %v2072_v43 = vmul.f32 0.5, %v8464_v50 }
 0x400   : > { %v8468_v18 = vpop.eup %8467  ;;  %v2106_v20 = vadd.f32 0.5, %v2074_v6  ;;  %v2075_v22 = vmul.f32 0.5, %v8466_v16  ;;  %v8163_v6 = vld [vmem:[#allocation3 + $0x130] sm:$0xff]   ;;  %v8164_v16 = vld [vmem:[#allocation3 + $0x138] sm:$0xff]  }
 0x401   : > { %v2104_v63 = vadd.f32 0.5, %v2072_v43  ;;  %v2073_v24 = vmul.f32 0.5, %v8468_v18 }
 0x402   : > { %v2107_v28 = vadd.f32 0.5, %v2075_v22  ;;  %v2138_v21 = vmul.f32 %v2106_v20, %v1938_v4  ;;  %v8161_v4 = vld [vmem:[#allocation3 + $0x120] sm:$0xff]  }
 0x403   : > { %v2105_v23 = vadd.f32 0.5, %v2073_v24  ;;  %v2136_v30 = vmul.f32 %v2104_v63, %v1930_v19  ;;  %7596 = vmatprep.subr.bf16.mxu0 %v8161_v4 }
 0x404   : > { %v2139_v38 = vmul.f32 %v2107_v28, %v1941_v10  ;;  %7597 = vmatpush3.bf16.msra.mxu0 %v8161_v4  ;;  %v9727_v4 = vld [vmem:[%s10280_s4 + $0x3] ss:$0 sm:$0xff] }
 0x405   : > { %v2137_v47 = vmul.f32 %v2105_v23, %v1933_v12  ;;  %7598 = vmatprep.subr.bf16.mxu0 %v8162_v14 }
 0x406   : > { %v7530_v25 = vpop.f32.mrb[52].mxu0  ;;  %v2161_v31 = vpack.c.bf16 %v2139_v38, %v2138_v21 }
 0x407   : > { %v1954_v32 = vadd.f32 %v7530_v25, %v9690_v7  ;;  %v1945_v34 = vpop.f32.mrb[53].mxu0  ;;  %v2160_v29 = vpack.c.bf16 %v2137_v47, %v2136_v30 }
 0x408   : > { %v1946_v37 = vadd.f32 %v9690_v7, %v1945_v34  ;;  %v7531_v8 = vpop.f32.mrb[54].mxu0  ;;  %7599 = vmatpush3.bf16.msra.mxu0 %v8162_v14 }
 0x409   : > { %v2014_v27 = vmul.f32 0.5, %v1954_v32  ;;  %v1957_v39 = vadd.f32 %v7531_v8, %v9690_v7  ;;  %v1948_v17 = vpop.f32.mrb[55].mxu0  ;;  %7572 = vmatprep.mubr.bf16.mxu1 %v2160_v29  ;;  %7600 = vmatprep.subr.bf16.mxu0 %v8163_v6 }
 0x40a   : > { %v2012_v40 = vmul.f32 0.5, %v1946_v37  ;;  %v1949_v41 = vadd.f32 %v9690_v7, %v1948_v17  ;;  %7573 = vmatmul.mubr.bf16.gmra.mrb[48].mxu1 %v2161_v31 }
 0x40b   : > { %8469 = vtanh.f32 %v2014_v27  ;;  %v2015_v44 = vmul.f32 0.5, %v1957_v39 }
 0x40c   : > { %8471 = vtanh.f32 %v2012_v40  ;;  %v2013_v26 = vmul.f32 0.5, %v1949_v41  ;;  %7601 = vmatpush3.bf16.msra.mxu0 %v8163_v6 }
 0x40d   : > { %8473 = vtanh.f32 %v2015_v44  ;;  %7602 = vmatprep.subr.bf16.mxu0 %v8164_v16 }
 0x40e   : > { %8475 = vtanh.f32 %v2013_v26 }
 0x410   : > { %7603 = vmatpush3.bf16.msra.mxu0 %v8164_v16 }
 0x415   : > { %v8470_v45 = vpop.eup %8469 }
 0x416   : > { %v8472_v61 = vpop.eup %8471  ;;  %v2078_v46 = vmul.f32 0.5, %v8470_v45 }
 0x417   : > { %v8474_v51 = vpop.eup %8473  ;;  %v2076_v52 = vmul.f32 0.5, %v8472_v61 }
 0x418   : > { %v8476_v53 = vpop.eup %8475  ;;  %v2110_v42 = vadd.f32 0.5, %v2078_v46  ;;  %v2079_v1 = vmul.f32 0.5, %v8474_v51 }
 0x419   : > { %v2108_v9 = vadd.f32 0.5, %v2076_v52  ;;  %v2077_v58 = vmul.f32 0.5, %v8476_v53 }
 0x41a   : > { %v2111_v59 = vadd.f32 0.5, %v2079_v1  ;;  %v2142_v62 = vmul.f32 %v2110_v42, %v1954_v32 }
 0x41b   : > { %v2109_v60 = vadd.f32 0.5, %v2077_v58  ;;  %v2140_v55 = vmul.f32 %v2108_v9, %v1946_v37 }
 0x41c   : > { %v2143_v33 = vmul.f32 %v2111_v59, %v1957_v39 }
 0x41d   : > { %v2141_v0 = vmul.f32 %v2109_v60, %v1949_v41 }
 0x41e   : > { %v7534_v3 = vpop.f32.mrb[56].mxu0  ;;  %v2163_v11 = vpack.c.bf16 %v2143_v33, %v2142_v62 }
 0x41f   : > { %v1970_v5 = vadd.f32 %v7534_v3, %v9690_v7  ;;  %v1961_v54 = vpop.f32.mrb[57].mxu0  ;;  %v2162_v19 = vpack.c.bf16 %v2141_v0, %v2140_v55 }
 0x420   : > { %v1962_v15 = vadd.f32 %v9690_v7, %v1961_v54  ;;  %v7535_v57 = vpop.f32.mrb[58].mxu0 }
 0x421   : > { %v2018_v10 = vmul.f32 0.5, %v1970_v5  ;;  %v1973_v56 = vadd.f32 %v7535_v57, %v9690_v7  ;;  %v1964_v48 = vpop.f32.mrb[59].mxu0  ;;  %7576 = vmatprep.mubr.bf16.mxu1 %v2162_v19 }
 0x422   : > { %v2016_v12 = vmul.f32 0.5, %v1962_v15  ;;  %v1965_v13 = vadd.f32 %v9690_v7, %v1964_v48  ;;  %7577 = vmatmul.mubr.bf16.gmra.mrb[52].mxu1 %v2163_v11 }
 0x423   : > { %8477 = vtanh.f32 %v2018_v10  ;;  %v2019_v2 = vmul.f32 0.5, %v1973_v56 }
 0x424   : > { %8479 = vtanh.f32 %v2016_v12  ;;  %v2017_v50 = vmul.f32 0.5, %v1965_v13 }
 0x425   : > { %8481 = vtanh.f32 %v2019_v2 }
 0x426   : > { %8483 = vtanh.f32 %v2017_v50 }
 0x42d   : > { %v8478_v43 = vpop.eup %8477 }
 0x42e   : > { %v8480_v18 = vpop.eup %8479  ;;  %v2082_v20 = vmul.f32 0.5, %v8478_v43 }
 0x42f   : > { %v8482_v22 = vpop.eup %8481  ;;  %v2080_v63 = vmul.f32 0.5, %v8480_v18 }
 0x430   : > { %v8484_v24 = vpop.eup %8483  ;;  %v2114_v28 = vadd.f32 0.5, %v2082_v20  ;;  %v2083_v23 = vmul.f32 0.5, %v8482_v22 }
 0x431   : > { %v2112_v21 = vadd.f32 0.5, %v2080_v63  ;;  %v2081_v38 = vmul.f32 0.5, %v8484_v24 }
 0x432   : > { %v2115_v30 = vadd.f32 0.5, %v2083_v23  ;;  %v2146_v25 = vmul.f32 %v2114_v28, %v1970_v5 }
 0x433   : > { %v2113_v47 = vadd.f32 0.5, %v2081_v38  ;;  %v2144_v32 = vmul.f32 %v2112_v21, %v1962_v15 }
 0x434   : > { %v2147_v31 = vmul.f32 %v2115_v30, %v1973_v56 }
 0x435   : > { %v2145_v34 = vmul.f32 %v2113_v47, %v1965_v13 }
 0x436   : > { %v7538_v29 = vpop.f32.mrb[60].mxu0  ;;  %v2165_v37 = vpack.c.bf16 %v2147_v31, %v2146_v25 }
 0x437   : > { %v1986_v8 = vadd.f32 %v7538_v29, %v9690_v7  ;;  %v1977_v27 = vpop.f32.mrb[61].mxu0  ;;  %v2164_v39 = vpack.c.bf16 %v2145_v34, %v2144_v32 }
 0x438   : > { %v1978_v17 = vadd.f32 %v9690_v7, %v1977_v27  ;;  %v7539_v40 = vpop.f32.mrb[62].mxu0 }
 0x439   : > { %v2022_v41 = vmul.f32 0.5, %v1986_v8  ;;  %v1989_v44 = vadd.f32 %v7539_v40, %v9690_v7  ;;  %v1980_v26 = vpop.f32.mrb[63].mxu0  ;;  %7580 = vmatprep.mubr.bf16.mxu1 %v2164_v39 }
 0x43a   : > { %v2020_v35 = vmul.f32 0.5, %v1978_v17  ;;  %v1981_v45 = vadd.f32 %v9690_v7, %v1980_v26  ;;  %7581 = vmatmul.mubr.bf16.gmra.mrb[56].mxu1 %v2165_v37 }
 0x43b   : > { %8485 = vtanh.f32 %v2022_v41  ;;  %v2023_v61 = vmul.f32 0.5, %v1989_v44 }
 0x43c   : > { %8487 = vtanh.f32 %v2020_v35  ;;  %v2021_v46 = vmul.f32 0.5, %v1981_v45 }
 0x43d   : > { %8489 = vtanh.f32 %v2023_v61 }
 0x43e   : > { %8491 = vtanh.f32 %v2021_v46 }
 0x445   : > { %v8486_v49 = vpop.eup %8485 }
 0x446   : > { %v8488_v51 = vpop.eup %8487  ;;  %v2086_v52 = vmul.f32 0.5, %v8486_v49 }
 0x447   : > { %v8490_v53 = vpop.eup %8489  ;;  %v2084_v42 = vmul.f32 0.5, %v8488_v51 }
 0x448   : > { %v8492_v1 = vpop.eup %8491  ;;  %v2118_v9 = vadd.f32 0.5, %v2086_v52  ;;  %v2087_v58 = vmul.f32 0.5, %v8490_v53 }
 0x449   : > { %v2116_v59 = vadd.f32 0.5, %v2084_v42  ;;  %v2085_v36 = vmul.f32 0.5, %v8492_v1 }
 0x44a   : > { %v2119_v60 = vadd.f32 0.5, %v2087_v58  ;;  %v2150_v7 = vmul.f32 %v2118_v9, %v1986_v8 }
 0x44b   : > { %v2117_v62 = vadd.f32 0.5, %v2085_v36  ;;  %v2148_v55 = vmul.f32 %v2116_v59, %v1978_v17 }
 0x44c   : > { %v2151_v33 = vmul.f32 %v2119_v60, %v1989_v44 }
 0x44d   : > { %v2149_v0 = vmul.f32 %v2117_v62, %v1981_v45 }
 0x44e   : > { %v2167_v3 = vpack.c.bf16 %v2151_v33, %v2150_v7 }
 0x44f   : > { %v2166_v11 = vpack.c.bf16 %v2149_v0, %v2148_v55 }
 0x451   : > { %7584 = vmatprep.mubr.bf16.mxu1 %v2166_v11 }
 0x452   : > { %7585 = vmatmul.mubr.bf16.gmra.mrb[60].mxu1 %v2167_v3 }
 0x494   : > { %v7558_v5 = vpop.f32.mrb[32].mxu1 }
 0x495   : > { %v2284_v54 = vadd.f32 %v7558_v5, %v9727_v4  ;;  %v2275_v19 = vpop.f32.mrb[33].mxu1 }
 0x496   : > { %v2276_v15 = vadd.f32 %v9727_v4, %v2275_v19  ;;  %v7559_v57 = vpop.f32.mrb[34].mxu1 }
 0x497   : > { %v2404_v10 = vmul.f32 0.5, %v2284_v54  ;;  %v2287_v56 = vadd.f32 %v7559_v57, %v9727_v4  ;;  %v2278_v48 = vpop.f32.mrb[35].mxu1 }
 0x498   : > { %v2402_v12 = vmul.f32 0.5, %v2276_v15  ;;  %v2279_v13 = vadd.f32 %v9727_v4, %v2278_v48 }
 0x499   : > { %8493 = vtanh.f32 %v2404_v10  ;;  %v2405_v14 = vmul.f32 0.5, %v2287_v56 }
 0x49a   : > { %8495 = vtanh.f32 %v2402_v12  ;;  %v2403_v2 = vmul.f32 0.5, %v2279_v13 }
 0x49b   : > { %8497 = vtanh.f32 %v2405_v14 }
 0x49c   : > { %8499 = vtanh.f32 %v2403_v2  ;;  %v7562_v50 = vpop.f32.mrb[36].mxu1 }
 0x49d   : > { %v2300_v6 = vadd.f32 %v7562_v50, %v9727_v4  ;;  %v2291_v16 = vpop.f32.mrb[37].mxu1 }
 0x49e   : > { %v2292_v43 = vadd.f32 %v9727_v4, %v2291_v16  ;;  %v7563_v18 = vpop.f32.mrb[38].mxu1 }
 0x49f   : > { %v2408_v20 = vmul.f32 0.5, %v2300_v6  ;;  %v2303_v22 = vadd.f32 %v7563_v18, %v9727_v4  ;;  %v2294_v63 = vpop.f32.mrb[39].mxu1 }
 0x4a0   : > { %v2406_v24 = vmul.f32 0.5, %v2292_v43  ;;  %v2295_v28 = vadd.f32 %v9727_v4, %v2294_v63 }
 0x4a1   : > { %8501 = vtanh.f32 %v2408_v20  ;;  %v2409_v23 = vmul.f32 0.5, %v2303_v22 }
 0x4a2   : > { %8503 = vtanh.f32 %v2406_v24  ;;  %v2407_v21 = vmul.f32 0.5, %v2295_v28  ;;  %v8165_v24 = vld [vmem:[#allocation3 + $0x140] sm:$0xff]  }
 0x4a3   : > { %v8494_v38 = vpop.eup %8493  ;;  %8505 = vtanh.f32 %v2409_v23  ;;  %7636 = vmatprep.subr.bf16.mxu1 %v8165_v24 }
 0x4a4   : > { %v8496_v30 = vpop.eup %8495  ;;  %v2468_v47 = vmul.f32 0.5, %v8494_v38  ;;  %8507 = vtanh.f32 %v2407_v21  ;;  %7637 = vmatpush3.bf16.msra.mxu1 %v8165_v24 }
 0x4a5   : > { %v8498_v25 = vpop.eup %8497  ;;  %v2466_v31 = vmul.f32 0.5, %v8496_v30 }
 0x4a6   : > { %v8500_v32 = vpop.eup %8499  ;;  %v2500_v34 = vadd.f32 0.5, %v2468_v47  ;;  %v2469_v29 = vmul.f32 0.5, %v8498_v25 }
 0x4a7   : > { %v2498_v37 = vadd.f32 0.5, %v2466_v31  ;;  %v2467_v8 = vmul.f32 0.5, %v8500_v32 }
 0x4a8   : > { %v2501_v27 = vadd.f32 0.5, %v2469_v29  ;;  %v2532_v17 = vmul.f32 %v2500_v34, %v2284_v54 }
 0x4a9   : > { %v2499_v39 = vadd.f32 0.5, %v2467_v8  ;;  %v2530_v44 = vmul.f32 %v2498_v37, %v2276_v15 }
 0x4aa   : > { %v2533_v40 = vmul.f32 %v2501_v27, %v2287_v56 }
 0x4ab   : > { %v8502_v41 = vpop.eup %8501  ;;  %v2531_v26 = vmul.f32 %v2499_v39, %v2279_v13 }
 0x4ac   : > { %v8504_v35 = vpop.eup %8503  ;;  %v2563_v45 = vpack.c.bf16 %v2533_v40, %v2532_v17  ;;  %v2472_v61 = vmul.f32 0.5, %v8502_v41 }
 0x4ad   : > { %v8506_v46 = vpop.eup %8505  ;;  %v2470_v49 = vmul.f32 0.5, %v8504_v35  ;;  %v7566_v51 = vpop.f32.mrb[40].mxu1  ;;  %v2562_v52 = vpack.c.bf16 %v2531_v26, %v2530_v44 }
 0x4ae   : > { %v8508_v53 = vpop.eup %8507  ;;  %v2504_v42 = vadd.f32 0.5, %v2472_v61  ;;  %v2473_v1 = vmul.f32 0.5, %v8506_v46  ;;  %v2316_v9 = vadd.f32 %v7566_v51, %v9727_v4  ;;  %v2307_v58 = vpop.f32.mrb[41].mxu1 }
 0x4af   : > { %v2502_v59 = vadd.f32 0.5, %v2470_v49  ;;  %v2471_v36 = vmul.f32 0.5, %v8508_v53  ;;  %v2308_v60 = vadd.f32 %v9727_v4, %v2307_v58  ;;  %v7567_v62 = vpop.f32.mrb[42].mxu1  ;;  %7604 = vmatprep.mubr.bf16.mxu0 %v2562_v52 }
 0x4b0   : > { %v2505_v7 = vadd.f32 0.5, %v2473_v1  ;;  %v2412_v33 = vmul.f32 0.5, %v2316_v9  ;;  %v2319_v55 = vadd.f32 %v7567_v62, %v9727_v4  ;;  %v2310_v0 = vpop.f32.mrb[43].mxu1  ;;  %7605 = vmatmul.mubr.bf16.vlgmr.msra.gmra.mrb[64].mxu0 %v2563_v45  ;;  %v2536_v54 = vmul.f32 %v2504_v42, %v2300_v6 }
 0x4b1   : > { %v2503_v3 = vadd.f32 0.5, %v2471_v36  ;;  %v2410_v11 = vmul.f32 0.5, %v2308_v60  ;;  %v2311_v5 = vadd.f32 %v9727_v4, %v2310_v0  ;;  %v2534_v57 = vmul.f32 %v2502_v59, %v2292_v43 }
 0x4b2   : > { %v2537_v19 = vmul.f32 %v2505_v7, %v2303_v22  ;;  %8509 = vtanh.f32 %v2412_v33  ;;  %v2413_v15 = vmul.f32 0.5, %v2319_v55 }
 0x4b3   : > { %v2535_v10 = vmul.f32 %v2503_v3, %v2295_v28  ;;  %8511 = vtanh.f32 %v2410_v11  ;;  %v2411_v56 = vmul.f32 0.5, %v2311_v5 }
 0x4b4   : > { %8513 = vtanh.f32 %v2413_v15  ;;  %v2565_v48 = vpack.c.bf16 %v2537_v19, %v2536_v54 }
 0x4b5   : > { %8515 = vtanh.f32 %v2411_v56  ;;  %v2564_v12 = vpack.c.bf16 %v2535_v10, %v2534_v57 }
 0x4b7   : > { %7608 = vmatprep.mubr.bf16.mxu0 %v2564_v12 }
 0x4b8   : > { %7609 = vmatmul.mubr.bf16.gmra.mrb[68].mxu0 %v2565_v48 }
 0x4bc   : > { %v8510_v13 = vpop.eup %8509 }
 0x4bd   : > { %v8512_v14 = vpop.eup %8511  ;;  %v2476_v2 = vmul.f32 0.5, %v8510_v13 }
 0x4be   : > { %v8514_v50 = vpop.eup %8513  ;;  %v2474_v16 = vmul.f32 0.5, %v8512_v14 }
 0x4bf   : > { %v8516_v18 = vpop.eup %8515  ;;  %v2508_v6 = vadd.f32 0.5, %v2476_v2  ;;  %v2477_v20 = vmul.f32 0.5, %v8514_v50 }
 0x4c0   : > { %v2506_v22 = vadd.f32 0.5, %v2474_v16  ;;  %v2475_v63 = vmul.f32 0.5, %v8516_v18 }
 0x4c1   : > { %v2509_v43 = vadd.f32 0.5, %v2477_v20  ;;  %v2540_v23 = vmul.f32 %v2508_v6, %v2316_v9 }
 0x4c2   : > { %v2507_v28 = vadd.f32 0.5, %v2475_v63  ;;  %v2538_v38 = vmul.f32 %v2506_v22, %v2308_v60 }
 0x4c3   : > { %v2541_v21 = vmul.f32 %v2509_v43, %v2319_v55 }
 0x4c4   : > { %v2539_v30 = vmul.f32 %v2507_v28, %v2311_v5 }
 0x4c5   : > { %v7570_v47 = vpop.f32.mrb[44].mxu1  ;;  %v2567_v25 = vpack.c.bf16 %v2541_v21, %v2540_v23 }
 0x4c6   : > { %v2332_v31 = vadd.f32 %v7570_v47, %v9727_v4  ;;  %v2323_v32 = vpop.f32.mrb[45].mxu1  ;;  %v2566_v34 = vpack.c.bf16 %v2539_v30, %v2538_v38 }
 0x4c7   : > { %v2324_v29 = vadd.f32 %v9727_v4, %v2323_v32  ;;  %v7571_v37 = vpop.f32.mrb[46].mxu1 }
 0x4c8   : > { %v2416_v8 = vmul.f32 0.5, %v2332_v31  ;;  %v2335_v27 = vadd.f32 %v7571_v37, %v9727_v4  ;;  %v2326_v39 = vpop.f32.mrb[47].mxu1  ;;  %7612 = vmatprep.mubr.bf16.mxu0 %v2566_v34 }
 0x4c9   : > { %v2414_v17 = vmul.f32 0.5, %v2324_v29  ;;  %v2327_v40 = vadd.f32 %v9727_v4, %v2326_v39  ;;  %7613 = vmatmul.mubr.bf16.gmra.mrb[72].mxu0 %v2567_v25 }
 0x4ca   : > { %8517 = vtanh.f32 %v2416_v8  ;;  %v2417_v41 = vmul.f32 0.5, %v2335_v27 }
 0x4cb   : > { %8519 = vtanh.f32 %v2414_v17  ;;  %v2415_v44 = vmul.f32 0.5, %v2327_v40 }
 0x4cc   : > { %8521 = vtanh.f32 %v2417_v41 }
 0x4cd   : > { %8523 = vtanh.f32 %v2415_v44 }
 0x4d4   : > { %v8518_v26 = vpop.eup %8517 }
 0x4d5   : > { %v8520_v35 = vpop.eup %8519  ;;  %v2480_v45 = vmul.f32 0.5, %v8518_v26 }
 0x4d6   : > { %v8522_v61 = vpop.eup %8521  ;;  %v2478_v46 = vmul.f32 0.5, %v8520_v35  ;;  %v8167_v35 = vld [vmem:[#allocation3 + $0x150] sm:$0xff]  }
 0x4d7   : > { %v8524_v49 = vpop.eup %8523  ;;  %v2512_v51 = vadd.f32 0.5, %v2480_v45  ;;  %v2481_v52 = vmul.f32 0.5, %v8522_v61 }
 0x4d8   : > { %v2510_v53 = vadd.f32 0.5, %v2478_v46  ;;  %v2479_v42 = vmul.f32 0.5, %v8524_v49 }
 0x4d9   : > { %v2513_v1 = vadd.f32 0.5, %v2481_v52  ;;  %v2544_v58 = vmul.f32 %v2512_v51, %v2332_v31 }
 0x4da   : > { %v2511_v9 = vadd.f32 0.5, %v2479_v42  ;;  %v2542_v36 = vmul.f32 %v2510_v53, %v2324_v29 }
 0x4db   : > { %v2545_v59 = vmul.f32 %v2513_v1, %v2335_v27  ;;  %v8168_v1 = vld [vmem:[#allocation3 + $0x158] sm:$0xff]  }
 0x4dc   : > { %v2543_v60 = vmul.f32 %v2511_v9, %v2327_v40  ;;  %v8166_v40 = vld [vmem:[#allocation3 + $0x148] sm:$0xff]  }
 0x4dd   : > { %v7574_v62 = vpop.f32.mrb[48].mxu1  ;;  %v2569_v7 = vpack.c.bf16 %v2545_v59, %v2544_v58  ;;  %7638 = vmatprep.subr.bf16.mxu1 %v8166_v40 }
 0x4de   : > { %v2348_v33 = vadd.f32 %v7574_v62, %v9727_v4  ;;  %v2339_v55 = vpop.f32.mrb[49].mxu1  ;;  %v2568_v0 = vpack.c.bf16 %v2543_v60, %v2542_v36  ;;  %7639 = vmatpush3.bf16.msra.mxu1 %v8166_v40 }
 0x4df   : > { %v2340_v3 = vadd.f32 %v9727_v4, %v2339_v55  ;;  %v7575_v11 = vpop.f32.mrb[50].mxu1  ;;  %7640 = vmatprep.subr.bf16.mxu1 %v8167_v35 }
 0x4e0   : > { %v2420_v5 = vmul.f32 0.5, %v2348_v33  ;;  %v2351_v54 = vadd.f32 %v7575_v11, %v9727_v4  ;;  %v2342_v19 = vpop.f32.mrb[51].mxu1  ;;  %7616 = vmatprep.mubr.bf16.mxu0 %v2568_v0 }
 0x4e1   : > { %v2418_v15 = vmul.f32 0.5, %v2340_v3  ;;  %v2343_v57 = vadd.f32 %v9727_v4, %v2342_v19  ;;  %7617 = vmatmul.mubr.bf16.gmra.mrb[76].mxu0 %v2569_v7 }
 0x4e2   : > { %8525 = vtanh.f32 %v2420_v5  ;;  %v2421_v10 = vmul.f32 0.5, %v2351_v54  ;;  %7641 = vmatpush3.bf16.msra.mxu1 %v8167_v35 }
 0x4e3   : > { %8527 = vtanh.f32 %v2418_v15  ;;  %v2419_v56 = vmul.f32 0.5, %v2343_v57  ;;  %7642 = vmatprep.subr.bf16.mxu1 %v8168_v1 }
 0x4e4   : > { %8529 = vtanh.f32 %v2421_v10 }
 0x4e5   : > { %8531 = vtanh.f32 %v2419_v56  ;;  %v8170_v56 = vld [vmem:[#allocation3 + $0x168] sm:$0xff]  }
 0x4e6   : > { %7643 = vmatpush3.bf16.msra.mxu1 %v8168_v1 }
 0x4ec   : > { %v8526_v48 = vpop.eup %8525 }
 0x4ed   : > { %v8528_v12 = vpop.eup %8527  ;;  %v2484_v13 = vmul.f32 0.5, %v8526_v48 }
 0x4ee   : > { %v8530_v14 = vpop.eup %8529  ;;  %v2482_v2 = vmul.f32 0.5, %v8528_v12 }
 0x4ef   : > { %v8532_v50 = vpop.eup %8531  ;;  %v2516_v16 = vadd.f32 0.5, %v2484_v13  ;;  %v2485_v18 = vmul.f32 0.5, %v8530_v14  ;;  %v8171_v13 = vld [vmem:[#allocation3 + $0x170] sm:$0xff]   ;;  %v8172_v14 = vld [vmem:[#allocation3 + $0x178] sm:$0xff]  }
 0x4f0   : > { %v2514_v6 = vadd.f32 0.5, %v2482_v2  ;;  %v2483_v20 = vmul.f32 0.5, %v8532_v50 }
 0x4f1   : > { %v2517_v22 = vadd.f32 0.5, %v2485_v18  ;;  %v2548_v43 = vmul.f32 %v2516_v16, %v2348_v33  ;;  %v8169_v33 = vld [vmem:[#allocation3 + $0x160] sm:$0xff]  }
 0x4f2   : > { %v2515_v63 = vadd.f32 0.5, %v2483_v20  ;;  %v2546_v28 = vmul.f32 %v2514_v6, %v2340_v3  ;;  %7644 = vmatprep.subr.bf16.mxu1 %v8169_v33 }
 0x4f3   : > { %v2549_v24 = vmul.f32 %v2517_v22, %v2351_v54  ;;  %7645 = vmatpush3.bf16.msra.mxu1 %v8169_v33  ;;  %v9764_v33 = vld [vmem:[%s10280_s4 + $0x4] ss:$0 sm:$0xff] }
 0x4f4   : > { %v2547_v23 = vmul.f32 %v2515_v63, %v2343_v57  ;;  %7646 = vmatprep.subr.bf16.mxu1 %v8170_v56 }
 0x4f5   : > { %v7578_v21 = vpop.f32.mrb[52].mxu1  ;;  %v2571_v38 = vpack.c.bf16 %v2549_v24, %v2548_v43 }
 0x4f6   : > { %v2364_v30 = vadd.f32 %v7578_v21, %v9727_v4  ;;  %v2355_v47 = vpop.f32.mrb[53].mxu1  ;;  %v2570_v25 = vpack.c.bf16 %v2547_v23, %v2546_v28 }
 0x4f7   : > { %v2356_v31 = vadd.f32 %v9727_v4, %v2355_v47  ;;  %v7579_v32 = vpop.f32.mrb[54].mxu1  ;;  %7647 = vmatpush3.bf16.msra.mxu1 %v8170_v56 }
 0x4f8   : > { %v2424_v34 = vmul.f32 0.5, %v2364_v30  ;;  %v2367_v29 = vadd.f32 %v7579_v32, %v9727_v4  ;;  %v2358_v37 = vpop.f32.mrb[55].mxu1  ;;  %7620 = vmatprep.mubr.bf16.mxu0 %v2570_v25  ;;  %7648 = vmatprep.subr.bf16.mxu1 %v8171_v13 }
 0x4f9   : > { %v2422_v8 = vmul.f32 0.5, %v2356_v31  ;;  %v2359_v27 = vadd.f32 %v9727_v4, %v2358_v37  ;;  %7621 = vmatmul.mubr.bf16.gmra.mrb[80].mxu0 %v2571_v38 }
 0x4fa   : > { %8533 = vtanh.f32 %v2424_v34  ;;  %v2425_v39 = vmul.f32 0.5, %v2367_v29 }
 0x4fb   : > { %8535 = vtanh.f32 %v2422_v8  ;;  %v2423_v17 = vmul.f32 0.5, %v2359_v27  ;;  %7649 = vmatpush3.bf16.msra.mxu1 %v8171_v13 }
 0x4fc   : > { %8537 = vtanh.f32 %v2425_v39  ;;  %7650 = vmatprep.subr.bf16.mxu1 %v8172_v14 }
 0x4fd   : > { %8539 = vtanh.f32 %v2423_v17 }
 0x4ff   : > { %7651 = vmatpush3.bf16.msra.mxu1 %v8172_v14 }
 0x504   : > { %v8534_v41 = vpop.eup %8533 }
 0x505   : > { %v8536_v44 = vpop.eup %8535  ;;  %v2488_v26 = vmul.f32 0.5, %v8534_v41 }
 0x506   : > { %v8538_v45 = vpop.eup %8537  ;;  %v2486_v61 = vmul.f32 0.5, %v8536_v44 }
 0x507   : > { %v8540_v46 = vpop.eup %8539  ;;  %v2520_v49 = vadd.f32 0.5, %v2488_v26  ;;  %v2489_v51 = vmul.f32 0.5, %v8538_v45 }
 0x508   : > { %v2518_v52 = vadd.f32 0.5, %v2486_v61  ;;  %v2487_v53 = vmul.f32 0.5, %v8540_v46 }
 0x509   : > { %v2521_v42 = vadd.f32 0.5, %v2489_v51  ;;  %v2552_v58 = vmul.f32 %v2520_v49, %v2364_v30 }
 0x50a   : > { %v2519_v9 = vadd.f32 0.5, %v2487_v53  ;;  %v2550_v36 = vmul.f32 %v2518_v52, %v2356_v31 }
 0x50b   : > { %v2553_v59 = vmul.f32 %v2521_v42, %v2367_v29 }
 0x50c   : > { %v2551_v60 = vmul.f32 %v2519_v9, %v2359_v27 }
 0x50d   : > { %v7582_v62 = vpop.f32.mrb[56].mxu1  ;;  %v2573_v7 = vpack.c.bf16 %v2553_v59, %v2552_v58 }
 0x50e   : > { %v2380_v55 = vadd.f32 %v7582_v62, %v9727_v4  ;;  %v2371_v0 = vpop.f32.mrb[57].mxu1  ;;  %v2572_v3 = vpack.c.bf16 %v2551_v60, %v2550_v36 }
 0x50f   : > { %v2372_v11 = vadd.f32 %v9727_v4, %v2371_v0  ;;  %v7583_v5 = vpop.f32.mrb[58].mxu1 }
 0x510   : > { %v2428_v54 = vmul.f32 0.5, %v2380_v55  ;;  %v2383_v19 = vadd.f32 %v7583_v5, %v9727_v4  ;;  %v2374_v15 = vpop.f32.mrb[59].mxu1  ;;  %7624 = vmatprep.mubr.bf16.mxu0 %v2572_v3 }
 0x511   : > { %v2426_v57 = vmul.f32 0.5, %v2372_v11  ;;  %v2375_v10 = vadd.f32 %v9727_v4, %v2374_v15  ;;  %7625 = vmatmul.mubr.bf16.gmra.mrb[84].mxu0 %v2573_v7 }
 0x512   : > { %8541 = vtanh.f32 %v2428_v54  ;;  %v2429_v48 = vmul.f32 0.5, %v2383_v19 }
 0x513   : > { %8543 = vtanh.f32 %v2426_v57  ;;  %v2427_v12 = vmul.f32 0.5, %v2375_v10 }
 0x514   : > { %8545 = vtanh.f32 %v2429_v48 }
 0x515   : > { %8547 = vtanh.f32 %v2427_v12 }
 0x51c   : > { %v8542_v2 = vpop.eup %8541 }
 0x51d   : > { %v8544_v50 = vpop.eup %8543  ;;  %v2492_v16 = vmul.f32 0.5, %v8542_v2 }
 0x51e   : > { %v8546_v18 = vpop.eup %8545  ;;  %v2490_v6 = vmul.f32 0.5, %v8544_v50 }
 0x51f   : > { %v8548_v20 = vpop.eup %8547  ;;  %v2524_v22 = vadd.f32 0.5, %v2492_v16  ;;  %v2493_v63 = vmul.f32 0.5, %v8546_v18 }
 0x520   : > { %v2522_v43 = vadd.f32 0.5, %v2490_v6  ;;  %v2491_v24 = vmul.f32 0.5, %v8548_v20 }
 0x521   : > { %v2525_v28 = vadd.f32 0.5, %v2493_v63  ;;  %v2556_v21 = vmul.f32 %v2524_v22, %v2380_v55 }
 0x522   : > { %v2523_v23 = vadd.f32 0.5, %v2491_v24  ;;  %v2554_v30 = vmul.f32 %v2522_v43, %v2372_v11 }
 0x523   : > { %v2557_v38 = vmul.f32 %v2525_v28, %v2383_v19 }
 0x524   : > { %v2555_v47 = vmul.f32 %v2523_v23, %v2375_v10 }
 0x525   : > { %v7586_v25 = vpop.f32.mrb[60].mxu1  ;;  %v2575_v31 = vpack.c.bf16 %v2557_v38, %v2556_v21 }
 0x526   : > { %v2396_v32 = vadd.f32 %v7586_v25, %v9727_v4  ;;  %v2387_v34 = vpop.f32.mrb[61].mxu1  ;;  %v2574_v29 = vpack.c.bf16 %v2555_v47, %v2554_v30 }
 0x527   : > { %v2388_v37 = vadd.f32 %v9727_v4, %v2387_v34  ;;  %v7587_v8 = vpop.f32.mrb[62].mxu1 }
 0x528   : > { %v2432_v27 = vmul.f32 0.5, %v2396_v32  ;;  %v2399_v39 = vadd.f32 %v7587_v8, %v9727_v4  ;;  %v2390_v17 = vpop.f32.mrb[63].mxu1  ;;  %7628 = vmatprep.mubr.bf16.mxu0 %v2574_v29 }
 0x529   : > { %v2430_v40 = vmul.f32 0.5, %v2388_v37  ;;  %v2391_v41 = vadd.f32 %v9727_v4, %v2390_v17  ;;  %7629 = vmatmul.mubr.bf16.gmra.mrb[88].mxu0 %v2575_v31 }
 0x52a   : > { %8549 = vtanh.f32 %v2432_v27  ;;  %v2433_v44 = vmul.f32 0.5, %v2399_v39 }
 0x52b   : > { %8551 = vtanh.f32 %v2430_v40  ;;  %v2431_v26 = vmul.f32 0.5, %v2391_v41 }
 0x52c   : > { %8553 = vtanh.f32 %v2433_v44 }
 0x52d   : > { %8555 = vtanh.f32 %v2431_v26 }
 0x534   : > { %v8550_v35 = vpop.eup %8549 }
 0x535   : > { %v8552_v45 = vpop.eup %8551  ;;  %v2496_v61 = vmul.f32 0.5, %v8550_v35 }
 0x536   : > { %v8554_v46 = vpop.eup %8553  ;;  %v2494_v49 = vmul.f32 0.5, %v8552_v45 }
 0x537   : > { %v8556_v51 = vpop.eup %8555  ;;  %v2528_v52 = vadd.f32 0.5, %v2496_v61  ;;  %v2497_v53 = vmul.f32 0.5, %v8554_v46 }
 0x538   : > { %v2526_v42 = vadd.f32 0.5, %v2494_v49  ;;  %v2495_v1 = vmul.f32 0.5, %v8556_v51 }
 0x539   : > { %v2529_v9 = vadd.f32 0.5, %v2497_v53  ;;  %v2560_v4 = vmul.f32 %v2528_v52, %v2396_v32 }
 0x53a   : > { %v2527_v58 = vadd.f32 0.5, %v2495_v1  ;;  %v2558_v36 = vmul.f32 %v2526_v42, %v2388_v37 }
 0x53b   : > { %v2561_v59 = vmul.f32 %v2529_v9, %v2399_v39 }
 0x53c   : > { %v2559_v60 = vmul.f32 %v2527_v58, %v2391_v41 }
 0x53d   : > { %v2577_v62 = vpack.c.bf16 %v2561_v59, %v2560_v4 }
 0x53e   : > { %v2576_v7 = vpack.c.bf16 %v2559_v60, %v2558_v36 }
 0x540   : > { %7632 = vmatprep.mubr.bf16.mxu0 %v2576_v7 }
 0x541   : > { %7633 = vmatmul.mubr.bf16.gmra.mrb[92].mxu0 %v2577_v62 }
 0x583   : > { %v7606_v55 = vpop.f32.mrb[64].mxu0 }
 0x584   : > { %v2694_v0 = vadd.f32 %v7606_v55, %v9764_v33  ;;  %v2685_v3 = vpop.f32.mrb[65].mxu0 }
 0x585   : > { %v2686_v11 = vadd.f32 %v9764_v33, %v2685_v3  ;;  %v7607_v5 = vpop.f32.mrb[66].mxu0 }
 0x586   : > { %v2814_v54 = vmul.f32 0.5, %v2694_v0  ;;  %v2697_v19 = vadd.f32 %v7607_v5, %v9764_v33  ;;  %v2688_v15 = vpop.f32.mrb[67].mxu0 }
 0x587   : > { %v2812_v57 = vmul.f32 0.5, %v2686_v11  ;;  %v2689_v10 = vadd.f32 %v9764_v33, %v2688_v15 }
 0x588   : > { %8557 = vtanh.f32 %v2814_v54  ;;  %v2815_v56 = vmul.f32 0.5, %v2697_v19 }
 0x589   : > { %8559 = vtanh.f32 %v2812_v57  ;;  %v2813_v48 = vmul.f32 0.5, %v2689_v10 }
 0x58a   : > { %8561 = vtanh.f32 %v2815_v56 }
 0x58b   : > { %8563 = vtanh.f32 %v2813_v48  ;;  %v7610_v12 = vpop.f32.mrb[68].mxu0 }
 0x58c   : > { %v2710_v13 = vadd.f32 %v7610_v12, %v9764_v33  ;;  %v2701_v14 = vpop.f32.mrb[69].mxu0 }
 0x58d   : > { %v2702_v2 = vadd.f32 %v9764_v33, %v2701_v14  ;;  %v7611_v50 = vpop.f32.mrb[70].mxu0 }
 0x58e   : > { %v2818_v16 = vmul.f32 0.5, %v2710_v13  ;;  %v2713_v18 = vadd.f32 %v7611_v50, %v9764_v33  ;;  %v2704_v6 = vpop.f32.mrb[71].mxu0 }
 0x58f   : > { %v2816_v20 = vmul.f32 0.5, %v2702_v2  ;;  %v2705_v22 = vadd.f32 %v9764_v33, %v2704_v6 }
 0x590   : > { %8565 = vtanh.f32 %v2818_v16  ;;  %v2819_v63 = vmul.f32 0.5, %v2713_v18 }
 0x591   : > { %8567 = vtanh.f32 %v2816_v20  ;;  %v2817_v43 = vmul.f32 0.5, %v2705_v22  ;;  %v8173_v20 = vld [vmem:[#allocation3 + $0x180] sm:$0xff]  }
 0x592   : > { %v8558_v24 = vpop.eup %8557  ;;  %8569 = vtanh.f32 %v2819_v63  ;;  %7684 = vmatprep.subr.bf16.mxu0 %v8173_v20 }
 0x593   : > { %v8560_v28 = vpop.eup %8559  ;;  %v2878_v23 = vmul.f32 0.5, %v8558_v24  ;;  %8571 = vtanh.f32 %v2817_v43  ;;  %7685 = vmatpush3.bf16.msra.mxu0 %v8173_v20 }
 0x594   : > { %v8562_v21 = vpop.eup %8561  ;;  %v2876_v38 = vmul.f32 0.5, %v8560_v28 }
 0x595   : > { %v8564_v30 = vpop.eup %8563  ;;  %v2910_v47 = vadd.f32 0.5, %v2878_v23  ;;  %v2879_v25 = vmul.f32 0.5, %v8562_v21 }
 0x596   : > { %v2908_v31 = vadd.f32 0.5, %v2876_v38  ;;  %v2877_v32 = vmul.f32 0.5, %v8564_v30 }
 0x597   : > { %v2911_v34 = vadd.f32 0.5, %v2879_v25  ;;  %v2942_v37 = vmul.f32 %v2910_v47, %v2694_v0 }
 0x598   : > { %v2909_v29 = vadd.f32 0.5, %v2877_v32  ;;  %v2940_v39 = vmul.f32 %v2908_v31, %v2686_v11 }
 0x599   : > { %v2943_v8 = vmul.f32 %v2911_v34, %v2697_v19 }
 0x59a   : > { %v8566_v27 = vpop.eup %8565  ;;  %v2941_v17 = vmul.f32 %v2909_v29, %v2689_v10 }
 0x59b   : > { %v8568_v40 = vpop.eup %8567  ;;  %v2973_v41 = vpack.c.bf16 %v2943_v8, %v2942_v37  ;;  %v2882_v44 = vmul.f32 0.5, %v8566_v27 }
 0x59c   : > { %v8570_v26 = vpop.eup %8569  ;;  %v2880_v35 = vmul.f32 0.5, %v8568_v40  ;;  %v7614_v45 = vpop.f32.mrb[72].mxu0  ;;  %v2972_v61 = vpack.c.bf16 %v2941_v17, %v2940_v39 }
 0x59d   : > { %v8572_v46 = vpop.eup %8571  ;;  %v2914_v49 = vadd.f32 0.5, %v2882_v44  ;;  %v2883_v51 = vmul.f32 0.5, %v8570_v26  ;;  %v2726_v52 = vadd.f32 %v7614_v45, %v9764_v33  ;;  %v2717_v53 = vpop.f32.mrb[73].mxu0 }
 0x59e   : > { %v2912_v42 = vadd.f32 0.5, %v2880_v35  ;;  %v2881_v1 = vmul.f32 0.5, %v8572_v46  ;;  %v2718_v9 = vadd.f32 %v9764_v33, %v2717_v53  ;;  %v7615_v58 = vpop.f32.mrb[74].mxu0  ;;  %7652 = vmatprep.mubr.bf16.mxu1 %v2972_v61 }
 0x59f   : > { %v2915_v4 = vadd.f32 0.5, %v2883_v51  ;;  %v2822_v59 = vmul.f32 0.5, %v2726_v52  ;;  %v2729_v36 = vadd.f32 %v7615_v58, %v9764_v33  ;;  %v2720_v60 = vpop.f32.mrb[75].mxu0  ;;  %7653 = vmatmul.mubr.bf16.vlgmr.msra.gmra.mrb[64].mxu1 %v2973_v41  ;;  %v2946_v0 = vmul.f32 %v2914_v49, %v2710_v13 }
 0x5a0   : > { %v2913_v62 = vadd.f32 0.5, %v2881_v1  ;;  %v2820_v7 = vmul.f32 0.5, %v2718_v9  ;;  %v2721_v55 = vadd.f32 %v9764_v33, %v2720_v60  ;;  %v2944_v5 = vmul.f32 %v2912_v42, %v2702_v2 }
 0x5a1   : > { %v2947_v3 = vmul.f32 %v2915_v4, %v2713_v18  ;;  %8573 = vtanh.f32 %v2822_v59  ;;  %v2823_v11 = vmul.f32 0.5, %v2729_v36 }
 0x5a2   : > { %v2945_v54 = vmul.f32 %v2913_v62, %v2705_v22  ;;  %8575 = vtanh.f32 %v2820_v7  ;;  %v2821_v19 = vmul.f32 0.5, %v2721_v55 }
 0x5a3   : > { %8577 = vtanh.f32 %v2823_v11  ;;  %v2975_v15 = vpack.c.bf16 %v2947_v3, %v2946_v0 }
 0x5a4   : > { %8579 = vtanh.f32 %v2821_v19  ;;  %v2974_v57 = vpack.c.bf16 %v2945_v54, %v2944_v5 }
 0x5a6   : > { %7656 = vmatprep.mubr.bf16.mxu1 %v2974_v57 }
 0x5a7   : > { %7657 = vmatmul.mubr.bf16.gmra.mrb[68].mxu1 %v2975_v15 }
 0x5ab   : > { %v8574_v10 = vpop.eup %8573 }
 0x5ac   : > { %v8576_v56 = vpop.eup %8575  ;;  %v2886_v48 = vmul.f32 0.5, %v8574_v10 }
 0x5ad   : > { %v8578_v12 = vpop.eup %8577  ;;  %v2884_v14 = vmul.f32 0.5, %v8576_v56 }
 0x5ae   : > { %v8580_v50 = vpop.eup %8579  ;;  %v2918_v13 = vadd.f32 0.5, %v2886_v48  ;;  %v2887_v16 = vmul.f32 0.5, %v8578_v12 }
 0x5af   : > { %v2916_v18 = vadd.f32 0.5, %v2884_v14  ;;  %v2885_v6 = vmul.f32 0.5, %v8580_v50 }
 0x5b0   : > { %v2919_v2 = vadd.f32 0.5, %v2887_v16  ;;  %v2950_v63 = vmul.f32 %v2918_v13, %v2726_v52 }
 0x5b1   : > { %v2917_v22 = vadd.f32 0.5, %v2885_v6  ;;  %v2948_v24 = vmul.f32 %v2916_v18, %v2718_v9 }
 0x5b2   : > { %v2951_v43 = vmul.f32 %v2919_v2, %v2729_v36 }
 0x5b3   : > { %v2949_v28 = vmul.f32 %v2917_v22, %v2721_v55 }
 0x5b4   : > { %v7618_v23 = vpop.f32.mrb[76].mxu0  ;;  %v2977_v21 = vpack.c.bf16 %v2951_v43, %v2950_v63 }
 0x5b5   : > { %v2742_v38 = vadd.f32 %v7618_v23, %v9764_v33  ;;  %v2733_v30 = vpop.f32.mrb[77].mxu0  ;;  %v2976_v47 = vpack.c.bf16 %v2949_v28, %v2948_v24 }
 0x5b6   : > { %v2734_v25 = vadd.f32 %v9764_v33, %v2733_v30  ;;  %v7619_v31 = vpop.f32.mrb[78].mxu0 }
 0x5b7   : > { %v2826_v32 = vmul.f32 0.5, %v2742_v38  ;;  %v2745_v34 = vadd.f32 %v7619_v31, %v9764_v33  ;;  %v2736_v29 = vpop.f32.mrb[79].mxu0  ;;  %7660 = vmatprep.mubr.bf16.mxu1 %v2976_v47 }
 0x5b8   : > { %v2824_v37 = vmul.f32 0.5, %v2734_v25  ;;  %v2737_v8 = vadd.f32 %v9764_v33, %v2736_v29  ;;  %7661 = vmatmul.mubr.bf16.gmra.mrb[72].mxu1 %v2977_v21 }
 0x5b9   : > { %8581 = vtanh.f32 %v2826_v32  ;;  %v2827_v27 = vmul.f32 0.5, %v2745_v34 }
 0x5ba   : > { %8583 = vtanh.f32 %v2824_v37  ;;  %v2825_v39 = vmul.f32 0.5, %v2737_v8 }
 0x5bb   : > { %8585 = vtanh.f32 %v2827_v27 }
 0x5bc   : > { %8587 = vtanh.f32 %v2825_v39 }
 0x5c3   : > { %v8582_v17 = vpop.eup %8581 }
 0x5c4   : > { %v8584_v40 = vpop.eup %8583  ;;  %v2890_v41 = vmul.f32 0.5, %v8582_v17 }
 0x5c5   : > { %v8586_v44 = vpop.eup %8585  ;;  %v2888_v26 = vmul.f32 0.5, %v8584_v40  ;;  %v8175_v40 = vld [vmem:[#allocation3 + $0x190] sm:$0xff]  }
 0x5c6   : > { %v8588_v35 = vpop.eup %8587  ;;  %v2922_v45 = vadd.f32 0.5, %v2890_v41  ;;  %v2891_v61 = vmul.f32 0.5, %v8586_v44 }
 0x5c7   : > { %v2920_v46 = vadd.f32 0.5, %v2888_v26  ;;  %v2889_v49 = vmul.f32 0.5, %v8588_v35 }
 0x5c8   : > { %v2923_v51 = vadd.f32 0.5, %v2891_v61  ;;  %v2954_v53 = vmul.f32 %v2922_v45, %v2742_v38 }
 0x5c9   : > { %v2921_v52 = vadd.f32 0.5, %v2889_v49  ;;  %v2952_v1 = vmul.f32 %v2920_v46, %v2734_v25 }
 0x5ca   : > { %v2955_v42 = vmul.f32 %v2923_v51, %v2745_v34  ;;  %v8176_v51 = vld [vmem:[#allocation3 + $0x198] sm:$0xff]  }
 0x5cb   : > { %v2953_v9 = vmul.f32 %v2921_v52, %v2737_v8  ;;  %v8174_v8 = vld [vmem:[#allocation3 + $0x188] sm:$0xff]  }
 0x5cc   : > { %v7622_v58 = vpop.f32.mrb[80].mxu0  ;;  %v2979_v4 = vpack.c.bf16 %v2955_v42, %v2954_v53  ;;  %7686 = vmatprep.subr.bf16.mxu0 %v8174_v8 }
 0x5cd   : > { %v2758_v59 = vadd.f32 %v7622_v58, %v9764_v33  ;;  %v2749_v36 = vpop.f32.mrb[81].mxu0  ;;  %v2978_v60 = vpack.c.bf16 %v2953_v9, %v2952_v1  ;;  %7687 = vmatpush3.bf16.msra.mxu0 %v8174_v8 }
 0x5ce   : > { %v2750_v62 = vadd.f32 %v9764_v33, %v2749_v36  ;;  %v7623_v7 = vpop.f32.mrb[82].mxu0  ;;  %7688 = vmatprep.subr.bf16.mxu0 %v8175_v40 }
 0x5cf   : > { %v2830_v55 = vmul.f32 0.5, %v2758_v59  ;;  %v2761_v0 = vadd.f32 %v7623_v7, %v9764_v33  ;;  %v2752_v3 = vpop.f32.mrb[83].mxu0  ;;  %7664 = vmatprep.mubr.bf16.mxu1 %v2978_v60 }
 0x5d0   : > { %v2828_v11 = vmul.f32 0.5, %v2750_v62  ;;  %v2753_v5 = vadd.f32 %v9764_v33, %v2752_v3  ;;  %7665 = vmatmul.mubr.bf16.gmra.mrb[76].mxu1 %v2979_v4 }
 0x5d1   : > { %8589 = vtanh.f32 %v2830_v55  ;;  %v2831_v54 = vmul.f32 0.5, %v2761_v0  ;;  %7689 = vmatpush3.bf16.msra.mxu0 %v8175_v40 }
 0x5d2   : > { %8591 = vtanh.f32 %v2828_v11  ;;  %v2829_v19 = vmul.f32 0.5, %v2753_v5  ;;  %7690 = vmatprep.subr.bf16.mxu0 %v8176_v51 }
 0x5d3   : > { %8593 = vtanh.f32 %v2831_v54 }
 0x5d4   : > { %8595 = vtanh.f32 %v2829_v19  ;;  %v8178_v19 = vld [vmem:[#allocation3 + $0x1a8] sm:$0xff]  }
 0x5d5   : > { %7691 = vmatpush3.bf16.msra.mxu0 %v8176_v51 }
 0x5db   : > { %v8590_v15 = vpop.eup %8589 }
 0x5dc   : > { %v8592_v57 = vpop.eup %8591  ;;  %v2894_v10 = vmul.f32 0.5, %v8590_v15 }
 0x5dd   : > { %v8594_v56 = vpop.eup %8593  ;;  %v2892_v48 = vmul.f32 0.5, %v8592_v57 }
 0x5de   : > { %v8596_v12 = vpop.eup %8595  ;;  %v2926_v14 = vadd.f32 0.5, %v2894_v10  ;;  %v2895_v50 = vmul.f32 0.5, %v8594_v56  ;;  %v8179_v10 = vld [vmem:[#allocation3 + $0x1b0] sm:$0xff]   ;;  %v8180_v56 = vld [vmem:[#allocation3 + $0x1b8] sm:$0xff]  }
 0x5df   : > { %v2924_v13 = vadd.f32 0.5, %v2892_v48  ;;  %v2893_v16 = vmul.f32 0.5, %v8596_v12 }
 0x5e0   : > { %v2927_v18 = vadd.f32 0.5, %v2895_v50  ;;  %v2958_v2 = vmul.f32 %v2926_v14, %v2758_v59  ;;  %v8177_v59 = vld [vmem:[#allocation3 + $0x1a0] sm:$0xff]  }
 0x5e1   : > { %v2925_v6 = vadd.f32 0.5, %v2893_v16  ;;  %v2956_v22 = vmul.f32 %v2924_v13, %v2750_v62  ;;  %7692 = vmatprep.subr.bf16.mxu0 %v8177_v59 }
 0x5e2   : > { %v2959_v20 = vmul.f32 %v2927_v18, %v2761_v0  ;;  %7693 = vmatpush3.bf16.msra.mxu0 %v8177_v59  ;;  %v9801_v59 = vld [vmem:[%s10280_s4 + $0x5] ss:$0 sm:$0xff] }
 0x5e3   : > { %v2957_v63 = vmul.f32 %v2925_v6, %v2753_v5  ;;  %7694 = vmatprep.subr.bf16.mxu0 %v8178_v19 }
 0x5e4   : > { %v7626_v43 = vpop.f32.mrb[84].mxu0  ;;  %v2981_v24 = vpack.c.bf16 %v2959_v20, %v2958_v2 }
 0x5e5   : > { %v2774_v28 = vadd.f32 %v7626_v43, %v9764_v33  ;;  %v2765_v23 = vpop.f32.mrb[85].mxu0  ;;  %v2980_v21 = vpack.c.bf16 %v2957_v63, %v2956_v22 }
 0x5e6   : > { %v2766_v38 = vadd.f32 %v9764_v33, %v2765_v23  ;;  %v7627_v30 = vpop.f32.mrb[86].mxu0  ;;  %7695 = vmatpush3.bf16.msra.mxu0 %v8178_v19 }
 0x5e7   : > { %v2834_v47 = vmul.f32 0.5, %v2774_v28  ;;  %v2777_v25 = vadd.f32 %v7627_v30, %v9764_v33  ;;  %v2768_v31 = vpop.f32.mrb[87].mxu0  ;;  %7668 = vmatprep.mubr.bf16.mxu1 %v2980_v21  ;;  %7696 = vmatprep.subr.bf16.mxu0 %v8179_v10 }
 0x5e8   : > { %v2832_v32 = vmul.f32 0.5, %v2766_v38  ;;  %v2769_v34 = vadd.f32 %v9764_v33, %v2768_v31  ;;  %7669 = vmatmul.mubr.bf16.gmra.mrb[80].mxu1 %v2981_v24 }
 0x5e9   : > { %8597 = vtanh.f32 %v2834_v47  ;;  %v2835_v29 = vmul.f32 0.5, %v2777_v25 }
 0x5ea   : > { %8599 = vtanh.f32 %v2832_v32  ;;  %v2833_v37 = vmul.f32 0.5, %v2769_v34  ;;  %7697 = vmatpush3.bf16.msra.mxu0 %v8179_v10 }
 0x5eb   : > { %8601 = vtanh.f32 %v2835_v29  ;;  %7698 = vmatprep.subr.bf16.mxu0 %v8180_v56 }
 0x5ec   : > { %8603 = vtanh.f32 %v2833_v37 }
 0x5ee   : > { %7699 = vmatpush3.bf16.msra.mxu0 %v8180_v56 }
 0x5f3   : > { %v8598_v27 = vpop.eup %8597 }
 0x5f4   : > { %v8600_v39 = vpop.eup %8599  ;;  %v2898_v17 = vmul.f32 0.5, %v8598_v27 }
 0x5f5   : > { %v8602_v41 = vpop.eup %8601  ;;  %v2896_v44 = vmul.f32 0.5, %v8600_v39 }
 0x5f6   : > { %v8604_v26 = vpop.eup %8603  ;;  %v2930_v35 = vadd.f32 0.5, %v2898_v17  ;;  %v2899_v45 = vmul.f32 0.5, %v8602_v41 }
 0x5f7   : > { %v2928_v61 = vadd.f32 0.5, %v2896_v44  ;;  %v2897_v46 = vmul.f32 0.5, %v8604_v26 }
 0x5f8   : > { %v2931_v49 = vadd.f32 0.5, %v2899_v45  ;;  %v2962_v53 = vmul.f32 %v2930_v35, %v2774_v28 }
 0x5f9   : > { %v2929_v52 = vadd.f32 0.5, %v2897_v46  ;;  %v2960_v1 = vmul.f32 %v2928_v61, %v2766_v38 }
 0x5fa   : > { %v2963_v42 = vmul.f32 %v2931_v49, %v2777_v25 }
 0x5fb   : > { %v2961_v9 = vmul.f32 %v2929_v52, %v2769_v34 }
 0x5fc   : > { %v7630_v58 = vpop.f32.mrb[88].mxu0  ;;  %v2983_v4 = vpack.c.bf16 %v2963_v42, %v2962_v53 }
 0x5fd   : > { %v2790_v36 = vadd.f32 %v7630_v58, %v9764_v33  ;;  %v2781_v60 = vpop.f32.mrb[89].mxu0  ;;  %v2982_v62 = vpack.c.bf16 %v2961_v9, %v2960_v1 }
 0x5fe   : > { %v2782_v7 = vadd.f32 %v9764_v33, %v2781_v60  ;;  %v7631_v55 = vpop.f32.mrb[90].mxu0 }
 0x5ff   : > { %v2838_v0 = vmul.f32 0.5, %v2790_v36  ;;  %v2793_v3 = vadd.f32 %v7631_v55, %v9764_v33  ;;  %v2784_v11 = vpop.f32.mrb[91].mxu0  ;;  %7672 = vmatprep.mubr.bf16.mxu1 %v2982_v62 }
 0x600   : > { %v2836_v5 = vmul.f32 0.5, %v2782_v7  ;;  %v2785_v54 = vadd.f32 %v9764_v33, %v2784_v11  ;;  %7673 = vmatmul.mubr.bf16.gmra.mrb[84].mxu1 %v2983_v4 }
 0x601   : > { %8605 = vtanh.f32 %v2838_v0  ;;  %v2839_v15 = vmul.f32 0.5, %v2793_v3 }
 0x602   : > { %8607 = vtanh.f32 %v2836_v5  ;;  %v2837_v57 = vmul.f32 0.5, %v2785_v54 }
 0x603   : > { %8609 = vtanh.f32 %v2839_v15 }
 0x604   : > { %8611 = vtanh.f32 %v2837_v57 }
 0x60b   : > { %v8606_v48 = vpop.eup %8605 }
 0x60c   : > { %v8608_v12 = vpop.eup %8607  ;;  %v2902_v14 = vmul.f32 0.5, %v8606_v48 }
 0x60d   : > { %v8610_v50 = vpop.eup %8609  ;;  %v2900_v13 = vmul.f32 0.5, %v8608_v12 }
 0x60e   : > { %v8612_v16 = vpop.eup %8611  ;;  %v2934_v18 = vadd.f32 0.5, %v2902_v14  ;;  %v2903_v6 = vmul.f32 0.5, %v8610_v50 }
 0x60f   : > { %v2932_v2 = vadd.f32 0.5, %v2900_v13  ;;  %v2901_v20 = vmul.f32 0.5, %v8612_v16 }
 0x610   : > { %v2935_v22 = vadd.f32 0.5, %v2903_v6  ;;  %v2966_v43 = vmul.f32 %v2934_v18, %v2790_v36 }
 0x611   : > { %v2933_v63 = vadd.f32 0.5, %v2901_v20  ;;  %v2964_v28 = vmul.f32 %v2932_v2, %v2782_v7 }
 0x612   : > { %v2967_v24 = vmul.f32 %v2935_v22, %v2793_v3 }
 0x613   : > { %v2965_v23 = vmul.f32 %v2933_v63, %v2785_v54 }
 0x614   : > { %v7634_v21 = vpop.f32.mrb[92].mxu0  ;;  %v2985_v38 = vpack.c.bf16 %v2967_v24, %v2966_v43 }
 0x615   : > { %v2806_v30 = vadd.f32 %v7634_v21, %v9764_v33  ;;  %v2797_v47 = vpop.f32.mrb[93].mxu0  ;;  %v2984_v25 = vpack.c.bf16 %v2965_v23, %v2964_v28 }
 0x616   : > { %v2798_v31 = vadd.f32 %v9764_v33, %v2797_v47  ;;  %v7635_v32 = vpop.f32.mrb[94].mxu0 }
 0x617   : > { %v2842_v34 = vmul.f32 0.5, %v2806_v30  ;;  %v2809_v29 = vadd.f32 %v7635_v32, %v9764_v33  ;;  %v2800_v37 = vpop.f32.mrb[95].mxu0  ;;  %7676 = vmatprep.mubr.bf16.mxu1 %v2984_v25 }
 0x618   : > { %v2840_v8 = vmul.f32 0.5, %v2798_v31  ;;  %v2801_v27 = vadd.f32 %v9764_v33, %v2800_v37  ;;  %7677 = vmatmul.mubr.bf16.gmra.mrb[88].mxu1 %v2985_v38 }
 0x619   : > { %8613 = vtanh.f32 %v2842_v34  ;;  %v2843_v39 = vmul.f32 0.5, %v2809_v29 }
 0x61a   : > { %8615 = vtanh.f32 %v2840_v8  ;;  %v2841_v17 = vmul.f32 0.5, %v2801_v27 }
 0x61b   : > { %8617 = vtanh.f32 %v2843_v39 }
 0x61c   : > { %8619 = vtanh.f32 %v2841_v17 }
 0x623   : > { %v8614_v40 = vpop.eup %8613 }
 0x624   : > { %v8616_v41 = vpop.eup %8615  ;;  %v2906_v44 = vmul.f32 0.5, %v8614_v40 }
 0x625   : > { %v8618_v26 = vpop.eup %8617  ;;  %v2904_v35 = vmul.f32 0.5, %v8616_v41 }
 0x626   : > { %v8620_v45 = vpop.eup %8619  ;;  %v2938_v61 = vadd.f32 0.5, %v2906_v44  ;;  %v2907_v46 = vmul.f32 0.5, %v8618_v26 }
 0x627   : > { %v2936_v49 = vadd.f32 0.5, %v2904_v35  ;;  %v2905_v51 = vmul.f32 0.5, %v8620_v45 }
 0x628   : > { %v2939_v52 = vadd.f32 0.5, %v2907_v46  ;;  %v2970_v33 = vmul.f32 %v2938_v61, %v2806_v30 }
 0x629   : > { %v2937_v53 = vadd.f32 0.5, %v2905_v51  ;;  %v2968_v1 = vmul.f32 %v2936_v49, %v2798_v31 }
 0x62a   : > { %v2971_v42 = vmul.f32 %v2939_v52, %v2809_v29 }
 0x62b   : > { %v2969_v9 = vmul.f32 %v2937_v53, %v2801_v27 }
 0x62c   : > { %v2987_v58 = vpack.c.bf16 %v2971_v42, %v2970_v33 }
 0x62d   : > { %v2986_v4 = vpack.c.bf16 %v2969_v9, %v2968_v1 }
 0x62f   : > { %7680 = vmatprep.mubr.bf16.mxu1 %v2986_v4 }
 0x630   : > { %7681 = vmatmul.mubr.bf16.gmra.mrb[92].mxu1 %v2987_v58 }
 0x672   : > { %v7654_v36 = vpop.f32.mrb[64].mxu1 }
 0x673   : > { %v3104_v60 = vadd.f32 %v7654_v36, %v9801_v59  ;;  %v3095_v62 = vpop.f32.mrb[65].mxu1 }
 0x674   : > { %v3096_v7 = vadd.f32 %v9801_v59, %v3095_v62  ;;  %v7655_v55 = vpop.f32.mrb[66].mxu1 }
 0x675   : > { %v3224_v0 = vmul.f32 0.5, %v3104_v60  ;;  %v3107_v3 = vadd.f32 %v7655_v55, %v9801_v59  ;;  %v3098_v11 = vpop.f32.mrb[67].mxu1 }
 0x676   : > { %v3222_v5 = vmul.f32 0.5, %v3096_v7  ;;  %v3099_v54 = vadd.f32 %v9801_v59, %v3098_v11 }
 0x677   : > { %8621 = vtanh.f32 %v3224_v0  ;;  %v3225_v19 = vmul.f32 0.5, %v3107_v3 }
 0x678   : > { %8623 = vtanh.f32 %v3222_v5  ;;  %v3223_v15 = vmul.f32 0.5, %v3099_v54 }
 0x679   : > { %8625 = vtanh.f32 %v3225_v19 }
 0x67a   : > { %8627 = vtanh.f32 %v3223_v15  ;;  %v7658_v57 = vpop.f32.mrb[68].mxu1 }
 0x67b   : > { %v3120_v10 = vadd.f32 %v7658_v57, %v9801_v59  ;;  %v3111_v56 = vpop.f32.mrb[69].mxu1 }
 0x67c   : > { %v3112_v48 = vadd.f32 %v9801_v59, %v3111_v56  ;;  %v7659_v12 = vpop.f32.mrb[70].mxu1 }
 0x67d   : > { %v3228_v14 = vmul.f32 0.5, %v3120_v10  ;;  %v3123_v50 = vadd.f32 %v7659_v12, %v9801_v59  ;;  %v3114_v13 = vpop.f32.mrb[71].mxu1 }
 0x67e   : > { %v3226_v16 = vmul.f32 0.5, %v3112_v48  ;;  %v3115_v18 = vadd.f32 %v9801_v59, %v3114_v13 }
 0x67f   : > { %8629 = vtanh.f32 %v3228_v14  ;;  %v3229_v6 = vmul.f32 0.5, %v3123_v50 }
 0x680   : > { %8631 = vtanh.f32 %v3226_v16  ;;  %v3227_v2 = vmul.f32 0.5, %v3115_v18  ;;  %v8181_v16 = vld [vmem:[#allocation3 + $0x1c0] sm:$0xff]  }
 0x681   : > { %v8622_v20 = vpop.eup %8621  ;;  %8633 = vtanh.f32 %v3229_v6  ;;  %7732 = vmatprep.subr.bf16.mxu1 %v8181_v16 }
 0x682   : > { %v8624_v22 = vpop.eup %8623  ;;  %v3288_v63 = vmul.f32 0.5, %v8622_v20  ;;  %8635 = vtanh.f32 %v3227_v2  ;;  %7733 = vmatpush3.bf16.msra.mxu1 %v8181_v16 }
 0x683   : > { %v8626_v43 = vpop.eup %8625  ;;  %v3286_v24 = vmul.f32 0.5, %v8624_v22 }
 0x684   : > { %v8628_v28 = vpop.eup %8627  ;;  %v3320_v23 = vadd.f32 0.5, %v3288_v63  ;;  %v3289_v21 = vmul.f32 0.5, %v8626_v43 }
 0x685   : > { %v3318_v38 = vadd.f32 0.5, %v3286_v24  ;;  %v3287_v30 = vmul.f32 0.5, %v8628_v28 }
 0x686   : > { %v3321_v47 = vadd.f32 0.5, %v3289_v21  ;;  %v3352_v31 = vmul.f32 %v3320_v23, %v3104_v60 }
 0x687   : > { %v3319_v25 = vadd.f32 0.5, %v3287_v30  ;;  %v3350_v29 = vmul.f32 %v3318_v38, %v3096_v7 }
 0x688   : > { %v3353_v32 = vmul.f32 %v3321_v47, %v3107_v3 }
 0x689   : > { %v8630_v34 = vpop.eup %8629  ;;  %v3351_v37 = vmul.f32 %v3319_v25, %v3099_v54 }
 0x68a   : > { %v8632_v8 = vpop.eup %8631  ;;  %v3383_v27 = vpack.c.bf16 %v3353_v32, %v3352_v31  ;;  %v3292_v39 = vmul.f32 0.5, %v8630_v34 }
 0x68b   : > { %v8634_v17 = vpop.eup %8633  ;;  %v3290_v40 = vmul.f32 0.5, %v8632_v8  ;;  %v7662_v41 = vpop.f32.mrb[72].mxu1  ;;  %v3382_v44 = vpack.c.bf16 %v3351_v37, %v3350_v29 }
 0x68c   : > { %v8636_v26 = vpop.eup %8635  ;;  %v3324_v35 = vadd.f32 0.5, %v3292_v39  ;;  %v3293_v45 = vmul.f32 0.5, %v8634_v17  ;;  %v3136_v61 = vadd.f32 %v7662_v41, %v9801_v59  ;;  %v3127_v46 = vpop.f32.mrb[73].mxu1 }
 0x68d   : > { %v3322_v49 = vadd.f32 0.5, %v3290_v40  ;;  %v3291_v51 = vmul.f32 0.5, %v8636_v26  ;;  %v3128_v52 = vadd.f32 %v9801_v59, %v3127_v46  ;;  %v7663_v53 = vpop.f32.mrb[74].mxu1  ;;  %7700 = vmatprep.mubr.bf16.mxu0 %v3382_v44 }
 0x68e   : > { %v3325_v33 = vadd.f32 0.5, %v3293_v45  ;;  %v3232_v42 = vmul.f32 0.5, %v3136_v61  ;;  %v3139_v1 = vadd.f32 %v7663_v53, %v9801_v59  ;;  %v3130_v9 = vpop.f32.mrb[75].mxu1  ;;  %7701 = vmatmul.mubr.bf16.vlgmr.msra.gmra.mrb[96].mxu0 %v3383_v27  ;;  %v3356_v60 = vmul.f32 %v3324_v35, %v3120_v10 }
 0x68f   : > { %v3323_v58 = vadd.f32 0.5, %v3291_v51  ;;  %v3230_v4 = vmul.f32 0.5, %v3128_v52  ;;  %v3131_v36 = vadd.f32 %v9801_v59, %v3130_v9  ;;  %v3354_v55 = vmul.f32 %v3322_v49, %v3112_v48 }
 0x690   : > { %v3357_v62 = vmul.f32 %v3325_v33, %v3123_v50  ;;  %8637 = vtanh.f32 %v3232_v42  ;;  %v3233_v7 = vmul.f32 0.5, %v3139_v1 }
 0x691   : > { %v3355_v0 = vmul.f32 %v3323_v58, %v3115_v18  ;;  %8639 = vtanh.f32 %v3230_v4  ;;  %v3231_v3 = vmul.f32 0.5, %v3131_v36 }
 0x692   : > { %8641 = vtanh.f32 %v3233_v7  ;;  %v3385_v11 = vpack.c.bf16 %v3357_v62, %v3356_v60 }
 0x693   : > { %8643 = vtanh.f32 %v3231_v3  ;;  %v3384_v5 = vpack.c.bf16 %v3355_v0, %v3354_v55 }
 0x695   : > { %7704 = vmatprep.mubr.bf16.mxu0 %v3384_v5 }
 0x696   : > { %7705 = vmatmul.mubr.bf16.gmra.mrb[100].mxu0 %v3385_v11 }
 0x69a   : > { %v8638_v54 = vpop.eup %8637 }
 0x69b   : > { %v8640_v19 = vpop.eup %8639  ;;  %v3296_v15 = vmul.f32 0.5, %v8638_v54 }
 0x69c   : > { %v8642_v57 = vpop.eup %8641  ;;  %v3294_v56 = vmul.f32 0.5, %v8640_v19 }
 0x69d   : > { %v8644_v12 = vpop.eup %8643  ;;  %v3328_v10 = vadd.f32 0.5, %v3296_v15  ;;  %v3297_v14 = vmul.f32 0.5, %v8642_v57 }
 0x69e   : > { %v3326_v50 = vadd.f32 0.5, %v3294_v56  ;;  %v3295_v13 = vmul.f32 0.5, %v8644_v12 }
 0x69f   : > { %v3329_v48 = vadd.f32 0.5, %v3297_v14  ;;  %v3360_v6 = vmul.f32 %v3328_v10, %v3136_v61 }
 0x6a0   : > { %v3327_v18 = vadd.f32 0.5, %v3295_v13  ;;  %v3358_v20 = vmul.f32 %v3326_v50, %v3128_v52 }
 0x6a1   : > { %v3361_v2 = vmul.f32 %v3329_v48, %v3139_v1 }
 0x6a2   : > { %v3359_v22 = vmul.f32 %v3327_v18, %v3131_v36 }
 0x6a3   : > { %v7666_v63 = vpop.f32.mrb[76].mxu1  ;;  %v3387_v43 = vpack.c.bf16 %v3361_v2, %v3360_v6 }
 0x6a4   : > { %v3152_v24 = vadd.f32 %v7666_v63, %v9801_v59  ;;  %v3143_v28 = vpop.f32.mrb[77].mxu1  ;;  %v3386_v23 = vpack.c.bf16 %v3359_v22, %v3358_v20 }
 0x6a5   : > { %v3144_v21 = vadd.f32 %v9801_v59, %v3143_v28  ;;  %v7667_v38 = vpop.f32.mrb[78].mxu1 }
 0x6a6   : > { %v3236_v30 = vmul.f32 0.5, %v3152_v24  ;;  %v3155_v47 = vadd.f32 %v7667_v38, %v9801_v59  ;;  %v3146_v25 = vpop.f32.mrb[79].mxu1  ;;  %7708 = vmatprep.mubr.bf16.mxu0 %v3386_v23 }
 0x6a7   : > { %v3234_v31 = vmul.f32 0.5, %v3144_v21  ;;  %v3147_v32 = vadd.f32 %v9801_v59, %v3146_v25  ;;  %7709 = vmatmul.mubr.bf16.gmra.mrb[104].mxu0 %v3387_v43 }
 0x6a8   : > { %8645 = vtanh.f32 %v3236_v30  ;;  %v3237_v34 = vmul.f32 0.5, %v3155_v47 }
 0x6a9   : > { %8647 = vtanh.f32 %v3234_v31  ;;  %v3235_v29 = vmul.f32 0.5, %v3147_v32 }
 0x6aa   : > { %8649 = vtanh.f32 %v3237_v34 }
 0x6ab   : > { %8651 = vtanh.f32 %v3235_v29 }
 0x6b2   : > { %v8646_v37 = vpop.eup %8645 }
 0x6b3   : > { %v8648_v8 = vpop.eup %8647  ;;  %v3300_v27 = vmul.f32 0.5, %v8646_v37 }
 0x6b4   : > { %v8650_v39 = vpop.eup %8649  ;;  %v3298_v17 = vmul.f32 0.5, %v8648_v8  ;;  %v8183_v8 = vld [vmem:[#allocation3 + $0x1d0] sm:$0xff]  }
 0x6b5   : > { %v8652_v40 = vpop.eup %8651  ;;  %v3332_v41 = vadd.f32 0.5, %v3300_v27  ;;  %v3301_v44 = vmul.f32 0.5, %v8650_v39 }
 0x6b6   : > { %v3330_v26 = vadd.f32 0.5, %v3298_v17  ;;  %v3299_v35 = vmul.f32 0.5, %v8652_v40 }
 0x6b7   : > { %v3333_v45 = vadd.f32 0.5, %v3301_v44  ;;  %v3364_v46 = vmul.f32 %v3332_v41, %v3152_v24 }
 0x6b8   : > { %v3331_v61 = vadd.f32 0.5, %v3299_v35  ;;  %v3362_v51 = vmul.f32 %v3330_v26, %v3144_v21 }
 0x6b9   : > { %v3365_v49 = vmul.f32 %v3333_v45, %v3155_v47  ;;  %v8184_v45 = vld [vmem:[#allocation3 + $0x1d8] sm:$0xff]  }
 0x6ba   : > { %v3363_v52 = vmul.f32 %v3331_v61, %v3147_v32  ;;  %v8182_v32 = vld [vmem:[#allocation3 + $0x1c8] sm:$0xff]  }
 0x6bb   : > { %v7670_v53 = vpop.f32.mrb[80].mxu1  ;;  %v3389_v33 = vpack.c.bf16 %v3365_v49, %v3364_v46  ;;  %7734 = vmatprep.subr.bf16.mxu1 %v8182_v32 }
 0x6bc   : > { %v3168_v42 = vadd.f32 %v7670_v53, %v9801_v59  ;;  %v3159_v1 = vpop.f32.mrb[81].mxu1  ;;  %v3388_v9 = vpack.c.bf16 %v3363_v52, %v3362_v51  ;;  %7735 = vmatpush3.bf16.msra.mxu1 %v8182_v32 }
 0x6bd   : > { %v3160_v58 = vadd.f32 %v9801_v59, %v3159_v1  ;;  %v7671_v4 = vpop.f32.mrb[82].mxu1  ;;  %7736 = vmatprep.subr.bf16.mxu1 %v8183_v8 }
 0x6be   : > { %v3240_v36 = vmul.f32 0.5, %v3168_v42  ;;  %v3171_v60 = vadd.f32 %v7671_v4, %v9801_v59  ;;  %v3162_v62 = vpop.f32.mrb[83].mxu1  ;;  %7712 = vmatprep.mubr.bf16.mxu0 %v3388_v9 }
 0x6bf   : > { %v3238_v7 = vmul.f32 0.5, %v3160_v58  ;;  %v3163_v55 = vadd.f32 %v9801_v59, %v3162_v62  ;;  %7713 = vmatmul.mubr.bf16.gmra.mrb[108].mxu0 %v3389_v33 }
 0x6c0   : > { %8653 = vtanh.f32 %v3240_v36  ;;  %v3241_v0 = vmul.f32 0.5, %v3171_v60  ;;  %7737 = vmatpush3.bf16.msra.mxu1 %v8183_v8 }
 0x6c1   : > { %8655 = vtanh.f32 %v3238_v7  ;;  %v3239_v3 = vmul.f32 0.5, %v3163_v55  ;;  %7738 = vmatprep.subr.bf16.mxu1 %v8184_v45 }
 0x6c2   : > { %8657 = vtanh.f32 %v3241_v0 }
 0x6c3   : > { %8659 = vtanh.f32 %v3239_v3  ;;  %v8186_v3 = vld [vmem:[#allocation3 + $0x1e8] sm:$0xff]  }
 0x6c4   : > { %7739 = vmatpush3.bf16.msra.mxu1 %v8184_v45 }
 0x6ca   : > { %v8654_v11 = vpop.eup %8653 }
 0x6cb   : > { %v8656_v5 = vpop.eup %8655  ;;  %v3304_v54 = vmul.f32 0.5, %v8654_v11 }
 0x6cc   : > { %v8658_v19 = vpop.eup %8657  ;;  %v3302_v15 = vmul.f32 0.5, %v8656_v5 }
 0x6cd   : > { %v8660_v57 = vpop.eup %8659  ;;  %v3336_v56 = vadd.f32 0.5, %v3304_v54  ;;  %v3305_v12 = vmul.f32 0.5, %v8658_v19  ;;  %v8187_v54 = vld [vmem:[#allocation3 + $0x1f0] sm:$0xff]   ;;  %v8188_v19 = vld [vmem:[#allocation3 + $0x1f8] sm:$0xff]  }
 0x6ce   : > { %v3334_v10 = vadd.f32 0.5, %v3302_v15  ;;  %v3303_v14 = vmul.f32 0.5, %v8660_v57 }
 0x6cf   : > { %v3337_v50 = vadd.f32 0.5, %v3305_v12  ;;  %v3368_v48 = vmul.f32 %v3336_v56, %v3168_v42  ;;  %v8185_v42 = vld [vmem:[#allocation3 + $0x1e0] sm:$0xff]  }
 0x6d0   : > { %v3335_v13 = vadd.f32 0.5, %v3303_v14  ;;  %v3366_v18 = vmul.f32 %v3334_v10, %v3160_v58  ;;  %7740 = vmatprep.subr.bf16.mxu1 %v8185_v42 }
 0x6d1   : > { %v3369_v16 = vmul.f32 %v3337_v50, %v3171_v60  ;;  %7741 = vmatpush3.bf16.msra.mxu1 %v8185_v42  ;;  %v9838_v42 = vld [vmem:[%s10280_s4 + $0x6] ss:$0 sm:$0xff] }
 0x6d2   : > { %v3367_v6 = vmul.f32 %v3335_v13, %v3163_v55  ;;  %7742 = vmatprep.subr.bf16.mxu1 %v8186_v3 }
 0x6d3   : > { %v7674_v2 = vpop.f32.mrb[84].mxu1  ;;  %v3391_v20 = vpack.c.bf16 %v3369_v16, %v3368_v48 }
 0x6d4   : > { %v3184_v22 = vadd.f32 %v7674_v2, %v9801_v59  ;;  %v3175_v63 = vpop.f32.mrb[85].mxu1  ;;  %v3390_v43 = vpack.c.bf16 %v3367_v6, %v3366_v18 }
 0x6d5   : > { %v3176_v24 = vadd.f32 %v9801_v59, %v3175_v63  ;;  %v7675_v28 = vpop.f32.mrb[86].mxu1  ;;  %7743 = vmatpush3.bf16.msra.mxu1 %v8186_v3 }
 0x6d6   : > { %v3244_v23 = vmul.f32 0.5, %v3184_v22  ;;  %v3187_v21 = vadd.f32 %v7675_v28, %v9801_v59  ;;  %v3178_v38 = vpop.f32.mrb[87].mxu1  ;;  %7716 = vmatprep.mubr.bf16.mxu0 %v3390_v43  ;;  %7744 = vmatprep.subr.bf16.mxu1 %v8187_v54 }
 0x6d7   : > { %v3242_v30 = vmul.f32 0.5, %v3176_v24  ;;  %v3179_v47 = vadd.f32 %v9801_v59, %v3178_v38  ;;  %7717 = vmatmul.mubr.bf16.gmra.mrb[112].mxu0 %v3391_v20 }
 0x6d8   : > { %8661 = vtanh.f32 %v3244_v23  ;;  %v3245_v25 = vmul.f32 0.5, %v3187_v21 }
 0x6d9   : > { %8663 = vtanh.f32 %v3242_v30  ;;  %v3243_v31 = vmul.f32 0.5, %v3179_v47  ;;  %7745 = vmatpush3.bf16.msra.mxu1 %v8187_v54 }
 0x6da   : > { %8665 = vtanh.f32 %v3245_v25  ;;  %7746 = vmatprep.subr.bf16.mxu1 %v8188_v19 }
 0x6db   : > { %8667 = vtanh.f32 %v3243_v31 }
 0x6dd   : > { %7747 = vmatpush3.bf16.msra.mxu1 %v8188_v19 }
 0x6e2   : > { %v8662_v34 = vpop.eup %8661 }
 0x6e3   : > { %v8664_v29 = vpop.eup %8663  ;;  %v3308_v37 = vmul.f32 0.5, %v8662_v34 }
 0x6e4   : > { %v8666_v27 = vpop.eup %8665  ;;  %v3306_v39 = vmul.f32 0.5, %v8664_v29 }
 0x6e5   : > { %v8668_v17 = vpop.eup %8667  ;;  %v3340_v40 = vadd.f32 0.5, %v3308_v37  ;;  %v3309_v41 = vmul.f32 0.5, %v8666_v27 }
 0x6e6   : > { %v3338_v44 = vadd.f32 0.5, %v3306_v39  ;;  %v3307_v26 = vmul.f32 0.5, %v8668_v17 }
 0x6e7   : > { %v3341_v35 = vadd.f32 0.5, %v3309_v41  ;;  %v3372_v46 = vmul.f32 %v3340_v40, %v3184_v22 }
 0x6e8   : > { %v3339_v61 = vadd.f32 0.5, %v3307_v26  ;;  %v3370_v51 = vmul.f32 %v3338_v44, %v3176_v24 }
 0x6e9   : > { %v3373_v49 = vmul.f32 %v3341_v35, %v3187_v21 }
 0x6ea   : > { %v3371_v52 = vmul.f32 %v3339_v61, %v3179_v47 }
 0x6eb   : > { %v7678_v53 = vpop.f32.mrb[88].mxu1  ;;  %v3393_v33 = vpack.c.bf16 %v3373_v49, %v3372_v46 }
 0x6ec   : > { %v3200_v1 = vadd.f32 %v7678_v53, %v9801_v59  ;;  %v3191_v9 = vpop.f32.mrb[89].mxu1  ;;  %v3392_v58 = vpack.c.bf16 %v3371_v52, %v3370_v51 }
 0x6ed   : > { %v3192_v4 = vadd.f32 %v9801_v59, %v3191_v9  ;;  %v7679_v36 = vpop.f32.mrb[90].mxu1 }
 0x6ee   : > { %v3248_v60 = vmul.f32 0.5, %v3200_v1  ;;  %v3203_v62 = vadd.f32 %v7679_v36, %v9801_v59  ;;  %v3194_v7 = vpop.f32.mrb[91].mxu1  ;;  %7720 = vmatprep.mubr.bf16.mxu0 %v3392_v58 }
 0x6ef   : > { %v3246_v55 = vmul.f32 0.5, %v3192_v4  ;;  %v3195_v0 = vadd.f32 %v9801_v59, %v3194_v7  ;;  %7721 = vmatmul.mubr.bf16.gmra.mrb[116].mxu0 %v3393_v33 }
 0x6f0   : > { %8669 = vtanh.f32 %v3248_v60  ;;  %v3249_v11 = vmul.f32 0.5, %v3203_v62 }
 0x6f1   : > { %8671 = vtanh.f32 %v3246_v55  ;;  %v3247_v5 = vmul.f32 0.5, %v3195_v0 }
 0x6f2   : > { %8673 = vtanh.f32 %v3249_v11 }
 0x6f3   : > { %8675 = vtanh.f32 %v3247_v5 }
 0x6fa   : > { %v8670_v15 = vpop.eup %8669 }
 0x6fb   : > { %v8672_v57 = vpop.eup %8671  ;;  %v3312_v56 = vmul.f32 0.5, %v8670_v15 }
 0x6fc   : > { %v8674_v12 = vpop.eup %8673  ;;  %v3310_v10 = vmul.f32 0.5, %v8672_v57 }
 0x6fd   : > { %v8676_v14 = vpop.eup %8675  ;;  %v3344_v50 = vadd.f32 0.5, %v3312_v56  ;;  %v3313_v13 = vmul.f32 0.5, %v8674_v12 }
 0x6fe   : > { %v3342_v48 = vadd.f32 0.5, %v3310_v10  ;;  %v3311_v16 = vmul.f32 0.5, %v8676_v14 }
 0x6ff   : > { %v3345_v18 = vadd.f32 0.5, %v3313_v13  ;;  %v3376_v2 = vmul.f32 %v3344_v50, %v3200_v1 }
 0x700   : > { %v3343_v6 = vadd.f32 0.5, %v3311_v16  ;;  %v3374_v22 = vmul.f32 %v3342_v48, %v3192_v4 }
 0x701   : > { %v3377_v20 = vmul.f32 %v3345_v18, %v3203_v62 }
 0x702   : > { %v3375_v63 = vmul.f32 %v3343_v6, %v3195_v0 }
 0x703   : > { %v7682_v43 = vpop.f32.mrb[92].mxu1  ;;  %v3395_v24 = vpack.c.bf16 %v3377_v20, %v3376_v2 }
 0x704   : > { %v3216_v28 = vadd.f32 %v7682_v43, %v9801_v59  ;;  %v3207_v23 = vpop.f32.mrb[93].mxu1  ;;  %v3394_v21 = vpack.c.bf16 %v3375_v63, %v3374_v22 }
 0x705   : > { %v3208_v38 = vadd.f32 %v9801_v59, %v3207_v23  ;;  %v7683_v30 = vpop.f32.mrb[94].mxu1 }
 0x706   : > { %v3252_v47 = vmul.f32 0.5, %v3216_v28  ;;  %v3219_v25 = vadd.f32 %v7683_v30, %v9801_v59  ;;  %v3210_v31 = vpop.f32.mrb[95].mxu1  ;;  %7724 = vmatprep.mubr.bf16.mxu0 %v3394_v21 }
 0x707   : > { %v3250_v32 = vmul.f32 0.5, %v3208_v38  ;;  %v3211_v34 = vadd.f32 %v9801_v59, %v3210_v31  ;;  %7725 = vmatmul.mubr.bf16.gmra.mrb[120].mxu0 %v3395_v24 }
 0x708   : > { %8677 = vtanh.f32 %v3252_v47  ;;  %v3253_v29 = vmul.f32 0.5, %v3219_v25 }
 0x709   : > { %8679 = vtanh.f32 %v3250_v32  ;;  %v3251_v37 = vmul.f32 0.5, %v3211_v34 }
 0x70a   : > { %8681 = vtanh.f32 %v3253_v29 }
 0x70b   : > { %8683 = vtanh.f32 %v3251_v37 }
 0x712   : > { %v8678_v8 = vpop.eup %8677 }
 0x713   : > { %v8680_v27 = vpop.eup %8679  ;;  %v3316_v39 = vmul.f32 0.5, %v8678_v8 }
 0x714   : > { %v8682_v17 = vpop.eup %8681  ;;  %v3314_v40 = vmul.f32 0.5, %v8680_v27 }
 0x715   : > { %v8684_v41 = vpop.eup %8683  ;;  %v3348_v44 = vadd.f32 0.5, %v3316_v39  ;;  %v3317_v26 = vmul.f32 0.5, %v8682_v17 }
 0x716   : > { %v3346_v35 = vadd.f32 0.5, %v3314_v40  ;;  %v3315_v45 = vmul.f32 0.5, %v8684_v41 }
 0x717   : > { %v3349_v61 = vadd.f32 0.5, %v3317_v26  ;;  %v3380_v59 = vmul.f32 %v3348_v44, %v3216_v28 }
 0x718   : > { %v3347_v46 = vadd.f32 0.5, %v3315_v45  ;;  %v3378_v51 = vmul.f32 %v3346_v35, %v3208_v38 }
 0x719   : > { %v3381_v49 = vmul.f32 %v3349_v61, %v3219_v25 }
 0x71a   : > { %v3379_v52 = vmul.f32 %v3347_v46, %v3211_v34 }
 0x71b   : > { %v3397_v53 = vpack.c.bf16 %v3381_v49, %v3380_v59 }
 0x71c   : > { %v3396_v33 = vpack.c.bf16 %v3379_v52, %v3378_v51 }
 0x71e   : > { %7728 = vmatprep.mubr.bf16.mxu0 %v3396_v33 }
 0x71f   : > { %7729 = vmatmul.mubr.bf16.gmra.mrb[124].mxu0 %v3397_v53 }
 0x761   : > { %v7702_v1 = vpop.f32.mrb[96].mxu0 }
 0x762   : > { %v3514_v9 = vadd.f32 %v7702_v1, %v9838_v42  ;;  %v3505_v58 = vpop.f32.mrb[97].mxu0 }
 0x763   : > { %v3506_v4 = vadd.f32 %v9838_v42, %v3505_v58  ;;  %v7703_v36 = vpop.f32.mrb[98].mxu0 }
 0x764   : > { %v3634_v60 = vmul.f32 0.5, %v3514_v9  ;;  %v3517_v62 = vadd.f32 %v7703_v36, %v9838_v42  ;;  %v3508_v7 = vpop.f32.mrb[99].mxu0 }
 0x765   : > { %v3632_v55 = vmul.f32 0.5, %v3506_v4  ;;  %v3509_v0 = vadd.f32 %v9838_v42, %v3508_v7 }
 0x766   : > { %8685 = vtanh.f32 %v3634_v60  ;;  %v3635_v3 = vmul.f32 0.5, %v3517_v62 }
 0x767   : > { %8687 = vtanh.f32 %v3632_v55  ;;  %v3633_v11 = vmul.f32 0.5, %v3509_v0 }
 0x768   : > { %8689 = vtanh.f32 %v3635_v3 }
 0x769   : > { %8691 = vtanh.f32 %v3633_v11  ;;  %v7706_v5 = vpop.f32.mrb[100].mxu0 }
 0x76a   : > { %v3530_v54 = vadd.f32 %v7706_v5, %v9838_v42  ;;  %v3521_v19 = vpop.f32.mrb[101].mxu0 }
 0x76b   : > { %v3522_v15 = vadd.f32 %v9838_v42, %v3521_v19  ;;  %v7707_v57 = vpop.f32.mrb[102].mxu0 }
 0x76c   : > { %v3638_v56 = vmul.f32 0.5, %v3530_v54  ;;  %v3533_v12 = vadd.f32 %v7707_v57, %v9838_v42  ;;  %v3524_v10 = vpop.f32.mrb[103].mxu0 }
 0x76d   : > { %v3636_v14 = vmul.f32 0.5, %v3522_v15  ;;  %v3525_v50 = vadd.f32 %v9838_v42, %v3524_v10 }
 0x76e   : > { %8693 = vtanh.f32 %v3638_v56  ;;  %v3639_v13 = vmul.f32 0.5, %v3533_v12 }
 0x76f   : > { %8695 = vtanh.f32 %v3636_v14  ;;  %v3637_v48 = vmul.f32 0.5, %v3525_v50  ;;  %v8189_v14 = vld [vmem:[#allocation3 + $0x200] sm:$0xff]  }
 0x770   : > { %v8686_v16 = vpop.eup %8685  ;;  %8697 = vtanh.f32 %v3639_v13  ;;  %7780 = vmatprep.subr.bf16.mxu0 %v8189_v14 }
 0x771   : > { %v8688_v18 = vpop.eup %8687  ;;  %v3698_v6 = vmul.f32 0.5, %v8686_v16  ;;  %8699 = vtanh.f32 %v3637_v48  ;;  %7781 = vmatpush3.bf16.msra.mxu0 %v8189_v14 }
 0x772   : > { %v8690_v2 = vpop.eup %8689  ;;  %v3696_v20 = vmul.f32 0.5, %v8688_v18 }
 0x773   : > { %v8692_v22 = vpop.eup %8691  ;;  %v3730_v63 = vadd.f32 0.5, %v3698_v6  ;;  %v3699_v43 = vmul.f32 0.5, %v8690_v2 }
 0x774   : > { %v3728_v24 = vadd.f32 0.5, %v3696_v20  ;;  %v3697_v28 = vmul.f32 0.5, %v8692_v22 }
 0x775   : > { %v3731_v23 = vadd.f32 0.5, %v3699_v43  ;;  %v3762_v38 = vmul.f32 %v3730_v63, %v3514_v9 }
 0x776   : > { %v3729_v21 = vadd.f32 0.5, %v3697_v28  ;;  %v3760_v25 = vmul.f32 %v3728_v24, %v3506_v4 }
 0x777   : > { %v3763_v30 = vmul.f32 %v3731_v23, %v3517_v62 }
 0x778   : > { %v8694_v47 = vpop.eup %8693  ;;  %v3761_v31 = vmul.f32 %v3729_v21, %v3509_v0 }
 0x779   : > { %v8696_v32 = vpop.eup %8695  ;;  %v3793_v34 = vpack.c.bf16 %v3763_v30, %v3762_v38  ;;  %v3702_v29 = vmul.f32 0.5, %v8694_v47 }
 0x77a   : > { %v8698_v37 = vpop.eup %8697  ;;  %v3700_v8 = vmul.f32 0.5, %v8696_v32  ;;  %v7710_v27 = vpop.f32.mrb[104].mxu0  ;;  %v3792_v39 = vpack.c.bf16 %v3761_v31, %v3760_v25 }
 0x77b   : > { %v8700_v17 = vpop.eup %8699  ;;  %v3734_v40 = vadd.f32 0.5, %v3702_v29  ;;  %v3703_v41 = vmul.f32 0.5, %v8698_v37  ;;  %v3546_v44 = vadd.f32 %v7710_v27, %v9838_v42  ;;  %v3537_v26 = vpop.f32.mrb[105].mxu0 }
 0x77c   : > { %v3732_v35 = vadd.f32 0.5, %v3700_v8  ;;  %v3701_v45 = vmul.f32 0.5, %v8700_v17  ;;  %v3538_v61 = vadd.f32 %v9838_v42, %v3537_v26  ;;  %v7711_v46 = vpop.f32.mrb[106].mxu0  ;;  %7748 = vmatprep.mubr.bf16.mxu1 %v3792_v39 }
 0x77d   : > { %v3735_v59 = vadd.f32 0.5, %v3703_v41  ;;  %v3642_v49 = vmul.f32 0.5, %v3546_v44  ;;  %v3549_v51 = vadd.f32 %v7711_v46, %v9838_v42  ;;  %v3540_v52 = vpop.f32.mrb[107].mxu0  ;;  %7749 = vmatmul.mubr.bf16.vlgmr.msra.gmra.mrb[96].mxu1 %v3793_v34  ;;  %v3766_v9 = vmul.f32 %v3734_v40, %v3530_v54 }
 0x77e   : > { %v3733_v53 = vadd.f32 0.5, %v3701_v45  ;;  %v3640_v33 = vmul.f32 0.5, %v3538_v61  ;;  %v3541_v1 = vadd.f32 %v9838_v42, %v3540_v52  ;;  %v3764_v36 = vmul.f32 %v3732_v35, %v3522_v15 }
 0x77f   : > { %v3767_v58 = vmul.f32 %v3735_v59, %v3533_v12  ;;  %8701 = vtanh.f32 %v3642_v49  ;;  %v3643_v4 = vmul.f32 0.5, %v3549_v51 }
 0x780   : > { %v3765_v60 = vmul.f32 %v3733_v53, %v3525_v50  ;;  %8703 = vtanh.f32 %v3640_v33  ;;  %v3641_v62 = vmul.f32 0.5, %v3541_v1 }
 0x781   : > { %8705 = vtanh.f32 %v3643_v4  ;;  %v3795_v7 = vpack.c.bf16 %v3767_v58, %v3766_v9 }
 0x782   : > { %8707 = vtanh.f32 %v3641_v62  ;;  %v3794_v55 = vpack.c.bf16 %v3765_v60, %v3764_v36 }
 0x784   : > { %7752 = vmatprep.mubr.bf16.mxu1 %v3794_v55 }
 0x785   : > { %7753 = vmatmul.mubr.bf16.gmra.mrb[100].mxu1 %v3795_v7 }
 0x789   : > { %v8702_v0 = vpop.eup %8701 }
 0x78a   : > { %v8704_v3 = vpop.eup %8703  ;;  %v3706_v11 = vmul.f32 0.5, %v8702_v0 }
 0x78b   : > { %v8706_v5 = vpop.eup %8705  ;;  %v3704_v19 = vmul.f32 0.5, %v8704_v3 }
 0x78c   : > { %v8708_v57 = vpop.eup %8707  ;;  %v3738_v54 = vadd.f32 0.5, %v3706_v11  ;;  %v3707_v56 = vmul.f32 0.5, %v8706_v5 }
 0x78d   : > { %v3736_v12 = vadd.f32 0.5, %v3704_v19  ;;  %v3705_v10 = vmul.f32 0.5, %v8708_v57 }
 0x78e   : > { %v3739_v15 = vadd.f32 0.5, %v3707_v56  ;;  %v3770_v13 = vmul.f32 %v3738_v54, %v3546_v44 }
 0x78f   : > { %v3737_v50 = vadd.f32 0.5, %v3705_v10  ;;  %v3768_v16 = vmul.f32 %v3736_v12, %v3538_v61 }
 0x790   : > { %v3771_v48 = vmul.f32 %v3739_v15, %v3549_v51 }
 0x791   : > { %v3769_v18 = vmul.f32 %v3737_v50, %v3541_v1 }
 0x792   : > { %v7714_v6 = vpop.f32.mrb[108].mxu0  ;;  %v3797_v2 = vpack.c.bf16 %v3771_v48, %v3770_v13 }
 0x793   : > { %v3562_v20 = vadd.f32 %v7714_v6, %v9838_v42  ;;  %v3553_v22 = vpop.f32.mrb[109].mxu0  ;;  %v3796_v63 = vpack.c.bf16 %v3769_v18, %v3768_v16 }
 0x794   : > { %v3554_v43 = vadd.f32 %v9838_v42, %v3553_v22  ;;  %v7715_v24 = vpop.f32.mrb[110].mxu0 }
 0x795   : > { %v3646_v28 = vmul.f32 0.5, %v3562_v20  ;;  %v3565_v23 = vadd.f32 %v7715_v24, %v9838_v42  ;;  %v3556_v21 = vpop.f32.mrb[111].mxu0  ;;  %7756 = vmatprep.mubr.bf16.mxu1 %v3796_v63 }
 0x796   : > { %v3644_v38 = vmul.f32 0.5, %v3554_v43  ;;  %v3557_v30 = vadd.f32 %v9838_v42, %v3556_v21  ;;  %7757 = vmatmul.mubr.bf16.gmra.mrb[104].mxu1 %v3797_v2 }
 0x797   : > { %8709 = vtanh.f32 %v3646_v28  ;;  %v3647_v47 = vmul.f32 0.5, %v3565_v23 }
 0x798   : > { %8711 = vtanh.f32 %v3644_v38  ;;  %v3645_v25 = vmul.f32 0.5, %v3557_v30 }
 0x799   : > { %8713 = vtanh.f32 %v3647_v47 }
 0x79a   : > { %8715 = vtanh.f32 %v3645_v25 }
 0x7a1   : > { %v8710_v31 = vpop.eup %8709 }
 0x7a2   : > { %v8712_v32 = vpop.eup %8711  ;;  %v3710_v34 = vmul.f32 0.5, %v8710_v31 }
 0x7a3   : > { %v8714_v29 = vpop.eup %8713  ;;  %v3708_v37 = vmul.f32 0.5, %v8712_v32  ;;  %v8191_v32 = vld [vmem:[#allocation3 + $0x210] sm:$0xff]  }
 0x7a4   : > { %v8716_v8 = vpop.eup %8715  ;;  %v3742_v27 = vadd.f32 0.5, %v3710_v34  ;;  %v3711_v39 = vmul.f32 0.5, %v8714_v29 }
 0x7a5   : > { %v3740_v17 = vadd.f32 0.5, %v3708_v37  ;;  %v3709_v40 = vmul.f32 0.5, %v8716_v8 }
 0x7a6   : > { %v3743_v41 = vadd.f32 0.5, %v3711_v39  ;;  %v3774_v26 = vmul.f32 %v3742_v27, %v3562_v20 }
 0x7a7   : > { %v3741_v44 = vadd.f32 0.5, %v3709_v40  ;;  %v3772_v45 = vmul.f32 %v3740_v17, %v3554_v43 }
 0x7a8   : > { %v3775_v35 = vmul.f32 %v3743_v41, %v3565_v23  ;;  %v8192_v41 = vld [vmem:[#allocation3 + $0x218] sm:$0xff]  }
 0x7a9   : > { %v3773_v61 = vmul.f32 %v3741_v44, %v3557_v30  ;;  %v8190_v30 = vld [vmem:[#allocation3 + $0x208] sm:$0xff]  }
 0x7aa   : > { %v7718_v46 = vpop.f32.mrb[112].mxu0  ;;  %v3799_v59 = vpack.c.bf16 %v3775_v35, %v3774_v26  ;;  %7782 = vmatprep.subr.bf16.mxu0 %v8190_v30 }
 0x7ab   : > { %v3578_v49 = vadd.f32 %v7718_v46, %v9838_v42  ;;  %v3569_v51 = vpop.f32.mrb[113].mxu0  ;;  %v3798_v52 = vpack.c.bf16 %v3773_v61, %v3772_v45  ;;  %7783 = vmatpush3.bf16.msra.mxu0 %v8190_v30 }
 0x7ac   : > { %v3570_v53 = vadd.f32 %v9838_v42, %v3569_v51  ;;  %v7719_v33 = vpop.f32.mrb[114].mxu0  ;;  %7784 = vmatprep.subr.bf16.mxu0 %v8191_v32 }
 0x7ad   : > { %v3650_v1 = vmul.f32 0.5, %v3578_v49  ;;  %v3581_v9 = vadd.f32 %v7719_v33, %v9838_v42  ;;  %v3572_v58 = vpop.f32.mrb[115].mxu0  ;;  %7760 = vmatprep.mubr.bf16.mxu1 %v3798_v52 }
 0x7ae   : > { %v3648_v4 = vmul.f32 0.5, %v3570_v53  ;;  %v3573_v36 = vadd.f32 %v9838_v42, %v3572_v58  ;;  %7761 = vmatmul.mubr.bf16.gmra.mrb[108].mxu1 %v3799_v59 }
 0x7af   : > { %8717 = vtanh.f32 %v3650_v1  ;;  %v3651_v60 = vmul.f32 0.5, %v3581_v9  ;;  %7785 = vmatpush3.bf16.msra.mxu0 %v8191_v32 }
 0x7b0   : > { %8719 = vtanh.f32 %v3648_v4  ;;  %v3649_v62 = vmul.f32 0.5, %v3573_v36  ;;  %7786 = vmatprep.subr.bf16.mxu0 %v8192_v41 }
 0x7b1   : > { %8721 = vtanh.f32 %v3651_v60 }
 0x7b2   : > { %8723 = vtanh.f32 %v3649_v62  ;;  %v8194_v62 = vld [vmem:[#allocation3 + $0x228] sm:$0xff]  }
 0x7b3   : > { %7787 = vmatpush3.bf16.msra.mxu0 %v8192_v41 }
 0x7b9   : > { %v8718_v7 = vpop.eup %8717 }
 0x7ba   : > { %v8720_v55 = vpop.eup %8719  ;;  %v3714_v0 = vmul.f32 0.5, %v8718_v7 }
 0x7bb   : > { %v8722_v3 = vpop.eup %8721  ;;  %v3712_v11 = vmul.f32 0.5, %v8720_v55 }
 0x7bc   : > { %v8724_v5 = vpop.eup %8723  ;;  %v3746_v19 = vadd.f32 0.5, %v3714_v0  ;;  %v3715_v57 = vmul.f32 0.5, %v8722_v3  ;;  %v8195_v0 = vld [vmem:[#allocation3 + $0x230] sm:$0xff]   ;;  %v8196_v3 = vld [vmem:[#allocation3 + $0x238] sm:$0xff]  }
 0x7bd   : > { %v3744_v54 = vadd.f32 0.5, %v3712_v11  ;;  %v3713_v56 = vmul.f32 0.5, %v8724_v5 }
 0x7be   : > { %v3747_v12 = vadd.f32 0.5, %v3715_v57  ;;  %v3778_v15 = vmul.f32 %v3746_v19, %v3578_v49  ;;  %v8193_v49 = vld [vmem:[#allocation3 + $0x220] sm:$0xff]  }
 0x7bf   : > { %v3745_v10 = vadd.f32 0.5, %v3713_v56  ;;  %v3776_v50 = vmul.f32 %v3744_v54, %v3570_v53  ;;  %7788 = vmatprep.subr.bf16.mxu0 %v8193_v49 }
 0x7c0   : > { %v3779_v14 = vmul.f32 %v3747_v12, %v3581_v9  ;;  %7789 = vmatpush3.bf16.msra.mxu0 %v8193_v49  ;;  %v9875_v49 = vld [vmem:[%s10280_s4 + $0x7] ss:$0 sm:$0xff] }
 0x7c1   : > { %v3777_v13 = vmul.f32 %v3745_v10, %v3573_v36  ;;  %7790 = vmatprep.subr.bf16.mxu0 %v8194_v62 }
 0x7c2   : > { %v7722_v48 = vpop.f32.mrb[116].mxu0  ;;  %v3801_v16 = vpack.c.bf16 %v3779_v14, %v3778_v15 }
 0x7c3   : > { %v3594_v18 = vadd.f32 %v7722_v48, %v9838_v42  ;;  %v3585_v6 = vpop.f32.mrb[117].mxu0  ;;  %v3800_v2 = vpack.c.bf16 %v3777_v13, %v3776_v50 }
 0x7c4   : > { %v3586_v20 = vadd.f32 %v9838_v42, %v3585_v6  ;;  %v7723_v22 = vpop.f32.mrb[118].mxu0  ;;  %7791 = vmatpush3.bf16.msra.mxu0 %v8194_v62 }
 0x7c5   : > { %v3654_v63 = vmul.f32 0.5, %v3594_v18  ;;  %v3597_v43 = vadd.f32 %v7723_v22, %v9838_v42  ;;  %v3588_v24 = vpop.f32.mrb[119].mxu0  ;;  %7764 = vmatprep.mubr.bf16.mxu1 %v3800_v2  ;;  %7792 = vmatprep.subr.bf16.mxu0 %v8195_v0 }
 0x7c6   : > { %v3652_v28 = vmul.f32 0.5, %v3586_v20  ;;  %v3589_v23 = vadd.f32 %v9838_v42, %v3588_v24  ;;  %7765 = vmatmul.mubr.bf16.gmra.mrb[112].mxu1 %v3801_v16 }
 0x7c7   : > { %8725 = vtanh.f32 %v3654_v63  ;;  %v3655_v21 = vmul.f32 0.5, %v3597_v43 }
 0x7c8   : > { %8727 = vtanh.f32 %v3652_v28  ;;  %v3653_v38 = vmul.f32 0.5, %v3589_v23  ;;  %7793 = vmatpush3.bf16.msra.mxu0 %v8195_v0 }
 0x7c9   : > { %8729 = vtanh.f32 %v3655_v21  ;;  %7794 = vmatprep.subr.bf16.mxu0 %v8196_v3 }
 0x7ca   : > { %8731 = vtanh.f32 %v3653_v38 }
 0x7cc   : > { %7795 = vmatpush3.bf16.msra.mxu0 %v8196_v3 }
 0x7d1   : > { %v8726_v47 = vpop.eup %8725 }
 0x7d2   : > { %v8728_v25 = vpop.eup %8727  ;;  %v3718_v31 = vmul.f32 0.5, %v8726_v47 }
 0x7d3   : > { %v8730_v34 = vpop.eup %8729  ;;  %v3716_v29 = vmul.f32 0.5, %v8728_v25 }
 0x7d4   : > { %v8732_v37 = vpop.eup %8731  ;;  %v3750_v8 = vadd.f32 0.5, %v3718_v31  ;;  %v3719_v27 = vmul.f32 0.5, %v8730_v34 }
 0x7d5   : > { %v3748_v39 = vadd.f32 0.5, %v3716_v29  ;;  %v3717_v17 = vmul.f32 0.5, %v8732_v37 }
 0x7d6   : > { %v3751_v40 = vadd.f32 0.5, %v3719_v27  ;;  %v3782_v26 = vmul.f32 %v3750_v8, %v3594_v18 }
 0x7d7   : > { %v3749_v44 = vadd.f32 0.5, %v3717_v17  ;;  %v3780_v45 = vmul.f32 %v3748_v39, %v3586_v20 }
 0x7d8   : > { %v3783_v35 = vmul.f32 %v3751_v40, %v3597_v43 }
 0x7d9   : > { %v3781_v61 = vmul.f32 %v3749_v44, %v3589_v23 }
 0x7da   : > { %v7726_v46 = vpop.f32.mrb[120].mxu0  ;;  %v3803_v59 = vpack.c.bf16 %v3783_v35, %v3782_v26 }
 0x7db   : > { %v3610_v51 = vadd.f32 %v7726_v46, %v9838_v42  ;;  %v3601_v52 = vpop.f32.mrb[121].mxu0  ;;  %v3802_v53 = vpack.c.bf16 %v3781_v61, %v3780_v45 }
 0x7dc   : > { %v3602_v33 = vadd.f32 %v9838_v42, %v3601_v52  ;;  %v7727_v1 = vpop.f32.mrb[122].mxu0 }
 0x7dd   : > { %v3658_v9 = vmul.f32 0.5, %v3610_v51  ;;  %v3613_v58 = vadd.f32 %v7727_v1, %v9838_v42  ;;  %v3604_v4 = vpop.f32.mrb[123].mxu0  ;;  %7768 = vmatprep.mubr.bf16.mxu1 %v3802_v53 }
 0x7de   : > { %v3656_v36 = vmul.f32 0.5, %v3602_v33  ;;  %v3605_v60 = vadd.f32 %v9838_v42, %v3604_v4  ;;  %7769 = vmatmul.mubr.bf16.gmra.mrb[116].mxu1 %v3803_v59 }
 0x7df   : > { %8733 = vtanh.f32 %v3658_v9  ;;  %v3659_v7 = vmul.f32 0.5, %v3613_v58 }
 0x7e0   : > { %8735 = vtanh.f32 %v3656_v36  ;;  %v3657_v55 = vmul.f32 0.5, %v3605_v60 }
 0x7e1   : > { %8737 = vtanh.f32 %v3659_v7 }
 0x7e2   : > { %8739 = vtanh.f32 %v3657_v55 }
 0x7e9   : > { %v8734_v11 = vpop.eup %8733 }
 0x7ea   : > { %v8736_v5 = vpop.eup %8735  ;;  %v3722_v19 = vmul.f32 0.5, %v8734_v11 }
 0x7eb   : > { %v8738_v57 = vpop.eup %8737  ;;  %v3720_v54 = vmul.f32 0.5, %v8736_v5 }
 0x7ec   : > { %v8740_v56 = vpop.eup %8739  ;;  %v3754_v12 = vadd.f32 0.5, %v3722_v19  ;;  %v3723_v10 = vmul.f32 0.5, %v8738_v57 }
 0x7ed   : > { %v3752_v15 = vadd.f32 0.5, %v3720_v54  ;;  %v3721_v14 = vmul.f32 0.5, %v8740_v56 }
 0x7ee   : > { %v3755_v50 = vadd.f32 0.5, %v3723_v10  ;;  %v3786_v48 = vmul.f32 %v3754_v12, %v3610_v51 }
 0x7ef   : > { %v3753_v13 = vadd.f32 0.5, %v3721_v14  ;;  %v3784_v18 = vmul.f32 %v3752_v15, %v3602_v33 }
 0x7f0   : > { %v3787_v16 = vmul.f32 %v3755_v50, %v3613_v58 }
 0x7f1   : > { %v3785_v6 = vmul.f32 %v3753_v13, %v3605_v60 }
 0x7f2   : > { %v7730_v2 = vpop.f32.mrb[124].mxu0  ;;  %v3805_v20 = vpack.c.bf16 %v3787_v16, %v3786_v48 }
 0x7f3   : > { %v3626_v22 = vadd.f32 %v7730_v2, %v9838_v42  ;;  %v3617_v63 = vpop.f32.mrb[125].mxu0  ;;  %v3804_v43 = vpack.c.bf16 %v3785_v6, %v3784_v18 }
 0x7f4   : > { %v3618_v24 = vadd.f32 %v9838_v42, %v3617_v63  ;;  %v7731_v28 = vpop.f32.mrb[126].mxu0 }
 0x7f5   : > { %v3662_v23 = vmul.f32 0.5, %v3626_v22  ;;  %v3629_v21 = vadd.f32 %v7731_v28, %v9838_v42  ;;  %v3620_v38 = vpop.f32.mrb[127].mxu0  ;;  %7772 = vmatprep.mubr.bf16.mxu1 %v3804_v43 }
 0x7f6   : > { %v3660_v30 = vmul.f32 0.5, %v3618_v24  ;;  %v3621_v47 = vadd.f32 %v9838_v42, %v3620_v38  ;;  %7773 = vmatmul.mubr.bf16.gmra.mrb[120].mxu1 %v3805_v20 }
 0x7f7   : > { %8741 = vtanh.f32 %v3662_v23  ;;  %v3663_v25 = vmul.f32 0.5, %v3629_v21 }
 0x7f8   : > { %8743 = vtanh.f32 %v3660_v30  ;;  %v3661_v31 = vmul.f32 0.5, %v3621_v47 }
 0x7f9   : > { %8745 = vtanh.f32 %v3663_v25 }
 0x7fa   : > { %8747 = vtanh.f32 %v3661_v31 }
 0x801   : > { %v8742_v32 = vpop.eup %8741 }
 0x802   : > { %v8744_v34 = vpop.eup %8743  ;;  %v3726_v29 = vmul.f32 0.5, %v8742_v32 }
 0x803   : > { %v8746_v37 = vpop.eup %8745  ;;  %v3724_v8 = vmul.f32 0.5, %v8744_v34 }
 0x804   : > { %v8748_v27 = vpop.eup %8747  ;;  %v3758_v39 = vadd.f32 0.5, %v3726_v29  ;;  %v3727_v17 = vmul.f32 0.5, %v8746_v37 }
 0x805   : > { %v3756_v40 = vadd.f32 0.5, %v3724_v8  ;;  %v3725_v41 = vmul.f32 0.5, %v8748_v27 }
 0x806   : > { %v3759_v44 = vadd.f32 0.5, %v3727_v17  ;;  %v3790_v42 = vmul.f32 %v3758_v39, %v3626_v22 }
 0x807   : > { %v3757_v26 = vadd.f32 0.5, %v3725_v41  ;;  %v3788_v45 = vmul.f32 %v3756_v40, %v3618_v24 }
 0x808   : > { %v3791_v35 = vmul.f32 %v3759_v44, %v3629_v21 }
 0x809   : > { %v3789_v61 = vmul.f32 %v3757_v26, %v3621_v47 }
 0x80a   : > { %v3807_v46 = vpack.c.bf16 %v3791_v35, %v3790_v42 }
 0x80b   : > { %v3806_v59 = vpack.c.bf16 %v3789_v61, %v3788_v45 }
 0x80d   : > { %7776 = vmatprep.mubr.bf16.mxu1 %v3806_v59 }
 0x80e   : > { %7777 = vmatmul.mubr.bf16.gmra.mrb[124].mxu1 %v3807_v46 }
 0x850   : > { %v7750_v51 = vpop.f32.mrb[96].mxu1 }
 0x851   : > { %v3924_v52 = vadd.f32 %v7750_v51, %v9875_v49  ;;  %v3915_v53 = vpop.f32.mrb[97].mxu1 }
 0x852   : > { %v3916_v33 = vadd.f32 %v9875_v49, %v3915_v53  ;;  %v7751_v1 = vpop.f32.mrb[98].mxu1 }
 0x853   : > { %v4044_v9 = vmul.f32 0.5, %v3924_v52  ;;  %v3927_v58 = vadd.f32 %v7751_v1, %v9875_v49  ;;  %v3918_v4 = vpop.f32.mrb[99].mxu1 }
 0x854   : > { %v4042_v36 = vmul.f32 0.5, %v3916_v33  ;;  %v3919_v60 = vadd.f32 %v9875_v49, %v3918_v4 }
 0x855   : > { %8749 = vtanh.f32 %v4044_v9  ;;  %v4045_v62 = vmul.f32 0.5, %v3927_v58 }
 0x856   : > { %8751 = vtanh.f32 %v4042_v36  ;;  %v4043_v7 = vmul.f32 0.5, %v3919_v60 }
 0x857   : > { %8753 = vtanh.f32 %v4045_v62 }
 0x858   : > { %8755 = vtanh.f32 %v4043_v7  ;;  %v7754_v55 = vpop.f32.mrb[100].mxu1 }
 0x859   : > { %v3940_v0 = vadd.f32 %v7754_v55, %v9875_v49  ;;  %v3931_v3 = vpop.f32.mrb[101].mxu1 }
 0x85a   : > { %v3932_v11 = vadd.f32 %v9875_v49, %v3931_v3  ;;  %v7755_v5 = vpop.f32.mrb[102].mxu1 }
 0x85b   : > { %v4048_v19 = vmul.f32 0.5, %v3940_v0  ;;  %v3943_v57 = vadd.f32 %v7755_v5, %v9875_v49  ;;  %v3934_v54 = vpop.f32.mrb[103].mxu1 }
 0x85c   : > { %v4046_v56 = vmul.f32 0.5, %v3932_v11  ;;  %v3935_v12 = vadd.f32 %v9875_v49, %v3934_v54 }
 0x85d   : > { %8757 = vtanh.f32 %v4048_v19  ;;  %v4049_v10 = vmul.f32 0.5, %v3943_v57 }
 0x85e   : > { %8759 = vtanh.f32 %v4046_v56  ;;  %v4047_v15 = vmul.f32 0.5, %v3935_v12  ;;  %v8197_v56 = vld [vmem:[#allocation3 + $0x240] sm:$0xff]  }
 0x85f   : > { %v8750_v14 = vpop.eup %8749  ;;  %8761 = vtanh.f32 %v4049_v10  ;;  %7828 = vmatprep.subr.bf16.mxu1 %v8197_v56 }
 0x860   : > { %v8752_v50 = vpop.eup %8751  ;;  %v4108_v13 = vmul.f32 0.5, %v8750_v14  ;;  %8763 = vtanh.f32 %v4047_v15  ;;  %7829 = vmatpush3.bf16.msra.mxu1 %v8197_v56 }
 0x861   : > { %v8754_v48 = vpop.eup %8753  ;;  %v4106_v16 = vmul.f32 0.5, %v8752_v50 }
 0x862   : > { %v8756_v18 = vpop.eup %8755  ;;  %v4140_v6 = vadd.f32 0.5, %v4108_v13  ;;  %v4109_v2 = vmul.f32 0.5, %v8754_v48 }
 0x863   : > { %v4138_v20 = vadd.f32 0.5, %v4106_v16  ;;  %v4107_v22 = vmul.f32 0.5, %v8756_v18 }
 0x864   : > { %v4141_v63 = vadd.f32 0.5, %v4109_v2  ;;  %v4172_v24 = vmul.f32 %v4140_v6, %v3924_v52 }
 0x865   : > { %v4139_v43 = vadd.f32 0.5, %v4107_v22  ;;  %v4170_v21 = vmul.f32 %v4138_v20, %v3916_v33 }
 0x866   : > { %v4173_v28 = vmul.f32 %v4141_v63, %v3927_v58 }
 0x867   : > { %v8758_v23 = vpop.eup %8757  ;;  %v4171_v38 = vmul.f32 %v4139_v43, %v3919_v60 }
 0x868   : > { %v8760_v30 = vpop.eup %8759  ;;  %v4203_v47 = vpack.c.bf16 %v4173_v28, %v4172_v24  ;;  %v4112_v25 = vmul.f32 0.5, %v8758_v23 }
 0x869   : > { %v8762_v31 = vpop.eup %8761  ;;  %v4110_v32 = vmul.f32 0.5, %v8760_v30  ;;  %v7758_v34 = vpop.f32.mrb[104].mxu1  ;;  %v4202_v29 = vpack.c.bf16 %v4171_v38, %v4170_v21 }
 0x86a   : > { %v8764_v37 = vpop.eup %8763  ;;  %v4144_v8 = vadd.f32 0.5, %v4112_v25  ;;  %v4113_v27 = vmul.f32 0.5, %v8762_v31  ;;  %v3956_v39 = vadd.f32 %v7758_v34, %v9875_v49  ;;  %v3947_v17 = vpop.f32.mrb[105].mxu1 }
 0x86b   : > { %v4142_v40 = vadd.f32 0.5, %v4110_v32  ;;  %v4111_v41 = vmul.f32 0.5, %v8764_v37  ;;  %v3948_v44 = vadd.f32 %v9875_v49, %v3947_v17  ;;  %v7759_v26 = vpop.f32.mrb[106].mxu1  ;;  %7796 = vmatprep.mubr.bf16.mxu0 %v4202_v29 }
 0x86c   : > { %v4145_v42 = vadd.f32 0.5, %v4113_v27  ;;  %v4052_v35 = vmul.f32 0.5, %v3956_v39  ;;  %v3959_v45 = vadd.f32 %v7759_v26, %v9875_v49  ;;  %v3950_v61 = vpop.f32.mrb[107].mxu1  ;;  %7797 = vmatmul.mubr.bf16.vlgmr.msra.gmra.mrb[128].mxu0 %v4203_v47  ;;  %v4176_v52 = vmul.f32 %v4144_v8, %v3940_v0 }
 0x86d   : > { %v4143_v46 = vadd.f32 0.5, %v4111_v41  ;;  %v4050_v59 = vmul.f32 0.5, %v3948_v44  ;;  %v3951_v51 = vadd.f32 %v9875_v49, %v3950_v61  ;;  %v4174_v1 = vmul.f32 %v4142_v40, %v3932_v11 }
 0x86e   : > { %v4177_v53 = vmul.f32 %v4145_v42, %v3943_v57  ;;  %8765 = vtanh.f32 %v4052_v35  ;;  %v4053_v33 = vmul.f32 0.5, %v3959_v45 }
 0x86f   : > { %v4175_v9 = vmul.f32 %v4143_v46, %v3935_v12  ;;  %8767 = vtanh.f32 %v4050_v59  ;;  %v4051_v58 = vmul.f32 0.5, %v3951_v51 }
 0x870   : > { %8769 = vtanh.f32 %v4053_v33  ;;  %v4205_v4 = vpack.c.bf16 %v4177_v53, %v4176_v52 }
 0x871   : > { %8771 = vtanh.f32 %v4051_v58  ;;  %v4204_v36 = vpack.c.bf16 %v4175_v9, %v4174_v1 }
 0x873   : > { %7800 = vmatprep.mubr.bf16.mxu0 %v4204_v36 }
 0x874   : > { %7801 = vmatmul.mubr.bf16.gmra.mrb[132].mxu0 %v4205_v4 }
 0x878   : > { %v8766_v60 = vpop.eup %8765 }
 0x879   : > { %v8768_v62 = vpop.eup %8767  ;;  %v4116_v7 = vmul.f32 0.5, %v8766_v60 }
 0x87a   : > { %v8770_v55 = vpop.eup %8769  ;;  %v4114_v3 = vmul.f32 0.5, %v8768_v62 }
 0x87b   : > { %v8772_v5 = vpop.eup %8771  ;;  %v4148_v0 = vadd.f32 0.5, %v4116_v7  ;;  %v4117_v19 = vmul.f32 0.5, %v8770_v55 }
 0x87c   : > { %v4146_v57 = vadd.f32 0.5, %v4114_v3  ;;  %v4115_v54 = vmul.f32 0.5, %v8772_v5 }
 0x87d   : > { %v4149_v11 = vadd.f32 0.5, %v4117_v19  ;;  %v4180_v10 = vmul.f32 %v4148_v0, %v3956_v39 }
 0x87e   : > { %v4147_v12 = vadd.f32 0.5, %v4115_v54  ;;  %v4178_v14 = vmul.f32 %v4146_v57, %v3948_v44 }
 0x87f   : > { %v4181_v15 = vmul.f32 %v4149_v11, %v3959_v45 }
 0x880   : > { %v4179_v50 = vmul.f32 %v4147_v12, %v3951_v51 }
 0x881   : > { %v7762_v13 = vpop.f32.mrb[108].mxu1  ;;  %v4207_v48 = vpack.c.bf16 %v4181_v15, %v4180_v10 }
 0x882   : > { %v3972_v16 = vadd.f32 %v7762_v13, %v9875_v49  ;;  %v3963_v18 = vpop.f32.mrb[109].mxu1  ;;  %v4206_v6 = vpack.c.bf16 %v4179_v50, %v4178_v14 }
 0x883   : > { %v3964_v2 = vadd.f32 %v9875_v49, %v3963_v18  ;;  %v7763_v20 = vpop.f32.mrb[110].mxu1 }
 0x884   : > { %v4056_v22 = vmul.f32 0.5, %v3972_v16  ;;  %v3975_v63 = vadd.f32 %v7763_v20, %v9875_v49  ;;  %v3966_v43 = vpop.f32.mrb[111].mxu1  ;;  %7804 = vmatprep.mubr.bf16.mxu0 %v4206_v6 }
 0x885   : > { %v4054_v24 = vmul.f32 0.5, %v3964_v2  ;;  %v3967_v28 = vadd.f32 %v9875_v49, %v3966_v43  ;;  %7805 = vmatmul.mubr.bf16.gmra.mrb[136].mxu0 %v4207_v48 }
 0x886   : > { %8773 = vtanh.f32 %v4056_v22  ;;  %v4057_v23 = vmul.f32 0.5, %v3975_v63 }
 0x887   : > { %8775 = vtanh.f32 %v4054_v24  ;;  %v4055_v21 = vmul.f32 0.5, %v3967_v28 }
 0x888   : > { %8777 = vtanh.f32 %v4057_v23 }
 0x889   : > { %8779 = vtanh.f32 %v4055_v21 }
 0x890   : > { %v8774_v38 = vpop.eup %8773 }
 0x891   : > { %v8776_v30 = vpop.eup %8775  ;;  %v4120_v47 = vmul.f32 0.5, %v8774_v38 }
 0x892   : > { %v8778_v25 = vpop.eup %8777  ;;  %v4118_v31 = vmul.f32 0.5, %v8776_v30  ;;  %v8199_v30 = vld [vmem:[#allocation3 + $0x250] sm:$0xff]  }
 0x893   : > { %v8780_v32 = vpop.eup %8779  ;;  %v4152_v34 = vadd.f32 0.5, %v4120_v47  ;;  %v4121_v29 = vmul.f32 0.5, %v8778_v25 }
 0x894   : > { %v4150_v37 = vadd.f32 0.5, %v4118_v31  ;;  %v4119_v8 = vmul.f32 0.5, %v8780_v32 }
 0x895   : > { %v4153_v27 = vadd.f32 0.5, %v4121_v29  ;;  %v4184_v17 = vmul.f32 %v4152_v34, %v3972_v16 }
 0x896   : > { %v4151_v39 = vadd.f32 0.5, %v4119_v8  ;;  %v4182_v41 = vmul.f32 %v4150_v37, %v3964_v2 }
 0x897   : > { %v4185_v40 = vmul.f32 %v4153_v27, %v3975_v63  ;;  %v8200_v27 = vld [vmem:[#allocation3 + $0x258] sm:$0xff]  }
 0x898   : > { %v4183_v44 = vmul.f32 %v4151_v39, %v3967_v28  ;;  %v8198_v28 = vld [vmem:[#allocation3 + $0x248] sm:$0xff]  }
 0x899   : > { %v7766_v26 = vpop.f32.mrb[112].mxu1  ;;  %v4209_v42 = vpack.c.bf16 %v4185_v40, %v4184_v17  ;;  %7830 = vmatprep.subr.bf16.mxu1 %v8198_v28 }
 0x89a   : > { %v3988_v35 = vadd.f32 %v7766_v26, %v9875_v49  ;;  %v3979_v45 = vpop.f32.mrb[113].mxu1  ;;  %v4208_v61 = vpack.c.bf16 %v4183_v44, %v4182_v41  ;;  %7831 = vmatpush3.bf16.msra.mxu1 %v8198_v28 }
 0x89b   : > { %v3980_v46 = vadd.f32 %v9875_v49, %v3979_v45  ;;  %v7767_v59 = vpop.f32.mrb[114].mxu1  ;;  %7832 = vmatprep.subr.bf16.mxu1 %v8199_v30 }
 0x89c   : > { %v4060_v51 = vmul.f32 0.5, %v3988_v35  ;;  %v3991_v52 = vadd.f32 %v7767_v59, %v9875_v49  ;;  %v3982_v53 = vpop.f32.mrb[115].mxu1  ;;  %7808 = vmatprep.mubr.bf16.mxu0 %v4208_v61 }
 0x89d   : > { %v4058_v33 = vmul.f32 0.5, %v3980_v46  ;;  %v3983_v1 = vadd.f32 %v9875_v49, %v3982_v53  ;;  %7809 = vmatmul.mubr.bf16.gmra.mrb[140].mxu0 %v4209_v42 }
 0x89e   : > { %8781 = vtanh.f32 %v4060_v51  ;;  %v4061_v9 = vmul.f32 0.5, %v3991_v52  ;;  %7833 = vmatpush3.bf16.msra.mxu1 %v8199_v30 }
 0x89f   : > { %8783 = vtanh.f32 %v4058_v33  ;;  %v4059_v58 = vmul.f32 0.5, %v3983_v1  ;;  %7834 = vmatprep.subr.bf16.mxu1 %v8200_v27 }
 0x8a0   : > { %8785 = vtanh.f32 %v4061_v9 }
 0x8a1   : > { %8787 = vtanh.f32 %v4059_v58  ;;  %v8202_v58 = vld [vmem:[#allocation3 + $0x268] sm:$0xff]  }
 0x8a2   : > { %7835 = vmatpush3.bf16.msra.mxu1 %v8200_v27 }
 0x8a8   : > { %v8782_v4 = vpop.eup %8781 }
 0x8a9   : > { %v8784_v36 = vpop.eup %8783  ;;  %v4124_v60 = vmul.f32 0.5, %v8782_v4 }
 0x8aa   : > { %v8786_v62 = vpop.eup %8785  ;;  %v4122_v7 = vmul.f32 0.5, %v8784_v36 }
 0x8ab   : > { %v8788_v55 = vpop.eup %8787  ;;  %v4156_v3 = vadd.f32 0.5, %v4124_v60  ;;  %v4125_v5 = vmul.f32 0.5, %v8786_v62  ;;  %v8203_v60 = vld [vmem:[#allocation3 + $0x270] sm:$0xff]   ;;  %v8204_v62 = vld [vmem:[#allocation3 + $0x278] sm:$0xff]  }
 0x8ac   : > { %v4154_v0 = vadd.f32 0.5, %v4122_v7  ;;  %v4123_v19 = vmul.f32 0.5, %v8788_v55 }
 0x8ad   : > { %v4157_v57 = vadd.f32 0.5, %v4125_v5  ;;  %v4188_v11 = vmul.f32 %v4156_v3, %v3988_v35  ;;  %v8201_v35 = vld [vmem:[#allocation3 + $0x260] sm:$0xff]  }
 0x8ae   : > { %v4155_v54 = vadd.f32 0.5, %v4123_v19  ;;  %v4186_v12 = vmul.f32 %v4154_v0, %v3980_v46  ;;  %7836 = vmatprep.subr.bf16.mxu1 %v8201_v35 }
 0x8af   : > { %v4189_v56 = vmul.f32 %v4157_v57, %v3991_v52  ;;  %7837 = vmatpush3.bf16.msra.mxu1 %v8201_v35  ;;  %v9912_v35 = vld [vmem:[%s10280_s4 + $0x8] ss:$0 sm:$0xff] }
 0x8b0   : > { %v4187_v10 = vmul.f32 %v4155_v54, %v3983_v1  ;;  %7838 = vmatprep.subr.bf16.mxu1 %v8202_v58 }
 0x8b1   : > { %v7770_v15 = vpop.f32.mrb[116].mxu1  ;;  %v4211_v14 = vpack.c.bf16 %v4189_v56, %v4188_v11 }
 0x8b2   : > { %v4004_v50 = vadd.f32 %v7770_v15, %v9875_v49  ;;  %v3995_v13 = vpop.f32.mrb[117].mxu1  ;;  %v4210_v48 = vpack.c.bf16 %v4187_v10, %v4186_v12 }
 0x8b3   : > { %v3996_v16 = vadd.f32 %v9875_v49, %v3995_v13  ;;  %v7771_v18 = vpop.f32.mrb[118].mxu1  ;;  %7839 = vmatpush3.bf16.msra.mxu1 %v8202_v58 }
 0x8b4   : > { %v4064_v6 = vmul.f32 0.5, %v4004_v50  ;;  %v4007_v2 = vadd.f32 %v7771_v18, %v9875_v49  ;;  %v3998_v20 = vpop.f32.mrb[119].mxu1  ;;  %7812 = vmatprep.mubr.bf16.mxu0 %v4210_v48  ;;  %7840 = vmatprep.subr.bf16.mxu1 %v8203_v60 }
 0x8b5   : > { %v4062_v22 = vmul.f32 0.5, %v3996_v16  ;;  %v3999_v63 = vadd.f32 %v9875_v49, %v3998_v20  ;;  %7813 = vmatmul.mubr.bf16.gmra.mrb[144].mxu0 %v4211_v14 }
 0x8b6   : > { %8789 = vtanh.f32 %v4064_v6  ;;  %v4065_v43 = vmul.f32 0.5, %v4007_v2 }
 0x8b7   : > { %8791 = vtanh.f32 %v4062_v22  ;;  %v4063_v24 = vmul.f32 0.5, %v3999_v63  ;;  %7841 = vmatpush3.bf16.msra.mxu1 %v8203_v60 }
 0x8b8   : > { %8793 = vtanh.f32 %v4065_v43  ;;  %7842 = vmatprep.subr.bf16.mxu1 %v8204_v62 }
 0x8b9   : > { %8795 = vtanh.f32 %v4063_v24 }
 0x8bb   : > { %7843 = vmatpush3.bf16.msra.mxu1 %v8204_v62 }
 0x8c0   : > { %v8790_v23 = vpop.eup %8789 }
 0x8c1   : > { %v8792_v21 = vpop.eup %8791  ;;  %v4128_v38 = vmul.f32 0.5, %v8790_v23 }
 0x8c2   : > { %v8794_v47 = vpop.eup %8793  ;;  %v4126_v25 = vmul.f32 0.5, %v8792_v21 }
 0x8c3   : > { %v8796_v31 = vpop.eup %8795  ;;  %v4160_v32 = vadd.f32 0.5, %v4128_v38  ;;  %v4129_v34 = vmul.f32 0.5, %v8794_v47 }
 0x8c4   : > { %v4158_v29 = vadd.f32 0.5, %v4126_v25  ;;  %v4127_v37 = vmul.f32 0.5, %v8796_v31 }
 0x8c5   : > { %v4161_v8 = vadd.f32 0.5, %v4129_v34  ;;  %v4192_v17 = vmul.f32 %v4160_v32, %v4004_v50 }
 0x8c6   : > { %v4159_v39 = vadd.f32 0.5, %v4127_v37  ;;  %v4190_v41 = vmul.f32 %v4158_v29, %v3996_v16 }
 0x8c7   : > { %v4193_v40 = vmul.f32 %v4161_v8, %v4007_v2 }
 0x8c8   : > { %v4191_v44 = vmul.f32 %v4159_v39, %v3999_v63 }
 0x8c9   : > { %v7774_v26 = vpop.f32.mrb[120].mxu1  ;;  %v4213_v42 = vpack.c.bf16 %v4193_v40, %v4192_v17 }
 0x8ca   : > { %v4020_v45 = vadd.f32 %v7774_v26, %v9875_v49  ;;  %v4011_v61 = vpop.f32.mrb[121].mxu1  ;;  %v4212_v46 = vpack.c.bf16 %v4191_v44, %v4190_v41 }
 0x8cb   : > { %v4012_v59 = vadd.f32 %v9875_v49, %v4011_v61  ;;  %v7775_v51 = vpop.f32.mrb[122].mxu1 }
 0x8cc   : > { %v4068_v52 = vmul.f32 0.5, %v4020_v45  ;;  %v4023_v53 = vadd.f32 %v7775_v51, %v9875_v49  ;;  %v4014_v33 = vpop.f32.mrb[123].mxu1  ;;  %7816 = vmatprep.mubr.bf16.mxu0 %v4212_v46 }
 0x8cd   : > { %v4066_v1 = vmul.f32 0.5, %v4012_v59  ;;  %v4015_v9 = vadd.f32 %v9875_v49, %v4014_v33  ;;  %7817 = vmatmul.mubr.bf16.gmra.mrb[148].mxu0 %v4213_v42 }
 0x8ce   : > { %8797 = vtanh.f32 %v4068_v52  ;;  %v4069_v4 = vmul.f32 0.5, %v4023_v53 }
 0x8cf   : > { %8799 = vtanh.f32 %v4066_v1  ;;  %v4067_v36 = vmul.f32 0.5, %v4015_v9 }
 0x8d0   : > { %8801 = vtanh.f32 %v4069_v4 }
 0x8d1   : > { %8803 = vtanh.f32 %v4067_v36 }
 0x8d8   : > { %v8798_v7 = vpop.eup %8797 }
 0x8d9   : > { %v8800_v55 = vpop.eup %8799  ;;  %v4132_v3 = vmul.f32 0.5, %v8798_v7 }
 0x8da   : > { %v8802_v5 = vpop.eup %8801  ;;  %v4130_v0 = vmul.f32 0.5, %v8800_v55 }
 0x8db   : > { %v8804_v19 = vpop.eup %8803  ;;  %v4164_v57 = vadd.f32 0.5, %v4132_v3  ;;  %v4133_v54 = vmul.f32 0.5, %v8802_v5 }
 0x8dc   : > { %v4162_v11 = vadd.f32 0.5, %v4130_v0  ;;  %v4131_v56 = vmul.f32 0.5, %v8804_v19 }
 0x8dd   : > { %v4165_v12 = vadd.f32 0.5, %v4133_v54  ;;  %v4196_v15 = vmul.f32 %v4164_v57, %v4020_v45 }
 0x8de   : > { %v4163_v10 = vadd.f32 0.5, %v4131_v56  ;;  %v4194_v50 = vmul.f32 %v4162_v11, %v4012_v59 }
 0x8df   : > { %v4197_v14 = vmul.f32 %v4165_v12, %v4023_v53 }
 0x8e0   : > { %v4195_v13 = vmul.f32 %v4163_v10, %v4015_v9 }
 0x8e1   : > { %v7778_v48 = vpop.f32.mrb[124].mxu1  ;;  %v4215_v16 = vpack.c.bf16 %v4197_v14, %v4196_v15 }
 0x8e2   : > { %v4036_v18 = vadd.f32 %v7778_v48, %v9875_v49  ;;  %v4027_v6 = vpop.f32.mrb[125].mxu1  ;;  %v4214_v2 = vpack.c.bf16 %v4195_v13, %v4194_v50 }
 0x8e3   : > { %v4028_v20 = vadd.f32 %v9875_v49, %v4027_v6  ;;  %v7779_v22 = vpop.f32.mrb[126].mxu1 }
 0x8e4   : > { %v4072_v63 = vmul.f32 0.5, %v4036_v18  ;;  %v4039_v43 = vadd.f32 %v7779_v22, %v9875_v49  ;;  %v4030_v24 = vpop.f32.mrb[127].mxu1  ;;  %7820 = vmatprep.mubr.bf16.mxu0 %v4214_v2 }
 0x8e5   : > { %v4070_v28 = vmul.f32 0.5, %v4028_v20  ;;  %v4031_v23 = vadd.f32 %v9875_v49, %v4030_v24  ;;  %7821 = vmatmul.mubr.bf16.gmra.mrb[152].mxu0 %v4215_v16 }
 0x8e6   : > { %8805 = vtanh.f32 %v4072_v63  ;;  %v4073_v21 = vmul.f32 0.5, %v4039_v43 }
 0x8e7   : > { %8807 = vtanh.f32 %v4070_v28  ;;  %v4071_v38 = vmul.f32 0.5, %v4031_v23 }
 0x8e8   : > { %8809 = vtanh.f32 %v4073_v21 }
 0x8e9   : > { %8811 = vtanh.f32 %v4071_v38 }
 0x8f0   : > { %v8806_v30 = vpop.eup %8805 }
 0x8f1   : > { %v8808_v47 = vpop.eup %8807  ;;  %v4136_v25 = vmul.f32 0.5, %v8806_v30 }
 0x8f2   : > { %v8810_v31 = vpop.eup %8809  ;;  %v4134_v32 = vmul.f32 0.5, %v8808_v47 }
 0x8f3   : > { %v8812_v34 = vpop.eup %8811  ;;  %v4168_v29 = vadd.f32 0.5, %v4136_v25  ;;  %v4137_v37 = vmul.f32 0.5, %v8810_v31 }
 0x8f4   : > { %v4166_v8 = vadd.f32 0.5, %v4134_v32  ;;  %v4135_v27 = vmul.f32 0.5, %v8812_v34 }
 0x8f5   : > { %v4169_v39 = vadd.f32 0.5, %v4137_v37  ;;  %v4200_v49 = vmul.f32 %v4168_v29, %v4036_v18 }
 0x8f6   : > { %v4167_v17 = vadd.f32 0.5, %v4135_v27  ;;  %v4198_v41 = vmul.f32 %v4166_v8, %v4028_v20 }
 0x8f7   : > { %v4201_v40 = vmul.f32 %v4169_v39, %v4039_v43 }
 0x8f8   : > { %v4199_v44 = vmul.f32 %v4167_v17, %v4031_v23 }
 0x8f9   : > { %v4217_v26 = vpack.c.bf16 %v4201_v40, %v4200_v49 }
 0x8fa   : > { %v4216_v42 = vpack.c.bf16 %v4199_v44, %v4198_v41 }
 0x8fc   : > { %7824 = vmatprep.mubr.bf16.mxu0 %v4216_v42 }
 0x8fd   : > { %7825 = vmatmul.mubr.bf16.gmra.mrb[156].mxu0 %v4217_v26 }
 0x93f   : > { %v7798_v45 = vpop.f32.mrb[128].mxu0 }
 0x940   : > { %v4334_v61 = vadd.f32 %v7798_v45, %v9912_v35  ;;  %v4325_v46 = vpop.f32.mrb[129].mxu0 }
 0x941   : > { %v4326_v59 = vadd.f32 %v9912_v35, %v4325_v46  ;;  %v7799_v51 = vpop.f32.mrb[130].mxu0 }
 0x942   : > { %v4454_v52 = vmul.f32 0.5, %v4334_v61  ;;  %v4337_v53 = vadd.f32 %v7799_v51, %v9912_v35  ;;  %v4328_v33 = vpop.f32.mrb[131].mxu0 }
 0x943   : > { %v4452_v1 = vmul.f32 0.5, %v4326_v59  ;;  %v4329_v9 = vadd.f32 %v9912_v35, %v4328_v33 }
 0x944   : > { %8813 = vtanh.f32 %v4454_v52  ;;  %v4455_v58 = vmul.f32 0.5, %v4337_v53 }
 0x945   : > { %8815 = vtanh.f32 %v4452_v1  ;;  %v4453_v4 = vmul.f32 0.5, %v4329_v9 }
 0x946   : > { %8817 = vtanh.f32 %v4455_v58 }
 0x947   : > { %8819 = vtanh.f32 %v4453_v4  ;;  %v7802_v36 = vpop.f32.mrb[132].mxu0 }
 0x948   : > { %v4350_v60 = vadd.f32 %v7802_v36, %v9912_v35  ;;  %v4341_v62 = vpop.f32.mrb[133].mxu0 }
 0x949   : > { %v4342_v7 = vadd.f32 %v9912_v35, %v4341_v62  ;;  %v7803_v55 = vpop.f32.mrb[134].mxu0 }
 0x94a   : > { %v4458_v3 = vmul.f32 0.5, %v4350_v60  ;;  %v4353_v5 = vadd.f32 %v7803_v55, %v9912_v35  ;;  %v4344_v0 = vpop.f32.mrb[135].mxu0 }
 0x94b   : > { %v4456_v19 = vmul.f32 0.5, %v4342_v7  ;;  %v4345_v57 = vadd.f32 %v9912_v35, %v4344_v0 }
 0x94c   : > { %8821 = vtanh.f32 %v4458_v3  ;;  %v4459_v54 = vmul.f32 0.5, %v4353_v5 }
 0x94d   : > { %8823 = vtanh.f32 %v4456_v19  ;;  %v4457_v11 = vmul.f32 0.5, %v4345_v57  ;;  %v8205_v19 = vld [vmem:[#allocation3 + $0x280] sm:$0xff]  }
 0x94e   : > { %v8814_v56 = vpop.eup %8813  ;;  %8825 = vtanh.f32 %v4459_v54  ;;  %7876 = vmatprep.subr.bf16.mxu0 %v8205_v19 }
 0x94f   : > { %v8816_v12 = vpop.eup %8815  ;;  %v4518_v10 = vmul.f32 0.5, %v8814_v56  ;;  %8827 = vtanh.f32 %v4457_v11  ;;  %7877 = vmatpush3.bf16.msra.mxu0 %v8205_v19 }
 0x950   : > { %v8818_v15 = vpop.eup %8817  ;;  %v4516_v14 = vmul.f32 0.5, %v8816_v12 }
 0x951   : > { %v8820_v50 = vpop.eup %8819  ;;  %v4550_v13 = vadd.f32 0.5, %v4518_v10  ;;  %v4519_v48 = vmul.f32 0.5, %v8818_v15 }
 0x952   : > { %v4548_v16 = vadd.f32 0.5, %v4516_v14  ;;  %v4517_v18 = vmul.f32 0.5, %v8820_v50 }
 0x953   : > { %v4551_v6 = vadd.f32 0.5, %v4519_v48  ;;  %v4582_v20 = vmul.f32 %v4550_v13, %v4334_v61 }
 0x954   : > { %v4549_v2 = vadd.f32 0.5, %v4517_v18  ;;  %v4580_v43 = vmul.f32 %v4548_v16, %v4326_v59 }
 0x955   : > { %v4583_v22 = vmul.f32 %v4551_v6, %v4337_v53 }
 0x956   : > { %v8822_v63 = vpop.eup %8821  ;;  %v4581_v24 = vmul.f32 %v4549_v2, %v4329_v9 }
 0x957   : > { %v8824_v28 = vpop.eup %8823  ;;  %v4613_v23 = vpack.c.bf16 %v4583_v22, %v4582_v20  ;;  %v4522_v21 = vmul.f32 0.5, %v8822_v63 }
 0x958   : > { %v8826_v38 = vpop.eup %8825  ;;  %v4520_v30 = vmul.f32 0.5, %v8824_v28  ;;  %v7806_v47 = vpop.f32.mrb[136].mxu0  ;;  %v4612_v25 = vpack.c.bf16 %v4581_v24, %v4580_v43 }
 0x959   : > { %v8828_v31 = vpop.eup %8827  ;;  %v4554_v32 = vadd.f32 0.5, %v4522_v21  ;;  %v4523_v34 = vmul.f32 0.5, %v8826_v38  ;;  %v4366_v29 = vadd.f32 %v7806_v47, %v9912_v35  ;;  %v4357_v37 = vpop.f32.mrb[137].mxu0 }
 0x95a   : > { %v4552_v8 = vadd.f32 0.5, %v4520_v30  ;;  %v4521_v27 = vmul.f32 0.5, %v8828_v31  ;;  %v4358_v39 = vadd.f32 %v9912_v35, %v4357_v37  ;;  %v7807_v17 = vpop.f32.mrb[138].mxu0  ;;  %7844 = vmatprep.mubr.bf16.mxu1 %v4612_v25 }
 0x95b   : > { %v4555_v49 = vadd.f32 0.5, %v4523_v34  ;;  %v4462_v40 = vmul.f32 0.5, %v4366_v29  ;;  %v4369_v41 = vadd.f32 %v7807_v17, %v9912_v35  ;;  %v4360_v44 = vpop.f32.mrb[139].mxu0  ;;  %7845 = vmatmul.mubr.bf16.vlgmr.msra.gmra.mrb[128].mxu1 %v4613_v23  ;;  %v4586_v61 = vmul.f32 %v4554_v32, %v4350_v60 }
 0x95c   : > { %v4553_v26 = vadd.f32 0.5, %v4521_v27  ;;  %v4460_v42 = vmul.f32 0.5, %v4358_v39  ;;  %v4361_v45 = vadd.f32 %v9912_v35, %v4360_v44  ;;  %v4584_v51 = vmul.f32 %v4552_v8, %v4342_v7 }
 0x95d   : > { %v4587_v46 = vmul.f32 %v4555_v49, %v4353_v5  ;;  %8829 = vtanh.f32 %v4462_v40  ;;  %v4463_v59 = vmul.f32 0.5, %v4369_v41 }
 0x95e   : > { %v4585_v52 = vmul.f32 %v4553_v26, %v4345_v57  ;;  %8831 = vtanh.f32 %v4460_v42  ;;  %v4461_v53 = vmul.f32 0.5, %v4361_v45 }
 0x95f   : > { %8833 = vtanh.f32 %v4463_v59  ;;  %v4615_v33 = vpack.c.bf16 %v4587_v46, %v4586_v61 }
 0x960   : > { %8835 = vtanh.f32 %v4461_v53  ;;  %v4614_v1 = vpack.c.bf16 %v4585_v52, %v4584_v51 }
 0x962   : > { %7848 = vmatprep.mubr.bf16.mxu1 %v4614_v1 }
 0x963   : > { %7849 = vmatmul.mubr.bf16.gmra.mrb[132].mxu1 %v4615_v33 }
 0x967   : > { %v8830_v9 = vpop.eup %8829 }
 0x968   : > { %v8832_v58 = vpop.eup %8831  ;;  %v4526_v4 = vmul.f32 0.5, %v8830_v9 }
 0x969   : > { %v8834_v36 = vpop.eup %8833  ;;  %v4524_v62 = vmul.f32 0.5, %v8832_v58 }
 0x96a   : > { %v8836_v55 = vpop.eup %8835  ;;  %v4558_v60 = vadd.f32 0.5, %v4526_v4  ;;  %v4527_v3 = vmul.f32 0.5, %v8834_v36 }
 0x96b   : > { %v4556_v5 = vadd.f32 0.5, %v4524_v62  ;;  %v4525_v0 = vmul.f32 0.5, %v8836_v55 }
 0x96c   : > { %v4559_v7 = vadd.f32 0.5, %v4527_v3  ;;  %v4590_v54 = vmul.f32 %v4558_v60, %v4366_v29 }
 0x96d   : > { %v4557_v57 = vadd.f32 0.5, %v4525_v0  ;;  %v4588_v56 = vmul.f32 %v4556_v5, %v4358_v39 }
 0x96e   : > { %v4591_v11 = vmul.f32 %v4559_v7, %v4369_v41 }
 0x96f   : > { %v4589_v12 = vmul.f32 %v4557_v57, %v4361_v45 }
 0x970   : > { %v7810_v10 = vpop.f32.mrb[140].mxu0  ;;  %v4617_v15 = vpack.c.bf16 %v4591_v11, %v4590_v54 }
 0x971   : > { %v4382_v14 = vadd.f32 %v7810_v10, %v9912_v35  ;;  %v4373_v50 = vpop.f32.mrb[141].mxu0  ;;  %v4616_v13 = vpack.c.bf16 %v4589_v12, %v4588_v56 }
 0x972   : > { %v4374_v48 = vadd.f32 %v9912_v35, %v4373_v50  ;;  %v7811_v16 = vpop.f32.mrb[142].mxu0 }
 0x973   : > { %v4466_v18 = vmul.f32 0.5, %v4382_v14  ;;  %v4385_v6 = vadd.f32 %v7811_v16, %v9912_v35  ;;  %v4376_v2 = vpop.f32.mrb[143].mxu0  ;;  %7852 = vmatprep.mubr.bf16.mxu1 %v4616_v13 }
 0x974   : > { %v4464_v20 = vmul.f32 0.5, %v4374_v48  ;;  %v4377_v22 = vadd.f32 %v9912_v35, %v4376_v2  ;;  %7853 = vmatmul.mubr.bf16.gmra.mrb[136].mxu1 %v4617_v15 }
 0x975   : > { %8837 = vtanh.f32 %v4466_v18  ;;  %v4467_v63 = vmul.f32 0.5, %v4385_v6 }
 0x976   : > { %8839 = vtanh.f32 %v4464_v20  ;;  %v4465_v43 = vmul.f32 0.5, %v4377_v22 }
 0x977   : > { %8841 = vtanh.f32 %v4467_v63 }
 0x978   : > { %8843 = vtanh.f32 %v4465_v43 }
 0x97f   : > { %v8838_v24 = vpop.eup %8837 }
 0x980   : > { %v8840_v28 = vpop.eup %8839  ;;  %v4530_v23 = vmul.f32 0.5, %v8838_v24 }
 0x981   : > { %v8842_v21 = vpop.eup %8841  ;;  %v4528_v38 = vmul.f32 0.5, %v8840_v28  ;;  %v8207_v28 = vld [vmem:[#allocation3 + $0x290] sm:$0xff]  }
 0x982   : > { %v8844_v30 = vpop.eup %8843  ;;  %v4562_v47 = vadd.f32 0.5, %v4530_v23  ;;  %v4531_v25 = vmul.f32 0.5, %v8842_v21 }
 0x983   : > { %v4560_v31 = vadd.f32 0.5, %v4528_v38  ;;  %v4529_v32 = vmul.f32 0.5, %v8844_v30 }
 0x984   : > { %v4563_v34 = vadd.f32 0.5, %v4531_v25  ;;  %v4594_v37 = vmul.f32 %v4562_v47, %v4382_v14 }
 0x985   : > { %v4561_v29 = vadd.f32 0.5, %v4529_v32  ;;  %v4592_v27 = vmul.f32 %v4560_v31, %v4374_v48 }
 0x986   : > { %v4595_v8 = vmul.f32 %v4563_v34, %v4385_v6  ;;  %v8208_v34 = vld [vmem:[#allocation3 + $0x298] sm:$0xff]  }
 0x987   : > { %v4593_v39 = vmul.f32 %v4561_v29, %v4377_v22  ;;  %v8206_v22 = vld [vmem:[#allocation3 + $0x288] sm:$0xff]  }
 0x988   : > { %v7814_v17 = vpop.f32.mrb[144].mxu0  ;;  %v4619_v49 = vpack.c.bf16 %v4595_v8, %v4594_v37  ;;  %7878 = vmatprep.subr.bf16.mxu0 %v8206_v22 }
 0x989   : > { %v4398_v40 = vadd.f32 %v7814_v17, %v9912_v35  ;;  %v4389_v41 = vpop.f32.mrb[145].mxu0  ;;  %v4618_v44 = vpack.c.bf16 %v4593_v39, %v4592_v27  ;;  %7879 = vmatpush3.bf16.msra.mxu0 %v8206_v22 }
 0x98a   : > { %v4390_v26 = vadd.f32 %v9912_v35, %v4389_v41  ;;  %v7815_v42 = vpop.f32.mrb[146].mxu0  ;;  %7880 = vmatprep.subr.bf16.mxu0 %v8207_v28 }
 0x98b   : > { %v4470_v45 = vmul.f32 0.5, %v4398_v40  ;;  %v4401_v61 = vadd.f32 %v7815_v42, %v9912_v35  ;;  %v4392_v46 = vpop.f32.mrb[147].mxu0  ;;  %7856 = vmatprep.mubr.bf16.mxu1 %v4618_v44 }
 0x98c   : > { %v4468_v59 = vmul.f32 0.5, %v4390_v26  ;;  %v4393_v51 = vadd.f32 %v9912_v35, %v4392_v46  ;;  %7857 = vmatmul.mubr.bf16.gmra.mrb[140].mxu1 %v4619_v49 }
 0x98d   : > { %8845 = vtanh.f32 %v4470_v45  ;;  %v4471_v52 = vmul.f32 0.5, %v4401_v61  ;;  %7881 = vmatpush3.bf16.msra.mxu0 %v8207_v28 }
 0x98e   : > { %8847 = vtanh.f32 %v4468_v59  ;;  %v4469_v53 = vmul.f32 0.5, %v4393_v51  ;;  %7882 = vmatprep.subr.bf16.mxu0 %v8208_v34 }
 0x98f   : > { %8849 = vtanh.f32 %v4471_v52 }
 0x990   : > { %8851 = vtanh.f32 %v4469_v53  ;;  %v8210_v53 = vld [vmem:[#allocation3 + $0x2a8] sm:$0xff]  }
 0x991   : > { %7883 = vmatpush3.bf16.msra.mxu0 %v8208_v34 }
 0x997   : > { %v8846_v33 = vpop.eup %8845 }
 0x998   : > { %v8848_v1 = vpop.eup %8847  ;;  %v4534_v9 = vmul.f32 0.5, %v8846_v33 }
 0x999   : > { %v8850_v58 = vpop.eup %8849  ;;  %v4532_v4 = vmul.f32 0.5, %v8848_v1 }
 0x99a   : > { %v8852_v36 = vpop.eup %8851  ;;  %v4566_v62 = vadd.f32 0.5, %v4534_v9  ;;  %v4535_v55 = vmul.f32 0.5, %v8850_v58  ;;  %v8211_v9 = vld [vmem:[#allocation3 + $0x2b0] sm:$0xff]   ;;  %v8212_v58 = vld [vmem:[#allocation3 + $0x2b8] sm:$0xff]  }
 0x99b   : > { %v4564_v60 = vadd.f32 0.5, %v4532_v4  ;;  %v4533_v3 = vmul.f32 0.5, %v8852_v36 }
 0x99c   : > { %v4567_v5 = vadd.f32 0.5, %v4535_v55  ;;  %v4598_v7 = vmul.f32 %v4566_v62, %v4398_v40  ;;  %v8209_v40 = vld [vmem:[#allocation3 + $0x2a0] sm:$0xff]  }
 0x99d   : > { %v4565_v0 = vadd.f32 0.5, %v4533_v3  ;;  %v4596_v57 = vmul.f32 %v4564_v60, %v4390_v26  ;;  %7884 = vmatprep.subr.bf16.mxu0 %v8209_v40 }
 0x99e   : > { %v4599_v19 = vmul.f32 %v4567_v5, %v4401_v61  ;;  %7885 = vmatpush3.bf16.msra.mxu0 %v8209_v40  ;;  %v9949_v40 = vld [vmem:[%s10280_s4 + $0x9] ss:$0 sm:$0xff] }
 0x99f   : > { %v4597_v54 = vmul.f32 %v4565_v0, %v4393_v51  ;;  %7886 = vmatprep.subr.bf16.mxu0 %v8210_v53 }
 0x9a0   : > { %v7818_v11 = vpop.f32.mrb[148].mxu0  ;;  %v4621_v56 = vpack.c.bf16 %v4599_v19, %v4598_v7 }
 0x9a1   : > { %v4414_v12 = vadd.f32 %v7818_v11, %v9912_v35  ;;  %v4405_v10 = vpop.f32.mrb[149].mxu0  ;;  %v4620_v15 = vpack.c.bf16 %v4597_v54, %v4596_v57 }
 0x9a2   : > { %v4406_v14 = vadd.f32 %v9912_v35, %v4405_v10  ;;  %v7819_v50 = vpop.f32.mrb[150].mxu0  ;;  %7887 = vmatpush3.bf16.msra.mxu0 %v8210_v53 }
 0x9a3   : > { %v4474_v13 = vmul.f32 0.5, %v4414_v12  ;;  %v4417_v48 = vadd.f32 %v7819_v50, %v9912_v35  ;;  %v4408_v16 = vpop.f32.mrb[151].mxu0  ;;  %7860 = vmatprep.mubr.bf16.mxu1 %v4620_v15  ;;  %7888 = vmatprep.subr.bf16.mxu0 %v8211_v9 }
 0x9a4   : > { %v4472_v18 = vmul.f32 0.5, %v4406_v14  ;;  %v4409_v6 = vadd.f32 %v9912_v35, %v4408_v16  ;;  %7861 = vmatmul.mubr.bf16.gmra.mrb[144].mxu1 %v4621_v56 }
 0x9a5   : > { %8853 = vtanh.f32 %v4474_v13  ;;  %v4475_v2 = vmul.f32 0.5, %v4417_v48 }
 0x9a6   : > { %8855 = vtanh.f32 %v4472_v18  ;;  %v4473_v20 = vmul.f32 0.5, %v4409_v6  ;;  %7889 = vmatpush3.bf16.msra.mxu0 %v8211_v9 }
 0x9a7   : > { %8857 = vtanh.f32 %v4475_v2  ;;  %7890 = vmatprep.subr.bf16.mxu0 %v8212_v58 }
 0x9a8   : > { %8859 = vtanh.f32 %v4473_v20 }
 0x9aa   : > { %7891 = vmatpush3.bf16.msra.mxu0 %v8212_v58 }
 0x9af   : > { %v8854_v63 = vpop.eup %8853 }
 0x9b0   : > { %v8856_v43 = vpop.eup %8855  ;;  %v4538_v24 = vmul.f32 0.5, %v8854_v63 }
 0x9b1   : > { %v8858_v23 = vpop.eup %8857  ;;  %v4536_v21 = vmul.f32 0.5, %v8856_v43 }
 0x9b2   : > { %v8860_v38 = vpop.eup %8859  ;;  %v4570_v30 = vadd.f32 0.5, %v4538_v24  ;;  %v4539_v47 = vmul.f32 0.5, %v8858_v23 }
 0x9b3   : > { %v4568_v25 = vadd.f32 0.5, %v4536_v21  ;;  %v4537_v31 = vmul.f32 0.5, %v8860_v38 }
 0x9b4   : > { %v4571_v32 = vadd.f32 0.5, %v4539_v47  ;;  %v4602_v37 = vmul.f32 %v4570_v30, %v4414_v12 }
 0x9b5   : > { %v4569_v29 = vadd.f32 0.5, %v4537_v31  ;;  %v4600_v27 = vmul.f32 %v4568_v25, %v4406_v14 }
 0x9b6   : > { %v4603_v8 = vmul.f32 %v4571_v32, %v4417_v48 }
 0x9b7   : > { %v4601_v39 = vmul.f32 %v4569_v29, %v4409_v6 }
 0x9b8   : > { %v7822_v17 = vpop.f32.mrb[152].mxu0  ;;  %v4623_v49 = vpack.c.bf16 %v4603_v8, %v4602_v37 }
 0x9b9   : > { %v4430_v41 = vadd.f32 %v7822_v17, %v9912_v35  ;;  %v4421_v44 = vpop.f32.mrb[153].mxu0  ;;  %v4622_v26 = vpack.c.bf16 %v4601_v39, %v4600_v27 }
 0x9ba   : > { %v4422_v42 = vadd.f32 %v9912_v35, %v4421_v44  ;;  %v7823_v45 = vpop.f32.mrb[154].mxu0 }
 0x9bb   : > { %v4478_v61 = vmul.f32 0.5, %v4430_v41  ;;  %v4433_v46 = vadd.f32 %v7823_v45, %v9912_v35  ;;  %v4424_v59 = vpop.f32.mrb[155].mxu0  ;;  %7864 = vmatprep.mubr.bf16.mxu1 %v4622_v26 }
 0x9bc   : > { %v4476_v51 = vmul.f32 0.5, %v4422_v42  ;;  %v4425_v52 = vadd.f32 %v9912_v35, %v4424_v59  ;;  %7865 = vmatmul.mubr.bf16.gmra.mrb[148].mxu1 %v4623_v49 }
 0x9bd   : > { %8861 = vtanh.f32 %v4478_v61  ;;  %v4479_v33 = vmul.f32 0.5, %v4433_v46 }
 0x9be   : > { %8863 = vtanh.f32 %v4476_v51  ;;  %v4477_v1 = vmul.f32 0.5, %v4425_v52 }
 0x9bf   : > { %8865 = vtanh.f32 %v4479_v33 }
 0x9c0   : > { %8867 = vtanh.f32 %v4477_v1 }
 0x9c7   : > { %v8862_v4 = vpop.eup %8861 }
 0x9c8   : > { %v8864_v36 = vpop.eup %8863  ;;  %v4542_v62 = vmul.f32 0.5, %v8862_v4 }
 0x9c9   : > { %v8866_v55 = vpop.eup %8865  ;;  %v4540_v60 = vmul.f32 0.5, %v8864_v36 }
 0x9ca   : > { %v8868_v3 = vpop.eup %8867  ;;  %v4574_v5 = vadd.f32 0.5, %v4542_v62  ;;  %v4543_v0 = vmul.f32 0.5, %v8866_v55 }
 0x9cb   : > { %v4572_v7 = vadd.f32 0.5, %v4540_v60  ;;  %v4541_v19 = vmul.f32 0.5, %v8868_v3 }
 0x9cc   : > { %v4575_v57 = vadd.f32 0.5, %v4543_v0  ;;  %v4606_v11 = vmul.f32 %v4574_v5, %v4430_v41 }
 0x9cd   : > { %v4573_v54 = vadd.f32 0.5, %v4541_v19  ;;  %v4604_v12 = vmul.f32 %v4572_v7, %v4422_v42 }
 0x9ce   : > { %v4607_v56 = vmul.f32 %v4575_v57, %v4433_v46 }
 0x9cf   : > { %v4605_v10 = vmul.f32 %v4573_v54, %v4425_v52 }
 0x9d0   : > { %v7826_v15 = vpop.f32.mrb[156].mxu0  ;;  %v4625_v14 = vpack.c.bf16 %v4607_v56, %v4606_v11 }
 0x9d1   : > { %v4446_v50 = vadd.f32 %v7826_v15, %v9912_v35  ;;  %v4437_v13 = vpop.f32.mrb[157].mxu0  ;;  %v4624_v48 = vpack.c.bf16 %v4605_v10, %v4604_v12 }
 0x9d2   : > { %v4438_v16 = vadd.f32 %v9912_v35, %v4437_v13  ;;  %v7827_v18 = vpop.f32.mrb[158].mxu0 }
 0x9d3   : > { %v4482_v6 = vmul.f32 0.5, %v4446_v50  ;;  %v4449_v2 = vadd.f32 %v7827_v18, %v9912_v35  ;;  %v4440_v20 = vpop.f32.mrb[159].mxu0  ;;  %7868 = vmatprep.mubr.bf16.mxu1 %v4624_v48 }
 0x9d4   : > { %v4480_v22 = vmul.f32 0.5, %v4438_v16  ;;  %v4441_v63 = vadd.f32 %v9912_v35, %v4440_v20  ;;  %7869 = vmatmul.mubr.bf16.gmra.mrb[152].mxu1 %v4625_v14 }
 0x9d5   : > { %8869 = vtanh.f32 %v4482_v6  ;;  %v4483_v43 = vmul.f32 0.5, %v4449_v2 }
 0x9d6   : > { %8871 = vtanh.f32 %v4480_v22  ;;  %v4481_v24 = vmul.f32 0.5, %v4441_v63 }
 0x9d7   : > { %8873 = vtanh.f32 %v4483_v43 }
 0x9d8   : > { %8875 = vtanh.f32 %v4481_v24 }
 0x9df   : > { %v8870_v28 = vpop.eup %8869 }
 0x9e0   : > { %v8872_v23 = vpop.eup %8871  ;;  %v4546_v21 = vmul.f32 0.5, %v8870_v28 }
 0x9e1   : > { %v8874_v38 = vpop.eup %8873  ;;  %v4544_v30 = vmul.f32 0.5, %v8872_v23 }
 0x9e2   : > { %v8876_v47 = vpop.eup %8875  ;;  %v4578_v25 = vadd.f32 0.5, %v4546_v21  ;;  %v4547_v31 = vmul.f32 0.5, %v8874_v38 }
 0x9e3   : > { %v4576_v32 = vadd.f32 0.5, %v4544_v30  ;;  %v4545_v34 = vmul.f32 0.5, %v8876_v47 }
 0x9e4   : > { %v4579_v29 = vadd.f32 0.5, %v4547_v31  ;;  %v4610_v35 = vmul.f32 %v4578_v25, %v4446_v50 }
 0x9e5   : > { %v4577_v37 = vadd.f32 0.5, %v4545_v34  ;;  %v4608_v27 = vmul.f32 %v4576_v32, %v4438_v16 }
 0x9e6   : > { %v4611_v8 = vmul.f32 %v4579_v29, %v4449_v2 }
 0x9e7   : > { %v4609_v39 = vmul.f32 %v4577_v37, %v4441_v63 }
 0x9e8   : > { %v4627_v17 = vpack.c.bf16 %v4611_v8, %v4610_v35 }
 0x9e9   : > { %v4626_v49 = vpack.c.bf16 %v4609_v39, %v4608_v27 }
 0x9eb   : > { %7872 = vmatprep.mubr.bf16.mxu1 %v4626_v49 }
 0x9ec   : > { %7873 = vmatmul.mubr.bf16.gmra.mrb[156].mxu1 %v4627_v17 }
 0xa2e   : > { %v7846_v41 = vpop.f32.mrb[128].mxu1 }
 0xa2f   : > { %v4744_v44 = vadd.f32 %v7846_v41, %v9949_v40  ;;  %v4735_v26 = vpop.f32.mrb[129].mxu1 }
 0xa30   : > { %v4736_v42 = vadd.f32 %v9949_v40, %v4735_v26  ;;  %v7847_v45 = vpop.f32.mrb[130].mxu1 }
 0xa31   : > { %v4864_v61 = vmul.f32 0.5, %v4744_v44  ;;  %v4747_v46 = vadd.f32 %v7847_v45, %v9949_v40  ;;  %v4738_v59 = vpop.f32.mrb[131].mxu1 }
 0xa32   : > { %v4862_v51 = vmul.f32 0.5, %v4736_v42  ;;  %v4739_v52 = vadd.f32 %v9949_v40, %v4738_v59 }
 0xa33   : > { %8877 = vtanh.f32 %v4864_v61  ;;  %v4865_v53 = vmul.f32 0.5, %v4747_v46 }
 0xa34   : > { %8879 = vtanh.f32 %v4862_v51  ;;  %v4863_v33 = vmul.f32 0.5, %v4739_v52 }
 0xa35   : > { %8881 = vtanh.f32 %v4865_v53 }
 0xa36   : > { %8883 = vtanh.f32 %v4863_v33  ;;  %v7850_v1 = vpop.f32.mrb[132].mxu1 }
 0xa37   : > { %v4760_v9 = vadd.f32 %v7850_v1, %v9949_v40  ;;  %v4751_v58 = vpop.f32.mrb[133].mxu1 }
 0xa38   : > { %v4752_v4 = vadd.f32 %v9949_v40, %v4751_v58  ;;  %v7851_v36 = vpop.f32.mrb[134].mxu1 }
 0xa39   : > { %v4868_v62 = vmul.f32 0.5, %v4760_v9  ;;  %v4763_v55 = vadd.f32 %v7851_v36, %v9949_v40  ;;  %v4754_v60 = vpop.f32.mrb[135].mxu1 }
 0xa3a   : > { %v4866_v3 = vmul.f32 0.5, %v4752_v4  ;;  %v4755_v5 = vadd.f32 %v9949_v40, %v4754_v60 }
 0xa3b   : > { %8885 = vtanh.f32 %v4868_v62  ;;  %v4869_v0 = vmul.f32 0.5, %v4763_v55 }
 0xa3c   : > { %8887 = vtanh.f32 %v4866_v3  ;;  %v4867_v7 = vmul.f32 0.5, %v4755_v5  ;;  %v8213_v3 = vld [vmem:[#allocation3 + $0x2c0] sm:$0xff]  }
 0xa3d   : > { %v8878_v19 = vpop.eup %8877  ;;  %8889 = vtanh.f32 %v4869_v0  ;;  %7924 = vmatprep.subr.bf16.mxu1 %v8213_v3 }
 0xa3e   : > { %v8880_v57 = vpop.eup %8879  ;;  %v4928_v54 = vmul.f32 0.5, %v8878_v19  ;;  %8891 = vtanh.f32 %v4867_v7  ;;  %7925 = vmatpush3.bf16.msra.mxu1 %v8213_v3 }
 0xa3f   : > { %v8882_v11 = vpop.eup %8881  ;;  %v4926_v56 = vmul.f32 0.5, %v8880_v57 }
 0xa40   : > { %v8884_v12 = vpop.eup %8883  ;;  %v4960_v10 = vadd.f32 0.5, %v4928_v54  ;;  %v4929_v15 = vmul.f32 0.5, %v8882_v11 }
 0xa41   : > { %v4958_v14 = vadd.f32 0.5, %v4926_v56  ;;  %v4927_v50 = vmul.f32 0.5, %v8884_v12 }
 0xa42   : > { %v4961_v13 = vadd.f32 0.5, %v4929_v15  ;;  %v4992_v16 = vmul.f32 %v4960_v10, %v4744_v44 }
 0xa43   : > { %v4959_v48 = vadd.f32 0.5, %v4927_v50  ;;  %v4990_v2 = vmul.f32 %v4958_v14, %v4736_v42 }
 0xa44   : > { %v4993_v18 = vmul.f32 %v4961_v13, %v4747_v46 }
 0xa45   : > { %v8886_v6 = vpop.eup %8885  ;;  %v4991_v20 = vmul.f32 %v4959_v48, %v4739_v52 }
 0xa46   : > { %v8888_v22 = vpop.eup %8887  ;;  %v5023_v63 = vpack.c.bf16 %v4993_v18, %v4992_v16  ;;  %v4932_v43 = vmul.f32 0.5, %v8886_v6 }
 0xa47   : > { %v8890_v24 = vpop.eup %8889  ;;  %v4930_v28 = vmul.f32 0.5, %v8888_v22  ;;  %v7854_v23 = vpop.f32.mrb[136].mxu1  ;;  %v5022_v21 = vpack.c.bf16 %v4991_v20, %v4990_v2 }
 0xa48   : > { %v8892_v38 = vpop.eup %8891  ;;  %v4964_v30 = vadd.f32 0.5, %v4932_v43  ;;  %v4933_v47 = vmul.f32 0.5, %v8890_v24  ;;  %v4776_v25 = vadd.f32 %v7854_v23, %v9949_v40  ;;  %v4767_v31 = vpop.f32.mrb[137].mxu1 }
 0xa49   : > { %v4962_v32 = vadd.f32 0.5, %v4930_v28  ;;  %v4931_v34 = vmul.f32 0.5, %v8892_v38  ;;  %v4768_v29 = vadd.f32 %v9949_v40, %v4767_v31  ;;  %v7855_v37 = vpop.f32.mrb[138].mxu1  ;;  %7892 = vmatprep.mubr.bf16.mxu0 %v5022_v21 }
 0xa4a   : > { %v4965_v35 = vadd.f32 0.5, %v4933_v47  ;;  %v4872_v8 = vmul.f32 0.5, %v4776_v25  ;;  %v4779_v27 = vadd.f32 %v7855_v37, %v9949_v40  ;;  %v4770_v39 = vpop.f32.mrb[139].mxu1  ;;  %7893 = vmatmul.mubr.bf16.vlgmr.msra.gmra.mrb[160].mxu0 %v5023_v63  ;;  %v4996_v44 = vmul.f32 %v4964_v30, %v4760_v9 }
 0xa4b   : > { %v4963_v17 = vadd.f32 0.5, %v4931_v34  ;;  %v4870_v49 = vmul.f32 0.5, %v4768_v29  ;;  %v4771_v41 = vadd.f32 %v9949_v40, %v4770_v39  ;;  %v4994_v45 = vmul.f32 %v4962_v32, %v4752_v4 }
 0xa4c   : > { %v4997_v26 = vmul.f32 %v4965_v35, %v4763_v55  ;;  %8893 = vtanh.f32 %v4872_v8  ;;  %v4873_v42 = vmul.f32 0.5, %v4779_v27 }
 0xa4d   : > { %v4995_v61 = vmul.f32 %v4963_v17, %v4755_v5  ;;  %8895 = vtanh.f32 %v4870_v49  ;;  %v4871_v46 = vmul.f32 0.5, %v4771_v41 }
 0xa4e   : > { %8897 = vtanh.f32 %v4873_v42  ;;  %v5025_v59 = vpack.c.bf16 %v4997_v26, %v4996_v44 }
 0xa4f   : > { %8899 = vtanh.f32 %v4871_v46  ;;  %v5024_v51 = vpack.c.bf16 %v4995_v61, %v4994_v45 }
 0xa51   : > { %7896 = vmatprep.mubr.bf16.mxu0 %v5024_v51 }
 0xa52   : > { %7897 = vmatmul.mubr.bf16.gmra.mrb[164].mxu0 %v5025_v59 }
 0xa56   : > { %v8894_v52 = vpop.eup %8893 }
 0xa57   : > { %v8896_v53 = vpop.eup %8895  ;;  %v4936_v33 = vmul.f32 0.5, %v8894_v52 }
 0xa58   : > { %v8898_v1 = vpop.eup %8897  ;;  %v4934_v58 = vmul.f32 0.5, %v8896_v53 }
 0xa59   : > { %v8900_v36 = vpop.eup %8899  ;;  %v4968_v9 = vadd.f32 0.5, %v4936_v33  ;;  %v4937_v62 = vmul.f32 0.5, %v8898_v1 }
 0xa5a   : > { %v4966_v55 = vadd.f32 0.5, %v4934_v58  ;;  %v4935_v60 = vmul.f32 0.5, %v8900_v36 }
 0xa5b   : > { %v4969_v4 = vadd.f32 0.5, %v4937_v62  ;;  %v5000_v0 = vmul.f32 %v4968_v9, %v4776_v25 }
 0xa5c   : > { %v4967_v5 = vadd.f32 0.5, %v4935_v60  ;;  %v4998_v19 = vmul.f32 %v4966_v55, %v4768_v29 }
 0xa5d   : > { %v5001_v7 = vmul.f32 %v4969_v4, %v4779_v27 }
 0xa5e   : > { %v4999_v57 = vmul.f32 %v4967_v5, %v4771_v41 }
 0xa5f   : > { %v7858_v54 = vpop.f32.mrb[140].mxu1  ;;  %v5027_v11 = vpack.c.bf16 %v5001_v7, %v5000_v0 }
 0xa60   : > { %v4792_v56 = vadd.f32 %v7858_v54, %v9949_v40  ;;  %v4783_v12 = vpop.f32.mrb[141].mxu1  ;;  %v5026_v10 = vpack.c.bf16 %v4999_v57, %v4998_v19 }
 0xa61   : > { %v4784_v15 = vadd.f32 %v9949_v40, %v4783_v12  ;;  %v7859_v14 = vpop.f32.mrb[142].mxu1 }
 0xa62   : > { %v4876_v50 = vmul.f32 0.5, %v4792_v56  ;;  %v4795_v13 = vadd.f32 %v7859_v14, %v9949_v40  ;;  %v4786_v48 = vpop.f32.mrb[143].mxu1  ;;  %7900 = vmatprep.mubr.bf16.mxu0 %v5026_v10 }
 0xa63   : > { %v4874_v16 = vmul.f32 0.5, %v4784_v15  ;;  %v4787_v18 = vadd.f32 %v9949_v40, %v4786_v48  ;;  %7901 = vmatmul.mubr.bf16.gmra.mrb[168].mxu0 %v5027_v11 }
 0xa64   : > { %8901 = vtanh.f32 %v4876_v50  ;;  %v4877_v6 = vmul.f32 0.5, %v4795_v13 }
 0xa65   : > { %8903 = vtanh.f32 %v4874_v16  ;;  %v4875_v2 = vmul.f32 0.5, %v4787_v18 }
 0xa66   : > { %8905 = vtanh.f32 %v4877_v6 }
 0xa67   : > { %8907 = vtanh.f32 %v4875_v2 }
 0xa6e   : > { %v8902_v20 = vpop.eup %8901 }
 0xa6f   : > { %v8904_v22 = vpop.eup %8903  ;;  %v4940_v63 = vmul.f32 0.5, %v8902_v20 }
 0xa70   : > { %v8906_v43 = vpop.eup %8905  ;;  %v4938_v24 = vmul.f32 0.5, %v8904_v22  ;;  %v8215_v22 = vld [vmem:[#allocation3 + $0x2d0] sm:$0xff]  }
 0xa71   : > { %v8908_v28 = vpop.eup %8907  ;;  %v4972_v23 = vadd.f32 0.5, %v4940_v63  ;;  %v4941_v21 = vmul.f32 0.5, %v8906_v43 }
 0xa72   : > { %v4970_v38 = vadd.f32 0.5, %v4938_v24  ;;  %v4939_v30 = vmul.f32 0.5, %v8908_v28 }
 0xa73   : > { %v4973_v47 = vadd.f32 0.5, %v4941_v21  ;;  %v5004_v31 = vmul.f32 %v4972_v23, %v4792_v56 }
 0xa74   : > { %v4971_v25 = vadd.f32 0.5, %v4939_v30  ;;  %v5002_v34 = vmul.f32 %v4970_v38, %v4784_v15 }
 0xa75   : > { %v5005_v32 = vmul.f32 %v4973_v47, %v4795_v13  ;;  %v8216_v47 = vld [vmem:[#allocation3 + $0x2d8] sm:$0xff]  }
 0xa76   : > { %v5003_v29 = vmul.f32 %v4971_v25, %v4787_v18  ;;  %v8214_v18 = vld [vmem:[#allocation3 + $0x2c8] sm:$0xff]  }
 0xa77   : > { %v7862_v37 = vpop.f32.mrb[144].mxu1  ;;  %v5029_v35 = vpack.c.bf16 %v5005_v32, %v5004_v31  ;;  %7926 = vmatprep.subr.bf16.mxu1 %v8214_v18 }
 0xa78   : > { %v4808_v8 = vadd.f32 %v7862_v37, %v9949_v40  ;;  %v4799_v27 = vpop.f32.mrb[145].mxu1  ;;  %v5028_v39 = vpack.c.bf16 %v5003_v29, %v5002_v34  ;;  %7927 = vmatpush3.bf16.msra.mxu1 %v8214_v18 }
 0xa79   : > { %v4800_v17 = vadd.f32 %v9949_v40, %v4799_v27  ;;  %v7863_v49 = vpop.f32.mrb[146].mxu1  ;;  %7928 = vmatprep.subr.bf16.mxu1 %v8215_v22 }
 0xa7a   : > { %v4880_v41 = vmul.f32 0.5, %v4808_v8  ;;  %v4811_v44 = vadd.f32 %v7863_v49, %v9949_v40  ;;  %v4802_v26 = vpop.f32.mrb[147].mxu1  ;;  %7904 = vmatprep.mubr.bf16.mxu0 %v5028_v39 }
 0xa7b   : > { %v4878_v42 = vmul.f32 0.5, %v4800_v17  ;;  %v4803_v45 = vadd.f32 %v9949_v40, %v4802_v26  ;;  %7905 = vmatmul.mubr.bf16.gmra.mrb[172].mxu0 %v5029_v35 }
 0xa7c   : > { %8909 = vtanh.f32 %v4880_v41  ;;  %v4881_v61 = vmul.f32 0.5, %v4811_v44  ;;  %7929 = vmatpush3.bf16.msra.mxu1 %v8215_v22 }
 0xa7d   : > { %8911 = vtanh.f32 %v4878_v42  ;;  %v4879_v46 = vmul.f32 0.5, %v4803_v45  ;;  %7930 = vmatprep.subr.bf16.mxu1 %v8216_v47 }
 0xa7e   : > { %8913 = vtanh.f32 %v4881_v61 }
 0xa7f   : > { %8915 = vtanh.f32 %v4879_v46  ;;  %v8218_v46 = vld [vmem:[#allocation3 + $0x2e8] sm:$0xff]  }
 0xa80   : > { %7931 = vmatpush3.bf16.msra.mxu1 %v8216_v47 }
 0xa86   : > { %v8910_v59 = vpop.eup %8909 }
 0xa87   : > { %v8912_v51 = vpop.eup %8911  ;;  %v4944_v52 = vmul.f32 0.5, %v8910_v59 }
 0xa88   : > { %v8914_v53 = vpop.eup %8913  ;;  %v4942_v33 = vmul.f32 0.5, %v8912_v51 }
 0xa89   : > { %v8916_v1 = vpop.eup %8915  ;;  %v4976_v58 = vadd.f32 0.5, %v4944_v52  ;;  %v4945_v36 = vmul.f32 0.5, %v8914_v53  ;;  %v8219_v52 = vld [vmem:[#allocation3 + $0x2f0] sm:$0xff]   ;;  %v8220_v53 = vld [vmem:[#allocation3 + $0x2f8] sm:$0xff]  }
 0xa8a   : > { %v4974_v9 = vadd.f32 0.5, %v4942_v33  ;;  %v4943_v62 = vmul.f32 0.5, %v8916_v1 }
 0xa8b   : > { %v4977_v55 = vadd.f32 0.5, %v4945_v36  ;;  %v5008_v4 = vmul.f32 %v4976_v58, %v4808_v8  ;;  %v8217_v8 = vld [vmem:[#allocation3 + $0x2e0] sm:$0xff]  }
 0xa8c   : > { %v4975_v60 = vadd.f32 0.5, %v4943_v62  ;;  %v5006_v5 = vmul.f32 %v4974_v9, %v4800_v17  ;;  %7932 = vmatprep.subr.bf16.mxu1 %v8217_v8 }
 0xa8d   : > { %v5009_v3 = vmul.f32 %v4977_v55, %v4811_v44  ;;  %7933 = vmatpush3.bf16.msra.mxu1 %v8217_v8  ;;  %v9986_v8 = vld [vmem:[%s10280_s4 + $0xa] ss:$0 sm:$0xff] }
 0xa8e   : > { %v5007_v0 = vmul.f32 %v4975_v60, %v4803_v45  ;;  %7934 = vmatprep.subr.bf16.mxu1 %v8218_v46 }
 0xa8f   : > { %v7866_v7 = vpop.f32.mrb[148].mxu1  ;;  %v5031_v19 = vpack.c.bf16 %v5009_v3, %v5008_v4 }
 0xa90   : > { %v4824_v57 = vadd.f32 %v7866_v7, %v9949_v40  ;;  %v4815_v54 = vpop.f32.mrb[149].mxu1  ;;  %v5030_v11 = vpack.c.bf16 %v5007_v0, %v5006_v5 }
 0xa91   : > { %v4816_v56 = vadd.f32 %v9949_v40, %v4815_v54  ;;  %v7867_v12 = vpop.f32.mrb[150].mxu1  ;;  %7935 = vmatpush3.bf16.msra.mxu1 %v8218_v46 }
 0xa92   : > { %v4884_v10 = vmul.f32 0.5, %v4824_v57  ;;  %v4827_v15 = vadd.f32 %v7867_v12, %v9949_v40  ;;  %v4818_v14 = vpop.f32.mrb[151].mxu1  ;;  %7908 = vmatprep.mubr.bf16.mxu0 %v5030_v11  ;;  %7936 = vmatprep.subr.bf16.mxu1 %v8219_v52 }
 0xa93   : > { %v4882_v50 = vmul.f32 0.5, %v4816_v56  ;;  %v4819_v13 = vadd.f32 %v9949_v40, %v4818_v14  ;;  %7909 = vmatmul.mubr.bf16.gmra.mrb[176].mxu0 %v5031_v19 }
 0xa94   : > { %8917 = vtanh.f32 %v4884_v10  ;;  %v4885_v48 = vmul.f32 0.5, %v4827_v15 }
 0xa95   : > { %8919 = vtanh.f32 %v4882_v50  ;;  %v4883_v16 = vmul.f32 0.5, %v4819_v13  ;;  %7937 = vmatpush3.bf16.msra.mxu1 %v8219_v52 }
 0xa96   : > { %8921 = vtanh.f32 %v4885_v48  ;;  %7938 = vmatprep.subr.bf16.mxu1 %v8220_v53 }
 0xa97   : > { %8923 = vtanh.f32 %v4883_v16 }
 0xa99   : > { %7939 = vmatpush3.bf16.msra.mxu1 %v8220_v53 }
 0xa9e   : > { %v8918_v6 = vpop.eup %8917 }
 0xa9f   : > { %v8920_v2 = vpop.eup %8919  ;;  %v4948_v20 = vmul.f32 0.5, %v8918_v6 }
 0xaa0   : > { %v8922_v63 = vpop.eup %8921  ;;  %v4946_v43 = vmul.f32 0.5, %v8920_v2 }
 0xaa1   : > { %v8924_v24 = vpop.eup %8923  ;;  %v4980_v28 = vadd.f32 0.5, %v4948_v20  ;;  %v4949_v23 = vmul.f32 0.5, %v8922_v63 }
 0xaa2   : > { %v4978_v21 = vadd.f32 0.5, %v4946_v43  ;;  %v4947_v38 = vmul.f32 0.5, %v8924_v24 }
 0xaa3   : > { %v4981_v30 = vadd.f32 0.5, %v4949_v23  ;;  %v5012_v31 = vmul.f32 %v4980_v28, %v4824_v57 }
 0xaa4   : > { %v4979_v25 = vadd.f32 0.5, %v4947_v38  ;;  %v5010_v34 = vmul.f32 %v4978_v21, %v4816_v56 }
 0xaa5   : > { %v5013_v32 = vmul.f32 %v4981_v30, %v4827_v15 }
 0xaa6   : > { %v5011_v29 = vmul.f32 %v4979_v25, %v4819_v13 }
 0xaa7   : > { %v7870_v37 = vpop.f32.mrb[152].mxu1  ;;  %v5033_v35 = vpack.c.bf16 %v5013_v32, %v5012_v31 }
 0xaa8   : > { %v4840_v27 = vadd.f32 %v7870_v37, %v9949_v40  ;;  %v4831_v39 = vpop.f32.mrb[153].mxu1  ;;  %v5032_v17 = vpack.c.bf16 %v5011_v29, %v5010_v34 }
 0xaa9   : > { %v4832_v49 = vadd.f32 %v9949_v40, %v4831_v39  ;;  %v7871_v41 = vpop.f32.mrb[154].mxu1 }
 0xaaa   : > { %v4888_v44 = vmul.f32 0.5, %v4840_v27  ;;  %v4843_v26 = vadd.f32 %v7871_v41, %v9949_v40  ;;  %v4834_v42 = vpop.f32.mrb[155].mxu1  ;;  %7912 = vmatprep.mubr.bf16.mxu0 %v5032_v17 }
 0xaab   : > { %v4886_v45 = vmul.f32 0.5, %v4832_v49  ;;  %v4835_v61 = vadd.f32 %v9949_v40, %v4834_v42  ;;  %7913 = vmatmul.mubr.bf16.gmra.mrb[180].mxu0 %v5033_v35 }
 0xaac   : > { %8925 = vtanh.f32 %v4888_v44  ;;  %v4889_v59 = vmul.f32 0.5, %v4843_v26 }
 0xaad   : > { %8927 = vtanh.f32 %v4886_v45  ;;  %v4887_v51 = vmul.f32 0.5, %v4835_v61 }
 0xaae   : > { %8929 = vtanh.f32 %v4889_v59 }
 0xaaf   : > { %8931 = vtanh.f32 %v4887_v51 }
 0xab6   : > { %v8926_v33 = vpop.eup %8925 }
 0xab7   : > { %v8928_v1 = vpop.eup %8927  ;;  %v4952_v58 = vmul.f32 0.5, %v8926_v33 }
 0xab8   : > { %v8930_v36 = vpop.eup %8929  ;;  %v4950_v9 = vmul.f32 0.5, %v8928_v1 }
 0xab9   : > { %v8932_v62 = vpop.eup %8931  ;;  %v4984_v55 = vadd.f32 0.5, %v4952_v58  ;;  %v4953_v60 = vmul.f32 0.5, %v8930_v36 }
 0xaba   : > { %v4982_v4 = vadd.f32 0.5, %v4950_v9  ;;  %v4951_v3 = vmul.f32 0.5, %v8932_v62 }
 0xabb   : > { %v4985_v5 = vadd.f32 0.5, %v4953_v60  ;;  %v5016_v7 = vmul.f32 %v4984_v55, %v4840_v27 }
 0xabc   : > { %v4983_v0 = vadd.f32 0.5, %v4951_v3  ;;  %v5014_v57 = vmul.f32 %v4982_v4, %v4832_v49 }
 0xabd   : > { %v5017_v19 = vmul.f32 %v4985_v5, %v4843_v26 }
 0xabe   : > { %v5015_v54 = vmul.f32 %v4983_v0, %v4835_v61 }
 0xabf   : > { %v7874_v11 = vpop.f32.mrb[156].mxu1  ;;  %v5035_v56 = vpack.c.bf16 %v5017_v19, %v5016_v7 }
 0xac0   : > { %v4856_v12 = vadd.f32 %v7874_v11, %v9949_v40  ;;  %v4847_v10 = vpop.f32.mrb[157].mxu1  ;;  %v5034_v15 = vpack.c.bf16 %v5015_v54, %v5014_v57 }
 0xac1   : > { %v4848_v14 = vadd.f32 %v9949_v40, %v4847_v10  ;;  %v7875_v50 = vpop.f32.mrb[158].mxu1 }
 0xac2   : > { %v4892_v13 = vmul.f32 0.5, %v4856_v12  ;;  %v4859_v48 = vadd.f32 %v7875_v50, %v9949_v40  ;;  %v4850_v16 = vpop.f32.mrb[159].mxu1  ;;  %7916 = vmatprep.mubr.bf16.mxu0 %v5034_v15 }
 0xac3   : > { %v4890_v18 = vmul.f32 0.5, %v4848_v14  ;;  %v4851_v6 = vadd.f32 %v9949_v40, %v4850_v16  ;;  %7917 = vmatmul.mubr.bf16.gmra.mrb[184].mxu0 %v5035_v56 }
 0xac4   : > { %8933 = vtanh.f32 %v4892_v13  ;;  %v4893_v2 = vmul.f32 0.5, %v4859_v48 }
 0xac5   : > { %8935 = vtanh.f32 %v4890_v18  ;;  %v4891_v20 = vmul.f32 0.5, %v4851_v6 }
 0xac6   : > { %8937 = vtanh.f32 %v4893_v2 }
 0xac7   : > { %8939 = vtanh.f32 %v4891_v20 }
 0xace   : > { %v8934_v22 = vpop.eup %8933 }
 0xacf   : > { %v8936_v63 = vpop.eup %8935  ;;  %v4956_v43 = vmul.f32 0.5, %v8934_v22 }
 0xad0   : > { %v8938_v24 = vpop.eup %8937  ;;  %v4954_v28 = vmul.f32 0.5, %v8936_v63 }
 0xad1   : > { %v8940_v23 = vpop.eup %8939  ;;  %v4988_v21 = vadd.f32 0.5, %v4956_v43  ;;  %v4957_v38 = vmul.f32 0.5, %v8938_v24 }
 0xad2   : > { %v4986_v30 = vadd.f32 0.5, %v4954_v28  ;;  %v4955_v47 = vmul.f32 0.5, %v8940_v23 }
 0xad3   : > { %v4989_v25 = vadd.f32 0.5, %v4957_v38  ;;  %v5020_v40 = vmul.f32 %v4988_v21, %v4856_v12 }
 0xad4   : > { %v4987_v31 = vadd.f32 0.5, %v4955_v47  ;;  %v5018_v34 = vmul.f32 %v4986_v30, %v4848_v14 }
 0xad5   : > { %v5021_v32 = vmul.f32 %v4989_v25, %v4859_v48 }
 0xad6   : > { %v5019_v29 = vmul.f32 %v4987_v31, %v4851_v6 }
 0xad7   : > { %v5037_v37 = vpack.c.bf16 %v5021_v32, %v5020_v40 }
 0xad8   : > { %v5036_v35 = vpack.c.bf16 %v5019_v29, %v5018_v34 }
 0xada   : > { %7920 = vmatprep.mubr.bf16.mxu0 %v5036_v35 }
 0xadb   : > { %7921 = vmatmul.mubr.bf16.gmra.mrb[188].mxu0 %v5037_v37 }
 0xb1d   : > { %v7894_v27 = vpop.f32.mrb[160].mxu0 }
 0xb1e   : > { %v5154_v39 = vadd.f32 %v7894_v27, %v9986_v8  ;;  %v5145_v17 = vpop.f32.mrb[161].mxu0 }
 0xb1f   : > { %v5146_v49 = vadd.f32 %v9986_v8, %v5145_v17  ;;  %v7895_v41 = vpop.f32.mrb[162].mxu0 }
 0xb20   : > { %v5274_v44 = vmul.f32 0.5, %v5154_v39  ;;  %v5157_v26 = vadd.f32 %v7895_v41, %v9986_v8  ;;  %v5148_v42 = vpop.f32.mrb[163].mxu0 }
 0xb21   : > { %v5272_v45 = vmul.f32 0.5, %v5146_v49  ;;  %v5149_v61 = vadd.f32 %v9986_v8, %v5148_v42 }
 0xb22   : > { %8941 = vtanh.f32 %v5274_v44  ;;  %v5275_v46 = vmul.f32 0.5, %v5157_v26 }
 0xb23   : > { %8943 = vtanh.f32 %v5272_v45  ;;  %v5273_v59 = vmul.f32 0.5, %v5149_v61 }
 0xb24   : > { %8945 = vtanh.f32 %v5275_v46 }
 0xb25   : > { %8947 = vtanh.f32 %v5273_v59  ;;  %v7898_v51 = vpop.f32.mrb[164].mxu0 }
 0xb26   : > { %v5170_v52 = vadd.f32 %v7898_v51, %v9986_v8  ;;  %v5161_v53 = vpop.f32.mrb[165].mxu0 }
 0xb27   : > { %v5162_v33 = vadd.f32 %v9986_v8, %v5161_v53  ;;  %v7899_v1 = vpop.f32.mrb[166].mxu0 }
 0xb28   : > { %v5278_v58 = vmul.f32 0.5, %v5170_v52  ;;  %v5173_v36 = vadd.f32 %v7899_v1, %v9986_v8  ;;  %v5164_v9 = vpop.f32.mrb[167].mxu0 }
 0xb29   : > { %v5276_v62 = vmul.f32 0.5, %v5162_v33  ;;  %v5165_v55 = vadd.f32 %v9986_v8, %v5164_v9 }
 0xb2a   : > { %8949 = vtanh.f32 %v5278_v58  ;;  %v5279_v60 = vmul.f32 0.5, %v5173_v36 }
 0xb2b   : > { %8951 = vtanh.f32 %v5276_v62  ;;  %v5277_v4 = vmul.f32 0.5, %v5165_v55  ;;  %v8221_v62 = vld [vmem:[#allocation3 + $0x300] sm:$0xff]  }
 0xb2c   : > { %v8942_v3 = vpop.eup %8941  ;;  %8953 = vtanh.f32 %v5279_v60  ;;  %7972 = vmatprep.subr.bf16.mxu0 %v8221_v62 }
 0xb2d   : > { %v8944_v5 = vpop.eup %8943  ;;  %v5338_v0 = vmul.f32 0.5, %v8942_v3  ;;  %8955 = vtanh.f32 %v5277_v4  ;;  %7973 = vmatpush3.bf16.msra.mxu0 %v8221_v62 }
 0xb2e   : > { %v8946_v7 = vpop.eup %8945  ;;  %v5336_v19 = vmul.f32 0.5, %v8944_v5 }
 0xb2f   : > { %v8948_v57 = vpop.eup %8947  ;;  %v5370_v54 = vadd.f32 0.5, %v5338_v0  ;;  %v5339_v11 = vmul.f32 0.5, %v8946_v7 }
 0xb30   : > { %v5368_v56 = vadd.f32 0.5, %v5336_v19  ;;  %v5337_v12 = vmul.f32 0.5, %v8948_v57 }
 0xb31   : > { %v5371_v10 = vadd.f32 0.5, %v5339_v11  ;;  %v5402_v14 = vmul.f32 %v5370_v54, %v5154_v39 }
 0xb32   : > { %v5369_v15 = vadd.f32 0.5, %v5337_v12  ;;  %v5400_v48 = vmul.f32 %v5368_v56, %v5146_v49 }
 0xb33   : > { %v5403_v50 = vmul.f32 %v5371_v10, %v5157_v26 }
 0xb34   : > { %v8950_v13 = vpop.eup %8949  ;;  %v5401_v16 = vmul.f32 %v5369_v15, %v5149_v61 }
 0xb35   : > { %v8952_v18 = vpop.eup %8951  ;;  %v5433_v6 = vpack.c.bf16 %v5403_v50, %v5402_v14  ;;  %v5342_v2 = vmul.f32 0.5, %v8950_v13 }
 0xb36   : > { %v8954_v20 = vpop.eup %8953  ;;  %v5340_v22 = vmul.f32 0.5, %v8952_v18  ;;  %v7902_v63 = vpop.f32.mrb[168].mxu0  ;;  %v5432_v43 = vpack.c.bf16 %v5401_v16, %v5400_v48 }
 0xb37   : > { %v8956_v24 = vpop.eup %8955  ;;  %v5374_v28 = vadd.f32 0.5, %v5342_v2  ;;  %v5343_v23 = vmul.f32 0.5, %v8954_v20  ;;  %v5186_v21 = vadd.f32 %v7902_v63, %v9986_v8  ;;  %v5177_v38 = vpop.f32.mrb[169].mxu0 }
 0xb38   : > { %v5372_v30 = vadd.f32 0.5, %v5340_v22  ;;  %v5341_v47 = vmul.f32 0.5, %v8956_v24  ;;  %v5178_v25 = vadd.f32 %v9986_v8, %v5177_v38  ;;  %v7903_v31 = vpop.f32.mrb[170].mxu0  ;;  %7940 = vmatprep.mubr.bf16.mxu1 %v5432_v43 }
 0xb39   : > { %v5375_v40 = vadd.f32 0.5, %v5343_v23  ;;  %v5282_v32 = vmul.f32 0.5, %v5186_v21  ;;  %v5189_v34 = vadd.f32 %v7903_v31, %v9986_v8  ;;  %v5180_v29 = vpop.f32.mrb[171].mxu0  ;;  %7941 = vmatmul.mubr.bf16.vlgmr.msra.gmra.mrb[160].mxu1 %v5433_v6  ;;  %v5406_v39 = vmul.f32 %v5374_v28, %v5170_v52 }
 0xb3a   : > { %v5373_v37 = vadd.f32 0.5, %v5341_v47  ;;  %v5280_v35 = vmul.f32 0.5, %v5178_v25  ;;  %v5181_v27 = vadd.f32 %v9986_v8, %v5180_v29  ;;  %v5404_v41 = vmul.f32 %v5372_v30, %v5162_v33 }
 0xb3b   : > { %v5407_v17 = vmul.f32 %v5375_v40, %v5173_v36  ;;  %8957 = vtanh.f32 %v5282_v32  ;;  %v5283_v49 = vmul.f32 0.5, %v5189_v34 }
 0xb3c   : > { %v5405_v44 = vmul.f32 %v5373_v37, %v5165_v55  ;;  %8959 = vtanh.f32 %v5280_v35  ;;  %v5281_v26 = vmul.f32 0.5, %v5181_v27 }
 0xb3d   : > { %8961 = vtanh.f32 %v5283_v49  ;;  %v5435_v42 = vpack.c.bf16 %v5407_v17, %v5406_v39 }
 0xb3e   : > { %8963 = vtanh.f32 %v5281_v26  ;;  %v5434_v45 = vpack.c.bf16 %v5405_v44, %v5404_v41 }
 0xb40   : > { %7944 = vmatprep.mubr.bf16.mxu1 %v5434_v45 }
 0xb41   : > { %7945 = vmatmul.mubr.bf16.gmra.mrb[164].mxu1 %v5435_v42 }
 0xb45   : > { %v8958_v61 = vpop.eup %8957 }
 0xb46   : > { %v8960_v46 = vpop.eup %8959  ;;  %v5346_v59 = vmul.f32 0.5, %v8958_v61 }
 0xb47   : > { %v8962_v51 = vpop.eup %8961  ;;  %v5344_v53 = vmul.f32 0.5, %v8960_v46 }
 0xb48   : > { %v8964_v1 = vpop.eup %8963  ;;  %v5378_v52 = vadd.f32 0.5, %v5346_v59  ;;  %v5347_v58 = vmul.f32 0.5, %v8962_v51 }
 0xb49   : > { %v5376_v36 = vadd.f32 0.5, %v5344_v53  ;;  %v5345_v9 = vmul.f32 0.5, %v8964_v1 }
 0xb4a   : > { %v5379_v33 = vadd.f32 0.5, %v5347_v58  ;;  %v5410_v60 = vmul.f32 %v5378_v52, %v5186_v21 }
 0xb4b   : > { %v5377_v55 = vadd.f32 0.5, %v5345_v9  ;;  %v5408_v3 = vmul.f32 %v5376_v36, %v5178_v25 }
 0xb4c   : > { %v5411_v4 = vmul.f32 %v5379_v33, %v5189_v34 }
 0xb4d   : > { %v5409_v5 = vmul.f32 %v5377_v55, %v5181_v27 }
 0xb4e   : > { %v7906_v0 = vpop.f32.mrb[172].mxu0  ;;  %v5437_v7 = vpack.c.bf16 %v5411_v4, %v5410_v60 }
 0xb4f   : > { %v5202_v19 = vadd.f32 %v7906_v0, %v9986_v8  ;;  %v5193_v57 = vpop.f32.mrb[173].mxu0  ;;  %v5436_v54 = vpack.c.bf16 %v5409_v5, %v5408_v3 }
 0xb50   : > { %v5194_v11 = vadd.f32 %v9986_v8, %v5193_v57  ;;  %v7907_v56 = vpop.f32.mrb[174].mxu0 }
 0xb51   : > { %v5286_v12 = vmul.f32 0.5, %v5202_v19  ;;  %v5205_v10 = vadd.f32 %v7907_v56, %v9986_v8  ;;  %v5196_v15 = vpop.f32.mrb[175].mxu0  ;;  %7948 = vmatprep.mubr.bf16.mxu1 %v5436_v54 }
 0xb52   : > { %v5284_v14 = vmul.f32 0.5, %v5194_v11  ;;  %v5197_v50 = vadd.f32 %v9986_v8, %v5196_v15  ;;  %7949 = vmatmul.mubr.bf16.gmra.mrb[168].mxu1 %v5437_v7 }
 0xb53   : > { %8965 = vtanh.f32 %v5286_v12  ;;  %v5287_v13 = vmul.f32 0.5, %v5205_v10 }
 0xb54   : > { %8967 = vtanh.f32 %v5284_v14  ;;  %v5285_v48 = vmul.f32 0.5, %v5197_v50 }
 0xb55   : > { %8969 = vtanh.f32 %v5287_v13 }
 0xb56   : > { %8971 = vtanh.f32 %v5285_v48 }
 0xb5d   : > { %v8966_v16 = vpop.eup %8965 }
 0xb5e   : > { %v8968_v18 = vpop.eup %8967  ;;  %v5350_v6 = vmul.f32 0.5, %v8966_v16 }
 0xb5f   : > { %v8970_v2 = vpop.eup %8969  ;;  %v5348_v20 = vmul.f32 0.5, %v8968_v18  ;;  %v8223_v18 = vld [vmem:[#allocation3 + $0x310] sm:$0xff]  }
 0xb60   : > { %v8972_v22 = vpop.eup %8971  ;;  %v5382_v63 = vadd.f32 0.5, %v5350_v6  ;;  %v5351_v43 = vmul.f32 0.5, %v8970_v2 }
 0xb61   : > { %v5380_v24 = vadd.f32 0.5, %v5348_v20  ;;  %v5349_v28 = vmul.f32 0.5, %v8972_v22 }
 0xb62   : > { %v5383_v23 = vadd.f32 0.5, %v5351_v43  ;;  %v5414_v38 = vmul.f32 %v5382_v63, %v5202_v19 }
 0xb63   : > { %v5381_v21 = vadd.f32 0.5, %v5349_v28  ;;  %v5412_v47 = vmul.f32 %v5380_v24, %v5194_v11 }
 0xb64   : > { %v5415_v30 = vmul.f32 %v5383_v23, %v5205_v10  ;;  %v8224_v23 = vld [vmem:[#allocation3 + $0x318] sm:$0xff]  }
 0xb65   : > { %v5413_v25 = vmul.f32 %v5381_v21, %v5197_v50  ;;  %v8222_v50 = vld [vmem:[#allocation3 + $0x308] sm:$0xff]  }
 0xb66   : > { %v7910_v31 = vpop.f32.mrb[176].mxu0  ;;  %v5439_v40 = vpack.c.bf16 %v5415_v30, %v5414_v38  ;;  %7974 = vmatprep.subr.bf16.mxu0 %v8222_v50 }
 0xb67   : > { %v5218_v32 = vadd.f32 %v7910_v31, %v9986_v8  ;;  %v5209_v34 = vpop.f32.mrb[177].mxu0  ;;  %v5438_v29 = vpack.c.bf16 %v5413_v25, %v5412_v47  ;;  %7975 = vmatpush3.bf16.msra.mxu0 %v8222_v50 }
 0xb68   : > { %v5210_v37 = vadd.f32 %v9986_v8, %v5209_v34  ;;  %v7911_v35 = vpop.f32.mrb[178].mxu0  ;;  %7976 = vmatprep.subr.bf16.mxu0 %v8223_v18 }
 0xb69   : > { %v5290_v27 = vmul.f32 0.5, %v5218_v32  ;;  %v5221_v39 = vadd.f32 %v7911_v35, %v9986_v8  ;;  %v5212_v17 = vpop.f32.mrb[179].mxu0  ;;  %7952 = vmatprep.mubr.bf16.mxu1 %v5438_v29 }
 0xb6a   : > { %v5288_v49 = vmul.f32 0.5, %v5210_v37  ;;  %v5213_v41 = vadd.f32 %v9986_v8, %v5212_v17  ;;  %7953 = vmatmul.mubr.bf16.gmra.mrb[172].mxu1 %v5439_v40 }
 0xb6b   : > { %8973 = vtanh.f32 %v5290_v27  ;;  %v5291_v44 = vmul.f32 0.5, %v5221_v39  ;;  %7977 = vmatpush3.bf16.msra.mxu0 %v8223_v18 }
 0xb6c   : > { %8975 = vtanh.f32 %v5288_v49  ;;  %v5289_v26 = vmul.f32 0.5, %v5213_v41  ;;  %7978 = vmatprep.subr.bf16.mxu0 %v8224_v23 }
 0xb6d   : > { %8977 = vtanh.f32 %v5291_v44 }
 0xb6e   : > { %8979 = vtanh.f32 %v5289_v26  ;;  %v8226_v26 = vld [vmem:[#allocation3 + $0x328] sm:$0xff]  }
 0xb6f   : > { %7979 = vmatpush3.bf16.msra.mxu0 %v8224_v23 }
 0xb75   : > { %v8974_v42 = vpop.eup %8973 }
 0xb76   : > { %v8976_v45 = vpop.eup %8975  ;;  %v5354_v61 = vmul.f32 0.5, %v8974_v42 }
 0xb77   : > { %v8978_v46 = vpop.eup %8977  ;;  %v5352_v59 = vmul.f32 0.5, %v8976_v45 }
 0xb78   : > { %v8980_v51 = vpop.eup %8979  ;;  %v5386_v53 = vadd.f32 0.5, %v5354_v61  ;;  %v5355_v1 = vmul.f32 0.5, %v8978_v46  ;;  %v8227_v61 = vld [vmem:[#allocation3 + $0x330] sm:$0xff]   ;;  %v8228_v46 = vld [vmem:[#allocation3 + $0x338] sm:$0xff]  }
 0xb79   : > { %v5384_v52 = vadd.f32 0.5, %v5352_v59  ;;  %v5353_v58 = vmul.f32 0.5, %v8980_v51 }
 0xb7a   : > { %v5387_v36 = vadd.f32 0.5, %v5355_v1  ;;  %v5418_v33 = vmul.f32 %v5386_v53, %v5218_v32  ;;  %v8225_v32 = vld [vmem:[#allocation3 + $0x320] sm:$0xff]  }
 0xb7b   : > { %v5385_v9 = vadd.f32 0.5, %v5353_v58  ;;  %v5416_v55 = vmul.f32 %v5384_v52, %v5210_v37  ;;  %7980 = vmatprep.subr.bf16.mxu0 %v8225_v32 }
 0xb7c   : > { %v5419_v62 = vmul.f32 %v5387_v36, %v5221_v39  ;;  %7981 = vmatpush3.bf16.msra.mxu0 %v8225_v32  ;;  %v10023_v32 = vld [vmem:[%s10280_s4 + $0xb] ss:$0 sm:$0xff] }
 0xb7d   : > { %v5417_v60 = vmul.f32 %v5385_v9, %v5213_v41  ;;  %7982 = vmatprep.subr.bf16.mxu0 %v8226_v26 }
 0xb7e   : > { %v7914_v4 = vpop.f32.mrb[180].mxu0  ;;  %v5441_v3 = vpack.c.bf16 %v5419_v62, %v5418_v33 }
 0xb7f   : > { %v5234_v5 = vadd.f32 %v7914_v4, %v9986_v8  ;;  %v5225_v0 = vpop.f32.mrb[181].mxu0  ;;  %v5440_v7 = vpack.c.bf16 %v5417_v60, %v5416_v55 }
 0xb80   : > { %v5226_v19 = vadd.f32 %v9986_v8, %v5225_v0  ;;  %v7915_v57 = vpop.f32.mrb[182].mxu0  ;;  %7983 = vmatpush3.bf16.msra.mxu0 %v8226_v26 }
 0xb81   : > { %v5294_v54 = vmul.f32 0.5, %v5234_v5  ;;  %v5237_v11 = vadd.f32 %v7915_v57, %v9986_v8  ;;  %v5228_v56 = vpop.f32.mrb[183].mxu0  ;;  %7956 = vmatprep.mubr.bf16.mxu1 %v5440_v7  ;;  %7984 = vmatprep.subr.bf16.mxu0 %v8227_v61 }
 0xb82   : > { %v5292_v12 = vmul.f32 0.5, %v5226_v19  ;;  %v5229_v10 = vadd.f32 %v9986_v8, %v5228_v56  ;;  %7957 = vmatmul.mubr.bf16.gmra.mrb[176].mxu1 %v5441_v3 }
 0xb83   : > { %8981 = vtanh.f32 %v5294_v54  ;;  %v5295_v15 = vmul.f32 0.5, %v5237_v11 }
 0xb84   : > { %8983 = vtanh.f32 %v5292_v12  ;;  %v5293_v14 = vmul.f32 0.5, %v5229_v10  ;;  %7985 = vmatpush3.bf16.msra.mxu0 %v8227_v61 }
 0xb85   : > { %8985 = vtanh.f32 %v5295_v15  ;;  %7986 = vmatprep.subr.bf16.mxu0 %v8228_v46 }
 0xb86   : > { %8987 = vtanh.f32 %v5293_v14 }
 0xb88   : > { %7987 = vmatpush3.bf16.msra.mxu0 %v8228_v46 }
 0xb8d   : > { %v8982_v13 = vpop.eup %8981 }
 0xb8e   : > { %v8984_v48 = vpop.eup %8983  ;;  %v5358_v16 = vmul.f32 0.5, %v8982_v13 }
 0xb8f   : > { %v8986_v6 = vpop.eup %8985  ;;  %v5356_v2 = vmul.f32 0.5, %v8984_v48 }
 0xb90   : > { %v8988_v20 = vpop.eup %8987  ;;  %v5390_v22 = vadd.f32 0.5, %v5358_v16  ;;  %v5359_v63 = vmul.f32 0.5, %v8986_v6 }
 0xb91   : > { %v5388_v43 = vadd.f32 0.5, %v5356_v2  ;;  %v5357_v24 = vmul.f32 0.5, %v8988_v20 }
 0xb92   : > { %v5391_v28 = vadd.f32 0.5, %v5359_v63  ;;  %v5422_v38 = vmul.f32 %v5390_v22, %v5234_v5 }
 0xb93   : > { %v5389_v21 = vadd.f32 0.5, %v5357_v24  ;;  %v5420_v47 = vmul.f32 %v5388_v43, %v5226_v19 }
 0xb94   : > { %v5423_v30 = vmul.f32 %v5391_v28, %v5237_v11 }
 0xb95   : > { %v5421_v25 = vmul.f32 %v5389_v21, %v5229_v10 }
 0xb96   : > { %v7918_v31 = vpop.f32.mrb[184].mxu0  ;;  %v5443_v40 = vpack.c.bf16 %v5423_v30, %v5422_v38 }
 0xb97   : > { %v5250_v34 = vadd.f32 %v7918_v31, %v9986_v8  ;;  %v5241_v29 = vpop.f32.mrb[185].mxu0  ;;  %v5442_v37 = vpack.c.bf16 %v5421_v25, %v5420_v47 }
 0xb98   : > { %v5242_v35 = vadd.f32 %v9986_v8, %v5241_v29  ;;  %v7919_v27 = vpop.f32.mrb[186].mxu0 }
 0xb99   : > { %v5298_v39 = vmul.f32 0.5, %v5250_v34  ;;  %v5253_v17 = vadd.f32 %v7919_v27, %v9986_v8  ;;  %v5244_v49 = vpop.f32.mrb[187].mxu0  ;;  %7960 = vmatprep.mubr.bf16.mxu1 %v5442_v37 }
 0xb9a   : > { %v5296_v41 = vmul.f32 0.5, %v5242_v35  ;;  %v5245_v44 = vadd.f32 %v9986_v8, %v5244_v49  ;;  %7961 = vmatmul.mubr.bf16.gmra.mrb[180].mxu1 %v5443_v40 }
 0xb9b   : > { %8989 = vtanh.f32 %v5298_v39  ;;  %v5299_v42 = vmul.f32 0.5, %v5253_v17 }
 0xb9c   : > { %8991 = vtanh.f32 %v5296_v41  ;;  %v5297_v45 = vmul.f32 0.5, %v5245_v44 }
 0xb9d   : > { %8993 = vtanh.f32 %v5299_v42 }
 0xb9e   : > { %8995 = vtanh.f32 %v5297_v45 }
 0xba5   : > { %v8990_v59 = vpop.eup %8989 }
 0xba6   : > { %v8992_v51 = vpop.eup %8991  ;;  %v5362_v53 = vmul.f32 0.5, %v8990_v59 }
 0xba7   : > { %v8994_v1 = vpop.eup %8993  ;;  %v5360_v52 = vmul.f32 0.5, %v8992_v51 }
 0xba8   : > { %v8996_v58 = vpop.eup %8995  ;;  %v5394_v36 = vadd.f32 0.5, %v5362_v53  ;;  %v5363_v9 = vmul.f32 0.5, %v8994_v1 }
 0xba9   : > { %v5392_v33 = vadd.f32 0.5, %v5360_v52  ;;  %v5361_v62 = vmul.f32 0.5, %v8996_v58 }
 0xbaa   : > { %v5395_v55 = vadd.f32 0.5, %v5363_v9  ;;  %v5426_v4 = vmul.f32 %v5394_v36, %v5250_v34 }
 0xbab   : > { %v5393_v60 = vadd.f32 0.5, %v5361_v62  ;;  %v5424_v5 = vmul.f32 %v5392_v33, %v5242_v35 }
 0xbac   : > { %v5427_v3 = vmul.f32 %v5395_v55, %v5253_v17 }
 0xbad   : > { %v5425_v0 = vmul.f32 %v5393_v60, %v5245_v44 }
 0xbae   : > { %v7922_v7 = vpop.f32.mrb[188].mxu0  ;;  %v5445_v19 = vpack.c.bf16 %v5427_v3, %v5426_v4 }
 0xbaf   : > { %v5266_v57 = vadd.f32 %v7922_v7, %v9986_v8  ;;  %v5257_v54 = vpop.f32.mrb[189].mxu0  ;;  %v5444_v11 = vpack.c.bf16 %v5425_v0, %v5424_v5 }
 0xbb0   : > { %v5258_v56 = vadd.f32 %v9986_v8, %v5257_v54  ;;  %v7923_v12 = vpop.f32.mrb[190].mxu0 }
 0xbb1   : > { %v5302_v10 = vmul.f32 0.5, %v5266_v57  ;;  %v5269_v15 = vadd.f32 %v7923_v12, %v9986_v8  ;;  %v5260_v14 = vpop.f32.mrb[191].mxu0  ;;  %7964 = vmatprep.mubr.bf16.mxu1 %v5444_v11 }
 0xbb2   : > { %v5300_v50 = vmul.f32 0.5, %v5258_v56  ;;  %v5261_v13 = vadd.f32 %v9986_v8, %v5260_v14  ;;  %7965 = vmatmul.mubr.bf16.gmra.mrb[184].mxu1 %v5445_v19 }
 0xbb3   : > { %8997 = vtanh.f32 %v5302_v10  ;;  %v5303_v48 = vmul.f32 0.5, %v5269_v15 }
 0xbb4   : > { %8999 = vtanh.f32 %v5300_v50  ;;  %v5301_v16 = vmul.f32 0.5, %v5261_v13 }
 0xbb5   : > { %9001 = vtanh.f32 %v5303_v48 }
 0xbb6   : > { %9003 = vtanh.f32 %v5301_v16 }
 0xbbd   : > { %v8998_v18 = vpop.eup %8997 }
 0xbbe   : > { %v9000_v6 = vpop.eup %8999  ;;  %v5366_v2 = vmul.f32 0.5, %v8998_v18 }
 0xbbf   : > { %v9002_v20 = vpop.eup %9001  ;;  %v5364_v22 = vmul.f32 0.5, %v9000_v6 }
 0xbc0   : > { %v9004_v63 = vpop.eup %9003  ;;  %v5398_v43 = vadd.f32 0.5, %v5366_v2  ;;  %v5367_v24 = vmul.f32 0.5, %v9002_v20 }
 0xbc1   : > { %v5396_v28 = vadd.f32 0.5, %v5364_v22  ;;  %v5365_v23 = vmul.f32 0.5, %v9004_v63 }
 0xbc2   : > { %v5399_v21 = vadd.f32 0.5, %v5367_v24  ;;  %v5430_v8 = vmul.f32 %v5398_v43, %v5266_v57 }
 0xbc3   : > { %v5397_v38 = vadd.f32 0.5, %v5365_v23  ;;  %v5428_v47 = vmul.f32 %v5396_v28, %v5258_v56 }
 0xbc4   : > { %v5431_v30 = vmul.f32 %v5399_v21, %v5269_v15 }
 0xbc5   : > { %v5429_v25 = vmul.f32 %v5397_v38, %v5261_v13 }
 0xbc6   : > { %v5447_v31 = vpack.c.bf16 %v5431_v30, %v5430_v8 }
 0xbc7   : > { %v5446_v40 = vpack.c.bf16 %v5429_v25, %v5428_v47 }
 0xbc9   : > { %7968 = vmatprep.mubr.bf16.mxu1 %v5446_v40 }
 0xbca   : > { %7969 = vmatmul.mubr.bf16.gmra.mrb[188].mxu1 %v5447_v31 }
 0xc0c   : > { %v7942_v34 = vpop.f32.mrb[160].mxu1 }
 0xc0d   : > { %v5564_v29 = vadd.f32 %v7942_v34, %v10023_v32  ;;  %v5555_v37 = vpop.f32.mrb[161].mxu1 }
 0xc0e   : > { %v5556_v35 = vadd.f32 %v10023_v32, %v5555_v37  ;;  %v7943_v27 = vpop.f32.mrb[162].mxu1 }
 0xc0f   : > { %v5684_v39 = vmul.f32 0.5, %v5564_v29  ;;  %v5567_v17 = vadd.f32 %v7943_v27, %v10023_v32  ;;  %v5558_v49 = vpop.f32.mrb[163].mxu1 }
 0xc10   : > { %v5682_v41 = vmul.f32 0.5, %v5556_v35  ;;  %v5559_v44 = vadd.f32 %v10023_v32, %v5558_v49 }
 0xc11   : > { %9005 = vtanh.f32 %v5684_v39  ;;  %v5685_v26 = vmul.f32 0.5, %v5567_v17 }
 0xc12   : > { %9007 = vtanh.f32 %v5682_v41  ;;  %v5683_v42 = vmul.f32 0.5, %v5559_v44 }
 0xc13   : > { %9009 = vtanh.f32 %v5685_v26 }
 0xc14   : > { %9011 = vtanh.f32 %v5683_v42  ;;  %v7946_v45 = vpop.f32.mrb[164].mxu1 }
 0xc15   : > { %v5580_v61 = vadd.f32 %v7946_v45, %v10023_v32  ;;  %v5571_v46 = vpop.f32.mrb[165].mxu1 }
 0xc16   : > { %v5572_v59 = vadd.f32 %v10023_v32, %v5571_v46  ;;  %v7947_v51 = vpop.f32.mrb[166].mxu1 }
 0xc17   : > { %v5688_v53 = vmul.f32 0.5, %v5580_v61  ;;  %v5583_v1 = vadd.f32 %v7947_v51, %v10023_v32  ;;  %v5574_v52 = vpop.f32.mrb[167].mxu1 }
 0xc18   : > { %v5686_v58 = vmul.f32 0.5, %v5572_v59  ;;  %v5575_v36 = vadd.f32 %v10023_v32, %v5574_v52 }
 0xc19   : > { %9013 = vtanh.f32 %v5688_v53  ;;  %v5689_v9 = vmul.f32 0.5, %v5583_v1 }
 0xc1a   : > { %9015 = vtanh.f32 %v5686_v58  ;;  %v5687_v33 = vmul.f32 0.5, %v5575_v36  ;;  %v8229_v58 = vld [vmem:[#allocation3 + $0x340] sm:$0xff]  }
 0xc1b   : > { %v9006_v62 = vpop.eup %9005  ;;  %9017 = vtanh.f32 %v5689_v9  ;;  %8020 = vmatprep.subr.bf16.mxu1 %v8229_v58 }
 0xc1c   : > { %v9008_v55 = vpop.eup %9007  ;;  %v5748_v60 = vmul.f32 0.5, %v9006_v62  ;;  %9019 = vtanh.f32 %v5687_v33  ;;  %8021 = vmatpush3.bf16.msra.mxu1 %v8229_v58 }
 0xc1d   : > { %v9010_v4 = vpop.eup %9009  ;;  %v5746_v3 = vmul.f32 0.5, %v9008_v55 }
 0xc1e   : > { %v9012_v5 = vpop.eup %9011  ;;  %v5780_v0 = vadd.f32 0.5, %v5748_v60  ;;  %v5749_v7 = vmul.f32 0.5, %v9010_v4 }
 0xc1f   : > { %v5778_v19 = vadd.f32 0.5, %v5746_v3  ;;  %v5747_v57 = vmul.f32 0.5, %v9012_v5 }
 0xc20   : > { %v5781_v54 = vadd.f32 0.5, %v5749_v7  ;;  %v5812_v56 = vmul.f32 %v5780_v0, %v5564_v29 }
 0xc21   : > { %v5779_v11 = vadd.f32 0.5, %v5747_v57  ;;  %v5810_v15 = vmul.f32 %v5778_v19, %v5556_v35 }
 0xc22   : > { %v5813_v12 = vmul.f32 %v5781_v54, %v5567_v17 }
 0xc23   : > { %v9014_v10 = vpop.eup %9013  ;;  %v5811_v14 = vmul.f32 %v5779_v11, %v5559_v44 }
 0xc24   : > { %v9016_v50 = vpop.eup %9015  ;;  %v5843_v13 = vpack.c.bf16 %v5813_v12, %v5812_v56  ;;  %v5752_v48 = vmul.f32 0.5, %v9014_v10 }
 0xc25   : > { %v9018_v16 = vpop.eup %9017  ;;  %v5750_v18 = vmul.f32 0.5, %v9016_v50  ;;  %v7950_v6 = vpop.f32.mrb[168].mxu1  ;;  %v5842_v2 = vpack.c.bf16 %v5811_v14, %v5810_v15 }
 0xc26   : > { %v9020_v20 = vpop.eup %9019  ;;  %v5784_v22 = vadd.f32 0.5, %v5752_v48  ;;  %v5753_v63 = vmul.f32 0.5, %v9018_v16  ;;  %v5596_v43 = vadd.f32 %v7950_v6, %v10023_v32  ;;  %v5587_v24 = vpop.f32.mrb[169].mxu1 }
 0xc27   : > { %v5782_v28 = vadd.f32 0.5, %v5750_v18  ;;  %v5751_v23 = vmul.f32 0.5, %v9020_v20  ;;  %v5588_v21 = vadd.f32 %v10023_v32, %v5587_v24  ;;  %v7951_v38 = vpop.f32.mrb[170].mxu1  ;;  %7988 = vmatprep.mubr.bf16.mxu0 %v5842_v2 }
 0xc28   : > { %v5785_v8 = vadd.f32 0.5, %v5753_v63  ;;  %v5692_v30 = vmul.f32 0.5, %v5596_v43  ;;  %v5599_v47 = vadd.f32 %v7951_v38, %v10023_v32  ;;  %v5590_v25 = vpop.f32.mrb[171].mxu1  ;;  %7989 = vmatmul.mubr.bf16.vlgmr.msra.gmra.mrb[192].mxu0 %v5843_v13  ;;  %v5816_v29 = vmul.f32 %v5784_v22, %v5580_v61 }
 0xc29   : > { %v5783_v31 = vadd.f32 0.5, %v5751_v23  ;;  %v5690_v40 = vmul.f32 0.5, %v5588_v21  ;;  %v5591_v34 = vadd.f32 %v10023_v32, %v5590_v25  ;;  %v5814_v27 = vmul.f32 %v5782_v28, %v5572_v59 }
 0xc2a   : > { %v5817_v37 = vmul.f32 %v5785_v8, %v5583_v1  ;;  %9021 = vtanh.f32 %v5692_v30  ;;  %v5693_v35 = vmul.f32 0.5, %v5599_v47 }
 0xc2b   : > { %v5815_v39 = vmul.f32 %v5783_v31, %v5575_v36  ;;  %9023 = vtanh.f32 %v5690_v40  ;;  %v5691_v17 = vmul.f32 0.5, %v5591_v34 }
 0xc2c   : > { %9025 = vtanh.f32 %v5693_v35  ;;  %v5845_v49 = vpack.c.bf16 %v5817_v37, %v5816_v29 }
 0xc2d   : > { %9027 = vtanh.f32 %v5691_v17  ;;  %v5844_v41 = vpack.c.bf16 %v5815_v39, %v5814_v27 }
 0xc2f   : > { %7992 = vmatprep.mubr.bf16.mxu0 %v5844_v41 }
 0xc30   : > { %7993 = vmatmul.mubr.bf16.gmra.mrb[196].mxu0 %v5845_v49 }
 0xc34   : > { %v9022_v44 = vpop.eup %9021 }
 0xc35   : > { %v9024_v26 = vpop.eup %9023  ;;  %v5756_v42 = vmul.f32 0.5, %v9022_v44 }
 0xc36   : > { %v9026_v45 = vpop.eup %9025  ;;  %v5754_v46 = vmul.f32 0.5, %v9024_v26 }
 0xc37   : > { %v9028_v51 = vpop.eup %9027  ;;  %v5788_v61 = vadd.f32 0.5, %v5756_v42  ;;  %v5757_v53 = vmul.f32 0.5, %v9026_v45 }
 0xc38   : > { %v5786_v1 = vadd.f32 0.5, %v5754_v46  ;;  %v5755_v52 = vmul.f32 0.5, %v9028_v51 }
 0xc39   : > { %v5789_v59 = vadd.f32 0.5, %v5757_v53  ;;  %v5820_v9 = vmul.f32 %v5788_v61, %v5596_v43 }
 0xc3a   : > { %v5787_v36 = vadd.f32 0.5, %v5755_v52  ;;  %v5818_v62 = vmul.f32 %v5786_v1, %v5588_v21 }
 0xc3b   : > { %v5821_v33 = vmul.f32 %v5789_v59, %v5599_v47 }
 0xc3c   : > { %v5819_v55 = vmul.f32 %v5787_v36, %v5591_v34 }
 0xc3d   : > { %v7954_v60 = vpop.f32.mrb[172].mxu1  ;;  %v5847_v4 = vpack.c.bf16 %v5821_v33, %v5820_v9 }
 0xc3e   : > { %v5612_v3 = vadd.f32 %v7954_v60, %v10023_v32  ;;  %v5603_v5 = vpop.f32.mrb[173].mxu1  ;;  %v5846_v0 = vpack.c.bf16 %v5819_v55, %v5818_v62 }
 0xc3f   : > { %v5604_v7 = vadd.f32 %v10023_v32, %v5603_v5  ;;  %v7955_v19 = vpop.f32.mrb[174].mxu1 }
 0xc40   : > { %v5696_v57 = vmul.f32 0.5, %v5612_v3  ;;  %v5615_v54 = vadd.f32 %v7955_v19, %v10023_v32  ;;  %v5606_v11 = vpop.f32.mrb[175].mxu1  ;;  %7996 = vmatprep.mubr.bf16.mxu0 %v5846_v0 }
 0xc41   : > { %v5694_v56 = vmul.f32 0.5, %v5604_v7  ;;  %v5607_v12 = vadd.f32 %v10023_v32, %v5606_v11  ;;  %7997 = vmatmul.mubr.bf16.gmra.mrb[200].mxu0 %v5847_v4 }
 0xc42   : > { %9029 = vtanh.f32 %v5696_v57  ;;  %v5697_v10 = vmul.f32 0.5, %v5615_v54 }
 0xc43   : > { %9031 = vtanh.f32 %v5694_v56  ;;  %v5695_v15 = vmul.f32 0.5, %v5607_v12 }
 0xc44   : > { %9033 = vtanh.f32 %v5697_v10 }
 0xc45   : > { %9035 = vtanh.f32 %v5695_v15 }
 0xc4c   : > { %v9030_v14 = vpop.eup %9029 }
 0xc4d   : > { %v9032_v50 = vpop.eup %9031  ;;  %v5760_v13 = vmul.f32 0.5, %v9030_v14 }
 0xc4e   : > { %v9034_v48 = vpop.eup %9033  ;;  %v5758_v16 = vmul.f32 0.5, %v9032_v50  ;;  %v8231_v50 = vld [vmem:[#allocation3 + $0x350] sm:$0xff]  }
 0xc4f   : > { %v9036_v18 = vpop.eup %9035  ;;  %v5792_v6 = vadd.f32 0.5, %v5760_v13  ;;  %v5761_v2 = vmul.f32 0.5, %v9034_v48 }
 0xc50   : > { %v5790_v20 = vadd.f32 0.5, %v5758_v16  ;;  %v5759_v22 = vmul.f32 0.5, %v9036_v18 }
 0xc51   : > { %v5793_v63 = vadd.f32 0.5, %v5761_v2  ;;  %v5824_v24 = vmul.f32 %v5792_v6, %v5612_v3 }
 0xc52   : > { %v5791_v43 = vadd.f32 0.5, %v5759_v22  ;;  %v5822_v23 = vmul.f32 %v5790_v20, %v5604_v7 }
 0xc53   : > { %v5825_v28 = vmul.f32 %v5793_v63, %v5615_v54  ;;  %v8232_v63 = vld [vmem:[#allocation3 + $0x358] sm:$0xff]  }
 0xc54   : > { %v5823_v21 = vmul.f32 %v5791_v43, %v5607_v12  ;;  %v8230_v12 = vld [vmem:[#allocation3 + $0x348] sm:$0xff]  }
 0xc55   : > { %v7958_v38 = vpop.f32.mrb[176].mxu1  ;;  %v5849_v8 = vpack.c.bf16 %v5825_v28, %v5824_v24  ;;  %8022 = vmatprep.subr.bf16.mxu1 %v8230_v12 }
 0xc56   : > { %v5628_v30 = vadd.f32 %v7958_v38, %v10023_v32  ;;  %v5619_v47 = vpop.f32.mrb[177].mxu1  ;;  %v5848_v25 = vpack.c.bf16 %v5823_v21, %v5822_v23  ;;  %8023 = vmatpush3.bf16.msra.mxu1 %v8230_v12 }
 0xc57   : > { %v5620_v31 = vadd.f32 %v10023_v32, %v5619_v47  ;;  %v7959_v40 = vpop.f32.mrb[178].mxu1  ;;  %8024 = vmatprep.subr.bf16.mxu1 %v8231_v50 }
 0xc58   : > { %v5700_v34 = vmul.f32 0.5, %v5628_v30  ;;  %v5631_v29 = vadd.f32 %v7959_v40, %v10023_v32  ;;  %v5622_v37 = vpop.f32.mrb[179].mxu1  ;;  %8000 = vmatprep.mubr.bf16.mxu0 %v5848_v25 }
 0xc59   : > { %v5698_v35 = vmul.f32 0.5, %v5620_v31  ;;  %v5623_v27 = vadd.f32 %v10023_v32, %v5622_v37  ;;  %8001 = vmatmul.mubr.bf16.gmra.mrb[204].mxu0 %v5849_v8 }
 0xc5a   : > { %9037 = vtanh.f32 %v5700_v34  ;;  %v5701_v39 = vmul.f32 0.5, %v5631_v29  ;;  %8025 = vmatpush3.bf16.msra.mxu1 %v8231_v50 }
 0xc5b   : > { %9039 = vtanh.f32 %v5698_v35  ;;  %v5699_v17 = vmul.f32 0.5, %v5623_v27  ;;  %8026 = vmatprep.subr.bf16.mxu1 %v8232_v63 }
 0xc5c   : > { %9041 = vtanh.f32 %v5701_v39 }
 0xc5d   : > { %9043 = vtanh.f32 %v5699_v17  ;;  %v8234_v17 = vld [vmem:[#allocation3 + $0x368] sm:$0xff]  }
 0xc5e   : > { %8027 = vmatpush3.bf16.msra.mxu1 %v8232_v63 }
 0xc64   : > { %v9038_v49 = vpop.eup %9037 }
 0xc65   : > { %v9040_v41 = vpop.eup %9039  ;;  %v5764_v44 = vmul.f32 0.5, %v9038_v49 }
 0xc66   : > { %v9042_v26 = vpop.eup %9041  ;;  %v5762_v42 = vmul.f32 0.5, %v9040_v41 }
 0xc67   : > { %v9044_v45 = vpop.eup %9043  ;;  %v5796_v46 = vadd.f32 0.5, %v5764_v44  ;;  %v5765_v51 = vmul.f32 0.5, %v9042_v26  ;;  %v8235_v44 = vld [vmem:[#allocation3 + $0x370] sm:$0xff]   ;;  %v8236_v26 = vld [vmem:[#allocation3 + $0x378] sm:$0xff]  }
 0xc68   : > { %v5794_v61 = vadd.f32 0.5, %v5762_v42  ;;  %v5763_v53 = vmul.f32 0.5, %v9044_v45 }
 0xc69   : > { %v5797_v1 = vadd.f32 0.5, %v5765_v51  ;;  %v5828_v59 = vmul.f32 %v5796_v46, %v5628_v30  ;;  %v8233_v30 = vld [vmem:[#allocation3 + $0x360] sm:$0xff]  }
 0xc6a   : > { %v5795_v52 = vadd.f32 0.5, %v5763_v53  ;;  %v5826_v36 = vmul.f32 %v5794_v61, %v5620_v31  ;;  %8028 = vmatprep.subr.bf16.mxu1 %v8233_v30 }
 0xc6b   : > { %v5829_v58 = vmul.f32 %v5797_v1, %v5631_v29  ;;  %8029 = vmatpush3.bf16.msra.mxu1 %v8233_v30  ;;  %v10060_v30 = vld [vmem:[%s10280_s4 + $0xc] ss:$0 sm:$0xff] }
 0xc6c   : > { %v5827_v9 = vmul.f32 %v5795_v52, %v5623_v27  ;;  %8030 = vmatprep.subr.bf16.mxu1 %v8234_v17 }
 0xc6d   : > { %v7962_v33 = vpop.f32.mrb[180].mxu1  ;;  %v5851_v62 = vpack.c.bf16 %v5829_v58, %v5828_v59 }
 0xc6e   : > { %v5644_v55 = vadd.f32 %v7962_v33, %v10023_v32  ;;  %v5635_v60 = vpop.f32.mrb[181].mxu1  ;;  %v5850_v4 = vpack.c.bf16 %v5827_v9, %v5826_v36 }
 0xc6f   : > { %v5636_v3 = vadd.f32 %v10023_v32, %v5635_v60  ;;  %v7963_v5 = vpop.f32.mrb[182].mxu1  ;;  %8031 = vmatpush3.bf16.msra.mxu1 %v8234_v17 }
 0xc70   : > { %v5704_v0 = vmul.f32 0.5, %v5644_v55  ;;  %v5647_v7 = vadd.f32 %v7963_v5, %v10023_v32  ;;  %v5638_v19 = vpop.f32.mrb[183].mxu1  ;;  %8004 = vmatprep.mubr.bf16.mxu0 %v5850_v4  ;;  %8032 = vmatprep.subr.bf16.mxu1 %v8235_v44 }
 0xc71   : > { %v5702_v57 = vmul.f32 0.5, %v5636_v3  ;;  %v5639_v54 = vadd.f32 %v10023_v32, %v5638_v19  ;;  %8005 = vmatmul.mubr.bf16.gmra.mrb[208].mxu0 %v5851_v62 }
 0xc72   : > { %9045 = vtanh.f32 %v5704_v0  ;;  %v5705_v11 = vmul.f32 0.5, %v5647_v7 }
 0xc73   : > { %9047 = vtanh.f32 %v5702_v57  ;;  %v5703_v56 = vmul.f32 0.5, %v5639_v54  ;;  %8033 = vmatpush3.bf16.msra.mxu1 %v8235_v44 }
 0xc74   : > { %9049 = vtanh.f32 %v5705_v11  ;;  %8034 = vmatprep.subr.bf16.mxu1 %v8236_v26 }
 0xc75   : > { %9051 = vtanh.f32 %v5703_v56 }
 0xc77   : > { %8035 = vmatpush3.bf16.msra.mxu1 %v8236_v26 }
 0xc7c   : > { %v9046_v10 = vpop.eup %9045 }
 0xc7d   : > { %v9048_v15 = vpop.eup %9047  ;;  %v5768_v14 = vmul.f32 0.5, %v9046_v10 }
 0xc7e   : > { %v9050_v13 = vpop.eup %9049  ;;  %v5766_v48 = vmul.f32 0.5, %v9048_v15 }
 0xc7f   : > { %v9052_v16 = vpop.eup %9051  ;;  %v5800_v18 = vadd.f32 0.5, %v5768_v14  ;;  %v5769_v6 = vmul.f32 0.5, %v9050_v13 }
 0xc80   : > { %v5798_v2 = vadd.f32 0.5, %v5766_v48  ;;  %v5767_v20 = vmul.f32 0.5, %v9052_v16 }
 0xc81   : > { %v5801_v22 = vadd.f32 0.5, %v5769_v6  ;;  %v5832_v24 = vmul.f32 %v5800_v18, %v5644_v55 }
 0xc82   : > { %v5799_v43 = vadd.f32 0.5, %v5767_v20  ;;  %v5830_v23 = vmul.f32 %v5798_v2, %v5636_v3 }
 0xc83   : > { %v5833_v28 = vmul.f32 %v5801_v22, %v5647_v7 }
 0xc84   : > { %v5831_v21 = vmul.f32 %v5799_v43, %v5639_v54 }
 0xc85   : > { %v7966_v38 = vpop.f32.mrb[184].mxu1  ;;  %v5853_v8 = vpack.c.bf16 %v5833_v28, %v5832_v24 }
 0xc86   : > { %v5660_v47 = vadd.f32 %v7966_v38, %v10023_v32  ;;  %v5651_v25 = vpop.f32.mrb[185].mxu1  ;;  %v5852_v31 = vpack.c.bf16 %v5831_v21, %v5830_v23 }
 0xc87   : > { %v5652_v40 = vadd.f32 %v10023_v32, %v5651_v25  ;;  %v7967_v34 = vpop.f32.mrb[186].mxu1 }
 0xc88   : > { %v5708_v29 = vmul.f32 0.5, %v5660_v47  ;;  %v5663_v37 = vadd.f32 %v7967_v34, %v10023_v32  ;;  %v5654_v35 = vpop.f32.mrb[187].mxu1  ;;  %8008 = vmatprep.mubr.bf16.mxu0 %v5852_v31 }
 0xc89   : > { %v5706_v27 = vmul.f32 0.5, %v5652_v40  ;;  %v5655_v39 = vadd.f32 %v10023_v32, %v5654_v35  ;;  %8009 = vmatmul.mubr.bf16.gmra.mrb[212].mxu0 %v5853_v8 }
 0xc8a   : > { %9053 = vtanh.f32 %v5708_v29  ;;  %v5709_v49 = vmul.f32 0.5, %v5663_v37 }
 0xc8b   : > { %9055 = vtanh.f32 %v5706_v27  ;;  %v5707_v41 = vmul.f32 0.5, %v5655_v39 }
 0xc8c   : > { %9057 = vtanh.f32 %v5709_v49 }
 0xc8d   : > { %9059 = vtanh.f32 %v5707_v41 }
 0xc94   : > { %v9054_v42 = vpop.eup %9053 }
 0xc95   : > { %v9056_v45 = vpop.eup %9055  ;;  %v5772_v46 = vmul.f32 0.5, %v9054_v42 }
 0xc96   : > { %v9058_v51 = vpop.eup %9057  ;;  %v5770_v61 = vmul.f32 0.5, %v9056_v45 }
 0xc97   : > { %v9060_v53 = vpop.eup %9059  ;;  %v5804_v1 = vadd.f32 0.5, %v5772_v46  ;;  %v5773_v52 = vmul.f32 0.5, %v9058_v51 }
 0xc98   : > { %v5802_v59 = vadd.f32 0.5, %v5770_v61  ;;  %v5771_v58 = vmul.f32 0.5, %v9060_v53 }
 0xc99   : > { %v5805_v36 = vadd.f32 0.5, %v5773_v52  ;;  %v5836_v33 = vmul.f32 %v5804_v1, %v5660_v47 }
 0xc9a   : > { %v5803_v9 = vadd.f32 0.5, %v5771_v58  ;;  %v5834_v55 = vmul.f32 %v5802_v59, %v5652_v40 }
 0xc9b   : > { %v5837_v62 = vmul.f32 %v5805_v36, %v5663_v37 }
 0xc9c   : > { %v5835_v60 = vmul.f32 %v5803_v9, %v5655_v39 }
 0xc9d   : > { %v7970_v4 = vpop.f32.mrb[188].mxu1  ;;  %v5855_v3 = vpack.c.bf16 %v5837_v62, %v5836_v33 }
 0xc9e   : > { %v5676_v5 = vadd.f32 %v7970_v4, %v10023_v32  ;;  %v5667_v0 = vpop.f32.mrb[189].mxu1  ;;  %v5854_v7 = vpack.c.bf16 %v5835_v60, %v5834_v55 }
 0xc9f   : > { %v5668_v19 = vadd.f32 %v10023_v32, %v5667_v0  ;;  %v7971_v57 = vpop.f32.mrb[190].mxu1 }
 0xca0   : > { %v5712_v54 = vmul.f32 0.5, %v5676_v5  ;;  %v5679_v11 = vadd.f32 %v7971_v57, %v10023_v32  ;;  %v5670_v56 = vpop.f32.mrb[191].mxu1  ;;  %8012 = vmatprep.mubr.bf16.mxu0 %v5854_v7 }
 0xca1   : > { %v5710_v12 = vmul.f32 0.5, %v5668_v19  ;;  %v5671_v10 = vadd.f32 %v10023_v32, %v5670_v56  ;;  %8013 = vmatmul.mubr.bf16.gmra.mrb[216].mxu0 %v5855_v3 }
 0xca2   : > { %9061 = vtanh.f32 %v5712_v54  ;;  %v5713_v15 = vmul.f32 0.5, %v5679_v11 }
 0xca3   : > { %9063 = vtanh.f32 %v5710_v12  ;;  %v5711_v14 = vmul.f32 0.5, %v5671_v10 }
 0xca4   : > { %9065 = vtanh.f32 %v5713_v15 }
 0xca5   : > { %9067 = vtanh.f32 %v5711_v14 }
 0xcac   : > { %v9062_v50 = vpop.eup %9061 }
 0xcad   : > { %v9064_v13 = vpop.eup %9063  ;;  %v5776_v48 = vmul.f32 0.5, %v9062_v50 }
 0xcae   : > { %v9066_v16 = vpop.eup %9065  ;;  %v5774_v18 = vmul.f32 0.5, %v9064_v13 }
 0xcaf   : > { %v9068_v6 = vpop.eup %9067  ;;  %v5808_v2 = vadd.f32 0.5, %v5776_v48  ;;  %v5777_v20 = vmul.f32 0.5, %v9066_v16 }
 0xcb0   : > { %v5806_v22 = vadd.f32 0.5, %v5774_v18  ;;  %v5775_v63 = vmul.f32 0.5, %v9068_v6 }
 0xcb1   : > { %v5809_v43 = vadd.f32 0.5, %v5777_v20  ;;  %v5840_v32 = vmul.f32 %v5808_v2, %v5676_v5 }
 0xcb2   : > { %v5807_v24 = vadd.f32 0.5, %v5775_v63  ;;  %v5838_v23 = vmul.f32 %v5806_v22, %v5668_v19 }
 0xcb3   : > { %v5841_v28 = vmul.f32 %v5809_v43, %v5679_v11 }
 0xcb4   : > { %v5839_v21 = vmul.f32 %v5807_v24, %v5671_v10 }
 0xcb5   : > { %v5857_v38 = vpack.c.bf16 %v5841_v28, %v5840_v32 }
 0xcb6   : > { %v5856_v8 = vpack.c.bf16 %v5839_v21, %v5838_v23 }
 0xcb8   : > { %8016 = vmatprep.mubr.bf16.mxu0 %v5856_v8 }
 0xcb9   : > { %8017 = vmatmul.mubr.bf16.gmra.mrb[220].mxu0 %v5857_v38 }
 0xcfb   : > { %v7990_v47 = vpop.f32.mrb[192].mxu0 }
 0xcfc   : > { %v5974_v25 = vadd.f32 %v7990_v47, %v10060_v30  ;;  %v5965_v31 = vpop.f32.mrb[193].mxu0 }
 0xcfd   : > { %v5966_v40 = vadd.f32 %v10060_v30, %v5965_v31  ;;  %v7991_v34 = vpop.f32.mrb[194].mxu0 }
 0xcfe   : > { %v6094_v29 = vmul.f32 0.5, %v5974_v25  ;;  %v5977_v37 = vadd.f32 %v7991_v34, %v10060_v30  ;;  %v5968_v35 = vpop.f32.mrb[195].mxu0 }
 0xcff   : > { %v6092_v27 = vmul.f32 0.5, %v5966_v40  ;;  %v5969_v39 = vadd.f32 %v10060_v30, %v5968_v35 }
 0xd00   : > { %9069 = vtanh.f32 %v6094_v29  ;;  %v6095_v17 = vmul.f32 0.5, %v5977_v37 }
 0xd01   : > { %9071 = vtanh.f32 %v6092_v27  ;;  %v6093_v49 = vmul.f32 0.5, %v5969_v39 }
 0xd02   : > { %9073 = vtanh.f32 %v6095_v17 }
 0xd03   : > { %9075 = vtanh.f32 %v6093_v49  ;;  %v7994_v41 = vpop.f32.mrb[196].mxu0 }
 0xd04   : > { %v5990_v44 = vadd.f32 %v7994_v41, %v10060_v30  ;;  %v5981_v26 = vpop.f32.mrb[197].mxu0 }
 0xd05   : > { %v5982_v42 = vadd.f32 %v10060_v30, %v5981_v26  ;;  %v7995_v45 = vpop.f32.mrb[198].mxu0 }
 0xd06   : > { %v6098_v46 = vmul.f32 0.5, %v5990_v44  ;;  %v5993_v51 = vadd.f32 %v7995_v45, %v10060_v30  ;;  %v5984_v61 = vpop.f32.mrb[199].mxu0 }
 0xd07   : > { %v6096_v53 = vmul.f32 0.5, %v5982_v42  ;;  %v5985_v1 = vadd.f32 %v10060_v30, %v5984_v61 }
 0xd08   : > { %9077 = vtanh.f32 %v6098_v46  ;;  %v6099_v52 = vmul.f32 0.5, %v5993_v51 }
 0xd09   : > { %9079 = vtanh.f32 %v6096_v53  ;;  %v6097_v59 = vmul.f32 0.5, %v5985_v1 }
 0xd0a   : > { %v9070_v58 = vpop.eup %9069  ;;  %9081 = vtanh.f32 %v6099_v52 }
 0xd0b   : > { %v9072_v36 = vpop.eup %9071  ;;  %v6158_v9 = vmul.f32 0.5, %v9070_v58  ;;  %9083 = vtanh.f32 %v6097_v59 }
 0xd0c   : > { %v9074_v33 = vpop.eup %9073  ;;  %v6156_v62 = vmul.f32 0.5, %v9072_v36 }
 0xd0d   : > { %v9076_v55 = vpop.eup %9075  ;;  %v6190_v60 = vadd.f32 0.5, %v6158_v9  ;;  %v6159_v4 = vmul.f32 0.5, %v9074_v33 }
 0xd0e   : > { %v6188_v3 = vadd.f32 0.5, %v6156_v62  ;;  %v6157_v5 = vmul.f32 0.5, %v9076_v55 }
 0xd0f   : > { %v6191_v0 = vadd.f32 0.5, %v6159_v4  ;;  %v6222_v19 = vmul.f32 %v6190_v60, %v5974_v25 }
 0xd10   : > { %v6189_v7 = vadd.f32 0.5, %v6157_v5  ;;  %v6220_v11 = vmul.f32 %v6188_v3, %v5966_v40 }
 0xd11   : > { %v6223_v57 = vmul.f32 %v6191_v0, %v5977_v37 }
 0xd12   : > { %v9078_v54 = vpop.eup %9077  ;;  %v6221_v56 = vmul.f32 %v6189_v7, %v5969_v39 }
 0xd13   : > { %v9080_v12 = vpop.eup %9079  ;;  %v6253_v10 = vpack.c.bf16 %v6223_v57, %v6222_v19  ;;  %v6162_v15 = vmul.f32 0.5, %v9078_v54 }
 0xd14   : > { %v9082_v14 = vpop.eup %9081  ;;  %v6160_v50 = vmul.f32 0.5, %v9080_v12  ;;  %v7998_v13 = vpop.f32.mrb[200].mxu0  ;;  %v6252_v48 = vpack.c.bf16 %v6221_v56, %v6220_v11 }
 0xd15   : > { %v9084_v16 = vpop.eup %9083  ;;  %v6194_v18 = vadd.f32 0.5, %v6162_v15  ;;  %v6163_v6 = vmul.f32 0.5, %v9082_v14  ;;  %v6006_v2 = vadd.f32 %v7998_v13, %v10060_v30  ;;  %v5997_v20 = vpop.f32.mrb[201].mxu0 }
 0xd16   : > { %v6192_v22 = vadd.f32 0.5, %v6160_v50  ;;  %v6161_v63 = vmul.f32 0.5, %v9084_v16  ;;  %v5998_v43 = vadd.f32 %v10060_v30, %v5997_v20  ;;  %v7999_v24 = vpop.f32.mrb[202].mxu0  ;;  %8036 = vmatprep.mubr.bf16.mxu1 %v6252_v48 }
 0xd17   : > { %v6195_v32 = vadd.f32 0.5, %v6163_v6  ;;  %v6102_v28 = vmul.f32 0.5, %v6006_v2  ;;  %v6009_v23 = vadd.f32 %v7999_v24, %v10060_v30  ;;  %v6000_v21 = vpop.f32.mrb[203].mxu0  ;;  %8037 = vmatmul.mubr.bf16.vlgmr.msra.gmra.mrb[192].mxu1 %v6253_v10  ;;  %v6226_v25 = vmul.f32 %v6194_v18, %v5990_v44 }
 0xd18   : > { %v6193_v38 = vadd.f32 0.5, %v6161_v63  ;;  %v6100_v8 = vmul.f32 0.5, %v5998_v43  ;;  %v6001_v47 = vadd.f32 %v10060_v30, %v6000_v21  ;;  %v6224_v34 = vmul.f32 %v6192_v22, %v5982_v42 }
 0xd19   : > { %v6227_v31 = vmul.f32 %v6195_v32, %v5993_v51  ;;  %9085 = vtanh.f32 %v6102_v28  ;;  %v6103_v40 = vmul.f32 0.5, %v6009_v23 }
 0xd1a   : > { %v6225_v29 = vmul.f32 %v6193_v38, %v5985_v1  ;;  %9087 = vtanh.f32 %v6100_v8  ;;  %v6101_v37 = vmul.f32 0.5, %v6001_v47 }
 0xd1b   : > { %9089 = vtanh.f32 %v6103_v40  ;;  %v6255_v35 = vpack.c.bf16 %v6227_v31, %v6226_v25 }
 0xd1c   : > { %9091 = vtanh.f32 %v6101_v37  ;;  %v6254_v27 = vpack.c.bf16 %v6225_v29, %v6224_v34 }
 0xd1e   : > { %8040 = vmatprep.mubr.bf16.mxu1 %v6254_v27 }
 0xd1f   : > { %8041 = vmatmul.mubr.bf16.gmra.mrb[196].mxu1 %v6255_v35 }
 0xd23   : > { %v9086_v39 = vpop.eup %9085 }
 0xd24   : > { %v9088_v17 = vpop.eup %9087  ;;  %v6166_v49 = vmul.f32 0.5, %v9086_v39 }
 0xd25   : > { %v9090_v41 = vpop.eup %9089  ;;  %v6164_v26 = vmul.f32 0.5, %v9088_v17 }
 0xd26   : > { %v9092_v45 = vpop.eup %9091  ;;  %v6198_v44 = vadd.f32 0.5, %v6166_v49  ;;  %v6167_v46 = vmul.f32 0.5, %v9090_v41 }
 0xd27   : > { %v6196_v51 = vadd.f32 0.5, %v6164_v26  ;;  %v6165_v61 = vmul.f32 0.5, %v9092_v45 }
 0xd28   : > { %v6199_v42 = vadd.f32 0.5, %v6167_v46  ;;  %v6230_v1 = vmul.f32 %v6198_v44, %v6006_v2 }
 0xd29   : > { %v6197_v53 = vadd.f32 0.5, %v6165_v61  ;;  %v6228_v59 = vmul.f32 %v6196_v51, %v5998_v43 }
 0xd2a   : > { %v6231_v52 = vmul.f32 %v6199_v42, %v6009_v23 }
 0xd2b   : > { %v6229_v58 = vmul.f32 %v6197_v53, %v6001_v47 }
 0xd2c   : > { %v8002_v36 = vpop.f32.mrb[204].mxu0  ;;  %v6257_v9 = vpack.c.bf16 %v6231_v52, %v6230_v1 }
 0xd2d   : > { %v6022_v33 = vadd.f32 %v8002_v36, %v10060_v30  ;;  %v6013_v62 = vpop.f32.mrb[205].mxu0  ;;  %v6256_v55 = vpack.c.bf16 %v6229_v58, %v6228_v59 }
 0xd2e   : > { %v6014_v60 = vadd.f32 %v10060_v30, %v6013_v62  ;;  %v8003_v4 = vpop.f32.mrb[206].mxu0 }
 0xd2f   : > { %v6106_v3 = vmul.f32 0.5, %v6022_v33  ;;  %v6025_v5 = vadd.f32 %v8003_v4, %v10060_v30  ;;  %v6016_v0 = vpop.f32.mrb[207].mxu0  ;;  %8044 = vmatprep.mubr.bf16.mxu1 %v6256_v55 }
 0xd30   : > { %v6104_v7 = vmul.f32 0.5, %v6014_v60  ;;  %v6017_v19 = vadd.f32 %v10060_v30, %v6016_v0  ;;  %8045 = vmatmul.mubr.bf16.gmra.mrb[200].mxu1 %v6257_v9 }
 0xd31   : > { %9093 = vtanh.f32 %v6106_v3  ;;  %v6107_v57 = vmul.f32 0.5, %v6025_v5 }
 0xd32   : > { %9095 = vtanh.f32 %v6104_v7  ;;  %v6105_v54 = vmul.f32 0.5, %v6017_v19 }
 0xd33   : > { %9097 = vtanh.f32 %v6107_v57 }
 0xd34   : > { %9099 = vtanh.f32 %v6105_v54 }
 0xd3b   : > { %v9094_v11 = vpop.eup %9093 }
 0xd3c   : > { %v9096_v56 = vpop.eup %9095  ;;  %v6170_v12 = vmul.f32 0.5, %v9094_v11 }
 0xd3d   : > { %v9098_v10 = vpop.eup %9097  ;;  %v6168_v15 = vmul.f32 0.5, %v9096_v56 }
 0xd3e   : > { %v9100_v14 = vpop.eup %9099  ;;  %v6202_v50 = vadd.f32 0.5, %v6170_v12  ;;  %v6171_v13 = vmul.f32 0.5, %v9098_v10 }
 0xd3f   : > { %v6200_v48 = vadd.f32 0.5, %v6168_v15  ;;  %v6169_v16 = vmul.f32 0.5, %v9100_v14 }
 0xd40   : > { %v6203_v18 = vadd.f32 0.5, %v6171_v13  ;;  %v6234_v2 = vmul.f32 %v6202_v50, %v6022_v33 }
 0xd41   : > { %v6201_v6 = vadd.f32 0.5, %v6169_v16  ;;  %v6232_v22 = vmul.f32 %v6200_v48, %v6014_v60 }
 0xd42   : > { %v6235_v20 = vmul.f32 %v6203_v18, %v6025_v5 }
 0xd43   : > { %v6233_v63 = vmul.f32 %v6201_v6, %v6017_v19 }
 0xd44   : > { %v8006_v43 = vpop.f32.mrb[208].mxu0  ;;  %v6259_v24 = vpack.c.bf16 %v6235_v20, %v6234_v2 }
 0xd45   : > { %v6038_v32 = vadd.f32 %v8006_v43, %v10060_v30  ;;  %v6029_v28 = vpop.f32.mrb[209].mxu0  ;;  %v6258_v23 = vpack.c.bf16 %v6233_v63, %v6232_v22 }
 0xd46   : > { %v6030_v21 = vadd.f32 %v10060_v30, %v6029_v28  ;;  %v8007_v38 = vpop.f32.mrb[210].mxu0 }
 0xd47   : > { %v6110_v8 = vmul.f32 0.5, %v6038_v32  ;;  %v6041_v47 = vadd.f32 %v8007_v38, %v10060_v30  ;;  %v6032_v25 = vpop.f32.mrb[211].mxu0  ;;  %8048 = vmatprep.mubr.bf16.mxu1 %v6258_v23 }
 0xd48   : > { %v6108_v31 = vmul.f32 0.5, %v6030_v21  ;;  %v6033_v40 = vadd.f32 %v10060_v30, %v6032_v25  ;;  %8049 = vmatmul.mubr.bf16.gmra.mrb[204].mxu1 %v6259_v24 }
 0xd49   : > { %9101 = vtanh.f32 %v6110_v8  ;;  %v6111_v34 = vmul.f32 0.5, %v6041_v47 }
 0xd4a   : > { %9103 = vtanh.f32 %v6108_v31  ;;  %v6109_v29 = vmul.f32 0.5, %v6033_v40 }
 0xd4b   : > { %9105 = vtanh.f32 %v6111_v34 }
 0xd4c   : > { %9107 = vtanh.f32 %v6109_v29 }
 0xd53   : > { %v9102_v37 = vpop.eup %9101 }
 0xd54   : > { %v9104_v35 = vpop.eup %9103  ;;  %v6174_v27 = vmul.f32 0.5, %v9102_v37 }
 0xd55   : > { %v9106_v39 = vpop.eup %9105  ;;  %v6172_v17 = vmul.f32 0.5, %v9104_v35 }
 0xd56   : > { %v9108_v49 = vpop.eup %9107  ;;  %v6206_v41 = vadd.f32 0.5, %v6174_v27  ;;  %v6175_v26 = vmul.f32 0.5, %v9106_v39 }
 0xd57   : > { %v6204_v45 = vadd.f32 0.5, %v6172_v17  ;;  %v6173_v44 = vmul.f32 0.5, %v9108_v49 }
 0xd58   : > { %v6207_v46 = vadd.f32 0.5, %v6175_v26  ;;  %v6238_v61 = vmul.f32 %v6206_v41, %v6038_v32 }
 0xd59   : > { %v6205_v51 = vadd.f32 0.5, %v6173_v44  ;;  %v6236_v53 = vmul.f32 %v6204_v45, %v6030_v21 }
 0xd5a   : > { %v6239_v42 = vmul.f32 %v6207_v46, %v6041_v47 }
 0xd5b   : > { %v6237_v1 = vmul.f32 %v6205_v51, %v6033_v40 }
 0xd5c   : > { %v8010_v52 = vpop.f32.mrb[212].mxu0  ;;  %v6261_v59 = vpack.c.bf16 %v6239_v42, %v6238_v61 }
 0xd5d   : > { %v6054_v58 = vadd.f32 %v8010_v52, %v10060_v30  ;;  %v6045_v36 = vpop.f32.mrb[213].mxu0  ;;  %v6260_v9 = vpack.c.bf16 %v6237_v1, %v6236_v53 }
 0xd5e   : > { %v6046_v33 = vadd.f32 %v10060_v30, %v6045_v36  ;;  %v8011_v62 = vpop.f32.mrb[214].mxu0 }
 0xd5f   : > { %v6114_v55 = vmul.f32 0.5, %v6054_v58  ;;  %v6057_v60 = vadd.f32 %v8011_v62, %v10060_v30  ;;  %v6048_v4 = vpop.f32.mrb[215].mxu0  ;;  %8052 = vmatprep.mubr.bf16.mxu1 %v6260_v9 }
 0xd60   : > { %v6112_v3 = vmul.f32 0.5, %v6046_v33  ;;  %v6049_v5 = vadd.f32 %v10060_v30, %v6048_v4  ;;  %8053 = vmatmul.mubr.bf16.gmra.mrb[208].mxu1 %v6261_v59 }
 0xd61   : > { %9109 = vtanh.f32 %v6114_v55  ;;  %v6115_v0 = vmul.f32 0.5, %v6057_v60 }
 0xd62   : > { %9111 = vtanh.f32 %v6112_v3  ;;  %v6113_v7 = vmul.f32 0.5, %v6049_v5 }
 0xd63   : > { %9113 = vtanh.f32 %v6115_v0 }
 0xd64   : > { %9115 = vtanh.f32 %v6113_v7 }
 0xd6b   : > { %v9110_v19 = vpop.eup %9109 }
 0xd6c   : > { %v9112_v57 = vpop.eup %9111  ;;  %v6178_v54 = vmul.f32 0.5, %v9110_v19 }
 0xd6d   : > { %v9114_v11 = vpop.eup %9113  ;;  %v6176_v56 = vmul.f32 0.5, %v9112_v57 }
 0xd6e   : > { %v9116_v12 = vpop.eup %9115  ;;  %v6210_v10 = vadd.f32 0.5, %v6178_v54  ;;  %v6179_v15 = vmul.f32 0.5, %v9114_v11 }
 0xd6f   : > { %v6208_v14 = vadd.f32 0.5, %v6176_v56  ;;  %v6177_v50 = vmul.f32 0.5, %v9116_v12 }
 0xd70   : > { %v6211_v13 = vadd.f32 0.5, %v6179_v15  ;;  %v6242_v16 = vmul.f32 %v6210_v10, %v6054_v58 }
 0xd71   : > { %v6209_v48 = vadd.f32 0.5, %v6177_v50  ;;  %v6240_v6 = vmul.f32 %v6208_v14, %v6046_v33 }
 0xd72   : > { %v6243_v18 = vmul.f32 %v6211_v13, %v6057_v60 }
 0xd73   : > { %v6241_v2 = vmul.f32 %v6209_v48, %v6049_v5 }
 0xd74   : > { %v8014_v20 = vpop.f32.mrb[216].mxu0  ;;  %v6263_v22 = vpack.c.bf16 %v6243_v18, %v6242_v16 }
 0xd75   : > { %v6070_v63 = vadd.f32 %v8014_v20, %v10060_v30  ;;  %v6061_v43 = vpop.f32.mrb[217].mxu0  ;;  %v6262_v24 = vpack.c.bf16 %v6241_v2, %v6240_v6  ;;  %v10097_v6 = vld [vmem:[%s10280_s4 + $0xd] ss:$0 sm:$0xff] }
 0xd76   : > { %v6062_v32 = vadd.f32 %v10060_v30, %v6061_v43  ;;  %v8015_v28 = vpop.f32.mrb[218].mxu0 }
 0xd77   : > { %v6118_v23 = vmul.f32 0.5, %v6070_v63  ;;  %v6073_v21 = vadd.f32 %v8015_v28, %v10060_v30  ;;  %v6064_v38 = vpop.f32.mrb[219].mxu0  ;;  %8056 = vmatprep.mubr.bf16.mxu1 %v6262_v24 }
 0xd78   : > { %v6116_v8 = vmul.f32 0.5, %v6062_v32  ;;  %v6065_v47 = vadd.f32 %v10060_v30, %v6064_v38  ;;  %8057 = vmatmul.mubr.bf16.gmra.mrb[212].mxu1 %v6263_v22 }
 0xd79   : > { %9117 = vtanh.f32 %v6118_v23  ;;  %v6119_v25 = vmul.f32 0.5, %v6073_v21 }
 0xd7a   : > { %9119 = vtanh.f32 %v6116_v8  ;;  %v6117_v31 = vmul.f32 0.5, %v6065_v47 }
 0xd7b   : > { %9121 = vtanh.f32 %v6119_v25 }
 0xd7c   : > { %9123 = vtanh.f32 %v6117_v31 }
 0xd83   : > { %v9118_v40 = vpop.eup %9117 }
 0xd84   : > { %v9120_v34 = vpop.eup %9119  ;;  %v6182_v29 = vmul.f32 0.5, %v9118_v40 }
 0xd85   : > { %v9122_v37 = vpop.eup %9121  ;;  %v6180_v35 = vmul.f32 0.5, %v9120_v34 }
 0xd86   : > { %v9124_v27 = vpop.eup %9123  ;;  %v6214_v39 = vadd.f32 0.5, %v6182_v29  ;;  %v6183_v17 = vmul.f32 0.5, %v9122_v37 }
 0xd87   : > { %v6212_v49 = vadd.f32 0.5, %v6180_v35  ;;  %v6181_v41 = vmul.f32 0.5, %v9124_v27 }
 0xd88   : > { %v6215_v26 = vadd.f32 0.5, %v6183_v17  ;;  %v6246_v44 = vmul.f32 %v6214_v39, %v6070_v63 }
 0xd89   : > { %v6213_v45 = vadd.f32 0.5, %v6181_v41  ;;  %v6244_v51 = vmul.f32 %v6212_v49, %v6062_v32 }
 0xd8a   : > { %v6247_v46 = vmul.f32 %v6215_v26, %v6073_v21 }
 0xd8b   : > { %v6245_v61 = vmul.f32 %v6213_v45, %v6065_v47 }
 0xd8c   : > { %v8018_v42 = vpop.f32.mrb[220].mxu0  ;;  %v6265_v53 = vpack.c.bf16 %v6247_v46, %v6246_v44 }
 0xd8d   : > { %v6086_v1 = vadd.f32 %v8018_v42, %v10060_v30  ;;  %v6077_v52 = vpop.f32.mrb[221].mxu0  ;;  %v6264_v59 = vpack.c.bf16 %v6245_v61, %v6244_v51 }
 0xd8e   : > { %v6078_v58 = vadd.f32 %v10060_v30, %v6077_v52  ;;  %v8019_v36 = vpop.f32.mrb[222].mxu0  ;;  %v10110_v52 = vld [vmem:[%s10281_s5] ss:$0 sm:$0xff] }
 0xd8f   : > { %v6122_v9 = vmul.f32 0.5, %v6086_v1  ;;  %v6089_v33 = vadd.f32 %v8019_v36, %v10060_v30  ;;  %v6080_v62 = vpop.f32.mrb[223].mxu0  ;;  %8060 = vmatprep.mubr.bf16.mxu1 %v6264_v59 }
 0xd90   : > { %v6120_v55 = vmul.f32 0.5, %v6078_v58  ;;  %v6081_v60 = vadd.f32 %v10060_v30, %v6080_v62  ;;  %8061 = vmatmul.mubr.bf16.gmra.mrb[216].mxu1 %v6265_v53 }
 0xd91   : > { %9125 = vtanh.f32 %v6122_v9  ;;  %v6123_v4 = vmul.f32 0.5, %v6089_v33 }
 0xd92   : > { %9127 = vtanh.f32 %v6120_v55  ;;  %v6121_v3 = vmul.f32 0.5, %v6081_v60 }
 0xd93   : > { %9129 = vtanh.f32 %v6123_v4 }
 0xd94   : > { %9131 = vtanh.f32 %v6121_v3 }
 0xd9b   : > { %v9126_v5 = vpop.eup %9125 }
 0xd9c   : > { %v9128_v0 = vpop.eup %9127  ;;  %v6186_v7 = vmul.f32 0.5, %v9126_v5 }
 0xd9d   : > { %v9130_v19 = vpop.eup %9129  ;;  %v6184_v57 = vmul.f32 0.5, %v9128_v0 }
 0xd9e   : > { %v9132_v54 = vpop.eup %9131  ;;  %v6218_v11 = vadd.f32 0.5, %v6186_v7  ;;  %v6187_v56 = vmul.f32 0.5, %v9130_v19 }
 0xd9f   : > { %v6216_v12 = vadd.f32 0.5, %v6184_v57  ;;  %v6185_v10 = vmul.f32 0.5, %v9132_v54 }
 0xda0   : > { %v6219_v15 = vadd.f32 0.5, %v6187_v56  ;;  %v6250_v30 = vmul.f32 %v6218_v11, %v6086_v1 }
 0xda1   : > { %v6217_v14 = vadd.f32 0.5, %v6185_v10  ;;  %v6248_v13 = vmul.f32 %v6216_v12, %v6078_v58 }
 0xda2   : > { %v6251_v50 = vmul.f32 %v6219_v15, %v6089_v33 }
 0xda3   : > { %v6249_v48 = vmul.f32 %v6217_v14, %v6081_v60 }
 0xda4   : > { %v6267_v16 = vpack.c.bf16 %v6251_v50, %v6250_v30 }
 0xda5   : > { %v6266_v18 = vpack.c.bf16 %v6249_v48, %v6248_v13 }
 0xda7   : > { %8064 = vmatprep.mubr.bf16.mxu1 %v6266_v18 }
 0xda8   : > { %8065 = vmatmul.mubr.bf16.gmra.mrb[220].mxu1 %v6267_v16 }
 0xdea   : > { %v8038_v2 = vpop.f32.mrb[192].mxu1 }
 0xdeb   : > { %v6384_v20 = vadd.f32 %v8038_v2, %v10097_v6  ;;  %v6375_v22 = vpop.f32.mrb[193].mxu1 }
 0xdec   : > { %v6376_v63 = vadd.f32 %v10097_v6, %v6375_v22  ;;  %v8039_v43 = vpop.f32.mrb[194].mxu1 }
 0xded   : > { %v6504_v24 = vmul.f32 0.5, %v6384_v20  ;;  %v6387_v32 = vadd.f32 %v8039_v43, %v10097_v6  ;;  %v6378_v28 = vpop.f32.mrb[195].mxu1 }
 0xdee   : > { %v6502_v23 = vmul.f32 0.5, %v6376_v63  ;;  %v6379_v21 = vadd.f32 %v10097_v6, %v6378_v28 }
 0xdef   : > { %9133 = vtanh.f32 %v6504_v24  ;;  %v6505_v38 = vmul.f32 0.5, %v6387_v32 }
 0xdf0   : > { %9135 = vtanh.f32 %v6502_v23  ;;  %v6503_v8 = vmul.f32 0.5, %v6379_v21 }
 0xdf1   : > { %9137 = vtanh.f32 %v6505_v38 }
 0xdf2   : > { %9139 = vtanh.f32 %v6503_v8  ;;  %v8042_v47 = vpop.f32.mrb[196].mxu1 }
 0xdf3   : > { %v6400_v25 = vadd.f32 %v8042_v47, %v10097_v6  ;;  %v6391_v31 = vpop.f32.mrb[197].mxu1 }
 0xdf4   : > { %v6392_v40 = vadd.f32 %v10097_v6, %v6391_v31  ;;  %v8043_v34 = vpop.f32.mrb[198].mxu1 }
 0xdf5   : > { %v6508_v29 = vmul.f32 0.5, %v6400_v25  ;;  %v6403_v37 = vadd.f32 %v8043_v34, %v10097_v6  ;;  %v6394_v35 = vpop.f32.mrb[199].mxu1 }
 0xdf6   : > { %v6506_v27 = vmul.f32 0.5, %v6392_v40  ;;  %v6395_v39 = vadd.f32 %v10097_v6, %v6394_v35 }
 0xdf7   : > { %9141 = vtanh.f32 %v6508_v29  ;;  %v6509_v17 = vmul.f32 0.5, %v6403_v37 }
 0xdf8   : > { %9143 = vtanh.f32 %v6506_v27  ;;  %v6507_v49 = vmul.f32 0.5, %v6395_v39 }
 0xdf9   : > { %v9134_v41 = vpop.eup %9133  ;;  %9145 = vtanh.f32 %v6509_v17 }
 0xdfa   : > { %v9136_v26 = vpop.eup %9135  ;;  %v6568_v45 = vmul.f32 0.5, %v9134_v41  ;;  %9147 = vtanh.f32 %v6507_v49 }
 0xdfb   : > { %v9138_v44 = vpop.eup %9137  ;;  %v6566_v46 = vmul.f32 0.5, %v9136_v26 }
 0xdfc   : > { %v9140_v51 = vpop.eup %9139  ;;  %v6600_v61 = vadd.f32 0.5, %v6568_v45  ;;  %v6569_v42 = vmul.f32 0.5, %v9138_v44 }
 0xdfd   : > { %v6598_v53 = vadd.f32 0.5, %v6566_v46  ;;  %v6567_v1 = vmul.f32 0.5, %v9140_v51 }
 0xdfe   : > { %v6632_v59 = vmul.f32 %v6600_v61, %v6384_v20  ;;  %v6601_v58 = vadd.f32 0.5, %v6569_v42 }
 0xdff   : > { %v6630_v36 = vmul.f32 %v6598_v53, %v6376_v63  ;;  %v6599_v9 = vadd.f32 0.5, %v6567_v1 }
 0xe00   : > { %v6671_v33 = vmul.f32 %v10110_v52, %v6632_v59  ;;  %v6633_v55 = vmul.f32 %v6601_v58, %v6387_v32 }
 0xe01   : > { %v9142_v62 = vpop.eup %9141  ;;  %v6631_v60 = vmul.f32 %v6599_v9, %v6379_v21  ;;  %v6669_v4 = vmul.f32 %v10110_v52, %v6630_v36 }
 0xe02   : > { %v9144_v3 = vpop.eup %9143  ;;  %v6572_v5 = vmul.f32 0.5, %v9142_v62  ;;  %6705 = vadd.xlane.f32.xlu0 %v6671_v33  ;;  %v6672_v13 = vmul.f32 %v10110_v52, %v6633_v55 }
 0xe03   : > { %v9146_v0 = vpop.eup %9145  ;;  %v6570_v7 = vmul.f32 0.5, %v9144_v3  ;;  %v8046_v19 = vpop.f32.mrb[200].mxu1  ;;  %6701 = vadd.xlane.f32.xlu1 %v6669_v4  ;;  %v6670_v57 = vmul.f32 %v10110_v52, %v6631_v60 }
 0xe04   : > { %v9148_v54 = vpop.eup %9147  ;;  %v6604_v11 = vadd.f32 0.5, %v6572_v5  ;;  %v6573_v56 = vmul.f32 0.5, %v9146_v0  ;;  %v6416_v12 = vadd.f32 %v8046_v19, %v10097_v6  ;;  %v6407_v10 = vpop.f32.mrb[201].mxu1 }
 0xe05   : > { %v6602_v15 = vadd.f32 0.5, %v6570_v7  ;;  %v6571_v14 = vmul.f32 0.5, %v9148_v54  ;;  %v6408_v30 = vadd.f32 %v10097_v6, %v6407_v10  ;;  %v8047_v50 = vpop.f32.mrb[202].mxu1 }
 0xe06   : > { %v6636_v48 = vmul.f32 %v6604_v11, %v6400_v25  ;;  %v6605_v16 = vadd.f32 0.5, %v6573_v56  ;;  %v6512_v18 = vmul.f32 0.5, %v6416_v12  ;;  %v6419_v2 = vadd.f32 %v8047_v50, %v10097_v6  ;;  %v6410_v20 = vpop.f32.mrb[203].mxu1  ;;  %6703 = vadd.xlane.f32.xlu0 %v6670_v57 }
 0xe07   : > { %v6634_v22 = vmul.f32 %v6602_v15, %v6392_v40  ;;  %v6603_v63 = vadd.f32 0.5, %v6571_v14  ;;  %v6510_v43 = vmul.f32 0.5, %v6408_v30  ;;  %v6411_v24 = vadd.f32 %v10097_v6, %v6410_v20  ;;  %6707 = vadd.xlane.f32.xlu1 %v6672_v13 }
 0xe08   : > { %v6637_v32 = vmul.f32 %v6605_v16, %v6403_v37  ;;  %9149 = vtanh.f32 %v6512_v18  ;;  %v6513_v28 = vmul.f32 0.5, %v6419_v2  ;;  %v6675_v23 = vmul.f32 %v10110_v52, %v6636_v48 }
 0xe09   : > { %9151 = vtanh.f32 %v6510_v43  ;;  %v6511_v21 = vmul.f32 0.5, %v6411_v24  ;;  %v6635_v38 = vmul.f32 %v6603_v63, %v6395_v39  ;;  %v6673_v47 = vmul.f32 %v10110_v52, %v6634_v22 }
 0xe0a   : > { %9153 = vtanh.f32 %v6513_v28  ;;  %6713 = vadd.xlane.f32.xlu0 %v6675_v23  ;;  %v6676_v8 = vmul.f32 %v10110_v52, %v6637_v32 }
 0xe0b   : > { %9155 = vtanh.f32 %v6511_v21  ;;  %v6674_v25 = vmul.f32 %v10110_v52, %v6635_v38 }
 0xe0c   : > { %6715 = vadd.xlane.f32.xlu1 %v6676_v8 }
 0xe0e   : > { %6709 = vadd.xlane.f32.xlu0 %v6673_v47 }
 0xe10   : > { %6711 = vadd.xlane.f32.xlu1 %v6674_v25 }
 0xe12   : > { %v9150_v31 = vpop.eup %9149 }
 0xe13   : > { %v9152_v40 = vpop.eup %9151  ;;  %v6576_v34 = vmul.f32 0.5, %v9150_v31 }
 0xe14   : > { %v9154_v29 = vpop.eup %9153  ;;  %v6574_v37 = vmul.f32 0.5, %v9152_v40 }
 0xe15   : > { %v9156_v35 = vpop.eup %9155  ;;  %v6608_v27 = vadd.f32 0.5, %v6576_v34  ;;  %v6577_v39 = vmul.f32 0.5, %v9154_v29 }
 0xe16   : > { %v6606_v17 = vadd.f32 0.5, %v6574_v37  ;;  %v6575_v49 = vmul.f32 0.5, %v9156_v35 }
 0xe17   : > { %v6640_v41 = vmul.f32 %v6608_v27, %v6416_v12  ;;  %v6609_v26 = vadd.f32 0.5, %v6577_v39 }
 0xe18   : > { %v6607_v45 = vadd.f32 0.5, %v6575_v49  ;;  %v6638_v44 = vmul.f32 %v6606_v17, %v6408_v30 }
 0xe19   : > { %v6641_v46 = vmul.f32 %v6609_v26, %v6419_v2  ;;  %v6679_v51 = vmul.f32 %v10110_v52, %v6640_v41 }
 0xe1a   : > { %v6639_v61 = vmul.f32 %v6607_v45, %v6411_v24  ;;  %v6677_v9 = vmul.f32 %v10110_v52, %v6638_v44 }
 0xe1b   : > { %v8050_v42 = vpop.f32.mrb[204].mxu1  ;;  %6721 = vadd.xlane.f32.xlu0 %v6679_v51  ;;  %v6680_v53 = vmul.f32 %v10110_v52, %v6641_v46 }
 0xe1c   : > { %v6432_v1 = vadd.f32 %v8050_v42, %v10097_v6  ;;  %v6423_v59 = vpop.f32.mrb[205].mxu1  ;;  %v6678_v3 = vmul.f32 %v10110_v52, %v6639_v61 }
 0xe1d   : > { %v6424_v58 = vadd.f32 %v10097_v6, %v6423_v59  ;;  %v8051_v36 = vpop.f32.mrb[206].mxu1  ;;  %6723 = vadd.xlane.f32.xlu1 %v6680_v53 }
 0xe1e   : > { %v6516_v33 = vmul.f32 0.5, %v6432_v1  ;;  %v6435_v62 = vadd.f32 %v8051_v36, %v10097_v6  ;;  %v6426_v55 = vpop.f32.mrb[207].mxu1 }
 0xe1f   : > { %v6514_v60 = vmul.f32 0.5, %v6424_v58  ;;  %v6427_v4 = vadd.f32 %v10097_v6, %v6426_v55  ;;  %6717 = vadd.xlane.f32.xlu0 %v6677_v9 }
 0xe20   : > { %9157 = vtanh.f32 %v6516_v33  ;;  %v6517_v5 = vmul.f32 0.5, %v6435_v62 }
 0xe21   : > { %9159 = vtanh.f32 %v6514_v60  ;;  %v6515_v0 = vmul.f32 0.5, %v6427_v4  ;;  %6719 = vadd.xlane.f32.xlu1 %v6678_v3 }
 0xe22   : > { %9161 = vtanh.f32 %v6517_v5 }
 0xe23   : > { %9163 = vtanh.f32 %v6515_v0 }
 0xe2a   : > { %v9158_v7 = vpop.eup %9157 }
 0xe2b   : > { %v9160_v19 = vpop.eup %9159  ;;  %v6580_v57 = vmul.f32 0.5, %v9158_v7 }
 0xe2c   : > { %v9162_v54 = vpop.eup %9161  ;;  %v6578_v11 = vmul.f32 0.5, %v9160_v19 }
 0xe2d   : > { %v9164_v56 = vpop.eup %9163  ;;  %v6612_v12 = vadd.f32 0.5, %v6580_v57  ;;  %v6581_v10 = vmul.f32 0.5, %v9162_v54 }
 0xe2e   : > { %v6610_v15 = vadd.f32 0.5, %v6578_v11  ;;  %v6579_v14 = vmul.f32 0.5, %v9164_v56 }
 0xe2f   : > { %v6644_v30 = vmul.f32 %v6612_v12, %v6432_v1  ;;  %v6613_v50 = vadd.f32 0.5, %v6581_v10 }
 0xe30   : > { %v6611_v13 = vadd.f32 0.5, %v6579_v14  ;;  %v6642_v48 = vmul.f32 %v6610_v15, %v6424_v58 }
 0xe31   : > { %v6645_v16 = vmul.f32 %v6613_v50, %v6435_v62  ;;  %v6683_v18 = vmul.f32 %v10110_v52, %v6644_v30 }
 0xe32   : > { %v6643_v2 = vmul.f32 %v6611_v13, %v6427_v4  ;;  %v6681_v28 = vmul.f32 %v10110_v52, %v6642_v48 }
 0xe33   : > { %v8054_v20 = vpop.f32.mrb[208].mxu1  ;;  %6729 = vadd.xlane.f32.xlu0 %v6683_v18  ;;  %v6684_v22 = vmul.f32 %v10110_v52, %v6645_v16 }
 0xe34   : > { %v6448_v63 = vadd.f32 %v8054_v20, %v10097_v6  ;;  %v6439_v43 = vpop.f32.mrb[209].mxu1  ;;  %v6682_v25 = vmul.f32 %v10110_v52, %v6643_v2 }
 0xe35   : > { %v6440_v24 = vadd.f32 %v10097_v6, %v6439_v43  ;;  %v8055_v32 = vpop.f32.mrb[210].mxu1  ;;  %6731 = vadd.xlane.f32.xlu1 %v6684_v22 }
 0xe36   : > { %v6520_v23 = vmul.f32 0.5, %v6448_v63  ;;  %v6451_v21 = vadd.f32 %v8055_v32, %v10097_v6  ;;  %v6442_v38 = vpop.f32.mrb[211].mxu1 }
 0xe37   : > { %v6518_v8 = vmul.f32 0.5, %v6440_v24  ;;  %v6443_v47 = vadd.f32 %v10097_v6, %v6442_v38  ;;  %6725 = vadd.xlane.f32.xlu0 %v6681_v28 }
 0xe38   : > { %9165 = vtanh.f32 %v6520_v23  ;;  %v6521_v31 = vmul.f32 0.5, %v6451_v21 }
 0xe39   : > { %9167 = vtanh.f32 %v6518_v8  ;;  %v6519_v40 = vmul.f32 0.5, %v6443_v47  ;;  %6727 = vadd.xlane.f32.xlu1 %v6682_v25 }
 0xe3a   : > { %9169 = vtanh.f32 %v6521_v31 }
 0xe3b   : > { %9171 = vtanh.f32 %v6519_v40 }
 0xe42   : > { %v9166_v34 = vpop.eup %9165 }
 0xe43   : > { %v9168_v29 = vpop.eup %9167  ;;  %v6584_v37 = vmul.f32 0.5, %v9166_v34 }
 0xe44   : > { %v9170_v35 = vpop.eup %9169  ;;  %v6582_v27 = vmul.f32 0.5, %v9168_v29 }
 0xe45   : > { %v9172_v39 = vpop.eup %9171  ;;  %v6616_v17 = vadd.f32 0.5, %v6584_v37  ;;  %v6585_v49 = vmul.f32 0.5, %v9170_v35 }
 0xe46   : > { %v6614_v41 = vadd.f32 0.5, %v6582_v27  ;;  %v6583_v26 = vmul.f32 0.5, %v9172_v39 }
 0xe47   : > { %v6648_v45 = vmul.f32 %v6616_v17, %v6448_v63  ;;  %v6617_v44 = vadd.f32 0.5, %v6585_v49 }
 0xe48   : > { %v6615_v46 = vadd.f32 0.5, %v6583_v26  ;;  %v6646_v51 = vmul.f32 %v6614_v41, %v6440_v24 }
 0xe49   : > { %v6649_v61 = vmul.f32 %v6617_v44, %v6451_v21  ;;  %v6687_v42 = vmul.f32 %v10110_v52, %v6648_v45 }
 0xe4a   : > { %v6647_v53 = vmul.f32 %v6615_v46, %v6443_v47  ;;  %v6685_v62 = vmul.f32 %v10110_v52, %v6646_v51 }
 0xe4b   : > { %v8058_v1 = vpop.f32.mrb[212].mxu1  ;;  %6737 = vadd.xlane.f32.xlu0 %v6687_v42  ;;  %v6688_v59 = vmul.f32 %v10110_v52, %v6649_v61 }
 0xe4c   : > { %v6464_v58 = vadd.f32 %v8058_v1, %v10097_v6  ;;  %v6455_v36 = vpop.f32.mrb[213].mxu1  ;;  %v6686_v0 = vmul.f32 %v10110_v52, %v6647_v53 }
 0xe4d   : > { %v6456_v9 = vadd.f32 %v10097_v6, %v6455_v36  ;;  %v8059_v33 = vpop.f32.mrb[214].mxu1  ;;  %6739 = vadd.xlane.f32.xlu1 %v6688_v59 }
 0xe4e   : > { %v6524_v55 = vmul.f32 0.5, %v6464_v58  ;;  %v6467_v60 = vadd.f32 %v8059_v33, %v10097_v6  ;;  %v6458_v4 = vpop.f32.mrb[215].mxu1 }
 0xe4f   : > { %v6522_v3 = vmul.f32 0.5, %v6456_v9  ;;  %v6459_v5 = vadd.f32 %v10097_v6, %v6458_v4  ;;  %6733 = vadd.xlane.f32.xlu0 %v6685_v62 }
 0xe50   : > { %9173 = vtanh.f32 %v6524_v55  ;;  %v6525_v7 = vmul.f32 0.5, %v6467_v60 }
 0xe51   : > { %9175 = vtanh.f32 %v6522_v3  ;;  %v6523_v19 = vmul.f32 0.5, %v6459_v5  ;;  %6735 = vadd.xlane.f32.xlu1 %v6686_v0 }
 0xe52   : > { %9177 = vtanh.f32 %v6525_v7 }
 0xe53   : > { %9179 = vtanh.f32 %v6523_v19 }
 0xe5a   : > { %v9174_v57 = vpop.eup %9173 }
 0xe5b   : > { %v9176_v54 = vpop.eup %9175  ;;  %v6588_v11 = vmul.f32 0.5, %v9174_v57 }
 0xe5c   : > { %v9178_v56 = vpop.eup %9177  ;;  %v6586_v12 = vmul.f32 0.5, %v9176_v54 }
 0xe5d   : > { %v9180_v10 = vpop.eup %9179  ;;  %v6620_v15 = vadd.f32 0.5, %v6588_v11  ;;  %v6589_v14 = vmul.f32 0.5, %v9178_v56 }
 0xe5e   : > { %v6618_v30 = vadd.f32 0.5, %v6586_v12  ;;  %v6587_v50 = vmul.f32 0.5, %v9180_v10 }
 0xe5f   : > { %v6652_v13 = vmul.f32 %v6620_v15, %v6464_v58  ;;  %v6621_v48 = vadd.f32 0.5, %v6589_v14 }
 0xe60   : > { %v6619_v16 = vadd.f32 0.5, %v6587_v50  ;;  %v6650_v18 = vmul.f32 %v6618_v30, %v6456_v9  ;;  %v10164_v50 = vld [vmem:[#allocation2] ss:$0 sm:$0xff] }
 0xe61   : > { %v6653_v2 = vmul.f32 %v6621_v48, %v6467_v60  ;;  %v6691_v20 = vmul.f32 %v10110_v52, %v6652_v13 }
 0xe62   : > { %v6651_v22 = vmul.f32 %v6619_v16, %v6459_v5  ;;  %v6689_v21 = vmul.f32 %v10110_v52, %v6650_v18 }
 0xe63   : > { %v8062_v63 = vpop.f32.mrb[216].mxu1  ;;  %6745 = vadd.xlane.f32.xlu0 %v6691_v20  ;;  %v6692_v43 = vmul.f32 %v10110_v52, %v6653_v2 }
 0xe64   : > { %v6480_v24 = vadd.f32 %v8062_v63, %v10097_v6  ;;  %v6471_v32 = vpop.f32.mrb[217].mxu1  ;;  %v6690_v40 = vmul.f32 %v10110_v52, %v6651_v22 }
 0xe65   : > { %v6472_v28 = vadd.f32 %v10097_v6, %v6471_v32  ;;  %v8063_v23 = vpop.f32.mrb[218].mxu1  ;;  %6747 = vadd.xlane.f32.xlu1 %v6692_v43 }
 0xe66   : > { %v6528_v38 = vmul.f32 0.5, %v6480_v24  ;;  %v6483_v8 = vadd.f32 %v8063_v23, %v10097_v6  ;;  %v6474_v47 = vpop.f32.mrb[219].mxu1 }
 0xe67   : > { %v6526_v25 = vmul.f32 0.5, %v6472_v28  ;;  %v6475_v31 = vadd.f32 %v10097_v6, %v6474_v47  ;;  %6741 = vadd.xlane.f32.xlu0 %v6689_v21 }
 0xe68   : > { %9181 = vtanh.f32 %v6528_v38  ;;  %v6529_v34 = vmul.f32 0.5, %v6483_v8 }
 0xe69   : > { %9183 = vtanh.f32 %v6526_v25  ;;  %v6527_v29 = vmul.f32 0.5, %v6475_v31  ;;  %6743 = vadd.xlane.f32.xlu1 %v6690_v40 }
 0xe6a   : > { %9185 = vtanh.f32 %v6529_v34 }
 0xe6b   : > { %9187 = vtanh.f32 %v6527_v29 }
 0xe72   : > { %v9182_v37 = vpop.eup %9181 }
 0xe73   : > { %v9184_v35 = vpop.eup %9183  ;;  %v6592_v27 = vmul.f32 0.5, %v9182_v37 }
 0xe74   : > { %v9186_v39 = vpop.eup %9185  ;;  %v6590_v17 = vmul.f32 0.5, %v9184_v35 }
 0xe75   : > { %v9188_v49 = vpop.eup %9187  ;;  %v6624_v41 = vadd.f32 0.5, %v6592_v27  ;;  %v6593_v26 = vmul.f32 0.5, %v9186_v39 }
 0xe76   : > { %v6622_v45 = vadd.f32 0.5, %v6590_v17  ;;  %v6591_v44 = vmul.f32 0.5, %v9188_v49 }
 0xe77   : > { %v6656_v46 = vmul.f32 %v6624_v41, %v6480_v24  ;;  %v6625_v51 = vadd.f32 0.5, %v6593_v26 }
 0xe78   : > { %v6623_v61 = vadd.f32 0.5, %v6591_v44  ;;  %v6654_v42 = vmul.f32 %v6622_v45, %v6472_v28 }
 0xe79   : > { %v6657_v53 = vmul.f32 %v6625_v51, %v6483_v8  ;;  %v6695_v1 = vmul.f32 %v10110_v52, %v6656_v46 }
 0xe7a   : > { %v6655_v59 = vmul.f32 %v6623_v61, %v6475_v31  ;;  %v6693_v60 = vmul.f32 %v10110_v52, %v6654_v42 }
 0xe7b   : > { %6753 = vadd.xlane.f32.xlu0 %v6695_v1  ;;  %v8066_v58 = vpop.f32.mrb[220].mxu1  ;;  %v6696_v36 = vmul.f32 %v10110_v52, %v6657_v53 }
 0xe7c   : > { %v6496_v9 = vadd.f32 %v8066_v58, %v10097_v6  ;;  %v6487_v33 = vpop.f32.mrb[221].mxu1  ;;  %v6694_v19 = vmul.f32 %v10110_v52, %v6655_v59 }
 0xe7d   : > { %v6488_v62 = vadd.f32 %v10097_v6, %v6487_v33  ;;  %6755 = vadd.xlane.f32.xlu1 %v6696_v36  ;;  %v8067_v55 = vpop.f32.mrb[222].mxu1 }
 0xe7e   : > { %v6532_v4 = vmul.f32 0.5, %v6496_v9  ;;  %v6499_v3 = vadd.f32 %v8067_v55, %v10097_v6  ;;  %v6490_v5 = vpop.f32.mrb[223].mxu1 }
 0xe7f   : > { %v6530_v0 = vmul.f32 0.5, %v6488_v62  ;;  %v6491_v7 = vadd.f32 %v10097_v6, %v6490_v5  ;;  %6749 = vadd.xlane.f32.xlu0 %v6693_v60 }
 0xe80   : > { %9189 = vtanh.f32 %v6532_v4  ;;  %v6533_v57 = vmul.f32 0.5, %v6499_v3 }
 0xe81   : > { %9191 = vtanh.f32 %v6530_v0  ;;  %v6531_v54 = vmul.f32 0.5, %v6491_v7  ;;  %6751 = vadd.xlane.f32.xlu1 %v6694_v19 }
 0xe82   : > { %9193 = vtanh.f32 %v6533_v57 }
 0xe83   : > { %9195 = vtanh.f32 %v6531_v54 }
 0xe8a   : > { %v9190_v11 = vpop.eup %9189 }
 0xe8b   : > { %v9192_v56 = vpop.eup %9191  ;;  %v6596_v12 = vmul.f32 0.5, %v9190_v11 }
 0xe8c   : > { %v9194_v10 = vpop.eup %9193  ;;  %v6594_v15 = vmul.f32 0.5, %v9192_v56 }
 0xe8d   : > { %v9196_v14 = vpop.eup %9195  ;;  %v6597_v30 = vmul.f32 0.5, %v9194_v10  ;;  %v6628_v6 = vadd.f32 0.5, %v6596_v12 }
 0xe8e   : > { %v6626_v13 = vadd.f32 0.5, %v6594_v15  ;;  %v6595_v48 = vmul.f32 0.5, %v9196_v14 }
 0xe8f   : > { %v6706_v16 = vpop.xlane.xlu0 %6705  ;;  %v6629_v2 = vadd.f32 0.5, %v6597_v30  ;;  %v6660_v24 = vmul.f32 %v6628_v6, %v6496_v9 }
 0xe90   : > { %v6658_v18 = vmul.f32 %v6626_v13, %v6488_v62  ;;  %v6627_v20 = vadd.f32 0.5, %v6595_v48  ;;  %v6774_v22 = vadd.f32 %v10164_v50, %v6706_v16  ;;  %v6702_v63 = vpop.xlane.xlu1 %6701 }
 0xe91   : > { %v6772_v43 = vadd.f32 %v10164_v50, %v6702_v63  ;;  %v6661_v21 = vmul.f32 %v6629_v2, %v6499_v3  ;;  %v6699_v31 = vmul.f32 %v10110_v52, %v6660_v24 }
 0xe92   : > { %v6659_v32 = vmul.f32 %v6627_v20, %v6491_v7  ;;  %6807 = vst.msk [vmem:[%s10171_s18 + $0x10] sm:$0xff] %vm6804_vm0, %v6774_v22  ;;  %v6697_v28 = vmul.f32 %v10110_v52, %v6658_v18 }
 0xe93   : > { %6805 = vst.msk [vmem:[%s10171_s18] sm:$0xff] %vm6804_vm0, %v6772_v43  ;;  %v6704_v23 = vpop.xlane.xlu0 %6703  ;;  %v6700_v29 = vmul.f32 %v10110_v52, %v6661_v21 }
 0xe94   : > { %v6773_v38 = vadd.f32 %v10164_v50, %v6704_v23  ;;  %v6708_v8 = vpop.xlane.xlu1 %6707  ;;  %6757 = vadd.xlane.f32.xlu0 %v6697_v28  ;;  %v6698_v47 = vmul.f32 %v10110_v52, %v6659_v32 }
 0xe95   : > { %v6775_v25 = vadd.f32 %v10164_v50, %v6708_v8 }
 0xe96   : > { %6806 = vst.msk [vmem:[%s10171_s18 + $0x8] sm:$0xff] %vm6804_vm0, %v6773_v38  ;;  %6759 = vadd.xlane.f32.xlu1 %v6698_v47 }
 0xe97   : > { %6808 = vst.msk [vmem:[%s10171_s18 + $0x18] sm:$0xff] %vm6804_vm0, %v6775_v25  ;;  %v6714_v40 = vpop.xlane.xlu0 %6713 }
 0xe98   : > { %v6778_v34 = vadd.f32 %v10164_v50, %v6714_v40  ;;  %6761 = vadd.xlane.f32.xlu0 %v6699_v31 }
 0xe99   : > { %v6716_v37 = vpop.xlane.xlu1 %6715 }
 0xe9a   : > { %6811 = vst.msk [vmem:[%s10171_s18 + $0x30] sm:$0xff] %vm6804_vm0, %v6778_v34  ;;  %v6779_v35 = vadd.f32 %v10164_v50, %v6716_v37  ;;  %6763 = vadd.xlane.f32.xlu1 %v6700_v29 }
 0xe9b   : > { %v6710_v27 = vpop.xlane.xlu0 %6709 }
 0xe9c   : > { %6812 = vst.msk [vmem:[%s10171_s18 + $0x38] sm:$0xff] %vm6804_vm0, %v6779_v35  ;;  %v6776_v39 = vadd.f32 %v10164_v50, %v6710_v27 }
 0xe9d   : > { %v6712_v17 = vpop.xlane.xlu1 %6711 }
 0xe9e   : > { %6809 = vst.msk [vmem:[%s10171_s18 + $0x20] sm:$0xff] %vm6804_vm0, %v6776_v39  ;;  %v6777_v49 = vadd.f32 %v10164_v50, %v6712_v17 }
 0xea0   : > { %6810 = vst.msk [vmem:[%s10171_s18 + $0x28] sm:$0xff] %vm6804_vm0, %v6777_v49 }
 0xea8   : > { %v6722_v52 = vpop.xlane.xlu0 %6721 }
 0xea9   : > { %v6782_v41 = vadd.f32 %v10164_v50, %v6722_v52 }
 0xeaa   : > { %v6724_v26 = vpop.xlane.xlu1 %6723 }
 0xeab   : > { %6815 = vst.msk [vmem:[%s10171_s18 + $0x50] sm:$0xff] %vm6804_vm0, %v6782_v41  ;;  %v6783_v45 = vadd.f32 %v10164_v50, %v6724_v26 }
 0xeac   : > { %v6718_v44 = vpop.xlane.xlu0 %6717 }
 0xead   : > { %6816 = vst.msk [vmem:[%s10171_s18 + $0x58] sm:$0xff] %vm6804_vm0, %v6783_v45  ;;  %v6780_v46 = vadd.f32 %v10164_v50, %v6718_v44 }
 0xeae   : > { %v6720_v51 = vpop.xlane.xlu1 %6719 }
 0xeaf   : > { %6813 = vst.msk [vmem:[%s10171_s18 + $0x40] sm:$0xff] %vm6804_vm0, %v6780_v46  ;;  %v6781_v61 = vadd.f32 %v10164_v50, %v6720_v51 }
 0xeb1   : > { %6814 = vst.msk [vmem:[%s10171_s18 + $0x48] sm:$0xff] %vm6804_vm0, %v6781_v61 }
 0xec0   : > { %v6730_v42 = vpop.xlane.xlu0 %6729 }
 0xec1   : > { %v6786_v53 = vadd.f32 %v10164_v50, %v6730_v42 }
 0xec2   : > { %v6732_v1 = vpop.xlane.xlu1 %6731 }
 0xec3   : > { %6819 = vst.msk [vmem:[%s10171_s18 + $0x70] sm:$0xff] %vm6804_vm0, %v6786_v53  ;;  %v6787_v59 = vadd.f32 %v10164_v50, %v6732_v1 }
 0xec4   : > { %v6726_v58 = vpop.xlane.xlu0 %6725 }
 0xec5   : > { %6820 = vst.msk [vmem:[%s10171_s18 + $0x78] sm:$0xff] %vm6804_vm0, %v6787_v59  ;;  %v6784_v36 = vadd.f32 %v10164_v50, %v6726_v58 }
 0xec6   : > { %v6728_v9 = vpop.xlane.xlu1 %6727 }
 0xec7   : > { %6817 = vst.msk [vmem:[%s10171_s18 + $0x60] sm:$0xff] %vm6804_vm0, %v6784_v36  ;;  %v6785_v33 = vadd.f32 %v10164_v50, %v6728_v9 }
 0xec9   : > { %6818 = vst.msk [vmem:[%s10171_s18 + $0x68] sm:$0xff] %vm6804_vm0, %v6785_v33 }
 0xed8   : > { %v6738_v62 = vpop.xlane.xlu0 %6737 }
 0xed9   : > { %v6790_v55 = vadd.f32 %v10164_v50, %v6738_v62 }
 0xeda   : > { %v6740_v60 = vpop.xlane.xlu1 %6739 }
 0xedb   : > { %6823 = vst.msk [vmem:[%s10171_s18 + $0x90] sm:$0xff] %vm6804_vm0, %v6790_v55  ;;  %v6791_v4 = vadd.f32 %v10164_v50, %v6740_v60 }
 0xedc   : > { %v6734_v3 = vpop.xlane.xlu0 %6733 }
 0xedd   : > { %6824 = vst.msk [vmem:[%s10171_s18 + $0x98] sm:$0xff] %vm6804_vm0, %v6791_v4  ;;  %v6788_v5 = vadd.f32 %v10164_v50, %v6734_v3 }
 0xede   : > { %v6736_v0 = vpop.xlane.xlu1 %6735 }
 0xedf   : > { %6821 = vst.msk [vmem:[%s10171_s18 + $0x80] sm:$0xff] %vm6804_vm0, %v6788_v5  ;;  %v6789_v7 = vadd.f32 %v10164_v50, %v6736_v0 }
 0xee1   : > { %6822 = vst.msk [vmem:[%s10171_s18 + $0x88] sm:$0xff] %vm6804_vm0, %v6789_v7 }
 0xef0   : > { %v6746_v19 = vpop.xlane.xlu0 %6745 }
 0xef1   : > { %v6794_v57 = vadd.f32 %v10164_v50, %v6746_v19 }
 0xef2   : > { %v6748_v54 = vpop.xlane.xlu1 %6747 }
 0xef3   : > { %6827 = vst.msk [vmem:[%s10171_s18 + $0xb0] sm:$0xff] %vm6804_vm0, %v6794_v57  ;;  %v6795_v11 = vadd.f32 %v10164_v50, %v6748_v54 }
 0xef4   : > { %v6742_v56 = vpop.xlane.xlu0 %6741 }
 0xef5   : > { %6828 = vst.msk [vmem:[%s10171_s18 + $0xb8] sm:$0xff] %vm6804_vm0, %v6795_v11  ;;  %v6792_v12 = vadd.f32 %v10164_v50, %v6742_v56 }
 0xef6   : > { %v6744_v10 = vpop.xlane.xlu1 %6743 }
 0xef7   : > { %6825 = vst.msk [vmem:[%s10171_s18 + $0xa0] sm:$0xff] %vm6804_vm0, %v6792_v12  ;;  %v6793_v15 = vadd.f32 %v10164_v50, %v6744_v10 }
 0xef9   : > { %6826 = vst.msk [vmem:[%s10171_s18 + $0xa8] sm:$0xff] %vm6804_vm0, %v6793_v15 }
 0xf08   : > { %v6754_v14 = vpop.xlane.xlu0 %6753 }
 0xf09   : > { %v6798_v30 = vadd.f32 %v10164_v50, %v6754_v14 }
 0xf0a   : > { %v6756_v6 = vpop.xlane.xlu1 %6755 }
 0xf0b   : > { %6831 = vst.msk [vmem:[%s10171_s18 + $0xd0] sm:$0xff] %vm6804_vm0, %v6798_v30  ;;  %v6799_v13 = vadd.f32 %v10164_v50, %v6756_v6 }
 0xf0c   : > { %v6750_v48 = vpop.xlane.xlu0 %6749 }
 0xf0d   : > { %6832 = vst.msk [vmem:[%s10171_s18 + $0xd8] sm:$0xff] %vm6804_vm0, %v6799_v13  ;;  %v6796_v16 = vadd.f32 %v10164_v50, %v6750_v48 }
 0xf0e   : > { %v6752_v18 = vpop.xlane.xlu1 %6751 }
 0xf0f   : > { %6829 = vst.msk [vmem:[%s10171_s18 + $0xc0] sm:$0xff] %vm6804_vm0, %v6796_v16  ;;  %v6797_v2 = vadd.f32 %v10164_v50, %v6752_v18 }
 0xf11   : > { %6830 = vst.msk [vmem:[%s10171_s18 + $0xc8] sm:$0xff] %vm6804_vm0, %v6797_v2 }
 0xf21   : > { %v6758_v20 = vpop.xlane.xlu0 %6757 }
 0xf22   : > { %v6800_v22 = vadd.f32 %v10164_v50, %v6758_v20 }
 0xf23   : > { %v6760_v63 = vpop.xlane.xlu1 %6759 }
 0xf24   : > { %6833 = vst.msk [vmem:[%s10171_s18 + $0xe0] sm:$0xff] %vm6804_vm0, %v6800_v22  ;;  %v6801_v43 = vadd.f32 %v10164_v50, %v6760_v63 }
 0xf25   : > { %v6762_v24 = vpop.xlane.xlu0 %6761 }
 0xf26   : > { %6834 = vst.msk [vmem:[%s10171_s18 + $0xe8] sm:$0xff] %vm6804_vm0, %v6801_v43  ;;  %v6802_v32 = vadd.f32 %v10164_v50, %v6762_v24 }
 0xf27   : > { %v6764_v28 = vpop.xlane.xlu1 %6763 }
 0xf28   : > { %6835 = vst.msk [vmem:[%s10171_s18 + $0xf0] sm:$0xff] %vm6804_vm0, %v6802_v32  ;;  %v6803_v23 = vadd.f32 %v10164_v50, %v6764_v28 }
 0xf2a   : > { %6836 = vst.msk [vmem:[%s10171_s18 + $0xf8] sm:$0xff] %vm6804_vm0, %v6803_v23 }
 0xf2b PF: > { %s20_s26 = sadd.s32 1, %s9235_s26  }
 0xf2c   : > { %p17_p3 = scmp.ge.s32.totalorder %s20_s26, 4  }
 0xf2e   :  { %19 = sbr.rel (!%p17_p3) target bundleno = 4 (0x4), region = 109 }
 0xf35   :  { %6859 = vsyncpa [#allocation4], 1 }
 0xf36   :  { %6861 = vsyncpa [#allocation4 + $0x1], 1 }

</bundles_post_ra>
